<compile_context>
chip_gen: v7x
topology: tpu7x:2x2x1
jax: 0.10.0
libtpu: 0.0.40
codegen_flags: <defaults>
</compile_context>

<pallas_src>
import functools

import jax
import jax.numpy as jnp
from jax.experimental import pallas as pl
from jax.experimental.pallas import tpu as pltpu


# ----------------------------- Pallas kernels -------------------------------

def _conv_kernel(x_ref, w_ref, ss_ref, o_ref, *, tap_offsets, ohw, act, cin_is_one):
    """One batch element: dilated conv as a sum of per-tap matmuls + affine + act.

    x_ref : (1, Cin, L)      bf16   flattened (H*W + tail) image
    w_ref : (T, Cout, Cin)   bf16   per-tap weight matrices (T = kh*kw)
    ss_ref: (2, Cout, 1)     f32    folded BatchNorm scale / (bias+BN) shift
    o_ref : (1, Cout, OH*W)  out    lane-dense output (pixels on lanes)
    """
    x = x_ref[...]                               # (1, Cin, L)
    w = w_ref[...]                               # (T, Cout, Cin)
    ss = ss_ref[...]                             # (2, Cout, 1)
    cout = w.shape[1]

    acc = jnp.zeros((cout, ohw), jnp.float32)
    for t, off in enumerate(tap_offsets):        # static, unrolled (kh*kw taps)
        xt = x[0, :, off:off + ohw]              # (Cin, ohw) lane-offset slice
        wt = w[t]                                # (Cout, Cin)
        if cin_is_one:
            # Cin == 1: skip the MXU entirely, broadcast FMA on the VPU.
            acc = acc + wt.astype(jnp.float32) * xt.astype(jnp.float32)
        else:
            acc = acc + jnp.dot(wt, xt, preferred_element_type=jnp.float32)

    y = acc * ss[0] + ss[1]                      # conv bias folded into BN shift
    if act == "relu":
        y = jnp.maximum(y, 0.0)
    elif act == "sigmoid":
        # exp + reciprocal both land on the EUP slot.
        y = pl.reciprocal(1.0 + jnp.exp(-y), approx=True)
    o_ref[...] = y.astype(o_ref.dtype)[None]


def _latent_kernel(h_ref, w4_ref, b4_ref, eps_ref, wd_ref, bd_ref,
                   d_ref, kl_ref, *, lat):
    """Fused fc41+fc42 -> (mu, log_var) -> reparam z -> KL -> defc1."""
    h = h_ref[...]                                                     # (B, feat) bf16
    y = jnp.dot(h, w4_ref[...], preferred_element_type=jnp.float32) + b4_ref[...]
    mu, lv = y[:, :lat], y[:, lat:]                                    # (B, lat) f32
    z = eps_ref[...] * jnp.exp(0.5 * lv) + mu                          # sampling()
    term = 1.0 + lv - mu * mu - jnp.exp(lv)
    s = jnp.sum(term, axis=1, keepdims=True)                           # (B, 1)
    kl_ref[...] = -0.5 * jnp.sum(s, axis=0, keepdims=True)             # sum, not mean
    d = jnp.dot(z.astype(wd_ref.dtype), wd_ref[...],
                preferred_element_type=jnp.float32) + bd_ref[...]
    d_ref[...] = d.astype(d_ref.dtype)


# ------------------------------ kernel wrappers ------------------------------

def conv_layer(x, w_taps, scale_shift, dil, k, act, out_dtype):
    """Dilated 'valid' conv on a pre-padded NCHW input + folded BN affine + act.

    Grid over batch; each grid step keeps the whole (Cin, H*W) image in VMEM
    and builds the kh*kw taps with static lane-offset slices (in-kernel im2col).
    Output columns where ow >= OW are garbage (taps that wrapped into the next
    image row) and are cropped by a cheap slice afterwards.
    """
    B, Cin, Hp, Wp = x.shape
    dh, dw = dil
    OH = Hp - dh * (k - 1)
    OW = Wp - dw * (k - 1)
    ohw = OH * Wp                       # includes dw*(k-1) garbage columns / row
    tail = dw * (k - 1)
    L = Hp * Wp + tail
    T, Cout, _ = w_taps.shape

    xf = x.reshape(B, Cin, Hp * Wp)
    if tail:
        xf = jnp.pad(xf, ((0, 0), (0, 0), (0, tail)))
    tap_offsets = tuple(ki * dh * Wp + kj * dw
                        for ki in range(k) for kj in range(k))

    kern = functools.partial(_conv_kernel, tap_offsets=tap_offsets, ohw=ohw,
                             act=act, cin_is_one=(Cin == 1))
    out = pl.pallas_call(
        kern,
        out_shape=jax.ShapeDtypeStruct((B, Cout, ohw), out_dtype),
        grid=(B,),
        in_specs=[
            pl.BlockSpec((1, Cin, L), lambda b: (b, 0, 0)),
            pl.BlockSpec((T, Cout, Cin), lambda b: (0, 0, 0)),
            pl.BlockSpec((2, Cout, 1), lambda b: (0, 0, 0)),
        ],
        out_specs=pl.BlockSpec((1, Cout, ohw), lambda b: (b, 0, 0)),
        compiler_params=pltpu.CompilerParams(
            dimension_semantics=("parallel",),          # megacore split on v7x
            vmem_limit_bytes=32 * 1024 * 1024),
    )(xf.astype(jnp.bfloat16), w_taps, scale_shift)

    # Drop the garbage columns, back to strict NCHW.
    return out.reshape(B, Cout, OH, Wp)[:, :, :, :OW]


def latent_head(hf, w4, b4, eps, wd, bd, lat):
    B = hf.shape[0]
    n_de = wd.shape[1]
    vmem = pl.BlockSpec(memory_space=pltpu.MemorySpace.VMEM)
    d, kl = pl.pallas_call(
        functools.partial(_latent_kernel, lat=lat),
        out_shape=(jax.ShapeDtypeStruct((B, n_de), jnp.bfloat16),
                   jax.ShapeDtypeStruct((1, 1), jnp.float32)),
        in_specs=[vmem] * 6,
        out_specs=(vmem, vmem),
    )(hf, w4, b4, eps, wd, bd)
    return d, kl[0, 0]


# ------------------------------- JAX glue ------------------------------------

def maxpool2x2(x):
    """MaxPool2d(kernel=2, ceil_mode=True)."""
    B, C, H, W = x.shape
    ph, pw = (-H) % 2, (-W) % 2
    if ph or pw:
        x = jnp.pad(x, ((0, 0), (0, 0), (0, ph), (0, pw)),
                    constant_values=-jnp.inf)
        B, C, H, W = x.shape
    return x.reshape(B, C, H // 2, 2, W // 2, 2).max(axis=(3, 5))


def upsample_nearest(x, size):
    """nn.Upsample(size=..., mode='nearest'): src = floor(dst * in/out)."""
    # TODO(synk): could be folded into the next conv's tap gather, kept as glue.
    B, C, H, W = x.shape
    oh, ow = size
    hi = (jnp.arange(oh) * H) // oh
    wi = (jnp.arange(ow) * W) // ow
    return x[:, :, hi, :][:, :, :, wi]


# ------------------------------ parameters -----------------------------------

def init_params(key, latent_dim=10, window_size=32, num_feats=38,
                kernel_size=3, num_levels=4):
    enc_ch = {3: [1, 8, 24, 4], 4: [1, 8, 32, 16, 4],
              5: [1, 8, 32, 64, 16, 4], 6: [1, 16, 32, 64, 24, 4]}[num_levels]
    dec_ch = {3: [4, 24, 8, 1], 4: [4, 16, 32, 8, 1],
              5: [4, 16, 64, 32, 8, 1], 6: [4, 24, 64, 32, 16, 1]}[num_levels]
    k = kernel_size
    dilation = 2
    bn_eps = 1e-5
    keys = iter(jax.random.split(key, 64))

    def rand_w(shape):
        return jax.random.normal(next(keys), shape, jnp.float32) * 0.1

    def conv_to_taps(w_conv):
        # (Cout, Cin, kh, kw) -> (kh*kw, Cout, Cin), tap index t = ki*kw + kj
        co, ci, kh, kw = w_conv.shape
        return w_conv.transpose(2, 3, 0, 1).reshape(kh * kw, co, ci).astype(jnp.bfloat16)

    def fold_affine(bias, n):
        # eval-mode BatchNorm2d (gamma=1, beta=0, mean=0, var=1) folded with conv bias
        inv = (1.0 + bn_eps) ** -0.5
        scale = jnp.full((n,), inv, jnp.float32)
        shift = bias.astype(jnp.float32) * inv
        return jnp.stack([scale, shift], axis=0).reshape(2, n, 1)

    # ---- encoder blocks (mirrors the nn.Sequential construction) ----
    enc = []
    before_pool = []
    cur_H, cur_W = window_size, num_feats
    for i in range(1, num_levels + 1):
        dil = (dilation ** (i - 1), 1)
        pad_top = dilation ** i * (k - 2)
        pool = i <= num_levels - 2
        in_c, out_c = enc_ch[i - 1], enc_ch[i]
        w = rand_w((out_c, in_c, k, k))
        b = jnp.zeros((out_c,), jnp.float32)
        enc.append(dict(w_taps=conv_to_taps(w), ss=fold_affine(b, out_c),
                        dil=dil, pad_top=pad_top, pool=pool))
        cur_H = cur_H + pad_top - dil[0] * (k - 1)
        cur_W = cur_W - dil[1] * (k - 1)
        if pool:
            before_pool.append((cur_H, cur_W))
            cur_H = -(-cur_H // 2)
            cur_W = -(-cur_W // 2)
    lin_layer = cur_H * cur_W
    feat = enc_ch[-1] * lin_layer

    # ---- latent head (fc41 | fc42 concatenated, plus defc1) ----
    fc41_w = rand_w((feat, latent_dim)); fc41_b = jnp.zeros((latent_dim,), jnp.float32)
    fc42_w = rand_w((feat, latent_dim)); fc42_b = jnp.zeros((latent_dim,), jnp.float32)
    w4 = jnp.concatenate([fc41_w, fc42_w], axis=1).astype(jnp.bfloat16)
    b4 = jnp.concatenate([fc41_b, fc42_b]).reshape(1, 2 * latent_dim)
    defc1_w = rand_w((latent_dim, dec_ch[0] * lin_layer)).astype(jnp.bfloat16)
    defc1_b = jnp.zeros((1, dec_ch[0] * lin_layer), jnp.float32)

    # ---- decoder blocks ----
    dec = []
    bp = list(before_pool)
    for i in range(num_levels, 0, -1):
        dil = (dilation ** (num_levels - i), 1)
        pad_top = dilation ** (num_levels - i) * (k - 1)
        conv_pad_h = pad_top + ((k - 3) // 2 if i == 1 else 0)
        in_c = dec_ch[num_levels - i]
        out_c = dec_ch[num_levels - i + 1]
        up = None
        if len(bp) >= 1 and i <= len(bp):   # replicates `i <= len(dims) >= 1`
            up = bp.pop(-1)
        w_t = rand_w((in_c, out_c, k, k))   # ConvTranspose2d weight layout
        # stride-1 ConvTranspose == direct conv with spatially flipped,
        # channel-swapped weight and extra padding dil*(k-1) - pad per side.
        w_conv = jnp.flip(w_t, axis=(2, 3)).transpose(1, 0, 2, 3)
        b = jnp.zeros((out_c,), jnp.float32)
        eph = dil[0] * (k - 1) - conv_pad_h   # 0 for kernel_size=3 (negative for k>3)
        epw = dil[1] * (k - 1)
        dec.append(dict(w_taps=conv_to_taps(w_conv), ss=fold_affine(b, out_c),
                        dil=dil, pad_top=pad_top, eph=eph, epw=epw,
                        upsample=up, act="relu" if i >= 2 else "sigmoid"))

    # TODO(synk): decoder_fc41/decoder_fc42 exist in __init__ but are only used
    # when use_probabilistic_decoder=True (default False) — omitted here.
    return dict(enc=enc, dec=dec, w4=w4, b4=b4,
                defc1_w=defc1_w, defc1_b=defc1_b,
                kernel_size=k, latent_dim=latent_dim,
                window_size=window_size, num_feats=num_feats)


# ------------------------------- forward --------------------------------------

def forward(params, x, sample_key):
    """Returns (output, rec_mu, rec_sigma, kl) like CNN_sigmaVAE.forward."""
    B = x.shape[0]
    k = params["kernel_size"]

    # ---------------- encoder ----------------
    h = x.astype(jnp.bfloat16)
    for lvl in params["enc"]:
        h = jnp.pad(h, ((0, 0), (0, 0), (lvl["pad_top"], 0), (0, 0)))   # ConstantPad2d
        h = conv_layer(h, lvl["w_taps"], lvl["ss"], lvl["dil"], k,
                       act="relu", out_dtype=jnp.bfloat16)              # Conv+BN+ReLU (+Dropout=id)
        if lvl["pool"]:
            h = maxpool2x2(h)
    saved_dim = h.shape[1:]
    hf = h.reshape(B, -1)

    # -------- fused fc41/fc42 + sampling + KL + defc1 --------
    eps = jax.random.normal(sample_key, (B, params["latent_dim"]), jnp.float32)
    d, kl = latent_head(hf, params["w4"], params["b4"], eps,
                        params["defc1_w"], params["defc1_b"],
                        params["latent_dim"])
    d = d.reshape(B, *saved_dim)

    # ---------------- decoder ----------------
    for blk in params["dec"]:
        if blk["upsample"] is not None:
            d = upsample_nearest(d, blk["upsample"])
        # ConstantPad2d (top) + ConvTranspose->direct-conv extra padding
        d = jnp.pad(d, ((0, 0), (0, 0),
                        (blk["pad_top"] + blk["eph"], blk["eph"]),
                        (blk["epw"], blk["epw"])))
        d = conv_layer(d, blk["w_taps"], blk["ss"], blk["dil"], k,
                       act=blk["act"],
                       out_dtype=jnp.float32 if blk["act"] == "sigmoid"
                       else jnp.bfloat16)                               # ConvT+BN+(ReLU|Sigmoid)

    rec_mu = jnp.float32(0.0)     # prob_decoder=False
    rec_sigma = jnp.float32(0.0)
    return d, rec_mu, rec_sigma, kl


# --------------------------------- main ----------------------------------------

if __name__ == "__main__":
    key = jax.random.PRNGKey(0)
    pkey, xkey, ekey = jax.random.split(key, 3)

    B, window_size, num_feats = 2, 32, 38
    params = init_params(pkey, latent_dim=10, window_size=window_size,
                         num_feats=num_feats, kernel_size=3, num_levels=4)

    x = jax.random.normal(xkey, (B, 1, window_size, num_feats), jnp.float32)

    fwd = jax.jit(functools.partial(forward, params))
    out, rec_mu, rec_sigma, kl = fwd(x, ekey)
    jax.block_until_ready(out)
    jax.block_until_ready(kl)

    assert out.shape == (B, 1, window_size, num_feats), out.shape
    assert kl.shape == (), kl.shape
    assert bool(jnp.isfinite(out).all()) and bool(jnp.isfinite(kl))
    print("KERNEL_OK")
</pallas_src>

<mosaic_0001>
module attributes {stable_mosaic.version = 11 : i64} {
  func.func @_conv_kernel(%arg0: i32, %arg1: memref<1x1x1294xbf16, #tpu.memory_space<vmem>>, %arg2: memref<9x8x1xbf16, #tpu.memory_space<vmem>>, %arg3: memref<2x8x1xf32, #tpu.memory_space<vmem>>, %arg4: memref<1x8x1216xbf16, #tpu.memory_space<vmem>>) attributes {dimension_semantics = [#tpu.dimension_semantics<parallel>], iteration_bounds = array<i64: 2>, scalar_prefetch = 0 : i64, scratch_operands = 0 : i64, tpu.core_type = #tpu.core_type<tc>, window_params = [{transform_indices = @transform_0, window_bounds = array<i64: 1, 1, 1294>}, {pipeline_mode = #tpu.pipeline_mode<synchronous>, transform_indices = @transform_1, window_bounds = array<i64: 9, 8, 1>}, {pipeline_mode = #tpu.pipeline_mode<synchronous>, transform_indices = @transform_2, window_bounds = array<i64: 2, 8, 1>}, {transform_indices = @transform_3, window_bounds = array<i64: 1, 8, 1216>}]} {
    %c0 = arith.constant 0 : index
    %c0_0 = arith.constant 0 : index
    %c0_1 = arith.constant 0 : index
    %0 = vector.load %arg1[%c0, %c0_0, %c0_1] : memref<1x1x1294xbf16, #tpu.memory_space<vmem>>, vector<1x1x1294xbf16>
    %c0_2 = arith.constant 0 : index
    %c0_3 = arith.constant 0 : index
    %c0_4 = arith.constant 0 : index
    %1 = vector.load %arg2[%c0_2, %c0_3, %c0_4] : memref<9x8x1xbf16, #tpu.memory_space<vmem>>, vector<9x8x1xbf16>
    %c0_5 = arith.constant 0 : index
    %c0_6 = arith.constant 0 : index
    %c0_7 = arith.constant 0 : index
    %2 = vector.load %arg3[%c0_5, %c0_6, %c0_7] : memref<2x8x1xf32, #tpu.memory_space<vmem>>, vector<2x8x1xf32>
    %cst = arith.constant 0.000000e+00 : f32
    %3 = vector.broadcast %cst : f32 to vector<8x1216xf32>
    %4 = vector.extract_strided_slice %0 {offsets = [0, 0, 0], sizes = [1, 1, 1216], strides = [1, 1, 1]} : vector<1x1x1294xbf16> to vector<1x1x1216xbf16>
    %5 = vector.shape_cast %4 : vector<1x1x1216xbf16> to vector<1x1216xbf16>
    %6 = vector.extract_strided_slice %1 {offsets = [0, 0, 0], sizes = [1, 8, 1], strides = [1, 1, 1]} : vector<9x8x1xbf16> to vector<1x8x1xbf16>
    %7 = vector.shape_cast %6 : vector<1x8x1xbf16> to vector<8x1xbf16>
    %8 = arith.extf %7 : vector<8x1xbf16> to vector<8x1xf32>
    %9 = arith.extf %5 : vector<1x1216xbf16> to vector<1x1216xf32>
    %10 = vector.broadcast %8 : vector<8x1xf32> to vector<8x1216xf32>
    %11 = vector.broadcast %9 : vector<1x1216xf32> to vector<8x1216xf32>
    %12 = arith.mulf %10, %11 : vector<8x1216xf32>
    %13 = arith.addf %3, %12 : vector<8x1216xf32>
    %14 = vector.extract_strided_slice %0 {offsets = [0, 0, 1], sizes = [1, 1, 1216], strides = [1, 1, 1]} : vector<1x1x1294xbf16> to vector<1x1x1216xbf16>
    %15 = vector.shape_cast %14 : vector<1x1x1216xbf16> to vector<1x1216xbf16>
    %16 = vector.extract_strided_slice %1 {offsets = [1, 0, 0], sizes = [1, 8, 1], strides = [1, 1, 1]} : vector<9x8x1xbf16> to vector<1x8x1xbf16>
    %17 = vector.shape_cast %16 : vector<1x8x1xbf16> to vector<8x1xbf16>
    %18 = arith.extf %17 : vector<8x1xbf16> to vector<8x1xf32>
    %19 = arith.extf %15 : vector<1x1216xbf16> to vector<1x1216xf32>
    %20 = vector.broadcast %18 : vector<8x1xf32> to vector<8x1216xf32>
    %21 = vector.broadcast %19 : vector<1x1216xf32> to vector<8x1216xf32>
    %22 = arith.mulf %20, %21 : vector<8x1216xf32>
    %23 = arith.addf %13, %22 : vector<8x1216xf32>
    %24 = vector.extract_strided_slice %0 {offsets = [0, 0, 2], sizes = [1, 1, 1216], strides = [1, 1, 1]} : vector<1x1x1294xbf16> to vector<1x1x1216xbf16>
    %25 = vector.shape_cast %24 : vector<1x1x1216xbf16> to vector<1x1216xbf16>
    %26 = vector.extract_strided_slice %1 {offsets = [2, 0, 0], sizes = [1, 8, 1], strides = [1, 1, 1]} : vector<9x8x1xbf16> to vector<1x8x1xbf16>
    %27 = vector.shape_cast %26 : vector<1x8x1xbf16> to vector<8x1xbf16>
    %28 = arith.extf %27 : vector<8x1xbf16> to vector<8x1xf32>
    %29 = arith.extf %25 : vector<1x1216xbf16> to vector<1x1216xf32>
    %30 = vector.broadcast %28 : vector<8x1xf32> to vector<8x1216xf32>
    %31 = vector.broadcast %29 : vector<1x1216xf32> to vector<8x1216xf32>
    %32 = arith.mulf %30, %31 : vector<8x1216xf32>
    %33 = arith.addf %23, %32 : vector<8x1216xf32>
    %34 = vector.extract_strided_slice %0 {offsets = [0, 0, 38], sizes = [1, 1, 1216], strides = [1, 1, 1]} : vector<1x1x1294xbf16> to vector<1x1x1216xbf16>
    %35 = vector.shape_cast %34 : vector<1x1x1216xbf16> to vector<1x1216xbf16>
    %36 = vector.extract_strided_slice %1 {offsets = [3, 0, 0], sizes = [1, 8, 1], strides = [1, 1, 1]} : vector<9x8x1xbf16> to vector<1x8x1xbf16>
    %37 = vector.shape_cast %36 : vector<1x8x1xbf16> to vector<8x1xbf16>
    %38 = arith.extf %37 : vector<8x1xbf16> to vector<8x1xf32>
    %39 = arith.extf %35 : vector<1x1216xbf16> to vector<1x1216xf32>
    %40 = vector.broadcast %38 : vector<8x1xf32> to vector<8x1216xf32>
    %41 = vector.broadcast %39 : vector<1x1216xf32> to vector<8x1216xf32>
    %42 = arith.mulf %40, %41 : vector<8x1216xf32>
    %43 = arith.addf %33, %42 : vector<8x1216xf32>
    %44 = vector.extract_strided_slice %0 {offsets = [0, 0, 39], sizes = [1, 1, 1216], strides = [1, 1, 1]} : vector<1x1x1294xbf16> to vector<1x1x1216xbf16>
    %45 = vector.shape_cast %44 : vector<1x1x1216xbf16> to vector<1x1216xbf16>
    %46 = vector.extract_strided_slice %1 {offsets = [4, 0, 0], sizes = [1, 8, 1], strides = [1, 1, 1]} : vector<9x8x1xbf16> to vector<1x8x1xbf16>
    %47 = vector.shape_cast %46 : vector<1x8x1xbf16> to vector<8x1xbf16>
    %48 = arith.extf %47 : vector<8x1xbf16> to vector<8x1xf32>
    %49 = arith.extf %45 : vector<1x1216xbf16> to vector<1x1216xf32>
    %50 = vector.broadcast %48 : vector<8x1xf32> to vector<8x1216xf32>
    %51 = vector.broadcast %49 : vector<1x1216xf32> to vector<8x1216xf32>
    %52 = arith.mulf %50, %51 : vector<8x1216xf32>
    %53 = arith.addf %43, %52 : vector<8x1216xf32>
    %54 = vector.extract_strided_slice %0 {offsets = [0, 0, 40], sizes = [1, 1, 1216], strides = [1, 1, 1]} : vector<1x1x1294xbf16> to vector<1x1x1216xbf16>
    %55 = vector.shape_cast %54 : vector<1x1x1216xbf16> to vector<1x1216xbf16>
    %56 = vector.extract_strided_slice %1 {offsets = [5, 0, 0], sizes = [1, 8, 1], strides = [1, 1, 1]} : vector<9x8x1xbf16> to vector<1x8x1xbf16>
    %57 = vector.shape_cast %56 : vector<1x8x1xbf16> to vector<8x1xbf16>
    %58 = arith.extf %57 : vector<8x1xbf16> to vector<8x1xf32>
    %59 = arith.extf %55 : vector<1x1216xbf16> to vector<1x1216xf32>
    %60 = vector.broadcast %58 : vector<8x1xf32> to vector<8x1216xf32>
    %61 = vector.broadcast %59 : vector<1x1216xf32> to vector<8x1216xf32>
    %62 = arith.mulf %60, %61 : vector<8x1216xf32>
    %63 = arith.addf %53, %62 : vector<8x1216xf32>
    %64 = vector.extract_strided_slice %0 {offsets = [0, 0, 76], sizes = [1, 1, 1216], strides = [1, 1, 1]} : vector<1x1x1294xbf16> to vector<1x1x1216xbf16>
    %65 = vector.shape_cast %64 : vector<1x1x1216xbf16> to vector<1x1216xbf16>
    %66 = vector.extract_strided_slice %1 {offsets = [6, 0, 0], sizes = [1, 8, 1], strides = [1, 1, 1]} : vector<9x8x1xbf16> to vector<1x8x1xbf16>
    %67 = vector.shape_cast %66 : vector<1x8x1xbf16> to vector<8x1xbf16>
    %68 = arith.extf %67 : vector<8x1xbf16> to vector<8x1xf32>
    %69 = arith.extf %65 : vector<1x1216xbf16> to vector<1x1216xf32>
    %70 = vector.broadcast %68 : vector<8x1xf32> to vector<8x1216xf32>
    %71 = vector.broadcast %69 : vector<1x1216xf32> to vector<8x1216xf32>
    %72 = arith.mulf %70, %71 : vector<8x1216xf32>
    %73 = arith.addf %63, %72 : vector<8x1216xf32>
    %74 = vector.extract_strided_slice %0 {offsets = [0, 0, 77], sizes = [1, 1, 1216], strides = [1, 1, 1]} : vector<1x1x1294xbf16> to vector<1x1x1216xbf16>
    %75 = vector.shape_cast %74 : vector<1x1x1216xbf16> to vector<1x1216xbf16>
    %76 = vector.extract_strided_slice %1 {offsets = [7, 0, 0], sizes = [1, 8, 1], strides = [1, 1, 1]} : vector<9x8x1xbf16> to vector<1x8x1xbf16>
    %77 = vector.shape_cast %76 : vector<1x8x1xbf16> to vector<8x1xbf16>
    %78 = arith.extf %77 : vector<8x1xbf16> to vector<8x1xf32>
    %79 = arith.extf %75 : vector<1x1216xbf16> to vector<1x1216xf32>
    %80 = vector.broadcast %78 : vector<8x1xf32> to vector<8x1216xf32>
    %81 = vector.broadcast %79 : vector<1x1216xf32> to vector<8x1216xf32>
    %82 = arith.mulf %80, %81 : vector<8x1216xf32>
    %83 = arith.addf %73, %82 : vector<8x1216xf32>
    %84 = vector.extract_strided_slice %0 {offsets = [0, 0, 78], sizes = [1, 1, 1216], strides = [1, 1, 1]} : vector<1x1x1294xbf16> to vector<1x1x1216xbf16>
    %85 = vector.shape_cast %84 : vector<1x1x1216xbf16> to vector<1x1216xbf16>
    %86 = vector.extract_strided_slice %1 {offsets = [8, 0, 0], sizes = [1, 8, 1], strides = [1, 1, 1]} : vector<9x8x1xbf16> to vector<1x8x1xbf16>
    %87 = vector.shape_cast %86 : vector<1x8x1xbf16> to vector<8x1xbf16>
    %88 = arith.extf %87 : vector<8x1xbf16> to vector<8x1xf32>
    %89 = arith.extf %85 : vector<1x1216xbf16> to vector<1x1216xf32>
    %90 = vector.broadcast %88 : vector<8x1xf32> to vector<8x1216xf32>
    %91 = vector.broadcast %89 : vector<1x1216xf32> to vector<8x1216xf32>
    %92 = arith.mulf %90, %91 : vector<8x1216xf32>
    %93 = arith.addf %83, %92 : vector<8x1216xf32>
    %94 = vector.extract_strided_slice %2 {offsets = [0, 0, 0], sizes = [1, 8, 1], strides = [1, 1, 1]} : vector<2x8x1xf32> to vector<1x8x1xf32>
    %95 = vector.shape_cast %94 : vector<1x8x1xf32> to vector<8x1xf32>
    %96 = vector.broadcast %95 : vector<8x1xf32> to vector<8x1216xf32>
    %97 = arith.mulf %93, %96 : vector<8x1216xf32>
    %98 = vector.extract_strided_slice %2 {offsets = [1, 0, 0], sizes = [1, 8, 1], strides = [1, 1, 1]} : vector<2x8x1xf32> to vector<1x8x1xf32>
    %99 = vector.shape_cast %98 : vector<1x8x1xf32> to vector<8x1xf32>
    %100 = vector.broadcast %99 : vector<8x1xf32> to vector<8x1216xf32>
    %101 = arith.addf %97, %100 : vector<8x1216xf32>
    %cst_8 = arith.constant 0.000000e+00 : f32
    %102 = vector.broadcast %cst_8 : f32 to vector<8x1216xf32>
    %103 = arith.maximumf %101, %102 : vector<8x1216xf32>
    %104 = arith.truncf %103 : vector<8x1216xf32> to vector<8x1216xbf16>
    %105 = vector.shape_cast %104 : vector<8x1216xbf16> to vector<1x8x1216xbf16>
    %c0_9 = arith.constant 0 : index
    %c0_10 = arith.constant 0 : index
    %c0_11 = arith.constant 0 : index
    %106 = vector.load %arg4[%c0_9, %c0_10, %c0_11] : memref<1x8x1216xbf16, #tpu.memory_space<vmem>>, vector<1x8x1216xbf16>
    tpu.vector_store %arg4[%c0_9, %c0_10, %c0_11], %105 {strides = array<i32>} : memref<1x8x1216xbf16, #tpu.memory_space<vmem>>, vector<1x8x1216xbf16>,
    return
  }
  func.func @transform_0(%arg0: i32) -> (i32, i32, i32) {
    %c0_i32 = arith.constant 0 : i32
    %c0_i32_0 = arith.constant 0 : i32
    %c0_i32_1 = arith.constant 0 : i32
    return %arg0, %c0_i32, %c0_i32_0 : i32, i32, i32
  }
  func.func @transform_1(%arg0: i32) -> (i32, i32, i32) {
    %c0_i32 = arith.constant 0 : i32
    %c0_i32_0 = arith.constant 0 : i32
    %c0_i32_1 = arith.constant 0 : i32
    %c0_i32_2 = arith.constant 0 : i32
    return %c0_i32, %c0_i32_0, %c0_i32_1 : i32, i32, i32
  }
  func.func @transform_2(%arg0: i32) -> (i32, i32, i32) {
    %c0_i32 = arith.constant 0 : i32
    %c0_i32_0 = arith.constant 0 : i32
    %c0_i32_1 = arith.constant 0 : i32
    %c0_i32_2 = arith.constant 0 : i32
    return %c0_i32, %c0_i32_0, %c0_i32_1 : i32, i32, i32
  }
  func.func @transform_3(%arg0: i32) -> (i32, i32, i32) {
    %c0_i32 = arith.constant 0 : i32
    %c0_i32_0 = arith.constant 0 : i32
    %c0_i32_1 = arith.constant 0 : i32
    return %arg0, %c0_i32, %c0_i32_0 : i32, i32, i32
  }
}

module attributes {stable_mosaic.version = 11 : i64} {
  func.func @_conv_kernel(%arg0: i32, %arg1: memref<1x8x362xbf16, #tpu.memory_space<vmem>>, %arg2: memref<9x32x8xbf16, #tpu.memory_space<vmem>>, %arg3: memref<2x32x1xf32, #tpu.memory_space<vmem>>, %arg4: memref<1x32x288xbf16, #tpu.memory_space<vmem>>) attributes {dimension_semantics = [#tpu.dimension_semantics<parallel>], iteration_bounds = array<i64: 2>, scalar_prefetch = 0 : i64, scratch_operands = 0 : i64, tpu.core_type = #tpu.core_type<tc>, window_params = [{transform_indices = @transform_0, window_bounds = array<i64: 1, 8, 362>}, {pipeline_mode = #tpu.pipeline_mode<synchronous>, transform_indices = @transform_1, window_bounds = array<i64: 9, 32, 8>}, {pipeline_mode = #tpu.pipeline_mode<synchronous>, transform_indices = @transform_2, window_bounds = array<i64: 2, 32, 1>}, {transform_indices = @transform_3, window_bounds = array<i64: 1, 32, 288>}]} {
    %c0 = arith.constant 0 : index
    %c0_0 = arith.constant 0 : index
    %c0_1 = arith.constant 0 : index
    %0 = vector.load %arg1[%c0, %c0_0, %c0_1] : memref<1x8x362xbf16, #tpu.memory_space<vmem>>, vector<1x8x362xbf16>
    %c0_2 = arith.constant 0 : index
    %c0_3 = arith.constant 0 : index
    %c0_4 = arith.constant 0 : index
    %1 = vector.load %arg2[%c0_2, %c0_3, %c0_4] : memref<9x32x8xbf16, #tpu.memory_space<vmem>>, vector<9x32x8xbf16>
    %c0_5 = arith.constant 0 : index
    %c0_6 = arith.constant 0 : index
    %c0_7 = arith.constant 0 : index
    %2 = vector.load %arg3[%c0_5, %c0_6, %c0_7] : memref<2x32x1xf32, #tpu.memory_space<vmem>>, vector<2x32x1xf32>
    %cst = arith.constant 0.000000e+00 : f32
    %3 = vector.broadcast %cst : f32 to vector<32x288xf32>
    %4 = vector.extract_strided_slice %0 {offsets = [0, 0, 0], sizes = [1, 8, 288], strides = [1, 1, 1]} : vector<1x8x362xbf16> to vector<1x8x288xbf16>
    %5 = vector.shape_cast %4 : vector<1x8x288xbf16> to vector<8x288xbf16>
    %6 = vector.extract_strided_slice %1 {offsets = [0, 0, 0], sizes = [1, 32, 8], strides = [1, 1, 1]} : vector<9x32x8xbf16> to vector<1x32x8xbf16>
    %7 = vector.shape_cast %6 : vector<1x32x8xbf16> to vector<32x8xbf16>
    %cst_8 = arith.constant dense<0.000000e+00> : vector<32x288xf32>
    %8 = tpu.matmul %7, %5, %cst_8 {dimension_numbers = #tpu.dot_dimension_numbers<[1], [0], [0], [1], [0, 0, 1, 1], [], []>} : vector<32x8xbf16>, vector<8x288xbf16>, vector<32x288xf32> -> vector<32x288xf32>
    %9 = arith.addf %3, %8 : vector<32x288xf32>
    %10 = vector.extract_strided_slice %0 {offsets = [0, 0, 1], sizes = [1, 8, 288], strides = [1, 1, 1]} : vector<1x8x362xbf16> to vector<1x8x288xbf16>
    %11 = vector.shape_cast %10 : vector<1x8x288xbf16> to vector<8x288xbf16>
    %12 = vector.extract_strided_slice %1 {offsets = [1, 0, 0], sizes = [1, 32, 8], strides = [1, 1, 1]} : vector<9x32x8xbf16> to vector<1x32x8xbf16>
    %13 = vector.shape_cast %12 : vector<1x32x8xbf16> to vector<32x8xbf16>
    %cst_9 = arith.constant dense<0.000000e+00> : vector<32x288xf32>
    %14 = tpu.matmul %13, %11, %cst_9 {dimension_numbers = #tpu.dot_dimension_numbers<[1], [0], [0], [1], [0, 0, 1, 1], [], []>} : vector<32x8xbf16>, vector<8x288xbf16>, vector<32x288xf32> -> vector<32x288xf32>
    %15 = arith.addf %9, %14 : vector<32x288xf32>
    %16 = vector.extract_strided_slice %0 {offsets = [0, 0, 2], sizes = [1, 8, 288], strides = [1, 1, 1]} : vector<1x8x362xbf16> to vector<1x8x288xbf16>
    %17 = vector.shape_cast %16 : vector<1x8x288xbf16> to vector<8x288xbf16>
    %18 = vector.extract_strided_slice %1 {offsets = [2, 0, 0], sizes = [1, 32, 8], strides = [1, 1, 1]} : vector<9x32x8xbf16> to vector<1x32x8xbf16>
    %19 = vector.shape_cast %18 : vector<1x32x8xbf16> to vector<32x8xbf16>
    %cst_10 = arith.constant dense<0.000000e+00> : vector<32x288xf32>
    %20 = tpu.matmul %19, %17, %cst_10 {dimension_numbers = #tpu.dot_dimension_numbers<[1], [0], [0], [1], [0, 0, 1, 1], [], []>} : vector<32x8xbf16>, vector<8x288xbf16>, vector<32x288xf32> -> vector<32x288xf32>
    %21 = arith.addf %15, %20 : vector<32x288xf32>
    %22 = vector.extract_strided_slice %0 {offsets = [0, 0, 36], sizes = [1, 8, 288], strides = [1, 1, 1]} : vector<1x8x362xbf16> to vector<1x8x288xbf16>
    %23 = vector.shape_cast %22 : vector<1x8x288xbf16> to vector<8x288xbf16>
    %24 = vector.extract_strided_slice %1 {offsets = [3, 0, 0], sizes = [1, 32, 8], strides = [1, 1, 1]} : vector<9x32x8xbf16> to vector<1x32x8xbf16>
    %25 = vector.shape_cast %24 : vector<1x32x8xbf16> to vector<32x8xbf16>
    %cst_11 = arith.constant dense<0.000000e+00> : vector<32x288xf32>
    %26 = tpu.matmul %25, %23, %cst_11 {dimension_numbers = #tpu.dot_dimension_numbers<[1], [0], [0], [1], [0, 0, 1, 1], [], []>} : vector<32x8xbf16>, vector<8x288xbf16>, vector<32x288xf32> -> vector<32x288xf32>
    %27 = arith.addf %21, %26 : vector<32x288xf32>
    %28 = vector.extract_strided_slice %0 {offsets = [0, 0, 37], sizes = [1, 8, 288], strides = [1, 1, 1]} : vector<1x8x362xbf16> to vector<1x8x288xbf16>
    %29 = vector.shape_cast %28 : vector<1x8x288xbf16> to vector<8x288xbf16>
    %30 = vector.extract_strided_slice %1 {offsets = [4, 0, 0], sizes = [1, 32, 8], strides = [1, 1, 1]} : vector<9x32x8xbf16> to vector<1x32x8xbf16>
    %31 = vector.shape_cast %30 : vector<1x32x8xbf16> to vector<32x8xbf16>
    %cst_12 = arith.constant dense<0.000000e+00> : vector<32x288xf32>
    %32 = tpu.matmul %31, %29, %cst_12 {dimension_numbers = #tpu.dot_dimension_numbers<[1], [0], [0], [1], [0, 0, 1, 1], [], []>} : vector<32x8xbf16>, vector<8x288xbf16>, vector<32x288xf32> -> vector<32x288xf32>
    %33 = arith.addf %27, %32 : vector<32x288xf32>
    %34 = vector.extract_strided_slice %0 {offsets = [0, 0, 38], sizes = [1, 8, 288], strides = [1, 1, 1]} : vector<1x8x362xbf16> to vector<1x8x288xbf16>
    %35 = vector.shape_cast %34 : vector<1x8x288xbf16> to vector<8x288xbf16>
    %36 = vector.extract_strided_slice %1 {offsets = [5, 0, 0], sizes = [1, 32, 8], strides = [1, 1, 1]} : vector<9x32x8xbf16> to vector<1x32x8xbf16>
    %37 = vector.shape_cast %36 : vector<1x32x8xbf16> to vector<32x8xbf16>
    %cst_13 = arith.constant dense<0.000000e+00> : vector<32x288xf32>
    %38 = tpu.matmul %37, %35, %cst_13 {dimension_numbers = #tpu.dot_dimension_numbers<[1], [0], [0], [1], [0, 0, 1, 1], [], []>} : vector<32x8xbf16>, vector<8x288xbf16>, vector<32x288xf32> -> vector<32x288xf32>
    %39 = arith.addf %33, %38 : vector<32x288xf32>
    %40 = vector.extract_strided_slice %0 {offsets = [0, 0, 72], sizes = [1, 8, 288], strides = [1, 1, 1]} : vector<1x8x362xbf16> to vector<1x8x288xbf16>
    %41 = vector.shape_cast %40 : vector<1x8x288xbf16> to vector<8x288xbf16>
    %42 = vector.extract_strided_slice %1 {offsets = [6, 0, 0], sizes = [1, 32, 8], strides = [1, 1, 1]} : vector<9x32x8xbf16> to vector<1x32x8xbf16>
    %43 = vector.shape_cast %42 : vector<1x32x8xbf16> to vector<32x8xbf16>
    %cst_14 = arith.constant dense<0.000000e+00> : vector<32x288xf32>
    %44 = tpu.matmul %43, %41, %cst_14 {dimension_numbers = #tpu.dot_dimension_numbers<[1], [0], [0], [1], [0, 0, 1, 1], [], []>} : vector<32x8xbf16>, vector<8x288xbf16>, vector<32x288xf32> -> vector<32x288xf32>
    %45 = arith.addf %39, %44 : vector<32x288xf32>
    %46 = vector.extract_strided_slice %0 {offsets = [0, 0, 73], sizes = [1, 8, 288], strides = [1, 1, 1]} : vector<1x8x362xbf16> to vector<1x8x288xbf16>
    %47 = vector.shape_cast %46 : vector<1x8x288xbf16> to vector<8x288xbf16>
    %48 = vector.extract_strided_slice %1 {offsets = [7, 0, 0], sizes = [1, 32, 8], strides = [1, 1, 1]} : vector<9x32x8xbf16> to vector<1x32x8xbf16>
    %49 = vector.shape_cast %48 : vector<1x32x8xbf16> to vector<32x8xbf16>
    %cst_15 = arith.constant dense<0.000000e+00> : vector<32x288xf32>
    %50 = tpu.matmul %49, %47, %cst_15 {dimension_numbers = #tpu.dot_dimension_numbers<[1], [0], [0], [1], [0, 0, 1, 1], [], []>} : vector<32x8xbf16>, vector<8x288xbf16>, vector<32x288xf32> -> vector<32x288xf32>
    %51 = arith.addf %45, %50 : vector<32x288xf32>
    %52 = vector.extract_strided_slice %0 {offsets = [0, 0, 74], sizes = [1, 8, 288], strides = [1, 1, 1]} : vector<1x8x362xbf16> to vector<1x8x288xbf16>
    %53 = vector.shape_cast %52 : vector<1x8x288xbf16> to vector<8x288xbf16>
    %54 = vector.extract_strided_slice %1 {offsets = [8, 0, 0], sizes = [1, 32, 8], strides = [1, 1, 1]} : vector<9x32x8xbf16> to vector<1x32x8xbf16>
    %55 = vector.shape_cast %54 : vector<1x32x8xbf16> to vector<32x8xbf16>
    %cst_16 = arith.constant dense<0.000000e+00> : vector<32x288xf32>
    %56 = tpu.matmul %55, %53, %cst_16 {dimension_numbers = #tpu.dot_dimension_numbers<[1], [0], [0], [1], [0, 0, 1, 1], [], []>} : vector<32x8xbf16>, vector<8x288xbf16>, vector<32x288xf32> -> vector<32x288xf32>
    %57 = arith.addf %51, %56 : vector<32x288xf32>
    %58 = vector.extract_strided_slice %2 {offsets = [0, 0, 0], sizes = [1, 32, 1], strides = [1, 1, 1]} : vector<2x32x1xf32> to vector<1x32x1xf32>
    %59 = vector.shape_cast %58 : vector<1x32x1xf32> to vector<32x1xf32>
    %60 = vector.broadcast %59 : vector<32x1xf32> to vector<32x288xf32>
    %61 = arith.mulf %57, %60 : vector<32x288xf32>
    %62 = vector.extract_strided_slice %2 {offsets = [1, 0, 0], sizes = [1, 32, 1], strides = [1, 1, 1]} : vector<2x32x1xf32> to vector<1x32x1xf32>
    %63 = vector.shape_cast %62 : vector<1x32x1xf32> to vector<32x1xf32>
    %64 = vector.broadcast %63 : vector<32x1xf32> to vector<32x288xf32>
    %65 = arith.addf %61, %64 : vector<32x288xf32>
    %cst_17 = arith.constant 0.000000e+00 : f32
    %66 = vector.broadcast %cst_17 : f32 to vector<32x288xf32>
    %67 = arith.maximumf %65, %66 : vector<32x288xf32>
    %68 = arith.truncf %67 : vector<32x288xf32> to vector<32x288xbf16>
    %69 = vector.shape_cast %68 : vector<32x288xbf16> to vector<1x32x288xbf16>
    %c0_18 = arith.constant 0 : index
    %c0_19 = arith.constant 0 : index
    %c0_20 = arith.constant 0 : index
    %70 = vector.load %arg4[%c0_18, %c0_19, %c0_20] : memref<1x32x288xbf16, #tpu.memory_space<vmem>>, vector<1x32x288xbf16>
    tpu.vector_store %arg4[%c0_18, %c0_19, %c0_20], %69 {strides = array<i32>} : memref<1x32x288xbf16, #tpu.memory_space<vmem>>, vector<1x32x288xbf16>,
    return
  }
  func.func @transform_0(%arg0: i32) -> (i32, i32, i32) {
    %c0_i32 = arith.constant 0 : i32
    %c0_i32_0 = arith.constant 0 : i32
    %c0_i32_1 = arith.constant 0 : i32
    return %arg0, %c0_i32, %c0_i32_0 : i32, i32, i32
  }
  func.func @transform_1(%arg0: i32) -> (i32, i32, i32) {
    %c0_i32 = arith.constant 0 : i32
    %c0_i32_0 = arith.constant 0 : i32
    %c0_i32_1 = arith.constant 0 : i32
    %c0_i32_2 = arith.constant 0 : i32
    return %c0_i32, %c0_i32_0, %c0_i32_1 : i32, i32, i32
  }
  func.func @transform_2(%arg0: i32) -> (i32, i32, i32) {
    %c0_i32 = arith.constant 0 : i32
    %c0_i32_0 = arith.constant 0 : i32
    %c0_i32_1 = arith.constant 0 : i32
    %c0_i32_2 = arith.constant 0 : i32
    return %c0_i32, %c0_i32_0, %c0_i32_1 : i32, i32, i32
  }
  func.func @transform_3(%arg0: i32) -> (i32, i32, i32) {
    %c0_i32 = arith.constant 0 : i32
    %c0_i32_0 = arith.constant 0 : i32
    %c0_i32_1 = arith.constant 0 : i32
    return %arg0, %c0_i32, %c0_i32_0 : i32, i32, i32
  }
}

module attributes {stable_mosaic.version = 11 : i64} {
  func.func @_conv_kernel(%arg0: i32, %arg1: memref<1x32x130xbf16, #tpu.memory_space<vmem>>, %arg2: memref<9x16x32xbf16, #tpu.memory_space<vmem>>, %arg3: memref<2x16x1xf32, #tpu.memory_space<vmem>>, %arg4: memref<1x16x64xbf16, #tpu.memory_space<vmem>>) attributes {dimension_semantics = [#tpu.dimension_semantics<parallel>], iteration_bounds = array<i64: 2>, scalar_prefetch = 0 : i64, scratch_operands = 0 : i64, tpu.core_type = #tpu.core_type<tc>, window_params = [{transform_indices = @transform_0, window_bounds = array<i64: 1, 32, 130>}, {pipeline_mode = #tpu.pipeline_mode<synchronous>, transform_indices = @transform_1, window_bounds = array<i64: 9, 16, 32>}, {pipeline_mode = #tpu.pipeline_mode<synchronous>, transform_indices = @transform_2, window_bounds = array<i64: 2, 16, 1>}, {transform_indices = @transform_3, window_bounds = array<i64: 1, 16, 64>}]} {
    %c0 = arith.constant 0 : index
    %c0_0 = arith.constant 0 : index
    %c0_1 = arith.constant 0 : index
    %0 = vector.load %arg1[%c0, %c0_0, %c0_1] : memref<1x32x130xbf16, #tpu.memory_space<vmem>>, vector<1x32x130xbf16>
    %c0_2 = arith.constant 0 : index
    %c0_3 = arith.constant 0 : index
    %c0_4 = arith.constant 0 : index
    %1 = vector.load %arg2[%c0_2, %c0_3, %c0_4] : memref<9x16x32xbf16, #tpu.memory_space<vmem>>, vector<9x16x32xbf16>
    %c0_5 = arith.constant 0 : index
    %c0_6 = arith.constant 0 : index
    %c0_7 = arith.constant 0 : index
    %2 = vector.load %arg3[%c0_5, %c0_6, %c0_7] : memref<2x16x1xf32, #tpu.memory_space<vmem>>, vector<2x16x1xf32>
    %cst = arith.constant 0.000000e+00 : f32
    %3 = vector.broadcast %cst : f32 to vector<16x64xf32>
    %4 = vector.extract_strided_slice %0 {offsets = [0, 0, 0], sizes = [1, 32, 64], strides = [1, 1, 1]} : vector<1x32x130xbf16> to vector<1x32x64xbf16>
    %5 = vector.shape_cast %4 : vector<1x32x64xbf16> to vector<32x64xbf16>
    %6 = vector.extract_strided_slice %1 {offsets = [0, 0, 0], sizes = [1, 16, 32], strides = [1, 1, 1]} : vector<9x16x32xbf16> to vector<1x16x32xbf16>
    %7 = vector.shape_cast %6 : vector<1x16x32xbf16> to vector<16x32xbf16>
    %cst_8 = arith.constant dense<0.000000e+00> : vector<16x64xf32>
    %8 = tpu.matmul %7, %5, %cst_8 {dimension_numbers = #tpu.dot_dimension_numbers<[1], [0], [0], [1], [0, 0, 1, 1], [], []>} : vector<16x32xbf16>, vector<32x64xbf16>, vector<16x64xf32> -> vector<16x64xf32>
    %9 = arith.addf %3, %8 : vector<16x64xf32>
    %10 = vector.extract_strided_slice %0 {offsets = [0, 0, 1], sizes = [1, 32, 64], strides = [1, 1, 1]} : vector<1x32x130xbf16> to vector<1x32x64xbf16>
    %11 = vector.shape_cast %10 : vector<1x32x64xbf16> to vector<32x64xbf16>
    %12 = vector.extract_strided_slice %1 {offsets = [1, 0, 0], sizes = [1, 16, 32], strides = [1, 1, 1]} : vector<9x16x32xbf16> to vector<1x16x32xbf16>
    %13 = vector.shape_cast %12 : vector<1x16x32xbf16> to vector<16x32xbf16>
    %cst_9 = arith.constant dense<0.000000e+00> : vector<16x64xf32>
    %14 = tpu.matmul %13, %11, %cst_9 {dimension_numbers = #tpu.dot_dimension_numbers<[1], [0], [0], [1], [0, 0, 1, 1], [], []>} : vector<16x32xbf16>, vector<32x64xbf16>, vector<16x64xf32> -> vector<16x64xf32>
    %15 = arith.addf %9, %14 : vector<16x64xf32>
    %16 = vector.extract_strided_slice %0 {offsets = [0, 0, 2], sizes = [1, 32, 64], strides = [1, 1, 1]} : vector<1x32x130xbf16> to vector<1x32x64xbf16>
    %17 = vector.shape_cast %16 : vector<1x32x64xbf16> to vector<32x64xbf16>
    %18 = vector.extract_strided_slice %1 {offsets = [2, 0, 0], sizes = [1, 16, 32], strides = [1, 1, 1]} : vector<9x16x32xbf16> to vector<1x16x32xbf16>
    %19 = vector.shape_cast %18 : vector<1x16x32xbf16> to vector<16x32xbf16>
    %cst_10 = arith.constant dense<0.000000e+00> : vector<16x64xf32>
    %20 = tpu.matmul %19, %17, %cst_10 {dimension_numbers = #tpu.dot_dimension_numbers<[1], [0], [0], [1], [0, 0, 1, 1], [], []>} : vector<16x32xbf16>, vector<32x64xbf16>, vector<16x64xf32> -> vector<16x64xf32>
    %21 = arith.addf %15, %20 : vector<16x64xf32>
    %22 = vector.extract_strided_slice %0 {offsets = [0, 0, 32], sizes = [1, 32, 64], strides = [1, 1, 1]} : vector<1x32x130xbf16> to vector<1x32x64xbf16>
    %23 = vector.shape_cast %22 : vector<1x32x64xbf16> to vector<32x64xbf16>
    %24 = vector.extract_strided_slice %1 {offsets = [3, 0, 0], sizes = [1, 16, 32], strides = [1, 1, 1]} : vector<9x16x32xbf16> to vector<1x16x32xbf16>
    %25 = vector.shape_cast %24 : vector<1x16x32xbf16> to vector<16x32xbf16>
    %cst_11 = arith.constant dense<0.000000e+00> : vector<16x64xf32>
    %26 = tpu.matmul %25, %23, %cst_11 {dimension_numbers = #tpu.dot_dimension_numbers<[1], [0], [0], [1], [0, 0, 1, 1], [], []>} : vector<16x32xbf16>, vector<32x64xbf16>, vector<16x64xf32> -> vector<16x64xf32>
    %27 = arith.addf %21, %26 : vector<16x64xf32>
    %28 = vector.extract_strided_slice %0 {offsets = [0, 0, 33], sizes = [1, 32, 64], strides = [1, 1, 1]} : vector<1x32x130xbf16> to vector<1x32x64xbf16>
    %29 = vector.shape_cast %28 : vector<1x32x64xbf16> to vector<32x64xbf16>
    %30 = vector.extract_strided_slice %1 {offsets = [4, 0, 0], sizes = [1, 16, 32], strides = [1, 1, 1]} : vector<9x16x32xbf16> to vector<1x16x32xbf16>
    %31 = vector.shape_cast %30 : vector<1x16x32xbf16> to vector<16x32xbf16>
    %cst_12 = arith.constant dense<0.000000e+00> : vector<16x64xf32>
    %32 = tpu.matmul %31, %29, %cst_12 {dimension_numbers = #tpu.dot_dimension_numbers<[1], [0], [0], [1], [0, 0, 1, 1], [], []>} : vector<16x32xbf16>, vector<32x64xbf16>, vector<16x64xf32> -> vector<16x64xf32>
    %33 = arith.addf %27, %32 : vector<16x64xf32>
    %34 = vector.extract_strided_slice %0 {offsets = [0, 0, 34], sizes = [1, 32, 64], strides = [1, 1, 1]} : vector<1x32x130xbf16> to vector<1x32x64xbf16>
    %35 = vector.shape_cast %34 : vector<1x32x64xbf16> to vector<32x64xbf16>
    %36 = vector.extract_strided_slice %1 {offsets = [5, 0, 0], sizes = [1, 16, 32], strides = [1, 1, 1]} : vector<9x16x32xbf16> to vector<1x16x32xbf16>
    %37 = vector.shape_cast %36 : vector<1x16x32xbf16> to vector<16x32xbf16>
    %cst_13 = arith.constant dense<0.000000e+00> : vector<16x64xf32>
    %38 = tpu.matmul %37, %35, %cst_13 {dimension_numbers = #tpu.dot_dimension_numbers<[1], [0], [0], [1], [0, 0, 1, 1], [], []>} : vector<16x32xbf16>, vector<32x64xbf16>, vector<16x64xf32> -> vector<16x64xf32>
    %39 = arith.addf %33, %38 : vector<16x64xf32>
    %40 = vector.extract_strided_slice %0 {offsets = [0, 0, 64], sizes = [1, 32, 64], strides = [1, 1, 1]} : vector<1x32x130xbf16> to vector<1x32x64xbf16>
    %41 = vector.shape_cast %40 : vector<1x32x64xbf16> to vector<32x64xbf16>
    %42 = vector.extract_strided_slice %1 {offsets = [6, 0, 0], sizes = [1, 16, 32], strides = [1, 1, 1]} : vector<9x16x32xbf16> to vector<1x16x32xbf16>
    %43 = vector.shape_cast %42 : vector<1x16x32xbf16> to vector<16x32xbf16>
    %cst_14 = arith.constant dense<0.000000e+00> : vector<16x64xf32>
    %44 = tpu.matmul %43, %41, %cst_14 {dimension_numbers = #tpu.dot_dimension_numbers<[1], [0], [0], [1], [0, 0, 1, 1], [], []>} : vector<16x32xbf16>, vector<32x64xbf16>, vector<16x64xf32> -> vector<16x64xf32>
    %45 = arith.addf %39, %44 : vector<16x64xf32>
    %46 = vector.extract_strided_slice %0 {offsets = [0, 0, 65], sizes = [1, 32, 64], strides = [1, 1, 1]} : vector<1x32x130xbf16> to vector<1x32x64xbf16>
    %47 = vector.shape_cast %46 : vector<1x32x64xbf16> to vector<32x64xbf16>
    %48 = vector.extract_strided_slice %1 {offsets = [7, 0, 0], sizes = [1, 16, 32], strides = [1, 1, 1]} : vector<9x16x32xbf16> to vector<1x16x32xbf16>
    %49 = vector.shape_cast %48 : vector<1x16x32xbf16> to vector<16x32xbf16>
    %cst_15 = arith.constant dense<0.000000e+00> : vector<16x64xf32>
    %50 = tpu.matmul %49, %47, %cst_15 {dimension_numbers = #tpu.dot_dimension_numbers<[1], [0], [0], [1], [0, 0, 1, 1], [], []>} : vector<16x32xbf16>, vector<32x64xbf16>, vector<16x64xf32> -> vector<16x64xf32>
    %51 = arith.addf %45, %50 : vector<16x64xf32>
    %52 = vector.extract_strided_slice %0 {offsets = [0, 0, 66], sizes = [1, 32, 64], strides = [1, 1, 1]} : vector<1x32x130xbf16> to vector<1x32x64xbf16>
    %53 = vector.shape_cast %52 : vector<1x32x64xbf16> to vector<32x64xbf16>
    %54 = vector.extract_strided_slice %1 {offsets = [8, 0, 0], sizes = [1, 16, 32], strides = [1, 1, 1]} : vector<9x16x32xbf16> to vector<1x16x32xbf16>
    %55 = vector.shape_cast %54 : vector<1x16x32xbf16> to vector<16x32xbf16>
    %cst_16 = arith.constant dense<0.000000e+00> : vector<16x64xf32>
    %56 = tpu.matmul %55, %53, %cst_16 {dimension_numbers = #tpu.dot_dimension_numbers<[1], [0], [0], [1], [0, 0, 1, 1], [], []>} : vector<16x32xbf16>, vector<32x64xbf16>, vector<16x64xf32> -> vector<16x64xf32>
    %57 = arith.addf %51, %56 : vector<16x64xf32>
    %58 = vector.extract_strided_slice %2 {offsets = [0, 0, 0], sizes = [1, 16, 1], strides = [1, 1, 1]} : vector<2x16x1xf32> to vector<1x16x1xf32>
    %59 = vector.shape_cast %58 : vector<1x16x1xf32> to vector<16x1xf32>
    %60 = vector.broadcast %59 : vector<16x1xf32> to vector<16x64xf32>
    %61 = arith.mulf %57, %60 : vector<16x64xf32>
    %62 = vector.extract_strided_slice %2 {offsets = [1, 0, 0], sizes = [1, 16, 1], strides = [1, 1, 1]} : vector<2x16x1xf32> to vector<1x16x1xf32>
    %63 = vector.shape_cast %62 : vector<1x16x1xf32> to vector<16x1xf32>
    %64 = vector.broadcast %63 : vector<16x1xf32> to vector<16x64xf32>
    %65 = arith.addf %61, %64 : vector<16x64xf32>
    %cst_17 = arith.constant 0.000000e+00 : f32
    %66 = vector.broadcast %cst_17 : f32 to vector<16x64xf32>
    %67 = arith.maximumf %65, %66 : vector<16x64xf32>
    %68 = arith.truncf %67 : vector<16x64xf32> to vector<16x64xbf16>
    %69 = vector.shape_cast %68 : vector<16x64xbf16> to vector<1x16x64xbf16>
    %c0_18 = arith.constant 0 : index
    %c0_19 = arith.constant 0 : index
    %c0_20 = arith.constant 0 : index
    %70 = vector.load %arg4[%c0_18, %c0_19, %c0_20] : memref<1x16x64xbf16, #tpu.memory_space<vmem>>, vector<1x16x64xbf16>
    tpu.vector_store %arg4[%c0_18, %c0_19, %c0_20], %69 {strides = array<i32>} : memref<1x16x64xbf16, #tpu.memory_space<vmem>>, vector<1x16x64xbf16>,
    return
  }
  func.func @transform_0(%arg0: i32) -> (i32, i32, i32) {
    %c0_i32 = arith.constant 0 : i32
    %c0_i32_0 = arith.constant 0 : i32
    %c0_i32_1 = arith.constant 0 : i32
    return %arg0, %c0_i32, %c0_i32_0 : i32, i32, i32
  }
  func.func @transform_1(%arg0: i32) -> (i32, i32, i32) {
    %c0_i32 = arith.constant 0 : i32
    %c0_i32_0 = arith.constant 0 : i32
    %c0_i32_1 = arith.constant 0 : i32
    %c0_i32_2 = arith.constant 0 : i32
    return %c0_i32, %c0_i32_0, %c0_i32_1 : i32, i32, i32
  }
  func.func @transform_2(%arg0: i32) -> (i32, i32, i32) {
    %c0_i32 = arith.constant 0 : i32
    %c0_i32_0 = arith.constant 0 : i32
    %c0_i32_1 = arith.constant 0 : i32
    %c0_i32_2 = arith.constant 0 : i32
    return %c0_i32, %c0_i32_0, %c0_i32_1 : i32, i32, i32
  }
  func.func @transform_3(%arg0: i32) -> (i32, i32, i32) {
    %c0_i32 = arith.constant 0 : i32
    %c0_i32_0 = arith.constant 0 : i32
    %c0_i32_1 = arith.constant 0 : i32
    return %arg0, %c0_i32, %c0_i32_0 : i32, i32, i32
  }
}

module attributes {stable_mosaic.version = 11 : i64} {
  func.func @_conv_kernel(%arg0: i32, %arg1: memref<1x16x146xbf16, #tpu.memory_space<vmem>>, %arg2: memref<9x4x16xbf16, #tpu.memory_space<vmem>>, %arg3: memref<2x4x1xf32, #tpu.memory_space<vmem>>, %arg4: memref<1x4x48xbf16, #tpu.memory_space<vmem>>) attributes {dimension_semantics = [#tpu.dimension_semantics<parallel>], iteration_bounds = array<i64: 2>, scalar_prefetch = 0 : i64, scratch_operands = 0 : i64, tpu.core_type = #tpu.core_type<tc>, window_params = [{transform_indices = @transform_0, window_bounds = array<i64: 1, 16, 146>}, {pipeline_mode = #tpu.pipeline_mode<synchronous>, transform_indices = @transform_1, window_bounds = array<i64: 9, 4, 16>}, {pipeline_mode = #tpu.pipeline_mode<synchronous>, transform_indices = @transform_2, window_bounds = array<i64: 2, 4, 1>}, {transform_indices = @transform_3, window_bounds = array<i64: 1, 4, 48>}]} {
    %c0 = arith.constant 0 : index
    %c0_0 = arith.constant 0 : index
    %c0_1 = arith.constant 0 : index
    %0 = vector.load %arg1[%c0, %c0_0, %c0_1] : memref<1x16x146xbf16, #tpu.memory_space<vmem>>, vector<1x16x146xbf16>
    %c0_2 = arith.constant 0 : index
    %c0_3 = arith.constant 0 : index
    %c0_4 = arith.constant 0 : index
    %1 = vector.load %arg2[%c0_2, %c0_3, %c0_4] : memref<9x4x16xbf16, #tpu.memory_space<vmem>>, vector<9x4x16xbf16>
    %c0_5 = arith.constant 0 : index
    %c0_6 = arith.constant 0 : index
    %c0_7 = arith.constant 0 : index
    %2 = vector.load %arg3[%c0_5, %c0_6, %c0_7] : memref<2x4x1xf32, #tpu.memory_space<vmem>>, vector<2x4x1xf32>
    %cst = arith.constant 0.000000e+00 : f32
    %3 = vector.broadcast %cst : f32 to vector<4x48xf32>
    %4 = vector.extract_strided_slice %0 {offsets = [0, 0, 0], sizes = [1, 16, 48], strides = [1, 1, 1]} : vector<1x16x146xbf16> to vector<1x16x48xbf16>
    %5 = vector.shape_cast %4 : vector<1x16x48xbf16> to vector<16x48xbf16>
    %6 = vector.extract_strided_slice %1 {offsets = [0, 0, 0], sizes = [1, 4, 16], strides = [1, 1, 1]} : vector<9x4x16xbf16> to vector<1x4x16xbf16>
    %7 = vector.shape_cast %6 : vector<1x4x16xbf16> to vector<4x16xbf16>
    %cst_8 = arith.constant dense<0.000000e+00> : vector<4x48xf32>
    %8 = tpu.matmul %7, %5, %cst_8 {dimension_numbers = #tpu.dot_dimension_numbers<[1], [0], [0], [1], [0, 0, 1, 1], [], []>} : vector<4x16xbf16>, vector<16x48xbf16>, vector<4x48xf32> -> vector<4x48xf32>
    %9 = arith.addf %3, %8 : vector<4x48xf32>
    %10 = vector.extract_strided_slice %0 {offsets = [0, 0, 1], sizes = [1, 16, 48], strides = [1, 1, 1]} : vector<1x16x146xbf16> to vector<1x16x48xbf16>
    %11 = vector.shape_cast %10 : vector<1x16x48xbf16> to vector<16x48xbf16>
    %12 = vector.extract_strided_slice %1 {offsets = [1, 0, 0], sizes = [1, 4, 16], strides = [1, 1, 1]} : vector<9x4x16xbf16> to vector<1x4x16xbf16>
    %13 = vector.shape_cast %12 : vector<1x4x16xbf16> to vector<4x16xbf16>
    %cst_9 = arith.constant dense<0.000000e+00> : vector<4x48xf32>
    %14 = tpu.matmul %13, %11, %cst_9 {dimension_numbers = #tpu.dot_dimension_numbers<[1], [0], [0], [1], [0, 0, 1, 1], [], []>} : vector<4x16xbf16>, vector<16x48xbf16>, vector<4x48xf32> -> vector<4x48xf32>
    %15 = arith.addf %9, %14 : vector<4x48xf32>
    %16 = vector.extract_strided_slice %0 {offsets = [0, 0, 2], sizes = [1, 16, 48], strides = [1, 1, 1]} : vector<1x16x146xbf16> to vector<1x16x48xbf16>
    %17 = vector.shape_cast %16 : vector<1x16x48xbf16> to vector<16x48xbf16>
    %18 = vector.extract_strided_slice %1 {offsets = [2, 0, 0], sizes = [1, 4, 16], strides = [1, 1, 1]} : vector<9x4x16xbf16> to vector<1x4x16xbf16>
    %19 = vector.shape_cast %18 : vector<1x4x16xbf16> to vector<4x16xbf16>
    %cst_10 = arith.constant dense<0.000000e+00> : vector<4x48xf32>
    %20 = tpu.matmul %19, %17, %cst_10 {dimension_numbers = #tpu.dot_dimension_numbers<[1], [0], [0], [1], [0, 0, 1, 1], [], []>} : vector<4x16xbf16>, vector<16x48xbf16>, vector<4x48xf32> -> vector<4x48xf32>
    %21 = arith.addf %15, %20 : vector<4x48xf32>
    %22 = vector.extract_strided_slice %0 {offsets = [0, 0, 48], sizes = [1, 16, 48], strides = [1, 1, 1]} : vector<1x16x146xbf16> to vector<1x16x48xbf16>
    %23 = vector.shape_cast %22 : vector<1x16x48xbf16> to vector<16x48xbf16>
    %24 = vector.extract_strided_slice %1 {offsets = [3, 0, 0], sizes = [1, 4, 16], strides = [1, 1, 1]} : vector<9x4x16xbf16> to vector<1x4x16xbf16>
    %25 = vector.shape_cast %24 : vector<1x4x16xbf16> to vector<4x16xbf16>
    %cst_11 = arith.constant dense<0.000000e+00> : vector<4x48xf32>
    %26 = tpu.matmul %25, %23, %cst_11 {dimension_numbers = #tpu.dot_dimension_numbers<[1], [0], [0], [1], [0, 0, 1, 1], [], []>} : vector<4x16xbf16>, vector<16x48xbf16>, vector<4x48xf32> -> vector<4x48xf32>
    %27 = arith.addf %21, %26 : vector<4x48xf32>
    %28 = vector.extract_strided_slice %0 {offsets = [0, 0, 49], sizes = [1, 16, 48], strides = [1, 1, 1]} : vector<1x16x146xbf16> to vector<1x16x48xbf16>
    %29 = vector.shape_cast %28 : vector<1x16x48xbf16> to vector<16x48xbf16>
    %30 = vector.extract_strided_slice %1 {offsets = [4, 0, 0], sizes = [1, 4, 16], strides = [1, 1, 1]} : vector<9x4x16xbf16> to vector<1x4x16xbf16>
    %31 = vector.shape_cast %30 : vector<1x4x16xbf16> to vector<4x16xbf16>
    %cst_12 = arith.constant dense<0.000000e+00> : vector<4x48xf32>
    %32 = tpu.matmul %31, %29, %cst_12 {dimension_numbers = #tpu.dot_dimension_numbers<[1], [0], [0], [1], [0, 0, 1, 1], [], []>} : vector<4x16xbf16>, vector<16x48xbf16>, vector<4x48xf32> -> vector<4x48xf32>
    %33 = arith.addf %27, %32 : vector<4x48xf32>
    %34 = vector.extract_strided_slice %0 {offsets = [0, 0, 50], sizes = [1, 16, 48], strides = [1, 1, 1]} : vector<1x16x146xbf16> to vector<1x16x48xbf16>
    %35 = vector.shape_cast %34 : vector<1x16x48xbf16> to vector<16x48xbf16>
    %36 = vector.extract_strided_slice %1 {offsets = [5, 0, 0], sizes = [1, 4, 16], strides = [1, 1, 1]} : vector<9x4x16xbf16> to vector<1x4x16xbf16>
    %37 = vector.shape_cast %36 : vector<1x4x16xbf16> to vector<4x16xbf16>
    %cst_13 = arith.constant dense<0.000000e+00> : vector<4x48xf32>
    %38 = tpu.matmul %37, %35, %cst_13 {dimension_numbers = #tpu.dot_dimension_numbers<[1], [0], [0], [1], [0, 0, 1, 1], [], []>} : vector<4x16xbf16>, vector<16x48xbf16>, vector<4x48xf32> -> vector<4x48xf32>
    %39 = arith.addf %33, %38 : vector<4x48xf32>
    %40 = vector.extract_strided_slice %0 {offsets = [0, 0, 96], sizes = [1, 16, 48], strides = [1, 1, 1]} : vector<1x16x146xbf16> to vector<1x16x48xbf16>
    %41 = vector.shape_cast %40 : vector<1x16x48xbf16> to vector<16x48xbf16>
    %42 = vector.extract_strided_slice %1 {offsets = [6, 0, 0], sizes = [1, 4, 16], strides = [1, 1, 1]} : vector<9x4x16xbf16> to vector<1x4x16xbf16>
    %43 = vector.shape_cast %42 : vector<1x4x16xbf16> to vector<4x16xbf16>
    %cst_14 = arith.constant dense<0.000000e+00> : vector<4x48xf32>
    %44 = tpu.matmul %43, %41, %cst_14 {dimension_numbers = #tpu.dot_dimension_numbers<[1], [0], [0], [1], [0, 0, 1, 1], [], []>} : vector<4x16xbf16>, vector<16x48xbf16>, vector<4x48xf32> -> vector<4x48xf32>
    %45 = arith.addf %39, %44 : vector<4x48xf32>
    %46 = vector.extract_strided_slice %0 {offsets = [0, 0, 97], sizes = [1, 16, 48], strides = [1, 1, 1]} : vector<1x16x146xbf16> to vector<1x16x48xbf16>
    %47 = vector.shape_cast %46 : vector<1x16x48xbf16> to vector<16x48xbf16>
    %48 = vector.extract_strided_slice %1 {offsets = [7, 0, 0], sizes = [1, 4, 16], strides = [1, 1, 1]} : vector<9x4x16xbf16> to vector<1x4x16xbf16>
    %49 = vector.shape_cast %48 : vector<1x4x16xbf16> to vector<4x16xbf16>
    %cst_15 = arith.constant dense<0.000000e+00> : vector<4x48xf32>
    %50 = tpu.matmul %49, %47, %cst_15 {dimension_numbers = #tpu.dot_dimension_numbers<[1], [0], [0], [1], [0, 0, 1, 1], [], []>} : vector<4x16xbf16>, vector<16x48xbf16>, vector<4x48xf32> -> vector<4x48xf32>
    %51 = arith.addf %45, %50 : vector<4x48xf32>
    %52 = vector.extract_strided_slice %0 {offsets = [0, 0, 98], sizes = [1, 16, 48], strides = [1, 1, 1]} : vector<1x16x146xbf16> to vector<1x16x48xbf16>
    %53 = vector.shape_cast %52 : vector<1x16x48xbf16> to vector<16x48xbf16>
    %54 = vector.extract_strided_slice %1 {offsets = [8, 0, 0], sizes = [1, 4, 16], strides = [1, 1, 1]} : vector<9x4x16xbf16> to vector<1x4x16xbf16>
    %55 = vector.shape_cast %54 : vector<1x4x16xbf16> to vector<4x16xbf16>
    %cst_16 = arith.constant dense<0.000000e+00> : vector<4x48xf32>
    %56 = tpu.matmul %55, %53, %cst_16 {dimension_numbers = #tpu.dot_dimension_numbers<[1], [0], [0], [1], [0, 0, 1, 1], [], []>} : vector<4x16xbf16>, vector<16x48xbf16>, vector<4x48xf32> -> vector<4x48xf32>
    %57 = arith.addf %51, %56 : vector<4x48xf32>
    %58 = vector.extract_strided_slice %2 {offsets = [0, 0, 0], sizes = [1, 4, 1], strides = [1, 1, 1]} : vector<2x4x1xf32> to vector<1x4x1xf32>
    %59 = vector.shape_cast %58 : vector<1x4x1xf32> to vector<4x1xf32>
    %60 = vector.broadcast %59 : vector<4x1xf32> to vector<4x48xf32>
    %61 = arith.mulf %57, %60 : vector<4x48xf32>
    %62 = vector.extract_strided_slice %2 {offsets = [1, 0, 0], sizes = [1, 4, 1], strides = [1, 1, 1]} : vector<2x4x1xf32> to vector<1x4x1xf32>
    %63 = vector.shape_cast %62 : vector<1x4x1xf32> to vector<4x1xf32>
    %64 = vector.broadcast %63 : vector<4x1xf32> to vector<4x48xf32>
    %65 = arith.addf %61, %64 : vector<4x48xf32>
    %cst_17 = arith.constant 0.000000e+00 : f32
    %66 = vector.broadcast %cst_17 : f32 to vector<4x48xf32>
    %67 = arith.maximumf %65, %66 : vector<4x48xf32>
    %68 = arith.truncf %67 : vector<4x48xf32> to vector<4x48xbf16>
    %69 = vector.shape_cast %68 : vector<4x48xbf16> to vector<1x4x48xbf16>
    %c0_18 = arith.constant 0 : index
    %c0_19 = arith.constant 0 : index
    %c0_20 = arith.constant 0 : index
    %70 = vector.load %arg4[%c0_18, %c0_19, %c0_20] : memref<1x4x48xbf16, #tpu.memory_space<vmem>>, vector<1x4x48xbf16>
    tpu.vector_store %arg4[%c0_18, %c0_19, %c0_20], %69 {strides = array<i32>} : memref<1x4x48xbf16, #tpu.memory_space<vmem>>, vector<1x4x48xbf16>,
    return
  }
  func.func @transform_0(%arg0: i32) -> (i32, i32, i32) {
    %c0_i32 = arith.constant 0 : i32
    %c0_i32_0 = arith.constant 0 : i32
    %c0_i32_1 = arith.constant 0 : i32
    return %arg0, %c0_i32, %c0_i32_0 : i32, i32, i32
  }
  func.func @transform_1(%arg0: i32) -> (i32, i32, i32) {
    %c0_i32 = arith.constant 0 : i32
    %c0_i32_0 = arith.constant 0 : i32
    %c0_i32_1 = arith.constant 0 : i32
    %c0_i32_2 = arith.constant 0 : i32
    return %c0_i32, %c0_i32_0, %c0_i32_1 : i32, i32, i32
  }
  func.func @transform_2(%arg0: i32) -> (i32, i32, i32) {
    %c0_i32 = arith.constant 0 : i32
    %c0_i32_0 = arith.constant 0 : i32
    %c0_i32_1 = arith.constant 0 : i32
    %c0_i32_2 = arith.constant 0 : i32
    return %c0_i32, %c0_i32_0, %c0_i32_1 : i32, i32, i32
  }
  func.func @transform_3(%arg0: i32) -> (i32, i32, i32) {
    %c0_i32 = arith.constant 0 : i32
    %c0_i32_0 = arith.constant 0 : i32
    %c0_i32_1 = arith.constant 0 : i32
    return %arg0, %c0_i32, %c0_i32_0 : i32, i32, i32
  }
}

module attributes {stable_mosaic.version = 11 : i64} {
  func.func @_latent_kernel(%arg0: memref<2x128xbf16, #tpu.memory_space<vmem>>, %arg1: memref<128x20xbf16, #tpu.memory_space<vmem>>, %arg2: memref<1x20xf32, #tpu.memory_space<vmem>>, %arg3: memref<2x10xf32, #tpu.memory_space<vmem>>, %arg4: memref<10x128xbf16, #tpu.memory_space<vmem>>, %arg5: memref<1x128xf32, #tpu.memory_space<vmem>>, %arg6: memref<2x128xbf16, #tpu.memory_space<vmem>>, %arg7: memref<1x1xf32, #tpu.memory_space<vmem>>) attributes {dimension_semantics = [], scalar_prefetch = 0 : i64, scratch_operands = 0 : i64, tpu.core_type = #tpu.core_type<tc>} {
    %c0 = arith.constant 0 : index
    %c0_0 = arith.constant 0 : index
    %0 = vector.load %arg0[%c0, %c0_0] : memref<2x128xbf16, #tpu.memory_space<vmem>>, vector<2x128xbf16>
    %c0_1 = arith.constant 0 : index
    %c0_2 = arith.constant 0 : index
    %1 = vector.load %arg1[%c0_1, %c0_2] : memref<128x20xbf16, #tpu.memory_space<vmem>>, vector<128x20xbf16>
    %cst = arith.constant dense<0.000000e+00> : vector<2x20xf32>
    %2 = tpu.matmul %0, %1, %cst {dimension_numbers = #tpu.dot_dimension_numbers<[1], [0], [0], [1], [0, 0, 1, 1], [], []>} : vector<2x128xbf16>, vector<128x20xbf16>, vector<2x20xf32> -> vector<2x20xf32>
    %c0_3 = arith.constant 0 : index
    %c0_4 = arith.constant 0 : index
    %3 = vector.load %arg2[%c0_3, %c0_4] : memref<1x20xf32, #tpu.memory_space<vmem>>, vector<1x20xf32>
    %4 = vector.broadcast %3 : vector<1x20xf32> to vector<2x20xf32>
    %5 = arith.addf %2, %4 : vector<2x20xf32>
    %6 = vector.extract_strided_slice %5 {offsets = [0, 0], sizes = [2, 10], strides = [1, 1]} : vector<2x20xf32> to vector<2x10xf32>
    %7 = vector.extract_strided_slice %5 {offsets = [0, 10], sizes = [2, 10], strides = [1, 1]} : vector<2x20xf32> to vector<2x10xf32>
    %c0_5 = arith.constant 0 : index
    %c0_6 = arith.constant 0 : index
    %8 = vector.load %arg3[%c0_5, %c0_6] : memref<2x10xf32, #tpu.memory_space<vmem>>, vector<2x10xf32>
    %cst_7 = arith.constant 5.000000e-01 : f32
    %9 = vector.broadcast %cst_7 : f32 to vector<2x10xf32>
    %10 = arith.mulf %9, %7 : vector<2x10xf32>
    %11 = math.exp %10 : vector<2x10xf32>
    %12 = arith.mulf %8, %11 : vector<2x10xf32>
    %13 = arith.addf %12, %6 : vector<2x10xf32>
    %cst_8 = arith.constant 1.000000e+00 : f32
    %14 = vector.broadcast %cst_8 : f32 to vector<2x10xf32>
    %15 = arith.addf %14, %7 : vector<2x10xf32>
    %16 = arith.mulf %6, %6 : vector<2x10xf32>
    %17 = arith.subf %15, %16 : vector<2x10xf32>
    %18 = math.exp %7 : vector<2x10xf32>
    %19 = arith.subf %17, %18 : vector<2x10xf32>
    %cst_9 = arith.constant dense<0.000000e+00> : vector<2xf32>
    %20 = vector.multi_reduction <add>, %19, %cst_9 [1] : vector<2x10xf32> to vector<2xf32>
    %21 = vector.shape_cast %20 : vector<2xf32> to vector<2x1xf32>
    %cst_10 = arith.constant dense<0.000000e+00> : vector<1xf32>
    %22 = vector.multi_reduction <add>, %21, %cst_10 [0] : vector<2x1xf32> to vector<1xf32>
    %23 = vector.shape_cast %22 : vector<1xf32> to vector<1x1xf32>
    %cst_11 = arith.constant -5.000000e-01 : f32
    %24 = vector.broadcast %cst_11 : f32 to vector<1x1xf32>
    %25 = arith.mulf %24, %23 : vector<1x1xf32>
    %c0_12 = arith.constant 0 : index
    %c0_13 = arith.constant 0 : index
    %26 = vector.load %arg7[%c0_12, %c0_13] : memref<1x1xf32, #tpu.memory_space<vmem>>, vector<1x1xf32>
    tpu.vector_store %arg7[%c0_12, %c0_13], %25 {strides = array<i32>} : memref<1x1xf32, #tpu.memory_space<vmem>>, vector<1x1xf32>,
    %27 = arith.truncf %13 : vector<2x10xf32> to vector<2x10xbf16>
    %c0_14 = arith.constant 0 : index
    %c0_15 = arith.constant 0 : index
    %28 = vector.load %arg4[%c0_14, %c0_15] : memref<10x128xbf16, #tpu.memory_space<vmem>>, vector<10x128xbf16>
    %cst_16 = arith.constant dense<0.000000e+00> : vector<2x128xf32>
    %29 = tpu.matmul %27, %28, %cst_16 {dimension_numbers = #tpu.dot_dimension_numbers<[1], [0], [0], [1], [0, 0, 1, 1], [], []>} : vector<2x10xbf16>, vector<10x128xbf16>, vector<2x128xf32> -> vector<2x128xf32>
    %c0_17 = arith.constant 0 : index
    %c0_18 = arith.constant 0 : index
    %30 = vector.load %arg5[%c0_17, %c0_18] : memref<1x128xf32, #tpu.memory_space<vmem>>, vector<1x128xf32>
    %31 = vector.broadcast %30 : vector<1x128xf32> to vector<2x128xf32>
    %32 = arith.addf %29, %31 : vector<2x128xf32>
    %33 = arith.truncf %32 : vector<2x128xf32> to vector<2x128xbf16>
    %c0_19 = arith.constant 0 : index
    %c0_20 = arith.constant 0 : index
    %34 = vector.load %arg6[%c0_19, %c0_20] : memref<2x128xbf16, #tpu.memory_space<vmem>>, vector<2x128xbf16>
    tpu.vector_store %arg6[%c0_19, %c0_20], %33 {strides = array<i32>} : memref<2x128xbf16, #tpu.memory_space<vmem>>, vector<2x128xbf16>,
    return
  }
}

module attributes {stable_mosaic.version = 11 : i64} {
  func.func @_conv_kernel(%arg0: i32, %arg1: memref<1x4x82xbf16, #tpu.memory_space<vmem>>, %arg2: memref<9x16x4xbf16, #tpu.memory_space<vmem>>, %arg3: memref<2x16x1xf32, #tpu.memory_space<vmem>>, %arg4: memref<1x16x64xbf16, #tpu.memory_space<vmem>>) attributes {dimension_semantics = [#tpu.dimension_semantics<parallel>], iteration_bounds = array<i64: 2>, scalar_prefetch = 0 : i64, scratch_operands = 0 : i64, tpu.core_type = #tpu.core_type<tc>, window_params = [{transform_indices = @transform_0, window_bounds = array<i64: 1, 4, 82>}, {pipeline_mode = #tpu.pipeline_mode<synchronous>, transform_indices = @transform_1, window_bounds = array<i64: 9, 16, 4>}, {pipeline_mode = #tpu.pipeline_mode<synchronous>, transform_indices = @transform_2, window_bounds = array<i64: 2, 16, 1>}, {transform_indices = @transform_3, window_bounds = array<i64: 1, 16, 64>}]} {
    %c0 = arith.constant 0 : index
    %c0_0 = arith.constant 0 : index
    %c0_1 = arith.constant 0 : index
    %0 = vector.load %arg1[%c0, %c0_0, %c0_1] : memref<1x4x82xbf16, #tpu.memory_space<vmem>>, vector<1x4x82xbf16>
    %c0_2 = arith.constant 0 : index
    %c0_3 = arith.constant 0 : index
    %c0_4 = arith.constant 0 : index
    %1 = vector.load %arg2[%c0_2, %c0_3, %c0_4] : memref<9x16x4xbf16, #tpu.memory_space<vmem>>, vector<9x16x4xbf16>
    %c0_5 = arith.constant 0 : index
    %c0_6 = arith.constant 0 : index
    %c0_7 = arith.constant 0 : index
    %2 = vector.load %arg3[%c0_5, %c0_6, %c0_7] : memref<2x16x1xf32, #tpu.memory_space<vmem>>, vector<2x16x1xf32>
    %cst = arith.constant 0.000000e+00 : f32
    %3 = vector.broadcast %cst : f32 to vector<16x64xf32>
    %4 = vector.extract_strided_slice %0 {offsets = [0, 0, 0], sizes = [1, 4, 64], strides = [1, 1, 1]} : vector<1x4x82xbf16> to vector<1x4x64xbf16>
    %5 = vector.shape_cast %4 : vector<1x4x64xbf16> to vector<4x64xbf16>
    %6 = vector.extract_strided_slice %1 {offsets = [0, 0, 0], sizes = [1, 16, 4], strides = [1, 1, 1]} : vector<9x16x4xbf16> to vector<1x16x4xbf16>
    %7 = vector.shape_cast %6 : vector<1x16x4xbf16> to vector<16x4xbf16>
    %cst_8 = arith.constant dense<0.000000e+00> : vector<16x64xf32>
    %8 = tpu.matmul %7, %5, %cst_8 {dimension_numbers = #tpu.dot_dimension_numbers<[1], [0], [0], [1], [0, 0, 1, 1], [], []>} : vector<16x4xbf16>, vector<4x64xbf16>, vector<16x64xf32> -> vector<16x64xf32>
    %9 = arith.addf %3, %8 : vector<16x64xf32>
    %10 = vector.extract_strided_slice %0 {offsets = [0, 0, 1], sizes = [1, 4, 64], strides = [1, 1, 1]} : vector<1x4x82xbf16> to vector<1x4x64xbf16>
    %11 = vector.shape_cast %10 : vector<1x4x64xbf16> to vector<4x64xbf16>
    %12 = vector.extract_strided_slice %1 {offsets = [1, 0, 0], sizes = [1, 16, 4], strides = [1, 1, 1]} : vector<9x16x4xbf16> to vector<1x16x4xbf16>
    %13 = vector.shape_cast %12 : vector<1x16x4xbf16> to vector<16x4xbf16>
    %cst_9 = arith.constant dense<0.000000e+00> : vector<16x64xf32>
    %14 = tpu.matmul %13, %11, %cst_9 {dimension_numbers = #tpu.dot_dimension_numbers<[1], [0], [0], [1], [0, 0, 1, 1], [], []>} : vector<16x4xbf16>, vector<4x64xbf16>, vector<16x64xf32> -> vector<16x64xf32>
    %15 = arith.addf %9, %14 : vector<16x64xf32>
    %16 = vector.extract_strided_slice %0 {offsets = [0, 0, 2], sizes = [1, 4, 64], strides = [1, 1, 1]} : vector<1x4x82xbf16> to vector<1x4x64xbf16>
    %17 = vector.shape_cast %16 : vector<1x4x64xbf16> to vector<4x64xbf16>
    %18 = vector.extract_strided_slice %1 {offsets = [2, 0, 0], sizes = [1, 16, 4], strides = [1, 1, 1]} : vector<9x16x4xbf16> to vector<1x16x4xbf16>
    %19 = vector.shape_cast %18 : vector<1x16x4xbf16> to vector<16x4xbf16>
    %cst_10 = arith.constant dense<0.000000e+00> : vector<16x64xf32>
    %20 = tpu.matmul %19, %17, %cst_10 {dimension_numbers = #tpu.dot_dimension_numbers<[1], [0], [0], [1], [0, 0, 1, 1], [], []>} : vector<16x4xbf16>, vector<4x64xbf16>, vector<16x64xf32> -> vector<16x64xf32>
    %21 = arith.addf %15, %20 : vector<16x64xf32>
    %22 = vector.extract_strided_slice %0 {offsets = [0, 0, 8], sizes = [1, 4, 64], strides = [1, 1, 1]} : vector<1x4x82xbf16> to vector<1x4x64xbf16>
    %23 = vector.shape_cast %22 : vector<1x4x64xbf16> to vector<4x64xbf16>
    %24 = vector.extract_strided_slice %1 {offsets = [3, 0, 0], sizes = [1, 16, 4], strides = [1, 1, 1]} : vector<9x16x4xbf16> to vector<1x16x4xbf16>
    %25 = vector.shape_cast %24 : vector<1x16x4xbf16> to vector<16x4xbf16>
    %cst_11 = arith.constant dense<0.000000e+00> : vector<16x64xf32>
    %26 = tpu.matmul %25, %23, %cst_11 {dimension_numbers = #tpu.dot_dimension_numbers<[1], [0], [0], [1], [0, 0, 1, 1], [], []>} : vector<16x4xbf16>, vector<4x64xbf16>, vector<16x64xf32> -> vector<16x64xf32>
    %27 = arith.addf %21, %26 : vector<16x64xf32>
    %28 = vector.extract_strided_slice %0 {offsets = [0, 0, 9], sizes = [1, 4, 64], strides = [1, 1, 1]} : vector<1x4x82xbf16> to vector<1x4x64xbf16>
    %29 = vector.shape_cast %28 : vector<1x4x64xbf16> to vector<4x64xbf16>
    %30 = vector.extract_strided_slice %1 {offsets = [4, 0, 0], sizes = [1, 16, 4], strides = [1, 1, 1]} : vector<9x16x4xbf16> to vector<1x16x4xbf16>
    %31 = vector.shape_cast %30 : vector<1x16x4xbf16> to vector<16x4xbf16>
    %cst_12 = arith.constant dense<0.000000e+00> : vector<16x64xf32>
    %32 = tpu.matmul %31, %29, %cst_12 {dimension_numbers = #tpu.dot_dimension_numbers<[1], [0], [0], [1], [0, 0, 1, 1], [], []>} : vector<16x4xbf16>, vector<4x64xbf16>, vector<16x64xf32> -> vector<16x64xf32>
    %33 = arith.addf %27, %32 : vector<16x64xf32>
    %34 = vector.extract_strided_slice %0 {offsets = [0, 0, 10], sizes = [1, 4, 64], strides = [1, 1, 1]} : vector<1x4x82xbf16> to vector<1x4x64xbf16>
    %35 = vector.shape_cast %34 : vector<1x4x64xbf16> to vector<4x64xbf16>
    %36 = vector.extract_strided_slice %1 {offsets = [5, 0, 0], sizes = [1, 16, 4], strides = [1, 1, 1]} : vector<9x16x4xbf16> to vector<1x16x4xbf16>
    %37 = vector.shape_cast %36 : vector<1x16x4xbf16> to vector<16x4xbf16>
    %cst_13 = arith.constant dense<0.000000e+00> : vector<16x64xf32>
    %38 = tpu.matmul %37, %35, %cst_13 {dimension_numbers = #tpu.dot_dimension_numbers<[1], [0], [0], [1], [0, 0, 1, 1], [], []>} : vector<16x4xbf16>, vector<4x64xbf16>, vector<16x64xf32> -> vector<16x64xf32>
    %39 = arith.addf %33, %38 : vector<16x64xf32>
    %40 = vector.extract_strided_slice %0 {offsets = [0, 0, 16], sizes = [1, 4, 64], strides = [1, 1, 1]} : vector<1x4x82xbf16> to vector<1x4x64xbf16>
    %41 = vector.shape_cast %40 : vector<1x4x64xbf16> to vector<4x64xbf16>
    %42 = vector.extract_strided_slice %1 {offsets = [6, 0, 0], sizes = [1, 16, 4], strides = [1, 1, 1]} : vector<9x16x4xbf16> to vector<1x16x4xbf16>
    %43 = vector.shape_cast %42 : vector<1x16x4xbf16> to vector<16x4xbf16>
    %cst_14 = arith.constant dense<0.000000e+00> : vector<16x64xf32>
    %44 = tpu.matmul %43, %41, %cst_14 {dimension_numbers = #tpu.dot_dimension_numbers<[1], [0], [0], [1], [0, 0, 1, 1], [], []>} : vector<16x4xbf16>, vector<4x64xbf16>, vector<16x64xf32> -> vector<16x64xf32>
    %45 = arith.addf %39, %44 : vector<16x64xf32>
    %46 = vector.extract_strided_slice %0 {offsets = [0, 0, 17], sizes = [1, 4, 64], strides = [1, 1, 1]} : vector<1x4x82xbf16> to vector<1x4x64xbf16>
    %47 = vector.shape_cast %46 : vector<1x4x64xbf16> to vector<4x64xbf16>
    %48 = vector.extract_strided_slice %1 {offsets = [7, 0, 0], sizes = [1, 16, 4], strides = [1, 1, 1]} : vector<9x16x4xbf16> to vector<1x16x4xbf16>
    %49 = vector.shape_cast %48 : vector<1x16x4xbf16> to vector<16x4xbf16>
    %cst_15 = arith.constant dense<0.000000e+00> : vector<16x64xf32>
    %50 = tpu.matmul %49, %47, %cst_15 {dimension_numbers = #tpu.dot_dimension_numbers<[1], [0], [0], [1], [0, 0, 1, 1], [], []>} : vector<16x4xbf16>, vector<4x64xbf16>, vector<16x64xf32> -> vector<16x64xf32>
    %51 = arith.addf %45, %50 : vector<16x64xf32>
    %52 = vector.extract_strided_slice %0 {offsets = [0, 0, 18], sizes = [1, 4, 64], strides = [1, 1, 1]} : vector<1x4x82xbf16> to vector<1x4x64xbf16>
    %53 = vector.shape_cast %52 : vector<1x4x64xbf16> to vector<4x64xbf16>
    %54 = vector.extract_strided_slice %1 {offsets = [8, 0, 0], sizes = [1, 16, 4], strides = [1, 1, 1]} : vector<9x16x4xbf16> to vector<1x16x4xbf16>
    %55 = vector.shape_cast %54 : vector<1x16x4xbf16> to vector<16x4xbf16>
    %cst_16 = arith.constant dense<0.000000e+00> : vector<16x64xf32>
    %56 = tpu.matmul %55, %53, %cst_16 {dimension_numbers = #tpu.dot_dimension_numbers<[1], [0], [0], [1], [0, 0, 1, 1], [], []>} : vector<16x4xbf16>, vector<4x64xbf16>, vector<16x64xf32> -> vector<16x64xf32>
    %57 = arith.addf %51, %56 : vector<16x64xf32>
    %58 = vector.extract_strided_slice %2 {offsets = [0, 0, 0], sizes = [1, 16, 1], strides = [1, 1, 1]} : vector<2x16x1xf32> to vector<1x16x1xf32>
    %59 = vector.shape_cast %58 : vector<1x16x1xf32> to vector<16x1xf32>
    %60 = vector.broadcast %59 : vector<16x1xf32> to vector<16x64xf32>
    %61 = arith.mulf %57, %60 : vector<16x64xf32>
    %62 = vector.extract_strided_slice %2 {offsets = [1, 0, 0], sizes = [1, 16, 1], strides = [1, 1, 1]} : vector<2x16x1xf32> to vector<1x16x1xf32>
    %63 = vector.shape_cast %62 : vector<1x16x1xf32> to vector<16x1xf32>
    %64 = vector.broadcast %63 : vector<16x1xf32> to vector<16x64xf32>
    %65 = arith.addf %61, %64 : vector<16x64xf32>
    %cst_17 = arith.constant 0.000000e+00 : f32
    %66 = vector.broadcast %cst_17 : f32 to vector<16x64xf32>
    %67 = arith.maximumf %65, %66 : vector<16x64xf32>
    %68 = arith.truncf %67 : vector<16x64xf32> to vector<16x64xbf16>
    %69 = vector.shape_cast %68 : vector<16x64xbf16> to vector<1x16x64xbf16>
    %c0_18 = arith.constant 0 : index
    %c0_19 = arith.constant 0 : index
    %c0_20 = arith.constant 0 : index
    %70 = vector.load %arg4[%c0_18, %c0_19, %c0_20] : memref<1x16x64xbf16, #tpu.memory_space<vmem>>, vector<1x16x64xbf16>
    tpu.vector_store %arg4[%c0_18, %c0_19, %c0_20], %69 {strides = array<i32>} : memref<1x16x64xbf16, #tpu.memory_space<vmem>>, vector<1x16x64xbf16>,
    return
  }
  func.func @transform_0(%arg0: i32) -> (i32, i32, i32) {
    %c0_i32 = arith.constant 0 : i32
    %c0_i32_0 = arith.constant 0 : i32
    %c0_i32_1 = arith.constant 0 : i32
    return %arg0, %c0_i32, %c0_i32_0 : i32, i32, i32
  }
  func.func @transform_1(%arg0: i32) -> (i32, i32, i32) {
    %c0_i32 = arith.constant 0 : i32
    %c0_i32_0 = arith.constant 0 : i32
    %c0_i32_1 = arith.constant 0 : i32
    %c0_i32_2 = arith.constant 0 : i32
    return %c0_i32, %c0_i32_0, %c0_i32_1 : i32, i32, i32
  }
  func.func @transform_2(%arg0: i32) -> (i32, i32, i32) {
    %c0_i32 = arith.constant 0 : i32
    %c0_i32_0 = arith.constant 0 : i32
    %c0_i32_1 = arith.constant 0 : i32
    %c0_i32_2 = arith.constant 0 : i32
    return %c0_i32, %c0_i32_0, %c0_i32_1 : i32, i32, i32
  }
  func.func @transform_3(%arg0: i32) -> (i32, i32, i32) {
    %c0_i32 = arith.constant 0 : i32
    %c0_i32_0 = arith.constant 0 : i32
    %c0_i32_1 = arith.constant 0 : i32
    return %arg0, %c0_i32, %c0_i32_0 : i32, i32, i32
  }
}

module attributes {stable_mosaic.version = 11 : i64} {
  func.func @_conv_kernel(%arg0: i32, %arg1: memref<1x16x122xbf16, #tpu.memory_space<vmem>>, %arg2: memref<9x32x16xbf16, #tpu.memory_space<vmem>>, %arg3: memref<2x32x1xf32, #tpu.memory_space<vmem>>, %arg4: memref<1x32x80xbf16, #tpu.memory_space<vmem>>) attributes {dimension_semantics = [#tpu.dimension_semantics<parallel>], iteration_bounds = array<i64: 2>, scalar_prefetch = 0 : i64, scratch_operands = 0 : i64, tpu.core_type = #tpu.core_type<tc>, window_params = [{transform_indices = @transform_0, window_bounds = array<i64: 1, 16, 122>}, {pipeline_mode = #tpu.pipeline_mode<synchronous>, transform_indices = @transform_1, window_bounds = array<i64: 9, 32, 16>}, {pipeline_mode = #tpu.pipeline_mode<synchronous>, transform_indices = @transform_2, window_bounds = array<i64: 2, 32, 1>}, {transform_indices = @transform_3, window_bounds = array<i64: 1, 32, 80>}]} {
    %c0 = arith.constant 0 : index
    %c0_0 = arith.constant 0 : index
    %c0_1 = arith.constant 0 : index
    %0 = vector.load %arg1[%c0, %c0_0, %c0_1] : memref<1x16x122xbf16, #tpu.memory_space<vmem>>, vector<1x16x122xbf16>
    %c0_2 = arith.constant 0 : index
    %c0_3 = arith.constant 0 : index
    %c0_4 = arith.constant 0 : index
    %1 = vector.load %arg2[%c0_2, %c0_3, %c0_4] : memref<9x32x16xbf16, #tpu.memory_space<vmem>>, vector<9x32x16xbf16>
    %c0_5 = arith.constant 0 : index
    %c0_6 = arith.constant 0 : index
    %c0_7 = arith.constant 0 : index
    %2 = vector.load %arg3[%c0_5, %c0_6, %c0_7] : memref<2x32x1xf32, #tpu.memory_space<vmem>>, vector<2x32x1xf32>
    %cst = arith.constant 0.000000e+00 : f32
    %3 = vector.broadcast %cst : f32 to vector<32x80xf32>
    %4 = vector.extract_strided_slice %0 {offsets = [0, 0, 0], sizes = [1, 16, 80], strides = [1, 1, 1]} : vector<1x16x122xbf16> to vector<1x16x80xbf16>
    %5 = vector.shape_cast %4 : vector<1x16x80xbf16> to vector<16x80xbf16>
    %6 = vector.extract_strided_slice %1 {offsets = [0, 0, 0], sizes = [1, 32, 16], strides = [1, 1, 1]} : vector<9x32x16xbf16> to vector<1x32x16xbf16>
    %7 = vector.shape_cast %6 : vector<1x32x16xbf16> to vector<32x16xbf16>
    %cst_8 = arith.constant dense<0.000000e+00> : vector<32x80xf32>
    %8 = tpu.matmul %7, %5, %cst_8 {dimension_numbers = #tpu.dot_dimension_numbers<[1], [0], [0], [1], [0, 0, 1, 1], [], []>} : vector<32x16xbf16>, vector<16x80xbf16>, vector<32x80xf32> -> vector<32x80xf32>
    %9 = arith.addf %3, %8 : vector<32x80xf32>
    %10 = vector.extract_strided_slice %0 {offsets = [0, 0, 1], sizes = [1, 16, 80], strides = [1, 1, 1]} : vector<1x16x122xbf16> to vector<1x16x80xbf16>
    %11 = vector.shape_cast %10 : vector<1x16x80xbf16> to vector<16x80xbf16>
    %12 = vector.extract_strided_slice %1 {offsets = [1, 0, 0], sizes = [1, 32, 16], strides = [1, 1, 1]} : vector<9x32x16xbf16> to vector<1x32x16xbf16>
    %13 = vector.shape_cast %12 : vector<1x32x16xbf16> to vector<32x16xbf16>
    %cst_9 = arith.constant dense<0.000000e+00> : vector<32x80xf32>
    %14 = tpu.matmul %13, %11, %cst_9 {dimension_numbers = #tpu.dot_dimension_numbers<[1], [0], [0], [1], [0, 0, 1, 1], [], []>} : vector<32x16xbf16>, vector<16x80xbf16>, vector<32x80xf32> -> vector<32x80xf32>
    %15 = arith.addf %9, %14 : vector<32x80xf32>
    %16 = vector.extract_strided_slice %0 {offsets = [0, 0, 2], sizes = [1, 16, 80], strides = [1, 1, 1]} : vector<1x16x122xbf16> to vector<1x16x80xbf16>
    %17 = vector.shape_cast %16 : vector<1x16x80xbf16> to vector<16x80xbf16>
    %18 = vector.extract_strided_slice %1 {offsets = [2, 0, 0], sizes = [1, 32, 16], strides = [1, 1, 1]} : vector<9x32x16xbf16> to vector<1x32x16xbf16>
    %19 = vector.shape_cast %18 : vector<1x32x16xbf16> to vector<32x16xbf16>
    %cst_10 = arith.constant dense<0.000000e+00> : vector<32x80xf32>
    %20 = tpu.matmul %19, %17, %cst_10 {dimension_numbers = #tpu.dot_dimension_numbers<[1], [0], [0], [1], [0, 0, 1, 1], [], []>} : vector<32x16xbf16>, vector<16x80xbf16>, vector<32x80xf32> -> vector<32x80xf32>
    %21 = arith.addf %15, %20 : vector<32x80xf32>
    %22 = vector.extract_strided_slice %0 {offsets = [0, 0, 20], sizes = [1, 16, 80], strides = [1, 1, 1]} : vector<1x16x122xbf16> to vector<1x16x80xbf16>
    %23 = vector.shape_cast %22 : vector<1x16x80xbf16> to vector<16x80xbf16>
    %24 = vector.extract_strided_slice %1 {offsets = [3, 0, 0], sizes = [1, 32, 16], strides = [1, 1, 1]} : vector<9x32x16xbf16> to vector<1x32x16xbf16>
    %25 = vector.shape_cast %24 : vector<1x32x16xbf16> to vector<32x16xbf16>
    %cst_11 = arith.constant dense<0.000000e+00> : vector<32x80xf32>
    %26 = tpu.matmul %25, %23, %cst_11 {dimension_numbers = #tpu.dot_dimension_numbers<[1], [0], [0], [1], [0, 0, 1, 1], [], []>} : vector<32x16xbf16>, vector<16x80xbf16>, vector<32x80xf32> -> vector<32x80xf32>
    %27 = arith.addf %21, %26 : vector<32x80xf32>
    %28 = vector.extract_strided_slice %0 {offsets = [0, 0, 21], sizes = [1, 16, 80], strides = [1, 1, 1]} : vector<1x16x122xbf16> to vector<1x16x80xbf16>
    %29 = vector.shape_cast %28 : vector<1x16x80xbf16> to vector<16x80xbf16>
    %30 = vector.extract_strided_slice %1 {offsets = [4, 0, 0], sizes = [1, 32, 16], strides = [1, 1, 1]} : vector<9x32x16xbf16> to vector<1x32x16xbf16>
    %31 = vector.shape_cast %30 : vector<1x32x16xbf16> to vector<32x16xbf16>
    %cst_12 = arith.constant dense<0.000000e+00> : vector<32x80xf32>
    %32 = tpu.matmul %31, %29, %cst_12 {dimension_numbers = #tpu.dot_dimension_numbers<[1], [0], [0], [1], [0, 0, 1, 1], [], []>} : vector<32x16xbf16>, vector<16x80xbf16>, vector<32x80xf32> -> vector<32x80xf32>
    %33 = arith.addf %27, %32 : vector<32x80xf32>
    %34 = vector.extract_strided_slice %0 {offsets = [0, 0, 22], sizes = [1, 16, 80], strides = [1, 1, 1]} : vector<1x16x122xbf16> to vector<1x16x80xbf16>
    %35 = vector.shape_cast %34 : vector<1x16x80xbf16> to vector<16x80xbf16>
    %36 = vector.extract_strided_slice %1 {offsets = [5, 0, 0], sizes = [1, 32, 16], strides = [1, 1, 1]} : vector<9x32x16xbf16> to vector<1x32x16xbf16>
    %37 = vector.shape_cast %36 : vector<1x32x16xbf16> to vector<32x16xbf16>
    %cst_13 = arith.constant dense<0.000000e+00> : vector<32x80xf32>
    %38 = tpu.matmul %37, %35, %cst_13 {dimension_numbers = #tpu.dot_dimension_numbers<[1], [0], [0], [1], [0, 0, 1, 1], [], []>} : vector<32x16xbf16>, vector<16x80xbf16>, vector<32x80xf32> -> vector<32x80xf32>
    %39 = arith.addf %33, %38 : vector<32x80xf32>
    %40 = vector.extract_strided_slice %0 {offsets = [0, 0, 40], sizes = [1, 16, 80], strides = [1, 1, 1]} : vector<1x16x122xbf16> to vector<1x16x80xbf16>
    %41 = vector.shape_cast %40 : vector<1x16x80xbf16> to vector<16x80xbf16>
    %42 = vector.extract_strided_slice %1 {offsets = [6, 0, 0], sizes = [1, 32, 16], strides = [1, 1, 1]} : vector<9x32x16xbf16> to vector<1x32x16xbf16>
    %43 = vector.shape_cast %42 : vector<1x32x16xbf16> to vector<32x16xbf16>
    %cst_14 = arith.constant dense<0.000000e+00> : vector<32x80xf32>
    %44 = tpu.matmul %43, %41, %cst_14 {dimension_numbers = #tpu.dot_dimension_numbers<[1], [0], [0], [1], [0, 0, 1, 1], [], []>} : vector<32x16xbf16>, vector<16x80xbf16>, vector<32x80xf32> -> vector<32x80xf32>
    %45 = arith.addf %39, %44 : vector<32x80xf32>
    %46 = vector.extract_strided_slice %0 {offsets = [0, 0, 41], sizes = [1, 16, 80], strides = [1, 1, 1]} : vector<1x16x122xbf16> to vector<1x16x80xbf16>
    %47 = vector.shape_cast %46 : vector<1x16x80xbf16> to vector<16x80xbf16>
    %48 = vector.extract_strided_slice %1 {offsets = [7, 0, 0], sizes = [1, 32, 16], strides = [1, 1, 1]} : vector<9x32x16xbf16> to vector<1x32x16xbf16>
    %49 = vector.shape_cast %48 : vector<1x32x16xbf16> to vector<32x16xbf16>
    %cst_15 = arith.constant dense<0.000000e+00> : vector<32x80xf32>
    %50 = tpu.matmul %49, %47, %cst_15 {dimension_numbers = #tpu.dot_dimension_numbers<[1], [0], [0], [1], [0, 0, 1, 1], [], []>} : vector<32x16xbf16>, vector<16x80xbf16>, vector<32x80xf32> -> vector<32x80xf32>
    %51 = arith.addf %45, %50 : vector<32x80xf32>
    %52 = vector.extract_strided_slice %0 {offsets = [0, 0, 42], sizes = [1, 16, 80], strides = [1, 1, 1]} : vector<1x16x122xbf16> to vector<1x16x80xbf16>
    %53 = vector.shape_cast %52 : vector<1x16x80xbf16> to vector<16x80xbf16>
    %54 = vector.extract_strided_slice %1 {offsets = [8, 0, 0], sizes = [1, 32, 16], strides = [1, 1, 1]} : vector<9x32x16xbf16> to vector<1x32x16xbf16>
    %55 = vector.shape_cast %54 : vector<1x32x16xbf16> to vector<32x16xbf16>
    %cst_16 = arith.constant dense<0.000000e+00> : vector<32x80xf32>
    %56 = tpu.matmul %55, %53, %cst_16 {dimension_numbers = #tpu.dot_dimension_numbers<[1], [0], [0], [1], [0, 0, 1, 1], [], []>} : vector<32x16xbf16>, vector<16x80xbf16>, vector<32x80xf32> -> vector<32x80xf32>
    %57 = arith.addf %51, %56 : vector<32x80xf32>
    %58 = vector.extract_strided_slice %2 {offsets = [0, 0, 0], sizes = [1, 32, 1], strides = [1, 1, 1]} : vector<2x32x1xf32> to vector<1x32x1xf32>
    %59 = vector.shape_cast %58 : vector<1x32x1xf32> to vector<32x1xf32>
    %60 = vector.broadcast %59 : vector<32x1xf32> to vector<32x80xf32>
    %61 = arith.mulf %57, %60 : vector<32x80xf32>
    %62 = vector.extract_strided_slice %2 {offsets = [1, 0, 0], sizes = [1, 32, 1], strides = [1, 1, 1]} : vector<2x32x1xf32> to vector<1x32x1xf32>
    %63 = vector.shape_cast %62 : vector<1x32x1xf32> to vector<32x1xf32>
    %64 = vector.broadcast %63 : vector<32x1xf32> to vector<32x80xf32>
    %65 = arith.addf %61, %64 : vector<32x80xf32>
    %cst_17 = arith.constant 0.000000e+00 : f32
    %66 = vector.broadcast %cst_17 : f32 to vector<32x80xf32>
    %67 = arith.maximumf %65, %66 : vector<32x80xf32>
    %68 = arith.truncf %67 : vector<32x80xf32> to vector<32x80xbf16>
    %69 = vector.shape_cast %68 : vector<32x80xbf16> to vector<1x32x80xbf16>
    %c0_18 = arith.constant 0 : index
    %c0_19 = arith.constant 0 : index
    %c0_20 = arith.constant 0 : index
    %70 = vector.load %arg4[%c0_18, %c0_19, %c0_20] : memref<1x32x80xbf16, #tpu.memory_space<vmem>>, vector<1x32x80xbf16>
    tpu.vector_store %arg4[%c0_18, %c0_19, %c0_20], %69 {strides = array<i32>} : memref<1x32x80xbf16, #tpu.memory_space<vmem>>, vector<1x32x80xbf16>,
    return
  }
  func.func @transform_0(%arg0: i32) -> (i32, i32, i32) {
    %c0_i32 = arith.constant 0 : i32
    %c0_i32_0 = arith.constant 0 : i32
    %c0_i32_1 = arith.constant 0 : i32
    return %arg0, %c0_i32, %c0_i32_0 : i32, i32, i32
  }
  func.func @transform_1(%arg0: i32) -> (i32, i32, i32) {
    %c0_i32 = arith.constant 0 : i32
    %c0_i32_0 = arith.constant 0 : i32
    %c0_i32_1 = arith.constant 0 : i32
    %c0_i32_2 = arith.constant 0 : i32
    return %c0_i32, %c0_i32_0, %c0_i32_1 : i32, i32, i32
  }
  func.func @transform_2(%arg0: i32) -> (i32, i32, i32) {
    %c0_i32 = arith.constant 0 : i32
    %c0_i32_0 = arith.constant 0 : i32
    %c0_i32_1 = arith.constant 0 : i32
    %c0_i32_2 = arith.constant 0 : i32
    return %c0_i32, %c0_i32_0, %c0_i32_1 : i32, i32, i32
  }
  func.func @transform_3(%arg0: i32) -> (i32, i32, i32) {
    %c0_i32 = arith.constant 0 : i32
    %c0_i32_0 = arith.constant 0 : i32
    %c0_i32_1 = arith.constant 0 : i32
    return %arg0, %c0_i32, %c0_i32_0 : i32, i32, i32
  }
}

module attributes {stable_mosaic.version = 11 : i64} {
  func.func @_conv_kernel(%arg0: i32, %arg1: memref<1x32x482xbf16, #tpu.memory_space<vmem>>, %arg2: memref<9x8x32xbf16, #tpu.memory_space<vmem>>, %arg3: memref<2x8x1xf32, #tpu.memory_space<vmem>>, %arg4: memref<1x8x320xbf16, #tpu.memory_space<vmem>>) attributes {dimension_semantics = [#tpu.dimension_semantics<parallel>], iteration_bounds = array<i64: 2>, scalar_prefetch = 0 : i64, scratch_operands = 0 : i64, tpu.core_type = #tpu.core_type<tc>, window_params = [{transform_indices = @transform_0, window_bounds = array<i64: 1, 32, 482>}, {pipeline_mode = #tpu.pipeline_mode<synchronous>, transform_indices = @transform_1, window_bounds = array<i64: 9, 8, 32>}, {pipeline_mode = #tpu.pipeline_mode<synchronous>, transform_indices = @transform_2, window_bounds = array<i64: 2, 8, 1>}, {transform_indices = @transform_3, window_bounds = array<i64: 1, 8, 320>}]} {
    %c0 = arith.constant 0 : index
    %c0_0 = arith.constant 0 : index
    %c0_1 = arith.constant 0 : index
    %0 = vector.load %arg1[%c0, %c0_0, %c0_1] : memref<1x32x482xbf16, #tpu.memory_space<vmem>>, vector<1x32x482xbf16>
    %c0_2 = arith.constant 0 : index
    %c0_3 = arith.constant 0 : index
    %c0_4 = arith.constant 0 : index
    %1 = vector.load %arg2[%c0_2, %c0_3, %c0_4] : memref<9x8x32xbf16, #tpu.memory_space<vmem>>, vector<9x8x32xbf16>
    %c0_5 = arith.constant 0 : index
    %c0_6 = arith.constant 0 : index
    %c0_7 = arith.constant 0 : index
    %2 = vector.load %arg3[%c0_5, %c0_6, %c0_7] : memref<2x8x1xf32, #tpu.memory_space<vmem>>, vector<2x8x1xf32>
    %cst = arith.constant 0.000000e+00 : f32
    %3 = vector.broadcast %cst : f32 to vector<8x320xf32>
    %4 = vector.extract_strided_slice %0 {offsets = [0, 0, 0], sizes = [1, 32, 320], strides = [1, 1, 1]} : vector<1x32x482xbf16> to vector<1x32x320xbf16>
    %5 = vector.shape_cast %4 : vector<1x32x320xbf16> to vector<32x320xbf16>
    %6 = vector.extract_strided_slice %1 {offsets = [0, 0, 0], sizes = [1, 8, 32], strides = [1, 1, 1]} : vector<9x8x32xbf16> to vector<1x8x32xbf16>
    %7 = vector.shape_cast %6 : vector<1x8x32xbf16> to vector<8x32xbf16>
    %cst_8 = arith.constant dense<0.000000e+00> : vector<8x320xf32>
    %8 = tpu.matmul %7, %5, %cst_8 {dimension_numbers = #tpu.dot_dimension_numbers<[1], [0], [0], [1], [0, 0, 1, 1], [], []>} : vector<8x32xbf16>, vector<32x320xbf16>, vector<8x320xf32> -> vector<8x320xf32>
    %9 = arith.addf %3, %8 : vector<8x320xf32>
    %10 = vector.extract_strided_slice %0 {offsets = [0, 0, 1], sizes = [1, 32, 320], strides = [1, 1, 1]} : vector<1x32x482xbf16> to vector<1x32x320xbf16>
    %11 = vector.shape_cast %10 : vector<1x32x320xbf16> to vector<32x320xbf16>
    %12 = vector.extract_strided_slice %1 {offsets = [1, 0, 0], sizes = [1, 8, 32], strides = [1, 1, 1]} : vector<9x8x32xbf16> to vector<1x8x32xbf16>
    %13 = vector.shape_cast %12 : vector<1x8x32xbf16> to vector<8x32xbf16>
    %cst_9 = arith.constant dense<0.000000e+00> : vector<8x320xf32>
    %14 = tpu.matmul %13, %11, %cst_9 {dimension_numbers = #tpu.dot_dimension_numbers<[1], [0], [0], [1], [0, 0, 1, 1], [], []>} : vector<8x32xbf16>, vector<32x320xbf16>, vector<8x320xf32> -> vector<8x320xf32>
    %15 = arith.addf %9, %14 : vector<8x320xf32>
    %16 = vector.extract_strided_slice %0 {offsets = [0, 0, 2], sizes = [1, 32, 320], strides = [1, 1, 1]} : vector<1x32x482xbf16> to vector<1x32x320xbf16>
    %17 = vector.shape_cast %16 : vector<1x32x320xbf16> to vector<32x320xbf16>
    %18 = vector.extract_strided_slice %1 {offsets = [2, 0, 0], sizes = [1, 8, 32], strides = [1, 1, 1]} : vector<9x8x32xbf16> to vector<1x8x32xbf16>
    %19 = vector.shape_cast %18 : vector<1x8x32xbf16> to vector<8x32xbf16>
    %cst_10 = arith.constant dense<0.000000e+00> : vector<8x320xf32>
    %20 = tpu.matmul %19, %17, %cst_10 {dimension_numbers = #tpu.dot_dimension_numbers<[1], [0], [0], [1], [0, 0, 1, 1], [], []>} : vector<8x32xbf16>, vector<32x320xbf16>, vector<8x320xf32> -> vector<8x320xf32>
    %21 = arith.addf %15, %20 : vector<8x320xf32>
    %22 = vector.extract_strided_slice %0 {offsets = [0, 0, 80], sizes = [1, 32, 320], strides = [1, 1, 1]} : vector<1x32x482xbf16> to vector<1x32x320xbf16>
    %23 = vector.shape_cast %22 : vector<1x32x320xbf16> to vector<32x320xbf16>
    %24 = vector.extract_strided_slice %1 {offsets = [3, 0, 0], sizes = [1, 8, 32], strides = [1, 1, 1]} : vector<9x8x32xbf16> to vector<1x8x32xbf16>
    %25 = vector.shape_cast %24 : vector<1x8x32xbf16> to vector<8x32xbf16>
    %cst_11 = arith.constant dense<0.000000e+00> : vector<8x320xf32>
    %26 = tpu.matmul %25, %23, %cst_11 {dimension_numbers = #tpu.dot_dimension_numbers<[1], [0], [0], [1], [0, 0, 1, 1], [], []>} : vector<8x32xbf16>, vector<32x320xbf16>, vector<8x320xf32> -> vector<8x320xf32>
    %27 = arith.addf %21, %26 : vector<8x320xf32>
    %28 = vector.extract_strided_slice %0 {offsets = [0, 0, 81], sizes = [1, 32, 320], strides = [1, 1, 1]} : vector<1x32x482xbf16> to vector<1x32x320xbf16>
    %29 = vector.shape_cast %28 : vector<1x32x320xbf16> to vector<32x320xbf16>
    %30 = vector.extract_strided_slice %1 {offsets = [4, 0, 0], sizes = [1, 8, 32], strides = [1, 1, 1]} : vector<9x8x32xbf16> to vector<1x8x32xbf16>
    %31 = vector.shape_cast %30 : vector<1x8x32xbf16> to vector<8x32xbf16>
    %cst_12 = arith.constant dense<0.000000e+00> : vector<8x320xf32>
    %32 = tpu.matmul %31, %29, %cst_12 {dimension_numbers = #tpu.dot_dimension_numbers<[1], [0], [0], [1], [0, 0, 1, 1], [], []>} : vector<8x32xbf16>, vector<32x320xbf16>, vector<8x320xf32> -> vector<8x320xf32>
    %33 = arith.addf %27, %32 : vector<8x320xf32>
    %34 = vector.extract_strided_slice %0 {offsets = [0, 0, 82], sizes = [1, 32, 320], strides = [1, 1, 1]} : vector<1x32x482xbf16> to vector<1x32x320xbf16>
    %35 = vector.shape_cast %34 : vector<1x32x320xbf16> to vector<32x320xbf16>
    %36 = vector.extract_strided_slice %1 {offsets = [5, 0, 0], sizes = [1, 8, 32], strides = [1, 1, 1]} : vector<9x8x32xbf16> to vector<1x8x32xbf16>
    %37 = vector.shape_cast %36 : vector<1x8x32xbf16> to vector<8x32xbf16>
    %cst_13 = arith.constant dense<0.000000e+00> : vector<8x320xf32>
    %38 = tpu.matmul %37, %35, %cst_13 {dimension_numbers = #tpu.dot_dimension_numbers<[1], [0], [0], [1], [0, 0, 1, 1], [], []>} : vector<8x32xbf16>, vector<32x320xbf16>, vector<8x320xf32> -> vector<8x320xf32>
    %39 = arith.addf %33, %38 : vector<8x320xf32>
    %40 = vector.extract_strided_slice %0 {offsets = [0, 0, 160], sizes = [1, 32, 320], strides = [1, 1, 1]} : vector<1x32x482xbf16> to vector<1x32x320xbf16>
    %41 = vector.shape_cast %40 : vector<1x32x320xbf16> to vector<32x320xbf16>
    %42 = vector.extract_strided_slice %1 {offsets = [6, 0, 0], sizes = [1, 8, 32], strides = [1, 1, 1]} : vector<9x8x32xbf16> to vector<1x8x32xbf16>
    %43 = vector.shape_cast %42 : vector<1x8x32xbf16> to vector<8x32xbf16>
    %cst_14 = arith.constant dense<0.000000e+00> : vector<8x320xf32>
    %44 = tpu.matmul %43, %41, %cst_14 {dimension_numbers = #tpu.dot_dimension_numbers<[1], [0], [0], [1], [0, 0, 1, 1], [], []>} : vector<8x32xbf16>, vector<32x320xbf16>, vector<8x320xf32> -> vector<8x320xf32>
    %45 = arith.addf %39, %44 : vector<8x320xf32>
    %46 = vector.extract_strided_slice %0 {offsets = [0, 0, 161], sizes = [1, 32, 320], strides = [1, 1, 1]} : vector<1x32x482xbf16> to vector<1x32x320xbf16>
    %47 = vector.shape_cast %46 : vector<1x32x320xbf16> to vector<32x320xbf16>
    %48 = vector.extract_strided_slice %1 {offsets = [7, 0, 0], sizes = [1, 8, 32], strides = [1, 1, 1]} : vector<9x8x32xbf16> to vector<1x8x32xbf16>
    %49 = vector.shape_cast %48 : vector<1x8x32xbf16> to vector<8x32xbf16>
    %cst_15 = arith.constant dense<0.000000e+00> : vector<8x320xf32>
    %50 = tpu.matmul %49, %47, %cst_15 {dimension_numbers = #tpu.dot_dimension_numbers<[1], [0], [0], [1], [0, 0, 1, 1], [], []>} : vector<8x32xbf16>, vector<32x320xbf16>, vector<8x320xf32> -> vector<8x320xf32>
    %51 = arith.addf %45, %50 : vector<8x320xf32>
    %52 = vector.extract_strided_slice %0 {offsets = [0, 0, 162], sizes = [1, 32, 320], strides = [1, 1, 1]} : vector<1x32x482xbf16> to vector<1x32x320xbf16>
    %53 = vector.shape_cast %52 : vector<1x32x320xbf16> to vector<32x320xbf16>
    %54 = vector.extract_strided_slice %1 {offsets = [8, 0, 0], sizes = [1, 8, 32], strides = [1, 1, 1]} : vector<9x8x32xbf16> to vector<1x8x32xbf16>
    %55 = vector.shape_cast %54 : vector<1x8x32xbf16> to vector<8x32xbf16>
    %cst_16 = arith.constant dense<0.000000e+00> : vector<8x320xf32>
    %56 = tpu.matmul %55, %53, %cst_16 {dimension_numbers = #tpu.dot_dimension_numbers<[1], [0], [0], [1], [0, 0, 1, 1], [], []>} : vector<8x32xbf16>, vector<32x320xbf16>, vector<8x320xf32> -> vector<8x320xf32>
    %57 = arith.addf %51, %56 : vector<8x320xf32>
    %58 = vector.extract_strided_slice %2 {offsets = [0, 0, 0], sizes = [1, 8, 1], strides = [1, 1, 1]} : vector<2x8x1xf32> to vector<1x8x1xf32>
    %59 = vector.shape_cast %58 : vector<1x8x1xf32> to vector<8x1xf32>
    %60 = vector.broadcast %59 : vector<8x1xf32> to vector<8x320xf32>
    %61 = arith.mulf %57, %60 : vector<8x320xf32>
    %62 = vector.extract_strided_slice %2 {offsets = [1, 0, 0], sizes = [1, 8, 1], strides = [1, 1, 1]} : vector<2x8x1xf32> to vector<1x8x1xf32>
    %63 = vector.shape_cast %62 : vector<1x8x1xf32> to vector<8x1xf32>
    %64 = vector.broadcast %63 : vector<8x1xf32> to vector<8x320xf32>
    %65 = arith.addf %61, %64 : vector<8x320xf32>
    %cst_17 = arith.constant 0.000000e+00 : f32
    %66 = vector.broadcast %cst_17 : f32 to vector<8x320xf32>
    %67 = arith.maximumf %65, %66 : vector<8x320xf32>
    %68 = arith.truncf %67 : vector<8x320xf32> to vector<8x320xbf16>
    %69 = vector.shape_cast %68 : vector<8x320xbf16> to vector<1x8x320xbf16>
    %c0_18 = arith.constant 0 : index
    %c0_19 = arith.constant 0 : index
    %c0_20 = arith.constant 0 : index
    %70 = vector.load %arg4[%c0_18, %c0_19, %c0_20] : memref<1x8x320xbf16, #tpu.memory_space<vmem>>, vector<1x8x320xbf16>
    tpu.vector_store %arg4[%c0_18, %c0_19, %c0_20], %69 {strides = array<i32>} : memref<1x8x320xbf16, #tpu.memory_space<vmem>>, vector<1x8x320xbf16>,
    return
  }
  func.func @transform_0(%arg0: i32) -> (i32, i32, i32) {
    %c0_i32 = arith.constant 0 : i32
    %c0_i32_0 = arith.constant 0 : i32
    %c0_i32_1 = arith.constant 0 : i32
    return %arg0, %c0_i32, %c0_i32_0 : i32, i32, i32
  }
  func.func @transform_1(%arg0: i32) -> (i32, i32, i32) {
    %c0_i32 = arith.constant 0 : i32
    %c0_i32_0 = arith.constant 0 : i32
    %c0_i32_1 = arith.constant 0 : i32
    %c0_i32_2 = arith.constant 0 : i32
    return %c0_i32, %c0_i32_0, %c0_i32_1 : i32, i32, i32
  }
  func.func @transform_2(%arg0: i32) -> (i32, i32, i32) {
    %c0_i32 = arith.constant 0 : i32
    %c0_i32_0 = arith.constant 0 : i32
    %c0_i32_1 = arith.constant 0 : i32
    %c0_i32_2 = arith.constant 0 : i32
    return %c0_i32, %c0_i32_0, %c0_i32_1 : i32, i32, i32
  }
  func.func @transform_3(%arg0: i32) -> (i32, i32, i32) {
    %c0_i32 = arith.constant 0 : i32
    %c0_i32_0 = arith.constant 0 : i32
    %c0_i32_1 = arith.constant 0 : i32
    return %arg0, %c0_i32, %c0_i32_0 : i32, i32, i32
  }
}

module attributes {stable_mosaic.version = 11 : i64} {
  func.func @_conv_kernel(%arg0: i32, %arg1: memref<1x8x1922xbf16, #tpu.memory_space<vmem>>, %arg2: memref<9x1x8xbf16, #tpu.memory_space<vmem>>, %arg3: memref<2x1x1xf32, #tpu.memory_space<vmem>>, %arg4: memref<1x1x1280xf32, #tpu.memory_space<vmem>>) attributes {dimension_semantics = [#tpu.dimension_semantics<parallel>], iteration_bounds = array<i64: 2>, scalar_prefetch = 0 : i64, scratch_operands = 0 : i64, tpu.core_type = #tpu.core_type<tc>, window_params = [{transform_indices = @transform_0, window_bounds = array<i64: 1, 8, 1922>}, {pipeline_mode = #tpu.pipeline_mode<synchronous>, transform_indices = @transform_1, window_bounds = array<i64: 9, 1, 8>}, {pipeline_mode = #tpu.pipeline_mode<synchronous>, transform_indices = @transform_2, window_bounds = array<i64: 2, 1, 1>}, {transform_indices = @transform_3, window_bounds = array<i64: 1, 1, 1280>}]} {
    %c0 = arith.constant 0 : index
    %c0_0 = arith.constant 0 : index
    %c0_1 = arith.constant 0 : index
    %0 = vector.load %arg1[%c0, %c0_0, %c0_1] : memref<1x8x1922xbf16, #tpu.memory_space<vmem>>, vector<1x8x1922xbf16>
    %c0_2 = arith.constant 0 : index
    %c0_3 = arith.constant 0 : index
    %c0_4 = arith.constant 0 : index
    %1 = vector.load %arg2[%c0_2, %c0_3, %c0_4] : memref<9x1x8xbf16, #tpu.memory_space<vmem>>, vector<9x1x8xbf16>
    %c0_5 = arith.constant 0 : index
    %c0_6 = arith.constant 0 : index
    %c0_7 = arith.constant 0 : index
    %2 = vector.load %arg3[%c0_5, %c0_6, %c0_7] : memref<2x1x1xf32, #tpu.memory_space<vmem>>, vector<2x1x1xf32>
    %cst = arith.constant 0.000000e+00 : f32
    %3 = vector.broadcast %cst : f32 to vector<1x1280xf32>
    %4 = vector.extract_strided_slice %0 {offsets = [0, 0, 0], sizes = [1, 8, 1280], strides = [1, 1, 1]} : vector<1x8x1922xbf16> to vector<1x8x1280xbf16>
    %5 = vector.shape_cast %4 : vector<1x8x1280xbf16> to vector<8x1280xbf16>
    %6 = vector.extract_strided_slice %1 {offsets = [0, 0, 0], sizes = [1, 1, 8], strides = [1, 1, 1]} : vector<9x1x8xbf16> to vector<1x1x8xbf16>
    %7 = vector.shape_cast %6 : vector<1x1x8xbf16> to vector<1x8xbf16>
    %cst_8 = arith.constant dense<0.000000e+00> : vector<1x1280xf32>
    %8 = tpu.matmul %7, %5, %cst_8 {dimension_numbers = #tpu.dot_dimension_numbers<[1], [0], [0], [1], [0, 0, 1, 1], [], []>} : vector<1x8xbf16>, vector<8x1280xbf16>, vector<1x1280xf32> -> vector<1x1280xf32>
    %9 = arith.addf %3, %8 : vector<1x1280xf32>
    %10 = vector.extract_strided_slice %0 {offsets = [0, 0, 1], sizes = [1, 8, 1280], strides = [1, 1, 1]} : vector<1x8x1922xbf16> to vector<1x8x1280xbf16>
    %11 = vector.shape_cast %10 : vector<1x8x1280xbf16> to vector<8x1280xbf16>
    %12 = vector.extract_strided_slice %1 {offsets = [1, 0, 0], sizes = [1, 1, 8], strides = [1, 1, 1]} : vector<9x1x8xbf16> to vector<1x1x8xbf16>
    %13 = vector.shape_cast %12 : vector<1x1x8xbf16> to vector<1x8xbf16>
    %cst_9 = arith.constant dense<0.000000e+00> : vector<1x1280xf32>
    %14 = tpu.matmul %13, %11, %cst_9 {dimension_numbers = #tpu.dot_dimension_numbers<[1], [0], [0], [1], [0, 0, 1, 1], [], []>} : vector<1x8xbf16>, vector<8x1280xbf16>, vector<1x1280xf32> -> vector<1x1280xf32>
    %15 = arith.addf %9, %14 : vector<1x1280xf32>
    %16 = vector.extract_strided_slice %0 {offsets = [0, 0, 2], sizes = [1, 8, 1280], strides = [1, 1, 1]} : vector<1x8x1922xbf16> to vector<1x8x1280xbf16>
    %17 = vector.shape_cast %16 : vector<1x8x1280xbf16> to vector<8x1280xbf16>
    %18 = vector.extract_strided_slice %1 {offsets = [2, 0, 0], sizes = [1, 1, 8], strides = [1, 1, 1]} : vector<9x1x8xbf16> to vector<1x1x8xbf16>
    %19 = vector.shape_cast %18 : vector<1x1x8xbf16> to vector<1x8xbf16>
    %cst_10 = arith.constant dense<0.000000e+00> : vector<1x1280xf32>
    %20 = tpu.matmul %19, %17, %cst_10 {dimension_numbers = #tpu.dot_dimension_numbers<[1], [0], [0], [1], [0, 0, 1, 1], [], []>} : vector<1x8xbf16>, vector<8x1280xbf16>, vector<1x1280xf32> -> vector<1x1280xf32>
    %21 = arith.addf %15, %20 : vector<1x1280xf32>
    %22 = vector.extract_strided_slice %0 {offsets = [0, 0, 320], sizes = [1, 8, 1280], strides = [1, 1, 1]} : vector<1x8x1922xbf16> to vector<1x8x1280xbf16>
    %23 = vector.shape_cast %22 : vector<1x8x1280xbf16> to vector<8x1280xbf16>
    %24 = vector.extract_strided_slice %1 {offsets = [3, 0, 0], sizes = [1, 1, 8], strides = [1, 1, 1]} : vector<9x1x8xbf16> to vector<1x1x8xbf16>
    %25 = vector.shape_cast %24 : vector<1x1x8xbf16> to vector<1x8xbf16>
    %cst_11 = arith.constant dense<0.000000e+00> : vector<1x1280xf32>
    %26 = tpu.matmul %25, %23, %cst_11 {dimension_numbers = #tpu.dot_dimension_numbers<[1], [0], [0], [1], [0, 0, 1, 1], [], []>} : vector<1x8xbf16>, vector<8x1280xbf16>, vector<1x1280xf32> -> vector<1x1280xf32>
    %27 = arith.addf %21, %26 : vector<1x1280xf32>
    %28 = vector.extract_strided_slice %0 {offsets = [0, 0, 321], sizes = [1, 8, 1280], strides = [1, 1, 1]} : vector<1x8x1922xbf16> to vector<1x8x1280xbf16>
    %29 = vector.shape_cast %28 : vector<1x8x1280xbf16> to vector<8x1280xbf16>
    %30 = vector.extract_strided_slice %1 {offsets = [4, 0, 0], sizes = [1, 1, 8], strides = [1, 1, 1]} : vector<9x1x8xbf16> to vector<1x1x8xbf16>
    %31 = vector.shape_cast %30 : vector<1x1x8xbf16> to vector<1x8xbf16>
    %cst_12 = arith.constant dense<0.000000e+00> : vector<1x1280xf32>
    %32 = tpu.matmul %31, %29, %cst_12 {dimension_numbers = #tpu.dot_dimension_numbers<[1], [0], [0], [1], [0, 0, 1, 1], [], []>} : vector<1x8xbf16>, vector<8x1280xbf16>, vector<1x1280xf32> -> vector<1x1280xf32>
    %33 = arith.addf %27, %32 : vector<1x1280xf32>
    %34 = vector.extract_strided_slice %0 {offsets = [0, 0, 322], sizes = [1, 8, 1280], strides = [1, 1, 1]} : vector<1x8x1922xbf16> to vector<1x8x1280xbf16>
    %35 = vector.shape_cast %34 : vector<1x8x1280xbf16> to vector<8x1280xbf16>
    %36 = vector.extract_strided_slice %1 {offsets = [5, 0, 0], sizes = [1, 1, 8], strides = [1, 1, 1]} : vector<9x1x8xbf16> to vector<1x1x8xbf16>
    %37 = vector.shape_cast %36 : vector<1x1x8xbf16> to vector<1x8xbf16>
    %cst_13 = arith.constant dense<0.000000e+00> : vector<1x1280xf32>
    %38 = tpu.matmul %37, %35, %cst_13 {dimension_numbers = #tpu.dot_dimension_numbers<[1], [0], [0], [1], [0, 0, 1, 1], [], []>} : vector<1x8xbf16>, vector<8x1280xbf16>, vector<1x1280xf32> -> vector<1x1280xf32>
    %39 = arith.addf %33, %38 : vector<1x1280xf32>
    %40 = vector.extract_strided_slice %0 {offsets = [0, 0, 640], sizes = [1, 8, 1280], strides = [1, 1, 1]} : vector<1x8x1922xbf16> to vector<1x8x1280xbf16>
    %41 = vector.shape_cast %40 : vector<1x8x1280xbf16> to vector<8x1280xbf16>
    %42 = vector.extract_strided_slice %1 {offsets = [6, 0, 0], sizes = [1, 1, 8], strides = [1, 1, 1]} : vector<9x1x8xbf16> to vector<1x1x8xbf16>
    %43 = vector.shape_cast %42 : vector<1x1x8xbf16> to vector<1x8xbf16>
    %cst_14 = arith.constant dense<0.000000e+00> : vector<1x1280xf32>
    %44 = tpu.matmul %43, %41, %cst_14 {dimension_numbers = #tpu.dot_dimension_numbers<[1], [0], [0], [1], [0, 0, 1, 1], [], []>} : vector<1x8xbf16>, vector<8x1280xbf16>, vector<1x1280xf32> -> vector<1x1280xf32>
    %45 = arith.addf %39, %44 : vector<1x1280xf32>
    %46 = vector.extract_strided_slice %0 {offsets = [0, 0, 641], sizes = [1, 8, 1280], strides = [1, 1, 1]} : vector<1x8x1922xbf16> to vector<1x8x1280xbf16>
    %47 = vector.shape_cast %46 : vector<1x8x1280xbf16> to vector<8x1280xbf16>
    %48 = vector.extract_strided_slice %1 {offsets = [7, 0, 0], sizes = [1, 1, 8], strides = [1, 1, 1]} : vector<9x1x8xbf16> to vector<1x1x8xbf16>
    %49 = vector.shape_cast %48 : vector<1x1x8xbf16> to vector<1x8xbf16>
    %cst_15 = arith.constant dense<0.000000e+00> : vector<1x1280xf32>
    %50 = tpu.matmul %49, %47, %cst_15 {dimension_numbers = #tpu.dot_dimension_numbers<[1], [0], [0], [1], [0, 0, 1, 1], [], []>} : vector<1x8xbf16>, vector<8x1280xbf16>, vector<1x1280xf32> -> vector<1x1280xf32>
    %51 = arith.addf %45, %50 : vector<1x1280xf32>
    %52 = vector.extract_strided_slice %0 {offsets = [0, 0, 642], sizes = [1, 8, 1280], strides = [1, 1, 1]} : vector<1x8x1922xbf16> to vector<1x8x1280xbf16>
    %53 = vector.shape_cast %52 : vector<1x8x1280xbf16> to vector<8x1280xbf16>
    %54 = vector.extract_strided_slice %1 {offsets = [8, 0, 0], sizes = [1, 1, 8], strides = [1, 1, 1]} : vector<9x1x8xbf16> to vector<1x1x8xbf16>
    %55 = vector.shape_cast %54 : vector<1x1x8xbf16> to vector<1x8xbf16>
    %cst_16 = arith.constant dense<0.000000e+00> : vector<1x1280xf32>
    %56 = tpu.matmul %55, %53, %cst_16 {dimension_numbers = #tpu.dot_dimension_numbers<[1], [0], [0], [1], [0, 0, 1, 1], [], []>} : vector<1x8xbf16>, vector<8x1280xbf16>, vector<1x1280xf32> -> vector<1x1280xf32>
    %57 = arith.addf %51, %56 : vector<1x1280xf32>
    %58 = vector.extract_strided_slice %2 {offsets = [0, 0, 0], sizes = [1, 1, 1], strides = [1, 1, 1]} : vector<2x1x1xf32> to vector<1x1x1xf32>
    %59 = vector.shape_cast %58 : vector<1x1x1xf32> to vector<1x1xf32>
    %60 = vector.broadcast %59 : vector<1x1xf32> to vector<1x1280xf32>
    %61 = arith.mulf %57, %60 : vector<1x1280xf32>
    %62 = vector.extract_strided_slice %2 {offsets = [1, 0, 0], sizes = [1, 1, 1], strides = [1, 1, 1]} : vector<2x1x1xf32> to vector<1x1x1xf32>
    %63 = vector.shape_cast %62 : vector<1x1x1xf32> to vector<1x1xf32>
    %64 = vector.broadcast %63 : vector<1x1xf32> to vector<1x1280xf32>
    %65 = arith.addf %61, %64 : vector<1x1280xf32>
    %cst_17 = arith.constant 0.000000e+00 : f32
    %66 = vector.broadcast %cst_17 : f32 to vector<1x1280xf32>
    %67 = arith.subf %66, %65 : vector<1x1280xf32>
    %68 = math.exp %67 : vector<1x1280xf32>
    %cst_18 = arith.constant 1.000000e+00 : f32
    %69 = vector.broadcast %cst_18 : f32 to vector<1x1280xf32>
    %70 = arith.addf %69, %68 : vector<1x1280xf32>
    %71 = tpu.reciprocal %70 {approx = true} : vector<1x1280xf32> -> vector<1x1280xf32>
    %72 = vector.shape_cast %71 : vector<1x1280xf32> to vector<1x1x1280xf32>
    %c0_19 = arith.constant 0 : index
    %c0_20 = arith.constant 0 : index
    %c0_21 = arith.constant 0 : index
    %73 = vector.load %arg4[%c0_19, %c0_20, %c0_21] : memref<1x1x1280xf32, #tpu.memory_space<vmem>>, vector<1x1x1280xf32>
    tpu.vector_store %arg4[%c0_19, %c0_20, %c0_21], %72 {strides = array<i32>} : memref<1x1x1280xf32, #tpu.memory_space<vmem>>, vector<1x1x1280xf32>,
    return
  }
  func.func @transform_0(%arg0: i32) -> (i32, i32, i32) {
    %c0_i32 = arith.constant 0 : i32
    %c0_i32_0 = arith.constant 0 : i32
    %c0_i32_1 = arith.constant 0 : i32
    return %arg0, %c0_i32, %c0_i32_0 : i32, i32, i32
  }
  func.func @transform_1(%arg0: i32) -> (i32, i32, i32) {
    %c0_i32 = arith.constant 0 : i32
    %c0_i32_0 = arith.constant 0 : i32
    %c0_i32_1 = arith.constant 0 : i32
    %c0_i32_2 = arith.constant 0 : i32
    return %c0_i32, %c0_i32_0, %c0_i32_1 : i32, i32, i32
  }
  func.func @transform_2(%arg0: i32) -> (i32, i32, i32) {
    %c0_i32 = arith.constant 0 : i32
    %c0_i32_0 = arith.constant 0 : i32
    %c0_i32_1 = arith.constant 0 : i32
    %c0_i32_2 = arith.constant 0 : i32
    return %c0_i32, %c0_i32_0, %c0_i32_1 : i32, i32, i32
  }
  func.func @transform_3(%arg0: i32) -> (i32, i32, i32) {
    %c0_i32 = arith.constant 0 : i32
    %c0_i32_0 = arith.constant 0 : i32
    %c0_i32_1 = arith.constant 0 : i32
    return %arg0, %c0_i32, %c0_i32_0 : i32, i32, i32
  }
}

</mosaic_0001>

<bundles_post_ra>
// kernel: forward.9
= control target key start
LH: loop header
LB: loop body
LE: loop exit
PB: predicated region body
PF: predicated region fallthrough
CT: control target
= control target key end

     0   :  { %s1193_s12 = smov 0   ;;  %s1606_s0 = inlined_call_operand.vmem [shape: bf16[2,1,1294], index: 0, kind: input, shape index: {}]   ;;  %s1607_s1 = inlined_call_operand.vmem [shape: bf16[9,8,1], index: 1, kind: input, shape index: {}]   ;;  %s1608_s2 = inlined_call_operand.vmem [shape: f32[2,8,1], index: 2, kind: input, shape index: {}]   ;;  %s1609_s3 = inlined_call_operand.vmem [shape: bf16[2,8,1216], index: 3, kind: output, shape index: {}]  }
   0x1 LB: > { %s1078_s13 = sadd.s32 4294967295, %s1162_s12   ;;  %p1082_p0 = scmp.ge.s32.totalorder %s1162_s12, 1  ;;  %s1162_s12 = sphi %s1193_s12, %s13_s12  }
   0x2   : > { %p136_p1 = scmp.lt.s32.totalorder %s1162_s12, 3 }
   0x4   : > { %p137_p2 = pnand %p1082_p0, %p136_p1 }
   0x5   : > { %v1097_v0 = vld [vmem:[%s1607_s1] sm:$0xff] (!%p137_p2)   ;;  %v1114_v1 = vld [vmem:[%s1607_s1 + $0x18] sm:$0xff] (!%p137_p2)   ;;  %v1164_v2 = vmov (!%p137_p2), 0   ;;  %v1112_v7 = vld [vmem:[%s1607_s1 + $0x8] sm:$0xff] (!%p137_p2)   ;;  %p159_p3 = scmp.lt.s32.totalorder (!%p137_p2), %s1078_s13, 1  ;;  %v193_v20 = vlaneseq (!%p137_p2)  ;;  %s1165_s30 = smov (!%p137_p2), 127  }
   0x6   : > { %140 = sbr.rel (%p137_p2) target bundleno = 446 (0x1be), region = 32  ;;  %1134 = vset.pattern.permute.xlu0 (!%p137_p2), %v1164_v2  ;;  %v1098_v3 = vunpack.c.l.bf16 (!%p137_p2), %v1097_v0  ;;  %v1099_v4 = vunpack.c.h.bf16 (!%p137_p2), %v1097_v0  ;;  %v1110_v5 = vunpack.c.l.bf16 (!%p137_p2), %v1114_v1  ;;  %v1111_v6 = vunpack.c.h.bf16 (!%p137_p2), %v1114_v1  ;;  %1140 = vset.pattern.permute.xlu1 (!%p137_p2), %v1164_v2  ;;  %v1113_v8 = vld [vmem:[%s1607_s1 + $0x10] sm:$0xff] (!%p137_p2)   ;;  %v178_v17 = vld [vmem:[%s1607_s1 + $0x20] sm:$0xf] (!%p137_p2)  ;;  %s1166_s4 = smov (!%p137_p2), 126  }
   0x7   : > { %v1102_v9 = vunpack.c.l.bf16 (!%p137_p2), %v1112_v7  ;;  %v1103_v10 = vunpack.c.h.bf16 (!%p137_p2), %v1112_v7  ;;  %v1106_v11 = vunpack.c.l.bf16 (!%p137_p2), %v1113_v8  ;;  %v1107_v12 = vunpack.c.h.bf16 (!%p137_p2), %v1113_v8  ;;  %v179_v18 = vld [vmem:[%s1608_s2] sm:$0xff] (!%p137_p2)  ;;  %s1167_s5 = smov (!%p137_p2), 90   ;;  %s1168_s6 = smov (!%p137_p2), 89  }
   0x8   : > { %v1135_v13 = vpack.i.bf16 (!%p137_p2), %v1099_v4, %v1098_v3  ;;  %v1151_v15 = vpack.i.bf16 (!%p137_p2), %v1111_v6, %v1110_v5  ;;  %v854_v19 = vunpack.c.l.bf16 (!%p137_p2), %v178_v17  ;;  %v194_v21 = vshrl.u32 (!%p137_p2), %v193_v20, 7  ;;  %s1169_s7 = smov (!%p137_p2), 88   ;;  %s1170_s8 = smov (!%p137_p2), 52  }
   0x9   : > { %v1141_v14 = vpack.i.bf16 (!%p137_p2), %v1103_v10, %v1102_v9  ;;  %v1146_v16 = vpack.i.bf16 (!%p137_p2), %v1107_v12, %v1106_v11  ;;  %vm349_vm0 = vcmask (!%p137_p2), 1039360   ;;  %s1171_s9 = smov (!%p137_p2), 51   ;;  %vm425_vm1 = vcmask (!%p137_p2), 1031168   ;;  %s1172_s14 = smov (!%p137_p2), 50  }
   0xa   : > { %1136 = vperm.xlu0 (!%p137_p2), %1134, %v1135_v13   ;;  %v203_v23 = vsub.s32 (!%p137_p2), 4, %v194_v21  ;;  %v195_v25 = vsub.s32 (!%p137_p2), 0, %v194_v21  ;;  %v199_v30 = vsub.s32 (!%p137_p2), 2, %v194_v21  ;;  %v207_v33 = vsub.s32 (!%p137_p2), 6, %v194_v21 }
   0xb   : > { %1142 = vperm.xlu1 (!%p137_p2), %1140, %v1141_v14   ;;  %vm501_vm2 = vcmask (!%p137_p2), 736256   ;;  %vm577_vm3 = vcmask (!%p137_p2), 728064   ;;  %vm653_vm4 = vcmask (!%p137_p2), 719872   ;;  %vm742_vm5 = vcmask (!%p137_p2), 424960  }
   0xc   : > { %vm823_vm6 = vcmask (!%p137_p2), 416768   ;;  %vm904_vm7 = vcmask (!%p137_p2), 408576   ;;  %vm1019_vm8 = vcmask (!%p137_p2), 1043456   ;;  %vm1020_vm9 = vcmask (!%p137_p2), 523268  }
   0xd   : > { %s1611_s13 = smov (!%p159_p3, %s1078_s13), 1  ;;  %vm1021_vm10 = vmor %vm1020_vm9, %vm1019_vm8 }
   0xe   : > { %1152 = vperm.xlu0 %1134, %v1151_v15   ;;  %s1115_s26 = smul.u32 11, %s1611_s13 }
   0xf   : > { %1147 = vperm.xlu1 %1140, %v1146_v16   ;;  %s1116_s15 = smul.u32 40, %s1611_s13 }
  0x10   : > { %s162_s29 = scalar_lea.vmem %s1606_s0, %s1115_s26 }
  0x11   : > { %v169_v22 = vld [vmem:[%s162_s29 + $0x8] sm:$0x7]  ;;  %v168_v28 = vld [vmem:[%s162_s29] sm:$0xff]  ;;  %s1570_s17 = scalar_lea.vmem %s1609_s3, %s1116_s15 }
  0x12   : > { %937 = vperm.xlu0 %1134, %v179_v18   ;;  %v184_v24 = vunpack.c.l.bf16 %v169_v22  ;;  %v182_v29 = vunpack.c.l.bf16 %v168_v28  ;;  %v183_v34 = vunpack.c.h.bf16 %v168_v28 }
  0x13   : > { %857 = vperm.xlu1 %1140, %v854_v19  }
  0x14   : > { %v692_v26 = vrot.slane %v184_v24, %v203_v23  ;;  %v200_v31 = vrot.slane %v182_v29, %v199_v30  ;;  %v196_v32 = vrot.slane %v182_v29, %v195_v25  ;;  %v204_v37 = vrot.slane %v182_v29, %v203_v23 }
  0x15   : > { %v208_v38 = vrot.slane %v182_v29, %v207_v33  ;;  %v212_v41 = vrot.slane %v183_v34, %v195_v25  ;;  %v216_v42 = vrot.slane %v183_v34, %v199_v30  ;;  %v220_v47 = vrot.slane %v183_v34, %v203_v23 }
  0x16   : > { %v1225_v27 = vrot.slane %v692_v26, %v195_v25  ;;  %v1227_v35 = vrot.slane %v200_v31, %v195_v25  ;;  %v1229_v36 = vrot.slane %v196_v32, %v195_v25  ;;  %v1233_v45 = vrot.slane %v204_v37, %v195_v25 }
  0x17   : > { %v1235_v46 = vrot.slane %v208_v38, %v195_v25  ;;  %v224_v48 = vrot.slane %v183_v34, %v207_v33  ;;  %v1241_v51 = vrot.slane %v212_v41, %v195_v25  ;;  %v1243_v52 = vrot.slane %v216_v42, %v195_v25 }
  0x18   : > { %v1247_v53 = vrot.slane %v220_v47, %v195_v25  ;;  %v228_v54 = vrot.slane %v184_v24, %v195_v25  ;;  %v232_v58 = vrot.slane %v184_v24, %v199_v30 }
  0x19   : > { %v1251_v57 = vrot.slane %v224_v48, %v195_v25 }
  0x1a   : > { %v1255_v59 = vrot.slane %v228_v54, %v195_v25  ;;  %v1259_v0 = vrot.slane %v232_v58, %v195_v25 }
  0x89   : > { %v1137_v39 = vpop.permute.xlu0 %1136 }
  0x8a   : > { %v1139_v40 = vunpack.i.h.bf16 %v1137_v39  ;;  %v1138_v60 = vunpack.i.l.bf16 %v1137_v39  ;;  %v1143_v61 = vpop.permute.xlu1 %1142 }
  0x8b   : > { %v1144_v1 = vunpack.i.l.bf16 %v1143_v61  ;;  %v1145_v22 = vunpack.i.h.bf16 %v1143_v61 }
  0x8c   : > { %v310_v43 = vmul.f32 %v1139_v40, %v1227_v35  ;;  %v309_v44 = vmul.f32 %v1139_v40, %v1229_v36  ;;  %v311_v49 = vmul.f32 %v1139_v40, %v1233_v45  ;;  %v312_v50 = vmul.f32 %v1139_v40, %v1235_v46 }
  0x8d   : > { %v313_v55 = vmul.f32 %v1139_v40, %v1241_v51  ;;  %v314_v56 = vmul.f32 %v1139_v40, %v1243_v52  ;;  %v315_v62 = vmul.f32 %v1139_v40, %v1247_v53  ;;  %v316_v63 = vmul.f32 %v1139_v40, %v1251_v57 }
  0x8e   : > { %331 = vrot.lane.b32.xlu1 %v310_v43, %s1165_s30  ;;  %329 = vrot.lane.b32.xlu0 %v309_v44, %s1165_s30  ;;  %v317_v2 = vmul.f32 %v1139_v40, %v1255_v59  ;;  %v318_v3 = vmul.f32 %v1139_v40, %v1259_v0  ;;  %v1266_v4 = vmul.f32 %v1138_v60, %v1229_v36  ;;  %v1148_v32 = vpop.permute.xlu1 %1147 }
  0x8f   : > { %v386_v5 = vmul.f32 %v1144_v1, %v1227_v35  ;;  %v1270_v6 = vmul.f32 %v1138_v60, %v1227_v35  ;;  %v1273_v7 = vmul.f32 %v1138_v60, %v1233_v45  ;;  %v385_v8 = vmul.f32 %v1144_v1, %v1229_v36 }
  0x90   : > { %v1279_v9 = vmul.f32 %v1138_v60, %v1235_v46  ;;  %v1282_v10 = vmul.f32 %v1138_v60, %v1241_v51  ;;  %v1285_v11 = vmul.f32 %v1138_v60, %v1243_v52  ;;  %v1288_v12 = vmul.f32 %v1138_v60, %v1247_v53 }
  0x91   : > { %v1291_v13 = vmul.f32 %v1138_v60, %v1251_v57  ;;  %v1294_v14 = vmul.f32 %v1138_v60, %v1255_v59  ;;  %v1297_v15 = vmul.f32 %v1138_v60, %v1259_v0  ;;  %v388_v16 = vmul.f32 %v1144_v1, %v1235_v46 }
  0x92   : > { %333 = vrot.lane.b32.xlu1 %v311_v49, %s1165_s30  ;;  %335 = vrot.lane.b32.xlu0 %v312_v50, %s1165_s30  ;;  %v387_v17 = vmul.f32 %v1144_v1, %v1233_v45  ;;  %v390_v18 = vmul.f32 %v1144_v1, %v1243_v52  ;;  %v389_v19 = vmul.f32 %v1144_v1, %v1241_v51  ;;  %v1149_v33 = vunpack.i.l.bf16 %v1148_v32 }
  0x93   : > { %v392_v20 = vmul.f32 %v1144_v1, %v1251_v57  ;;  %v391_v21 = vmul.f32 %v1144_v1, %v1247_v53  ;;  %v394_v23 = vmul.f32 %v1144_v1, %v1259_v0  ;;  %v393_v24 = vmul.f32 %v1144_v1, %v1255_v59  ;;  %v1153_v1 = vpop.permute.xlu0 %1152 }
  0x94   : > { %v462_v25 = vmul.f32 %v1145_v22, %v1227_v35  ;;  %v461_v26 = vmul.f32 %v1145_v22, %v1229_v36  ;;  %v464_v28 = vmul.f32 %v1145_v22, %v1235_v46  ;;  %v463_v29 = vmul.f32 %v1145_v22, %v1233_v45 }
  0x95   : > { %v467_v30 = vmul.f32 %v1145_v22, %v1247_v53  ;;  %v465_v31 = vmul.f32 %v1145_v22, %v1241_v51  ;;  %v469_v34 = vmul.f32 %v1145_v22, %v1255_v59  ;;  %v466_v37 = vmul.f32 %v1145_v22, %v1243_v52 }
  0x96   : > { %337 = vrot.lane.b32.xlu1 %v313_v55, %s1165_s30  ;;  %339 = vrot.lane.b32.xlu0 %v314_v56, %s1165_s30  ;;  %v537_v38 = vmul.f32 %v1149_v33, %v1229_v36  ;;  %v468_v39 = vmul.f32 %v1145_v22, %v1251_v57  ;;  %v539_v40 = vmul.f32 %v1149_v33, %v1233_v45  ;;  %v1150_v48 = vunpack.i.h.bf16 %v1148_v32 }
  0x97   : > { %v470_v41 = vmul.f32 %v1145_v22, %v1259_v0  ;;  %v541_v42 = vmul.f32 %v1149_v33, %v1241_v51  ;;  %v538_v43 = vmul.f32 %v1149_v33, %v1227_v35  ;;  %v543_v44 = vmul.f32 %v1149_v33, %v1247_v53 }
  0x98   : > { %v540_v47 = vmul.f32 %v1149_v33, %v1235_v46  ;;  %v545_v49 = vmul.f32 %v1149_v33, %v1255_v59  ;;  %v542_v50 = vmul.f32 %v1149_v33, %v1243_v52  ;;  %v613_v54 = vmul.f32 %v1150_v48, %v1229_v36 }
  0x99   : > { %v544_v55 = vmul.f32 %v1149_v33, %v1251_v57  ;;  %v615_v56 = vmul.f32 %v1150_v48, %v1233_v45  ;;  %v546_v58 = vmul.f32 %v1149_v33, %v1259_v0  ;;  %v617_v60 = vmul.f32 %v1150_v48, %v1241_v51 }
  0x9a   : > { %341 = vrot.lane.b32.xlu1 %v315_v62, %s1165_s30  ;;  %343 = vrot.lane.b32.xlu0 %v316_v63, %s1165_s30  ;;  %v614_v61 = vmul.f32 %v1150_v48, %v1227_v35  ;;  %v619_v62 = vmul.f32 %v1150_v48, %v1247_v53  ;;  %v616_v63 = vmul.f32 %v1150_v48, %v1235_v46 }
  0x9e   : > { %345 = vrot.lane.b32.xlu1 %v317_v2, %s1165_s30  ;;  %347 = vrot.lane.b32.xlu0 %v318_v3, %s1165_s30  ;;  %v1154_v2 = vunpack.i.l.bf16 %v1153_v1  ;;  %v621_v3 = vmul.f32 %v1150_v48, %v1255_v59 }
  0xa0   : > { %v701_v22 = vmul.f32 %v1154_v2, %v1235_v46  ;;  %v705_v32 = vmul.f32 %v1154_v2, %v1251_v57 }
  0xa2   : > { %407 = vrot.lane.b32.xlu1 %v386_v5, %s1166_s4  ;;  %405 = vrot.lane.b32.xlu0 %v385_v8, %s1166_s4  ;;  %v618_v5 = vmul.f32 %v1150_v48, %v1243_v52  ;;  %v698_v8 = vmul.f32 %v1154_v2, %v1229_v36 }
  0xa6   : > { %411 = vrot.lane.b32.xlu1 %v388_v16, %s1166_s4  ;;  %409 = vrot.lane.b32.xlu0 %v387_v17, %s1166_s4  ;;  %v620_v16 = vmul.f32 %v1150_v48, %v1251_v57  ;;  %v700_v17 = vmul.f32 %v1154_v2, %v1233_v45 }
  0xaa   : > { %415 = vrot.lane.b32.xlu1 %v390_v18, %s1166_s4  ;;  %413 = vrot.lane.b32.xlu0 %v389_v19, %s1166_s4  ;;  %v622_v18 = vmul.f32 %v1150_v48, %v1259_v0  ;;  %v702_v19 = vmul.f32 %v1154_v2, %v1241_v51 }
  0xae   : > { %419 = vrot.lane.b32.xlu1 %v392_v20, %s1166_s4  ;;  %417 = vrot.lane.b32.xlu0 %v391_v21, %s1166_s4  ;;  %v699_v20 = vmul.f32 %v1154_v2, %v1227_v35  ;;  %v704_v21 = vmul.f32 %v1154_v2, %v1247_v53 }
  0xb2   : > { %423 = vrot.lane.b32.xlu1 %v394_v23, %s1166_s4  ;;  %421 = vrot.lane.b32.xlu0 %v393_v24, %s1166_s4  ;;  %v1349_v23 = vpop.permute.xlu0 %937  ;;  %v1351_v24 = vpop.permute.xlu1 %857 }
  0xb6   : > { %483 = vrot.lane.b32.xlu1 %v462_v25, %s1167_s5  ;;  %481 = vrot.lane.b32.xlu0 %v461_v26, %s1167_s5  ;;  %v706_v25 = vmul.f32 %v1154_v2, %v1255_v59  ;;  %v703_v26 = vmul.f32 %v1154_v2, %v1243_v52 }
  0xba   : > { %487 = vrot.lane.b32.xlu1 %v464_v28, %s1167_s5  ;;  %485 = vrot.lane.b32.xlu0 %v463_v29, %s1167_s5  ;;  %v1357_v28 = vunpack.i.h.bf16 %v1153_v1 }
  0xbc   : > { %v781_v48 = vmul.f32 %v1357_v28, %v1233_v45 }
  0xbe   : > { %493 = vrot.lane.b32.xlu1 %v467_v30, %s1167_s5  ;;  %489 = vrot.lane.b32.xlu0 %v465_v31, %s1167_s5  ;;  %v708_v31 = vmul.f32 %v1154_v2, %v1225_v27 }
  0xc2   : > { %497 = vrot.lane.b32.xlu1 %v469_v34, %s1167_s5  ;;  %491 = vrot.lane.b32.xlu0 %v466_v37, %s1167_s5 }
  0xc6   : > { %557 = vrot.lane.b32.xlu1 %v537_v38, %s1168_s6  ;;  %495 = vrot.lane.b32.xlu0 %v468_v39, %s1167_s5  ;;  %v779_v39 = vmul.f32 %v1357_v28, %v1229_v36 }
  0xca   : > { %561 = vrot.lane.b32.xlu1 %v539_v40, %s1168_s6  ;;  %499 = vrot.lane.b32.xlu0 %v470_v41, %s1167_s5  ;;  %v707_v40 = vmul.f32 %v1154_v2, %v1259_v0  ;;  %v785_v2 = vmul.f32 %v1357_v28, %v1247_v53 }
  0xce   : > { %565 = vrot.lane.b32.xlu1 %v541_v42, %s1168_s6  ;;  %559 = vrot.lane.b32.xlu0 %v538_v43, %s1168_s6 }
  0xd2   : > { %569 = vrot.lane.b32.xlu1 %v543_v44, %s1168_s6  ;;  %563 = vrot.lane.b32.xlu0 %v540_v47, %s1168_s6 }
  0xd6   : > { %573 = vrot.lane.b32.xlu1 %v545_v49, %s1168_s6  ;;  %567 = vrot.lane.b32.xlu0 %v542_v50, %s1168_s6  ;;  %v780_v49 = vmul.f32 %v1357_v28, %v1227_v35 }
  0xda   : > { %633 = vrot.lane.b32.xlu1 %v613_v54, %s1169_s7  ;;  %571 = vrot.lane.b32.xlu0 %v544_v55, %s1168_s6 }
  0xde   : > { %637 = vrot.lane.b32.xlu1 %v615_v56, %s1169_s7  ;;  %575 = vrot.lane.b32.xlu0 %v546_v58, %s1168_s6  ;;  %v783_v58 = vmul.f32 %v1357_v28, %v1241_v51 }
  0xe2   : > { %641 = vrot.lane.b32.xlu1 %v617_v60, %s1169_s7  ;;  %635 = vrot.lane.b32.xlu0 %v614_v61, %s1169_s7  ;;  %v782_v60 = vmul.f32 %v1357_v28, %v1235_v46 }
  0xe6   : > { %645 = vrot.lane.b32.xlu1 %v619_v62, %s1169_s7  ;;  %639 = vrot.lane.b32.xlu0 %v616_v63, %s1169_s7 }
  0xea   : > { %649 = vrot.lane.b32.xlu1 %v621_v3, %s1169_s7  ;;  %643 = vrot.lane.b32.xlu0 %v618_v5, %s1169_s7  ;;  %v784_v3 = vmul.f32 %v1357_v28, %v1243_v52 }
  0xee   : > { %720 = vrot.lane.b32.xlu1 %v698_v8, %s1170_s8  ;;  %647 = vrot.lane.b32.xlu0 %v620_v16, %s1169_s7 }
  0xf2   : > { %724 = vrot.lane.b32.xlu1 %v700_v17, %s1170_s8  ;;  %651 = vrot.lane.b32.xlu0 %v622_v18, %s1169_s7 }
  0xf6   : > { %728 = vrot.lane.b32.xlu1 %v702_v19, %s1170_s8  ;;  %722 = vrot.lane.b32.xlu0 %v699_v20, %s1170_s8  ;;  %v787_v19 = vmul.f32 %v1357_v28, %v1255_v59  ;;  %v786_v20 = vmul.f32 %v1357_v28, %v1251_v57 }
  0xfa   : > { %732 = vrot.lane.b32.xlu1 %v704_v21, %s1170_s8  ;;  %726 = vrot.lane.b32.xlu0 %v701_v22, %s1170_s8  ;;  %v789_v22 = vmul.f32 %v1357_v28, %v1225_v27 }
  0xfe   : > { %736 = vrot.lane.b32.xlu1 %v706_v25, %s1170_s8  ;;  %730 = vrot.lane.b32.xlu0 %v703_v26, %s1170_s8  ;;  %v788_v25 = vmul.f32 %v1357_v28, %v1259_v0 }
 0x100   : > { %v332_v29 = vpop.permute.xlu1 %331  ;;  %v330_v30 = vpop.permute.xlu0 %329 }
 0x101   : > { %v350_v33 = vsel %vm349_vm0, %v330_v30, %v332_v29 }
 0x102   : > { %v369_v34 = vadd.f32 %v350_v33, %v1266_v4  ;;  %740 = vrot.lane.b32.xlu1 %v708_v31, %s1170_s8  ;;  %734 = vrot.lane.b32.xlu0 %v705_v32, %s1170_s8  ;;  %v180_v32 = vld [vmem:[%s1608_s2 + $0x8] sm:$0xff] }
 0x104   : > { %v334_v37 = vpop.permute.xlu1 %333  ;;  %v336_v38 = vpop.permute.xlu0 %335 }
 0x105   : > { %v351_v41 = vsel %vm349_vm0, %v332_v29, %v334_v37  ;;  %v352_v42 = vsel %vm349_vm0, %v334_v37, %v336_v38  ;;  %v860_v37 = vmul.f32 %v1351_v24, %v1229_v36 }
 0x106   : > { %v370_v43 = vadd.f32 %v351_v41, %v1270_v6  ;;  %v371_v44 = vadd.f32 %v352_v42, %v1273_v7  ;;  %801 = vrot.lane.b32.xlu1 %v779_v39, %s1171_s9  ;;  %738 = vrot.lane.b32.xlu0 %v707_v40, %s1170_s8 }
 0x108   : > { %v338_v4 = vpop.permute.xlu1 %337  ;;  %v340_v47 = vpop.permute.xlu0 %339 }
 0x109   : > { %v353_v50 = vsel %vm349_vm0, %v336_v38, %v338_v4  ;;  %v354_v54 = vsel %vm349_vm0, %v338_v4, %v340_v47 }
 0x10a   : > { %v372_v6 = vadd.f32 %v353_v50, %v1279_v9  ;;  %v373_v7 = vadd.f32 %v354_v54, %v1282_v10  ;;  %805 = vrot.lane.b32.xlu1 %v781_v48, %s1171_s9  ;;  %803 = vrot.lane.b32.xlu0 %v780_v49, %s1171_s9  ;;  %v864_v54 = vmul.f32 %v1351_v24, %v1241_v51 }
 0x10b   : > { %v866_v51 = vmul.f32 %v1351_v24, %v1247_v53 }
 0x10c   : > { %v342_v55 = vpop.permute.xlu1 %341  ;;  %v344_v56 = vpop.permute.xlu0 %343 }
 0x10d   : > { %v355_v61 = vsel %vm349_vm0, %v340_v47, %v342_v55  ;;  %v356_v62 = vsel %vm349_vm0, %v342_v55, %v344_v56 }
 0x10e   : > { %v374_v9 = vadd.f32 %v355_v61, %v1285_v11  ;;  %v375_v10 = vadd.f32 %v356_v62, %v1288_v12  ;;  %809 = vrot.lane.b32.xlu1 %v783_v58, %s1171_s9  ;;  %807 = vrot.lane.b32.xlu0 %v782_v60, %s1171_s9 }
 0x110   : > { %v346_v63 = vpop.permute.xlu1 %345  ;;  %v348_v1 = vpop.permute.xlu0 %347 }
 0x111   : > { %v357_v5 = vsel %vm349_vm0, %v344_v56, %v346_v63  ;;  %v358_v8 = vsel %vm349_vm0, %v346_v63, %v348_v1  ;;  %v378_v11 = vadd.f32 %v348_v1, %v1297_v15  ;;  %v868_v63 = vmul.f32 %v1351_v24, %v1255_v59 }
 0x112   : > { %v376_v12 = vadd.f32 %v357_v5, %v1291_v13  ;;  %v377_v16 = vadd.f32 %v358_v8, %v1294_v14  ;;  %813 = vrot.lane.b32.xlu1 %v785_v2, %s1171_s9  ;;  %811 = vrot.lane.b32.xlu0 %v784_v3, %s1171_s9  ;;  %v867_v1 = vmul.f32 %v1351_v24, %v1251_v57 }
 0x113   : > { %v869_v59 = vmul.f32 %v1351_v24, %v1259_v0 }
 0x114   : > { %v408_v17 = vpop.permute.xlu1 %407  ;;  %v406_v18 = vpop.permute.xlu0 %405 }
 0x115   : > { %v426_v21 = vsel %vm425_vm1, %v406_v18, %v408_v17 }
 0x116   : > { %v445_v15 = vadd.f32 %v426_v21, %v369_v34  ;;  %817 = vrot.lane.b32.xlu1 %v787_v19, %s1171_s9  ;;  %815 = vrot.lane.b32.xlu0 %v786_v20, %s1171_s9 }
 0x118   : > { %v412_v13 = vpop.permute.xlu1 %411  ;;  %v410_v14 = vpop.permute.xlu0 %409 }
 0x119   : > { %v427_v26 = vsel %vm425_vm1, %v408_v17, %v410_v14  ;;  %v428_v29 = vsel %vm425_vm1, %v410_v14, %v412_v13 }
 0x11a   : > { %v446_v30 = vadd.f32 %v427_v26, %v370_v43  ;;  %v447_v31 = vadd.f32 %v428_v29, %v371_v44  ;;  %821 = vrot.lane.b32.xlu1 %v789_v22, %s1171_s9  ;;  %819 = vrot.lane.b32.xlu0 %v788_v25, %s1171_s9  ;;  %v862_v43 = vmul.f32 %v1351_v24, %v1233_v45 }
 0x11b   : > { %v861_v44 = vmul.f32 %v1351_v24, %v1227_v35  ;;  %v863_v45 = vmul.f32 %v1351_v24, %v1235_v46  ;;  %v865_v46 = vmul.f32 %v1351_v24, %v1243_v52 }
 0x11c   : > { %v416_v33 = vpop.permute.xlu1 %415  ;;  %v414_v34 = vpop.permute.xlu0 %413 }
 0x11d   : > { %v429_v28 = vsel %vm425_vm1, %v412_v13, %v414_v34  ;;  %v430_v38 = vsel %vm425_vm1, %v414_v34, %v416_v33 }
 0x11e   : > { %v448_v39 = vadd.f32 %v429_v28, %v372_v6  ;;  %v449_v40 = vadd.f32 %v430_v38, %v373_v7  ;;  %882 = vrot.lane.b32.xlu1 %v860_v37, %s1172_s14  ;;  %952 = vperm.xlu0 %1134, %v180_v32  }
 0x120   : > { %v420_v41 = vpop.permute.xlu1 %419  ;;  %v418_v42 = vpop.permute.xlu0 %417 }
 0x121   : > { %v431_v36 = vsel %vm425_vm1, %v416_v33, %v418_v42  ;;  %v432_v4 = vsel %vm425_vm1, %v418_v42, %v420_v41 }
 0x122   : > { %v450_v47 = vadd.f32 %v431_v36, %v374_v9  ;;  %v451_v48 = vadd.f32 %v432_v4, %v375_v10  ;;  %886 = vrot.lane.b32.xlu1 %v862_v43, %s1172_s14  ;;  %884 = vrot.lane.b32.xlu0 %v861_v44, %s1172_s14 }
 0x124   : > { %v424_v49 = vpop.permute.xlu1 %423  ;;  %v422_v50 = vpop.permute.xlu0 %421 }
 0x125   : > { %v454_v6 = vadd.f32 %v424_v49, %v378_v11  ;;  %v433_v35 = vsel %vm425_vm1, %v420_v41, %v422_v50  ;;  %v434_v7 = vsel %vm425_vm1, %v422_v50, %v424_v49  ;;  %v870_v11 = vmul.f32 %v1351_v24, %v1225_v27 }
 0x126   : > { %v452_v55 = vadd.f32 %v433_v35, %v376_v12  ;;  %v453_v56 = vadd.f32 %v434_v7, %v377_v16  ;;  %890 = vrot.lane.b32.xlu1 %v864_v54, %s1172_s14  ;;  %888 = vrot.lane.b32.xlu0 %v863_v45, %s1172_s14 }
 0x128   : > { %v484_v58 = vpop.permute.xlu1 %483  ;;  %v482_v60 = vpop.permute.xlu0 %481 }
 0x129   : > { %v502_v61 = vsel %vm501_vm2, %v482_v60, %v484_v58 }
 0x12a   : > { %v521_v62 = vadd.f32 %v502_v61, %v445_v15  ;;  %894 = vrot.lane.b32.xlu1 %v866_v51, %s1172_s14  ;;  %892 = vrot.lane.b32.xlu0 %v865_v46, %s1172_s14 }
 0x12c   : > { %v488_v9 = vpop.permute.xlu1 %487  ;;  %v486_v10 = vpop.permute.xlu0 %485 }
 0x12d   : > { %v503_v53 = vsel %vm501_vm2, %v484_v58, %v486_v10  ;;  %v504_v2 = vsel %vm501_vm2, %v486_v10, %v488_v9 }
 0x12e   : > { %v522_v52 = vadd.f32 %v503_v53, %v446_v30  ;;  %v523_v3 = vadd.f32 %v504_v2, %v447_v31  ;;  %898 = vrot.lane.b32.xlu1 %v868_v63, %s1172_s14  ;;  %896 = vrot.lane.b32.xlu0 %v867_v1, %s1172_s14 }
 0x130   : > { %v494_v5 = vpop.permute.xlu1 %493  ;;  %v490_v8 = vpop.permute.xlu0 %489 }
 0x131   : > { %v505_v57 = vsel %vm501_vm2, %v488_v9, %v490_v8 }
 0x132   : > { %v524_v12 = vadd.f32 %v505_v57, %v448_v39  ;;  %902 = vrot.lane.b32.xlu1 %v870_v11, %s1172_s14  ;;  %900 = vrot.lane.b32.xlu0 %v869_v59, %s1172_s14 }
 0x134   : > { %v498_v16 = vpop.permute.xlu1 %497  ;;  %v492_v17 = vpop.permute.xlu0 %491 }
 0x135   : > { %v506_v18 = vsel %vm501_vm2, %v490_v8, %v492_v17  ;;  %v507_v19 = vsel %vm501_vm2, %v492_v17, %v494_v5 }
 0x136   : > { %v525_v20 = vadd.f32 %v506_v18, %v449_v40  ;;  %v526_v21 = vadd.f32 %v507_v19, %v450_v47 }
 0x138   : > { %v558_v15 = vpop.permute.xlu1 %557  ;;  %v496_v27 = vpop.permute.xlu0 %495 }
 0x139   : > { %v508_v13 = vsel %vm501_vm2, %v494_v5, %v496_v27  ;;  %v509_v0 = vsel %vm501_vm2, %v496_v27, %v498_v16 }
 0x13a   : > { %v527_v24 = vadd.f32 %v508_v13, %v451_v48  ;;  %v528_v14 = vadd.f32 %v509_v0, %v452_v55 }
 0x13c   : > { %v562_v22 = vpop.permute.xlu1 %561  ;;  %v500_v25 = vpop.permute.xlu0 %499 }
 0x13d   : > { %v510_v26 = vsel %vm501_vm2, %v498_v16, %v500_v25  ;;  %v530_v29 = vadd.f32 %v500_v25, %v454_v6 }
 0x13e   : > { %v529_v30 = vadd.f32 %v510_v26, %v453_v56 }
 0x140   : > { %v566_v31 = vpop.permute.xlu1 %565  ;;  %v560_v32 = vpop.permute.xlu0 %559 }
 0x141   : > { %v578_v33 = vsel %vm577_vm3, %v558_v15, %v560_v32  ;;  %v579_v34 = vsel %vm577_vm3, %v560_v32, %v562_v22 }
 0x142   : > { %v597_v37 = vadd.f32 %v578_v33, %v521_v62  ;;  %v1473_v28 = vadd.f32 %v579_v34, %v522_v52 }
 0x144   : > { %v570_v38 = vpop.permute.xlu1 %569  ;;  %v564_v39 = vpop.permute.xlu0 %563 }
 0x145   : > { %v580_v40 = vsel %vm577_vm3, %v562_v22, %v564_v39  ;;  %v581_v41 = vsel %vm577_vm3, %v564_v39, %v566_v31 }
 0x146   : > { %v599_v42 = vadd.f32 %v580_v40, %v523_v3  ;;  %v1477_v43 = vadd.f32 %v581_v41, %v524_v12 }
 0x148   : > { %v574_v44 = vpop.permute.xlu1 %573  ;;  %v568_v36 = vpop.permute.xlu0 %567 }
 0x149   : > { %v582_v4 = vsel %vm577_vm3, %v566_v31, %v568_v36  ;;  %v583_v47 = vsel %vm577_vm3, %v568_v36, %v570_v38 }
 0x14a   : > { %v601_v48 = vadd.f32 %v582_v4, %v525_v20  ;;  %v1481_v49 = vadd.f32 %v583_v47, %v526_v21 }
 0x14c   : > { %v634_v50 = vpop.permute.xlu1 %633  ;;  %v572_v54 = vpop.permute.xlu0 %571 }
 0x14d   : > { %v584_v45 = vsel %vm577_vm3, %v570_v38, %v572_v54  ;;  %v585_v6 = vsel %vm577_vm3, %v572_v54, %v574_v44 }
 0x14e   : > { %v603_v35 = vadd.f32 %v584_v45, %v527_v24  ;;  %v604_v7 = vadd.f32 %v585_v6, %v528_v14 }
 0x150   : > { %v638_v55 = vpop.permute.xlu1 %637  ;;  %v576_v56 = vpop.permute.xlu0 %575 }
 0x151   : > { %v586_v58 = vsel %vm577_vm3, %v574_v44, %v576_v56  ;;  %v606_v60 = vadd.f32 %v576_v56, %v530_v29 }
 0x152   : > { %v605_v51 = vadd.f32 %v586_v58, %v529_v30 }
 0x154   : > { %v642_v46 = vpop.permute.xlu1 %641  ;;  %v636_v61 = vpop.permute.xlu0 %635 }
 0x155   : > { %v654_v62 = vsel %vm653_vm4, %v634_v50, %v636_v61  ;;  %v655_v41 = vsel %vm653_vm4, %v636_v61, %v638_v55 }
 0x156   : > { %v673_v9 = vadd.f32 %v654_v62, %v597_v37 }
 0x158   : > { %v646_v10 = vpop.permute.xlu1 %645  ;;  %v640_v63 = vpop.permute.xlu0 %639 }
 0x159   : > { %v656_v1 = vsel %vm653_vm4, %v638_v55, %v640_v63 }
 0x15a   : > { %v1488_v53 = vadd.f32 %v656_v1, %v599_v42  ;;  %v657_v42 = vsel %vm653_vm4, %v640_v63, %v642_v46 }
 0x15b   : > { %v676_v50 = vadd.f32 %v657_v42, %v1477_v43 }
 0x15c   : > { %v650_v2 = vpop.permute.xlu1 %649  ;;  %v644_v52 = vpop.permute.xlu0 %643 }
 0x15d   : > { %v658_v3 = vsel %vm653_vm4, %v642_v46, %v644_v52  ;;  %v659_v44 = vsel %vm653_vm4, %v644_v52, %v646_v10 }
 0x15e   : > { %v1491_v5 = vadd.f32 %v658_v3, %v601_v48  ;;  %v674_v48 = vadd.f32 %v655_v41, %v1473_v28  ;;  %v678_v45 = vadd.f32 %v659_v44, %v1481_v49 }
 0x160   : > { %v721_v8 = vpop.permute.xlu1 %720  ;;  %v648_v11 = vpop.permute.xlu0 %647 }
 0x161   : > { %v660_v59 = vsel %vm653_vm4, %v646_v10, %v648_v11  ;;  %v661_v36 = vsel %vm653_vm4, %v648_v11, %v650_v2 }
 0x162   : > { %v1494_v57 = vadd.f32 %v660_v59, %v603_v35  ;;  %v680_v6 = vadd.f32 %v661_v36, %v604_v7 }
 0x164   : > { %v725_v12 = vpop.permute.xlu1 %724  ;;  %v652_v16 = vpop.permute.xlu0 %651 }
 0x165   : > { %v662_v17 = vsel %vm653_vm4, %v650_v2, %v652_v16  ;;  %v682_v56 = vadd.f32 %v652_v16, %v606_v60 }
 0x166   : > { %v1497_v18 = vadd.f32 %v662_v17, %v605_v51 }
 0x168   : > { %v729_v19 = vpop.permute.xlu1 %728  ;;  %v723_v20 = vpop.permute.xlu0 %722 }
 0x169   : > { %v743_v4 = vsel %vm742_vm5, %v721_v8, %v723_v20  ;;  %v744_v47 = vsel %vm742_vm5, %v723_v20, %v725_v12 }
 0x16a   : > { %v763_v58 = vadd.f32 %v743_v4, %v673_v9  ;;  %v764_v51 = vadd.f32 %v744_v47, %v674_v48 }
 0x16c   : > { %v733_v21 = vpop.permute.xlu1 %732  ;;  %v727_v15 = vpop.permute.xlu0 %726 }
 0x16d   : > { %v745_v46 = vsel %vm742_vm5, %v725_v12, %v727_v15  ;;  %v746_v28 = vsel %vm742_vm5, %v727_v15, %v729_v19 }
 0x16e   : > { %v765_v1 = vadd.f32 %v745_v46, %v1488_v53  ;;  %v766_v8 = vadd.f32 %v746_v28, %v676_v50 }
 0x170   : > { %v1499_v27 = vpop.permute.xlu1 %736  ;;  %v731_v13 = vpop.permute.xlu0 %730 }
 0x171   : > { %v747_v43 = vsel %vm742_vm5, %v729_v19, %v731_v13  ;;  %v748_v62 = vsel %vm742_vm5, %v731_v13, %v733_v21 }
 0x172   : > { %v767_v11 = vadd.f32 %v747_v43, %v1491_v5  ;;  %v768_v16 = vadd.f32 %v748_v62, %v678_v45 }
 0x174   : > { %v1501_v0 = vpop.permute.xlu1 %740  ;;  %v735_v24 = vpop.permute.xlu0 %734 }
 0x175   : > { %v749_v10 = vsel %vm742_vm5, %v733_v21, %v735_v24  ;;  %v750_v49 = vsel %vm742_vm5, %v735_v24, %v1499_v27 }
 0x176   : > { %v769_v17 = vadd.f32 %v749_v10, %v1494_v57  ;;  %v770_v19 = vadd.f32 %v750_v49, %v680_v6 }
 0x178   : > { %v802_v14 = vpop.permute.xlu1 %801  ;;  %v1503_v22 = vpop.permute.xlu0 %738 }
 0x179   : > { %v751_v5 = vsel %vm742_vm5, %v1499_v27, %v1503_v22  ;;  %v752_v42 = vsel %vm742_vm5, %v1503_v22, %v1501_v0 }
 0x17a   : > { %v771_v50 = vadd.f32 %v751_v5, %v1497_v18 }
 0x17c   : > { %v806_v25 = vpop.permute.xlu1 %805  ;;  %v804_v29 = vpop.permute.xlu0 %803 }
 0x17d   : > { %v824_v35 = vsel %vm823_vm6, %v802_v14, %v804_v29  ;;  %v825_v55 = vsel %vm823_vm6, %v804_v29, %v806_v25 }
 0x17e   : > { %v844_v7 = vadd.f32 %v824_v35, %v763_v58  ;;  %v845_v63 = vadd.f32 %v825_v55, %v764_v51  ;;  %v772_v58 = vadd.f32 %v752_v42, %v682_v56 }
 0x180   : > { %v810_v26 = vpop.permute.xlu1 %809  ;;  %v808_v31 = vpop.permute.xlu0 %807 }
 0x181   : > { %v826_v60 = vsel %vm823_vm6, %v806_v25, %v808_v31  ;;  %v827_v2 = vsel %vm823_vm6, %v808_v31, %v810_v26 }
 0x182   : > { %v846_v20 = vadd.f32 %v826_v60, %v765_v1  ;;  %v847_v21 = vadd.f32 %v827_v2, %v766_v8 }
 0x184   : > { %v1505_v30 = vpop.permute.xlu1 %813  ;;  %v812_v33 = vpop.permute.xlu0 %811 }
 0x185   : > { %v828_v53 = vsel %vm823_vm6, %v810_v26, %v812_v33  ;;  %v829_v25 = vsel %vm823_vm6, %v812_v33, %v1505_v30 }
 0x186   : > { %v848_v44 = vadd.f32 %v828_v53, %v767_v11  ;;  %v849_v45 = vadd.f32 %v829_v25, %v768_v16 }
 0x188   : > { %v1507_v32 = vpop.permute.xlu1 %817  ;;  %v1511_v37 = vpop.permute.xlu0 %815 }
 0x189   : > { %v830_v27 = vsel %vm823_vm6, %v1505_v30, %v1511_v37  ;;  %v831_v33 = vsel %vm823_vm6, %v1511_v37, %v1507_v32 }
 0x18a   : > { %v850_v18 = vadd.f32 %v830_v27, %v769_v17  ;;  %v851_v51 = vadd.f32 %v831_v33, %v770_v19 }
 0x18c   : > { %v1509_v34 = vpop.permute.xlu1 %821  ;;  %v1513_v39 = vpop.permute.xlu0 %819 }
 0x18d   : > { %v832_v28 = vsel %vm823_vm6, %v1507_v32, %v1513_v39  ;;  %v833_v49 = vsel %vm823_vm6, %v1513_v39, %v1509_v34 }
 0x18e   : > { %v852_v2 = vadd.f32 %v832_v28, %v771_v50 }
 0x190   : > { %v883_v38 = vpop.permute.xlu1 %882 }
 0x194   : > { %v887_v40 = vpop.permute.xlu1 %886 }
 0x198   : > { %v891_v61 = vpop.permute.xlu1 %890 }
 0x19c   : > { %v895_v15 = vpop.permute.xlu1 %894 }
 0x19d   : > { %v1523_v54 = vpop.permute.xlu0 %952 }
 0x1a0   : > { %v899_v30 = vpop.permute.xlu1 %898 }
 0x1a1   : > { %v885_v9 = vpop.permute.xlu0 %884 }
 0x1a2   : > { %v905_v52 = vsel %vm904_vm7, %v883_v38, %v885_v9  ;;  %v906_v3 = vsel %vm904_vm7, %v885_v9, %v887_v40 }
 0x1a3   : > { %v925_v59 = vadd.f32 %v905_v52, %v844_v7  ;;  %v926_v12 = vadd.f32 %v906_v3, %v845_v63  ;;  %v853_v3 = vadd.f32 %v833_v49, %v772_v58 }
 0x1a4   : > { %v903_v8 = vpop.permute.xlu1 %902 }
 0x1a5   : > { %v940_v13 = vmul.f32 %v1349_v23, %v925_v59  ;;  %v941_v24 = vmul.f32 %v1349_v23, %v926_v12  ;;  %v889_v14 = vpop.permute.xlu0 %888 }
 0x1a6   : > { %v907_v57 = vsel %vm904_vm7, %v887_v40, %v889_v14  ;;  %v908_v29 = vsel %vm904_vm7, %v889_v14, %v891_v61 }
 0x1a7   : > { %v955_v26 = vadd.f32 %v1523_v54, %v940_v13  ;;  %v956_v31 = vadd.f32 %v1523_v54, %v941_v24  ;;  %v927_v38 = vadd.f32 %v907_v57, %v846_v20  ;;  %v928_v41 = vadd.f32 %v908_v29, %v847_v21 }
 0x1a9   : > { %v965_v40 = vmax.f32 %v955_v26, 0.0  ;;  %v966_v36 = vmax.f32 %v956_v31, 0.0  ;;  %v942_v4 = vmul.f32 %v1349_v23, %v927_v38  ;;  %v943_v47 = vmul.f32 %v1349_v23, %v928_v41  ;;  %v893_v48 = vpop.permute.xlu0 %892 }
 0x1aa   : > { %v909_v0 = vsel %vm904_vm7, %v891_v61, %v893_v48  ;;  %v910_v22 = vsel %vm904_vm7, %v893_v48, %v895_v15 }
 0x1ab   : > { %v1091_v37 = vpack.c.bf16 %v966_v36, %v965_v40  ;;  %v957_v6 = vadd.f32 %v1523_v54, %v942_v4  ;;  %v958_v35 = vadd.f32 %v1523_v54, %v943_v47  ;;  %v929_v55 = vadd.f32 %v909_v0, %v848_v44 }
 0x1ac   : > { %v930_v46 = vadd.f32 %v910_v22, %v849_v45 }
 0x1ad   : > { %1015 = vst [vmem:[%s1570_s17] sm:$0xff] %v1091_v37  ;;  %v967_v43 = vmax.f32 %v957_v6, 0.0  ;;  %v968_v61 = vmax.f32 %v958_v35, 0.0  ;;  %v944_v62 = vmul.f32 %v1349_v23, %v929_v55  ;;  %v897_v10 = vpop.permute.xlu0 %896 }
 0x1ae   : > { %v945_v56 = vmul.f32 %v1349_v23, %v930_v46  ;;  %v911_v7 = vsel %vm904_vm7, %v895_v15, %v897_v10  ;;  %v912_v63 = vsel %vm904_vm7, %v897_v10, %v899_v30 }
 0x1af   : > { %v1092_v60 = vpack.c.bf16 %v968_v61, %v967_v43  ;;  %v959_v32 = vadd.f32 %v1523_v54, %v944_v62  ;;  %v931_v9 = vadd.f32 %v911_v7, %v850_v18  ;;  %v932_v1 = vadd.f32 %v912_v63, %v851_v51 }
 0x1b0   : > { %v960_v52 = vadd.f32 %v1523_v54, %v945_v56 }
 0x1b1   : > { %1016 = vst [vmem:[%s1570_s17 + $0x8] sm:$0xff] %v1092_v60  ;;  %v969_v11 = vmax.f32 %v959_v32, 0.0  ;;  %v946_v34 = vmul.f32 %v1349_v23, %v931_v9  ;;  %v947_v39 = vmul.f32 %v1349_v23, %v932_v1  ;;  %v901_v59 = vpop.permute.xlu0 %900 }
 0x1b2   : > { %v970_v12 = vmax.f32 %v960_v52, 0.0  ;;  %v913_v16 = vsel %vm904_vm7, %v899_v30, %v901_v59  ;;  %v914_v17 = vsel %vm904_vm7, %v901_v59, %v903_v8 }
 0x1b3   : > { %v961_v19 = vadd.f32 %v1523_v54, %v946_v34  ;;  %v962_v20 = vadd.f32 %v1523_v54, %v947_v39  ;;  %v933_v21 = vadd.f32 %v913_v16, %v852_v2  ;;  %v934_v53 = vadd.f32 %v914_v17, %v853_v3 }
 0x1b4   : > { %v1093_v15 = vpack.c.bf16 %v970_v12, %v969_v11 }
 0x1b5   : > { %v971_v13 = vmax.f32 %v961_v19, 0.0  ;;  %v972_v24 = vmax.f32 %v962_v20, 0.0  ;;  %v948_v14 = vmul.f32 %v1349_v23, %v933_v21  ;;  %v949_v5 = vmul.f32 %v1349_v23, %v934_v53 }
 0x1b6   : > { %1017 = vst [vmem:[%s1570_s17 + $0x10] sm:$0xff] %v1093_v15 }
 0x1b7   : > { %v1094_v25 = vpack.c.bf16 %v972_v24, %v971_v13  ;;  %v963_v57 = vadd.f32 %v1523_v54, %v948_v14  ;;  %v964_v29 = vadd.f32 %v1523_v54, %v949_v5 }
 0x1b9   : > { %1018 = vst [vmem:[%s1570_s17 + $0x18] sm:$0xff] %v1094_v25  ;;  %v973_v26 = vmax.f32 %v963_v57, 0.0  ;;  %v974_v31 = vmax.f32 %v964_v29, 0.0 }
 0x1bb   : > { %v1095_v38 = vpack.c.bf16 %v974_v31, %v973_v26 }
 0x1bd   : > { %1022 = vst.msk [vmem:[%s1570_s17 + $0x20] sm:$0xff] %vm1021_vm10, %v1095_v38 }
 0x1be PF: > { %s13_s12 = sadd.s32 1, %s1162_s12  }
 0x1bf   : > { %p10_p4 = scmp.ge.s32.totalorder %s13_s12, 4  }
 0x1c1   :  { %12 = sbr.rel (!%p10_p4) target bundleno = 1 (0x1), region = 62 }

// kernel: forward.10
= control target key start
LH: loop header
LB: loop body
LE: loop exit
PB: predicated region body
PF: predicated region fallthrough
CT: control target
= control target key end

     0   :  { %s2063_s12 = smov 0   ;;  %s2346_s0 = inlined_call_operand.vmem [shape: bf16[2,8,362], index: 0, kind: input, shape index: {}]   ;;  %s2347_s1 = inlined_call_operand.vmem [shape: bf16[9,32,8], index: 1, kind: input, shape index: {}]   ;;  %s2348_s2 = inlined_call_operand.vmem [shape: f32[2,32,1], index: 2, kind: input, shape index: {}]   ;;  %s2349_s3 = inlined_call_operand.vmem [shape: bf16[2,32,288], index: 3, kind: output, shape index: {}]  }
   0x1 LB: > { %s1707_s13 = sadd.s32 4294967295, %s2032_s12   ;;  %p1711_p0 = scmp.ge.s32.totalorder %s2032_s12, 1  ;;  %s2032_s12 = sphi %s2063_s12, %s13_s12  }
   0x2   : > { %p137_p1 = scmp.lt.s32.totalorder %s2032_s12, 3 }
   0x4   : > { %p138_p2 = pnand %p1711_p0, %p137_p1 }
   0x5   : > { %p161_p3 = scmp.lt.s32.totalorder (!%p138_p2), %s1707_s13, 1  ;;  %v2034_v0 = vmov (!%p138_p2), 0   ;;  %s2035_s18 = smov (!%p138_p2), 127   ;;  %vm242_vm0 = vcmask (!%p138_p2), 1039360   ;;  %vm252_vm1 = vcmask (!%p138_p2), 1043456   ;;  %v2008_v12 = vld [vmem:[%s2347_s1 + $0x10] sm:$0xff] (!%p138_p2)  }
   0x6   : > { %141 = sbr.rel (%p138_p2) target bundleno = 492 (0x1ec), region = 32  ;;  %294 = vmatprep.mubr.bf16.mxu1 (!%p138_p2), %v2034_v0  ;;  %557 = vmatprep.mubr.bf16.mxu0 (!%p138_p2), %v2034_v0  ;;  %s2036_s19 = smov (!%p138_p2), 126   ;;  %vm507_vm2 = vcmask (!%p138_p2), 1031168   ;;  %v211_v13 = vld [vmem:[%s2348_s2 + $0x8] sm:$0xff] (!%p138_p2)  ;;  %v210_v14 = vld [vmem:[%s2348_s2] sm:$0xff] (!%p138_p2)  ;;  %vm245_vm3 = vcmask (!%p138_p2), 64512  }
   0x7   : > { %2004 = vset.pattern.permute.xlu1 (!%p138_p2), %v2034_v0  ;;  %2003 = vset.pattern.permute.xlu0 (!%p138_p2), %v2034_v0  ;;  %s2037_s20 = smov (!%p138_p2), 92   ;;  %s2038_s21 = smov (!%p138_p2), 91   ;;  %v2133_v21 = vld [vmem:[%s2347_s1 + $0x20] sm:$0xff] (!%p138_p2)   ;;  %vm655_vm4 = vcmask (!%p138_p2), 752640   ;;  %v212_v22 = vld [vmem:[%s2348_s2 + $0x10] sm:$0xff] (!%p138_p2)  ;;  %v213_v23 = vld [vmem:[%s2348_s2 + $0x18] sm:$0xff] (!%p138_p2) }
   0x8   : > { %s2039_s22 = smov (!%p138_p2), 90   ;;  %s2040_s23 = smov (!%p138_p2), 56   ;;  %v2010_v27 = vld [vmem:[%s2347_s1 + $0x18] sm:$0xff] (!%p138_p2)   ;;  %v214_v28 = vld [vmem:[%s2348_s2 + $0x20] sm:$0xff] (!%p138_p2)  ;;  %v215_v29 = vld [vmem:[%s2348_s2 + $0x28] sm:$0xff] (!%p138_p2)  ;;  %vm803_vm5 = vcmask (!%p138_p2), 744448  }
   0x9   : > { %s2041_s24 = smov (!%p138_p2), 55   ;;  %s2042_s25 = smov (!%p138_p2), 54   ;;  %v2166_v34 = vld [vmem:[%s2347_s1 + $0x28] sm:$0xff] (!%p138_p2)   ;;  %v216_v35 = vld [vmem:[%s2348_s2 + $0x30] sm:$0xff] (!%p138_p2)  ;;  %v217_v36 = vld [vmem:[%s2348_s2 + $0x38] sm:$0xff] (!%p138_p2)  ;;  %vm951_vm6 = vcmask (!%p138_p2), 736256  }
   0xa   : > { %v2012_v43 = vld [vmem:[%s2347_s1 + $0x30] sm:$0xff] (!%p138_p2)   ;;  %v2013_v48 = vld [vmem:[%s2347_s1] sm:$0xff] (!%p138_p2)   ;;  %v2014_v50 = vld [vmem:[%s2347_s1 + $0x38] sm:$0xff] (!%p138_p2)   ;;  %vm1099_vm7 = vcmask (!%p138_p2), 457728   ;;  %vm1247_vm8 = vcmask (!%p138_p2), 449536   ;;  %vm1395_vm9 = vcmask (!%p138_p2), 441344  }
   0xb   : > { %v2015_v52 = vld [vmem:[%s2347_s1 + $0x8] sm:$0xff] (!%p138_p2)   ;;  %v2016_v54 = vld [vmem:[%s2347_s1 + $0x40] sm:$0xff] (!%p138_p2)   ;;  %v2018_v62 = vld [vmem:[%s2347_s1 + $0x50] sm:$0xff] (!%p138_p2)   ;;  %vm1644_vm10 = vcmask (!%p138_p2), 257024  }
   0xc   : > { %v2017_v60 = vld [vmem:[%s2347_s1 + $0x48] sm:$0xff] (!%p138_p2)  }
   0xd   : > { %s2351_s13 = smov (!%p161_p3, %s1707_s13), 1 }
   0xe   : > { %s1984_s14 = smul.u32 12, %s2351_s13 }
   0xf   : > { %s1985_s28 = smul.u32 48, %s2351_s13 }
  0x10   : > { %s165_s17 = scalar_lea.vmem %s2346_s0, %s1984_s14 }
  0x11   : > { %v2081_v1 = vld [vmem:[%s165_s17 + $0x8] ss:$0 sps:$4 sm:$0xff]   ;;  %v172_v2 = vld [vmem:[%s165_s17] sm:$0xff]  ;;  %s2332_s4 = scalar_lea.vmem %s2349_s3, %s1985_s28 }
  0x12   : > { %v2083_v3 = vcombine.low %v172_v2, %v172_v2  ;;  %240 = vrot.lane.b32.xlu1 %v2081_v1, %s2035_s18  ;;  %v2087_v4 = vcombine.high %v172_v2, %v172_v2  ;;  %v387_v49 = vsel %vm252_vm1, %v2081_v1, 0 }
  0x14   : > { %236 = vrot.lane.b32.xlu0 %v2083_v3, %s2035_s18  ;;  %v381_v40 = vsel %vm252_vm1, %v2083_v3, 0 }
  0x16   : > { %501 = vrot.lane.b32.xlu1 %v2083_v3, %s2036_s19 }
  0x18   : > { %238 = vrot.lane.b32.xlu0 %v2087_v4, %s2035_s18 }
  0x1a   : > { %505 = vrot.lane.b32.xlu1 %v2081_v1, %s2036_s19 }
  0x1c   : > { %503 = vrot.lane.b32.xlu0 %v2087_v4, %s2036_s19 }
  0x1e   : > { %651 = vrot.lane.b32.xlu1 %v2087_v4, %s2037_s20 }
  0x20   : > { %649 = vrot.lane.b32.xlu0 %v2083_v3, %s2037_s20 }
  0x22   : > { %797 = vrot.lane.b32.xlu1 %v2083_v3, %s2038_s21 }
  0x24   : > { %653 = vrot.lane.b32.xlu0 %v2081_v1, %s2037_s20 }
  0x26   : > { %801 = vrot.lane.b32.xlu1 %v2081_v1, %s2038_s21 }
  0x28   : > { %799 = vrot.lane.b32.xlu0 %v2087_v4, %s2038_s21 }
  0x2a   : > { %947 = vrot.lane.b32.xlu1 %v2087_v4, %s2039_s22 }
  0x2c   : > { %945 = vrot.lane.b32.xlu0 %v2083_v3, %s2039_s22 }
  0x2e   : > { %1093 = vrot.lane.b32.xlu1 %v2083_v3, %s2040_s23 }
  0x30   : > { %949 = vrot.lane.b32.xlu0 %v2081_v1, %s2039_s22 }
  0x32   : > { %1097 = vrot.lane.b32.xlu1 %v2081_v1, %s2040_s23 }
  0x34   : > { %1095 = vrot.lane.b32.xlu0 %v2087_v4, %s2040_s23 }
  0x36   : > { %1243 = vrot.lane.b32.xlu1 %v2087_v4, %s2041_s24 }
  0x38   : > { %1241 = vrot.lane.b32.xlu0 %v2083_v3, %s2041_s24 }
  0x3a   : > { %1389 = vrot.lane.b32.xlu1 %v2083_v3, %s2042_s25 }
  0x3c   : > { %1245 = vrot.lane.b32.xlu0 %v2081_v1, %s2041_s24 }
  0x3e   : > { %1393 = vrot.lane.b32.xlu1 %v2081_v1, %s2042_s25 }
  0x40   : > { %1391 = vrot.lane.b32.xlu0 %v2087_v4, %s2042_s25 }
  0x42   : > { %1534 = vperm.xlu1 %2004, %v211_v13  }
  0x44   : > { %1529 = vperm.xlu0 %2003, %v210_v14  }
  0x46   : > { %1539 = vperm.xlu1 %2004, %v212_v22   ;;  %v2024_v22 = vld [vmem:[%s2347_s1 + $0x80] sm:$0xff]  }
  0x48   : > { %1544 = vperm.xlu0 %2003, %v213_v23  }
  0x4a   : > { %1561 = vperm.xlu1 %2004, %v214_v28  }
  0x4c   : > { %1566 = vperm.xlu0 %2003, %v215_v29  }
  0x4e   : > { %1571 = vperm.xlu1 %2004, %v216_v35  }
  0x50   : > { %1576 = vperm.xlu0 %2003, %v217_v36  }
  0x84   : > { %v241_v5 = vpop.permute.xlu1 %240 }
  0x85   : > { %v260_v19 = vsel %vm252_vm1, %v241_v5, 0 }
  0x86   : > { %v237_v6 = vpop.permute.xlu0 %236 }
  0x88   : > { %v502_v7 = vpop.permute.xlu1 %501 }
  0x8a   : > { %v239_v8 = vpop.permute.xlu0 %238 }
  0x8b   : > { %v244_v9 = vsel %vm242_vm0, %v239_v8, %v241_v5  ;;  %v243_v10 = vsel %vm242_vm0, %v237_v6, %v239_v8  ;;  %v2019_v6 = vld [vmem:[%s2347_s1 + $0x58] sm:$0xff]  }
  0x8c   : > { %1719 = vmatprep.subr.msk.bf16.mxu1 %vm252_vm1, %v244_v9  ;;  %v254_v11 = vsel %vm252_vm1, %v243_v10, 0  ;;  %v2122_v15 = vpop.permute.xlu1 %505  ;;  %v2020_v10 = vld [vmem:[%s2347_s1 + $0x60] sm:$0xff]  }
  0x8d   : > { %263 = vmatpush1.bf16.msra.mxu1 %v254_v11  ;;  %v523_v59 = vsel %vm252_vm1, %v2122_v15, 0 }
  0x8e   : > { %1975 = vmatprep.subr.msk.bf16.mxu1 %vm252_vm1, %v241_v5  ;;  %v504_v16 = vpop.permute.xlu0 %503 }
  0x8f   : > { %v509_v17 = vsel %vm507_vm2, %v504_v16, %v2122_v15  ;;  %v508_v18 = vsel %vm507_vm2, %v502_v7, %v504_v16 }
  0x90   : > { %1720 = vmatmul.mubr.msk.bf16.vlgmr.msra.gmra.mrb[0].mxu1 %vm245_vm3, %v2008_v12  ;;  %1733 = vmatprep.subr.msk.bf16.mxu0 %vm252_vm1, %v509_v17  ;;  %v517_v20 = vsel %vm252_vm1, %v508_v18, 0  ;;  %v652_v24 = vpop.permute.xlu1 %651  ;;  %v2022_v18 = vld [vmem:[%s2347_s1 + $0x70] sm:$0xff]  }
  0x91   : > { %1826 = vmatpush3.bf16.msra.mxu1 %v260_v19  ;;  %526 = vmatpush1.bf16.msra.mxu0 %v517_v20 }
  0x92   : > { %304 = vmatprep.mubr.bf16.mxu1 %v2034_v0  ;;  %v650_v25 = vpop.permute.xlu0 %649  ;;  %1726 = vmatprep.subr.msk.bf16.mxu1 %vm252_vm1, %v2087_v4 }
  0x93   : > { %v656_v26 = vsel %vm655_vm4, %v650_v25, %v652_v24 }
  0x94   : > { %1734 = vmatmul.mubr.msk.bf16.vlgmr.msra.gmra.mrb[0].mxu0 %vm245_vm3, %v2133_v21  ;;  %v798_v30 = vpop.permute.xlu1 %797  ;;  %v665_v31 = vsel %vm252_vm1, %v656_v26, 0 }
  0x95   : > { %567 = vmatprep.mubr.bf16.mxu0 %v2034_v0 }
  0x96   : > { %v2158_v32 = vpop.permute.xlu0 %653 }
  0x97   : > { %v657_v33 = vsel %vm655_vm4, %v652_v24, %v2158_v32  ;;  %v671_v3 = vsel %vm252_vm1, %v2158_v32, 0  ;;  %v2025_v24 = vld [vmem:[%s2347_s1 + $0x88] sm:$0xff]  }
  0x98   : > { %1721 = vmatmul.mubr.msk.bf16.gmra.mrb[4].mxu1 %vm245_vm3, %v2010_v27  ;;  %1740 = vmatprep.subr.msk.bf16.mxu0 %vm252_vm1, %v657_v33  ;;  %v2176_v37 = vpop.permute.xlu1 %801 }
  0x99   : > { %1827 = vmatprep.mubr.msk.bf16.mxu1 %vm245_vm3, %v2008_v12  ;;  %674 = vmatpush1.bf16.msra.mxu0 %v665_v31  ;;  %v819_v9 = vsel %vm252_vm1, %v2176_v37, 0 }
  0x9a   : > { %v800_v38 = vpop.permute.xlu0 %799 }
  0x9b   : > { %v805_v39 = vsel %vm803_vm5, %v800_v38, %v2176_v37  ;;  %v804_v42 = vsel %vm803_vm5, %v798_v30, %v800_v38 }
  0x9c   : > { %1735 = vmatmul.mubr.msk.bf16.gmra.mrb[4].mxu0 %vm245_vm3, %v2166_v34  ;;  %1747 = vmatprep.subr.msk.bf16.mxu0 %vm252_vm1, %v805_v39  ;;  %v948_v44 = vpop.permute.xlu1 %947  ;;  %v813_v45 = vsel %vm252_vm1, %v804_v42, 0 }
  0x9d   : > { %705 = vmatprep.mubr.bf16.mxu0 %v2034_v0 }
  0x9e   : > { %v946_v41 = vpop.permute.xlu0 %945 }
  0x9f   : > { %v952_v53 = vsel %vm951_vm6, %v946_v41, %v948_v44 }
  0xa0   : > { %1828 = vmatmul.mubr.msk.bf16.vlgmr.msra.gmra.mrb[8].mxu1 %vm245_vm3, %v2010_v27  ;;  %v1094_v51 = vpop.permute.xlu1 %1093  ;;  %v961_v57 = vsel %vm252_vm1, %v952_v53, 0 }
  0xa1   : > { %390 = vmatpush1.bf16.msra.mxu1 %v381_v40  ;;  %421 = vmatprep.mubr.bf16.mxu1 %v2034_v0 }
  0xa2   : > { %1976 = vmatprep.subr.msk.bf16.mxu1 %vm252_vm1, %v2081_v1  ;;  %v2193_v46 = vpop.permute.xlu0 %949 }
  0xa3   : > { %v953_v47 = vsel %vm951_vm6, %v948_v44, %v2193_v46  ;;  %v967_v16 = vsel %vm252_vm1, %v2193_v46, 0 }
  0xa4   : > { %1741 = vmatmul.mubr.msk.bf16.vlgmr.msra.gmra.mrb[0].mxu0 %vm245_vm3, %v2012_v43  ;;  %v2222_v55 = vpop.permute.xlu1 %1097 }
  0xa5   : > { %715 = vmatprep.mubr.bf16.mxu0 %v2034_v0  ;;  %822 = vmatpush1.bf16.msra.mxu0 %v813_v45  ;;  %v1115_v20 = vsel %vm252_vm1, %v2222_v55, 0 }
  0xa6   : > { %1754 = vmatprep.subr.msk.bf16.mxu0 %vm252_vm1, %v953_v47  ;;  %v1096_v56 = vpop.permute.xlu0 %1095 }
  0xa7   : > { %v1101_v58 = vsel %vm1099_vm7, %v1096_v56, %v2222_v55  ;;  %v1100_v63 = vsel %vm1099_vm7, %v1094_v51, %v1096_v56 }
  0xa8   : > { %1727 = vmatmul.mubr.msk.bf16.vlgmr.msra.gmra.mrb[0].mxu1 %vm245_vm3, %v2013_v48  ;;  %v1244_v1 = vpop.permute.xlu1 %1243  ;;  %v1109_v4 = vsel %vm252_vm1, %v1100_v63, 0 }
  0xa9   : > { %1832 = vmatpush3.bf16.msra.mxu1 %v387_v49  ;;  %431 = vmatprep.mubr.bf16.mxu1 %v2034_v0 }
  0xaa   : > { %1977 = vmatprep.subr.msk.bf16.mxu1 %vm252_vm1, %v2122_v15  ;;  %v1242_v61 = vpop.permute.xlu0 %1241  ;;  %v2021_v15 = vld [vmem:[%s2347_s1 + $0x68] sm:$0xff]  }
  0xab   : > { %v1248_v8 = vsel %vm1247_vm8, %v1242_v61, %v1244_v1 }
  0xac   : > { %1742 = vmatmul.mubr.msk.bf16.gmra.mrb[4].mxu0 %vm245_vm3, %v2014_v50  ;;  %v1390_v7 = vpop.permute.xlu1 %1389  ;;  %v1257_v13 = vsel %vm252_vm1, %v1248_v8, 0 }
  0xad   : > { %853 = vmatprep.mubr.bf16.mxu0 %v2034_v0 }
  0xae   : > { %v1246_v2 = vpop.permute.xlu0 %1245 }
  0xaf   : > { %v1249_v5 = vsel %vm1247_vm8, %v1244_v1, %v1246_v2  ;;  %v1263_v23 = vsel %vm252_vm1, %v1246_v2, 0 }
  0xb0   : > { %1728 = vmatmul.mubr.msk.bf16.gmra.mrb[4].mxu1 %vm245_vm3, %v2015_v52  ;;  %v1394_v11 = vpop.permute.xlu1 %1393 }
  0xb1   : > { %1833 = vmatprep.mubr.msk.bf16.mxu1 %vm245_vm3, %v2013_v48  ;;  %v1411_v25 = vsel %vm252_vm1, %v1394_v11, 0 }
  0xb2   : > { %v1392_v12 = vpop.permute.xlu0 %1391 }
  0xb3   : > { %v1397_v14 = vsel %vm1395_vm9, %v1392_v12, %v1394_v11  ;;  %v1396_v17 = vsel %vm1395_vm9, %v1390_v7, %v1392_v12 }
  0xb4   : > { %1748 = vmatmul.mubr.msk.bf16.vlgmr.msra.gmra.mrb[0].mxu0 %vm245_vm3, %v2016_v54  ;;  %v1405_v19 = vsel %vm252_vm1, %v1396_v17, 0 }
  0xb5   : > { %863 = vmatprep.mubr.bf16.mxu0 %v2034_v0  ;;  %970 = vmatpush1.bf16.msra.mxu0 %v961_v57 }
  0xb6   : > { %1761 = vmatprep.subr.msk.bf16.mxu0 %vm252_vm1, %v1101_v58 }
  0xb8   : > { %1834 = vmatmul.mubr.msk.bf16.vlgmr.msra.gmra.mrb[8].mxu1 %vm245_vm3, %v2015_v52 }
  0xb9   : > { %1838 = vmatpush3.bf16.msra.mxu1 %v523_v59  ;;  %1839 = vmatprep.mubr.msk.bf16.mxu1 %vm245_vm3, %v2133_v21  ;;  %v2023_v21 = vld [vmem:[%s2347_s1 + $0x78] sm:$0xff]  }
  0xba   : > { %1978 = vmatprep.subr.msk.bf16.mxu1 %vm252_vm1, %v2158_v32 }
  0xbc   : > { %1749 = vmatmul.mubr.msk.bf16.gmra.mrb[4].mxu0 %vm245_vm3, %v2017_v60 }
  0xbd   : > { %1001 = vmatprep.mubr.bf16.mxu0 %v2034_v0 }
  0xc1   : > { %v2324_v33 = vpop.permute.xlu1 %1534 }
  0xc4   : > { %1840 = vmatmul.mubr.msk.bf16.vlgmr.msra.gmra.mrb[8].mxu1 %vm245_vm3, %v2166_v34  ;;  %1755 = vmatmul.mubr.msk.bf16.vlgmr.msra.gmra.mrb[0].mxu0 %vm245_vm3, %v2018_v62  ;;  %v1530_v34 = vpop.permute.xlu0 %1529 }
  0xc5   : > { %1844 = vmatpush3.bf16.msra.mxu1 %v671_v3  ;;  %1011 = vmatprep.mubr.bf16.mxu0 %v2034_v0  ;;  %v1540_v35 = vpop.permute.xlu1 %1539 }
  0xc6   : > { %1979 = vmatprep.subr.msk.bf16.mxu1 %vm252_vm1, %v2176_v37  ;;  %1845 = vmatprep.mubr.msk.bf16.mxu1 %vm245_vm3, %v2012_v43 }
  0xc7   : > { %1118 = vmatpush1.bf16.msra.mxu0 %v1109_v4 }
  0xc8   : > { %1768 = vmatprep.subr.msk.bf16.mxu0 %vm252_vm1, %v1249_v5  ;;  %v1545_v36 = vpop.permute.xlu0 %1544 }
  0xc9   : > { %v1562_v42 = vpop.permute.xlu1 %1561 }
  0xcc   : > { %1756 = vmatmul.mubr.msk.bf16.gmra.mrb[4].mxu0 %vm245_vm3, %v2019_v6  ;;  %v1567_v48 = vpop.permute.xlu0 %1566 }
  0xcd   : > { %1149 = vmatprep.mubr.bf16.mxu0 %v2034_v0 }
  0xd0   : > { %1846 = vmatmul.mubr.msk.bf16.vlgmr.msra.gmra.mrb[8].mxu1 %vm245_vm3, %v2014_v50 }
  0xd1   : > { %1850 = vmatpush3.bf16.msra.mxu1 %v819_v9  ;;  %1851 = vmatprep.mubr.msk.bf16.mxu1 %vm245_vm3, %v2016_v54  ;;  %v1577_v9 = vpop.permute.xlu0 %1576 }
  0xd2   : > { %1980 = vmatprep.subr.msk.bf16.mxu1 %vm252_vm1, %v2193_v46 }
  0xd4   : > { %1762 = vmatmul.mubr.msk.bf16.vlgmr.msra.gmra.mrb[0].mxu0 %vm245_vm3, %v2020_v10 }
  0xd5   : > { %1159 = vmatprep.mubr.bf16.mxu0 %v2034_v0  ;;  %1266 = vmatpush1.bf16.msra.mxu0 %v1257_v13 }
  0xd6   : > { %1775 = vmatprep.subr.msk.bf16.mxu0 %vm252_vm1, %v1397_v14 }
  0xdc   : > { %1763 = vmatmul.mubr.msk.bf16.gmra.mrb[4].mxu0 %vm245_vm3, %v2021_v15  ;;  %1852 = vmatmul.mubr.msk.bf16.vlgmr.msra.gmra.mrb[8].mxu1 %vm245_vm3, %v2017_v60 }
  0xdd   : > { %1856 = vmatpush3.bf16.msra.mxu1 %v967_v16  ;;  %1297 = vmatprep.mubr.bf16.mxu0 %v2034_v0 }
  0xde   : > { %1981 = vmatprep.subr.msk.bf16.mxu1 %vm252_vm1, %v2222_v55  ;;  %1857 = vmatprep.mubr.msk.bf16.mxu1 %vm245_vm3, %v2018_v62 }
  0xe4   : > { %1769 = vmatmul.mubr.msk.bf16.vlgmr.msra.gmra.mrb[0].mxu0 %vm245_vm3, %v2022_v18 }
  0xe5   : > { %1307 = vmatprep.mubr.bf16.mxu0 %v2034_v0  ;;  %1414 = vmatpush1.bf16.msra.mxu0 %v1405_v19 }
  0xe8   : > { %1858 = vmatmul.mubr.msk.bf16.vlgmr.msra.gmra.mrb[8].mxu1 %vm245_vm3, %v2019_v6 }
  0xe9   : > { %1862 = vmatpush3.bf16.msra.mxu1 %v1115_v20  ;;  %1863 = vmatprep.mubr.msk.bf16.mxu1 %vm245_vm3, %v2020_v10 }
  0xea   : > { %1982 = vmatprep.subr.msk.bf16.mxu1 %vm252_vm1, %v1246_v2  ;;  %v1572_v2 = vpop.permute.xlu1 %1571 }
  0xec   : > { %1770 = vmatmul.mubr.msk.bf16.gmra.mrb[4].mxu0 %vm245_vm3, %v2023_v21 }
  0xed   : > { %1445 = vmatprep.mubr.bf16.mxu0 %v2034_v0 }
  0xf4   : > { %1864 = vmatmul.mubr.msk.bf16.vlgmr.msra.gmra.mrb[8].mxu1 %vm245_vm3, %v2021_v15  ;;  %1776 = vmatmul.mubr.msk.bf16.vlgmr.msra.gmra.mrb[0].mxu0 %vm245_vm3, %v2024_v22 }
  0xf5   : > { %1868 = vmatpush3.bf16.msra.mxu1 %v1263_v23  ;;  %1455 = vmatprep.mubr.bf16.mxu0 %v2034_v0 }
  0xf6   : > { %1983 = vmatprep.subr.msk.bf16.mxu1 %vm252_vm1, %v1394_v11  ;;  %1869 = vmatprep.mubr.msk.bf16.mxu1 %vm245_vm3, %v2022_v18 }
  0xfc   : > { %1777 = vmatmul.mubr.msk.bf16.gmra.mrb[4].mxu0 %vm245_vm3, %v2025_v24 }
 0x100   : > { %1870 = vmatmul.mubr.msk.bf16.vlgmr.msra.gmra.mrb[8].mxu1 %vm245_vm3, %v2023_v21 }
 0x101   : > { %1874 = vmatpush3.bf16.msra.mxu1 %v1411_v25  ;;  %1875 = vmatprep.mubr.msk.bf16.mxu1 %vm245_vm3, %v2024_v22 }
 0x10c   : > { %1876 = vmatmul.mubr.msk.bf16.vlgmr.msra.gmra.mrb[8].mxu1 %vm245_vm3, %v2025_v24 }
 0x17b   : > { %v423_v0 = vpop.f32.mrb[0].mxu1 }
 0x17c   : > { %v425_v26 = vpop.f32.mrb[1].mxu1 }
 0x17d   : > { %v427_v27 = vpop.f32.mrb[2].mxu1 }
 0x17e   : > { %v429_v28 = vpop.f32.mrb[3].mxu1 }
 0x183   : > { %v433_v29 = vpop.f32.mrb[4].mxu1 }
 0x184   : > { %v435_v30 = vpop.f32.mrb[5].mxu1 }
 0x185   : > { %v437_v31 = vpop.f32.mrb[6].mxu1 }
 0x186   : > { %v439_v32 = vpop.f32.mrb[7].mxu1 }
 0x1c7   : > { %v1447_v37 = vpop.f32.mrb[0].mxu0 }
 0x1c8   : > { %v1879_v38 = vadd.f32 %v1447_v37, %v423_v0  ;;  %v1449_v39 = vpop.f32.mrb[1].mxu0 }
 0x1c9   : > { %v1880_v40 = vadd.f32 %v1449_v39, %v425_v26  ;;  %v1451_v41 = vpop.f32.mrb[2].mxu0 }
 0x1ca   : > { %v1547_v43 = vmul.f32 %v1879_v38, %v1530_v34  ;;  %v1881_v44 = vadd.f32 %v1451_v41, %v427_v27  ;;  %v1453_v45 = vpop.f32.mrb[3].mxu0 }
 0x1cb   : > { %v1548_v46 = vmul.f32 %v1880_v40, %v1530_v34  ;;  %v1882_v47 = vadd.f32 %v1453_v45, %v429_v28 }
 0x1cc   : > { %v1550_v49 = vmul.f32 %v1881_v44, %v2324_v33  ;;  %v1579_v50 = vadd.f32 %v1562_v42, %v1547_v43 }
 0x1cd   : > { %v1551_v51 = vmul.f32 %v1882_v47, %v2324_v33  ;;  %v1580_v52 = vadd.f32 %v1562_v42, %v1548_v46 }
 0x1ce   : > { %v1591_v53 = vmax.f32 %v1579_v50, 0.0  ;;  %v1582_v54 = vadd.f32 %v1567_v48, %v1550_v49 }
 0x1cf   : > { %v1592_v55 = vmax.f32 %v1580_v52, 0.0  ;;  %v1583_v56 = vadd.f32 %v1567_v48, %v1551_v51  ;;  %v1457_v57 = vpop.f32.mrb[4].mxu0 }
 0x1d0   : > { %v1594_v58 = vmax.f32 %v1582_v54, 0.0  ;;  %v1883_v59 = vadd.f32 %v1457_v57, %v433_v29  ;;  %v1459_v60 = vpop.f32.mrb[5].mxu0 }
 0x1d1   : > { %v1790_v61 = vpack.c.bf16 %v1592_v55, %v1591_v53  ;;  %v1595_v62 = vmax.f32 %v1583_v56, 0.0  ;;  %v1884_v63 = vadd.f32 %v1459_v60, %v435_v30  ;;  %v1461_v1 = vpop.f32.mrb[6].mxu0 }
 0x1d2   : > { %v1553_v3 = vmul.f32 %v1883_v59, %v1540_v35  ;;  %v1885_v4 = vadd.f32 %v1461_v1, %v437_v31  ;;  %v1463_v5 = vpop.f32.mrb[7].mxu0 }
 0x1d3   : > { %1643 = vst [vmem:[%s2332_s4] sm:$0xff] %v1790_v61  ;;  %v1792_v6 = vpack.c.bf16 %v1595_v62, %v1594_v58  ;;  %v1554_v7 = vmul.f32 %v1884_v63, %v1540_v35  ;;  %v1886_v8 = vadd.f32 %v1463_v5, %v439_v32 }
 0x1d4   : > { %v1556_v10 = vmul.f32 %v1885_v4, %v1545_v36  ;;  %v1585_v11 = vadd.f32 %v1572_v2, %v1553_v3 }
 0x1d5   : > { %1646 = vst [vmem:[%s2332_s4 + $0xc] sm:$0xff] %v1792_v6  ;;  %v1557_v12 = vmul.f32 %v1886_v8, %v1545_v36  ;;  %v1586_v13 = vadd.f32 %v1572_v2, %v1554_v7 }
 0x1d6   : > { %v1597_v14 = vmax.f32 %v1585_v11, 0.0  ;;  %v1588_v15 = vadd.f32 %v1577_v9, %v1556_v10 }
 0x1d7   : > { %v1598_v16 = vmax.f32 %v1586_v13, 0.0  ;;  %v1589_v17 = vadd.f32 %v1577_v9, %v1557_v12 }
 0x1d8   : > { %v1600_v18 = vmax.f32 %v1588_v15, 0.0 }
 0x1d9   : > { %v1794_v19 = vpack.c.bf16 %v1598_v16, %v1597_v14  ;;  %v1601_v20 = vmax.f32 %v1589_v17, 0.0 }
 0x1db   : > { %1648 = vst [vmem:[%s2332_s4 + $0x18] sm:$0xff] %v1794_v19  ;;  %v1796_v21 = vpack.c.bf16 %v1601_v20, %v1600_v18 }
 0x1dd   : > { %1650 = vst [vmem:[%s2332_s4 + $0x24] sm:$0xff] %v1796_v21 }
 0x1df   : > { %v1877_v22 = vpop.f32.mrb[8].mxu1 }
 0x1e0   : > { %v1555_v23 = vmul.f32 %v1877_v22, %v1540_v35  ;;  %v1500_v24 = vpop.f32.mrb[9].mxu1 }
 0x1e1   : > { %v1549_v25 = vmul.f32 %v1530_v34, %v1500_v24  ;;  %v1878_v0 = vpop.f32.mrb[10].mxu1 }
 0x1e2   : > { %v1587_v26 = vadd.f32 %v1572_v2, %v1555_v23  ;;  %v1558_v27 = vmul.f32 %v1878_v0, %v1545_v36  ;;  %v1503_v28 = vpop.f32.mrb[11].mxu1 }
 0x1e3   : > { %v1581_v29 = vadd.f32 %v1562_v42, %v1549_v25  ;;  %v1552_v30 = vmul.f32 %v2324_v33, %v1503_v28 }
 0x1e4   : > { %v1599_v31 = vmax.f32 %v1587_v26, 0.0  ;;  %v1590_v32 = vadd.f32 %v1577_v9, %v1558_v27 }
 0x1e5   : > { %v1593_v37 = vmax.f32 %v1581_v29, 0.0  ;;  %v1584_v38 = vadd.f32 %v1567_v48, %v1552_v30 }
 0x1e6   : > { %v1795_v39 = vpack.c.bf16 %v1599_v31, %v1599_v31  ;;  %v1602_v35 = vmax.f32 %v1590_v32, 0.0 }
 0x1e7   : > { %v1791_v40 = vpack.c.bf16 %v1593_v37, %v1593_v37  ;;  %v1596_v34 = vmax.f32 %v1584_v38, 0.0 }
 0x1e8   : > { %1649 = vst.msk [vmem:[%s2332_s4 + $0x20] sm:$0xf] %vm1644_vm10, %v1795_v39  ;;  %v1797_v41 = vpack.c.bf16 %v1602_v35, %v1602_v35 }
 0x1e9   : > { %1645 = vst.msk [vmem:[%s2332_s4 + $0x8] sm:$0xf] %vm1644_vm10, %v1791_v40  ;;  %v1793_v43 = vpack.c.bf16 %v1596_v34, %v1596_v34 }
 0x1ea   : > { %1651 = vst.msk [vmem:[%s2332_s4 + $0x2c] sm:$0xf] %vm1644_vm10, %v1797_v41 }
 0x1eb   : > { %1647 = vst.msk [vmem:[%s2332_s4 + $0x14] sm:$0xf] %vm1644_vm10, %v1793_v43 }
 0x1ec PF: > { %s13_s12 = sadd.s32 1, %s2032_s12  }
 0x1ed   : > { %p10_p4 = scmp.ge.s32.totalorder %s13_s12, 4  }
 0x1ef   :  { %12 = sbr.rel (!%p10_p4) target bundleno = 1 (0x1), region = 62 }

// kernel: forward.11
= control target key start
LH: loop header
LB: loop body
LE: loop exit
PB: predicated region body
PF: predicated region fallthrough
CT: control target
= control target key end

     0   :  { %s1069_s12 = smov 0   ;;  %s1196_s0 = inlined_call_operand.vmem [shape: bf16[2,32,130], index: 0, kind: input, shape index: {}]   ;;  %s1197_s1 = inlined_call_operand.vmem [shape: bf16[9,16,32], index: 1, kind: input, shape index: {}]   ;;  %s1198_s2 = inlined_call_operand.vmem [shape: f32[2,16,1], index: 2, kind: input, shape index: {}]   ;;  %s1199_s3 = inlined_call_operand.vmem [shape: bf16[2,16,64], index: 3, kind: output, shape index: {}]  }
   0x1 LB: > { %s826_s13 = sadd.s32 4294967295, %s1036_s12   ;;  %p830_p0 = scmp.ge.s32.totalorder %s1036_s12, 1  ;;  %s1036_s12 = sphi %s1069_s12, %s13_s12  }
   0x2   : > { %p137_p1 = scmp.lt.s32.totalorder %s1036_s12, 3 }
   0x4   : > { %p138_p2 = pnand %p830_p0, %p137_p1 }
   0x5   : > { %p161_p3 = scmp.lt.s32.totalorder (!%p138_p2), %s826_s13, 1  ;;  %v1038_v0 = vmov (!%p138_p2), 0.0   ;;  %vm1039_vm0 = vmmov (!%p138_p2), 0   ;;  %s1040_s18 = smov (!%p138_p2), 95   ;;  %v195_v5 = vld [vmem:[%s1198_s2 + $0x8] sm:$0xff] (!%p138_p2)  ;;  %v194_v6 = vld [vmem:[%s1198_s2] sm:$0xff] (!%p138_p2) }
   0x6   : > { %141 = sbr.rel (%p138_p2) target bundleno = 412 (0x19c), region = 32  ;;  %924 = vmatprep.subr.bf16.mxu0 (!%p138_p2), %v1038_v0  ;;  %892 = vmatprep.subr.bf16.mxu1 (!%p138_p2), %v1038_v0  ;;  %s1041_s19 = smov (!%p138_p2), 127   ;;  %v1048_v7 = vmov (!%p138_p2), 0   ;;  %v196_v8 = vld [vmem:[%s1198_s2 + $0x10] sm:$0xff] (!%p138_p2)  ;;  %v197_v9 = vld [vmem:[%s1198_s2 + $0x18] sm:$0xff] (!%p138_p2)  ;;  %v1021_v14 = vld [vmem:[%s1197_s1 + $0x20] sm:$0xff] (!%p138_p2)  }
   0x7   : > { %928 = vmatprep.mubr.msk.bf16.mxu0 (!%p138_p2), %vm1039_vm0, %v1038_v0  ;;  %896 = vmatprep.mubr.msk.bf16.mxu1 (!%p138_p2), %vm1039_vm0, %v1038_v0  ;;  %s1042_s20 = smov (!%p138_p2), 94   ;;  %s1043_s21 = smov (!%p138_p2), 64   ;;  %vm219_vm1 = vcmask (!%p138_p2), 261120   ;;  %v1022_v16 = vld [vmem:[%s1197_s1 + $0x8] sm:$0xff] (!%p138_p2)   ;;  %v1024_v23 = vld [vmem:[%s1197_s1] sm:$0xff] (!%p138_p2)   ;;  %vm619_vm2 = vcmask (!%p138_p2), 515072  }
   0x8   : > { %s1044_s22 = smov (!%p138_p2), 63   ;;  %s1045_s23 = smov (!%p138_p2), 126   ;;  %1014 = vset.pattern.permute.xlu1 (!%p138_p2), %v1048_v7  ;;  %1013 = vset.pattern.permute.xlu0 (!%p138_p2), %v1048_v7  ;;  %v1023_v20 = vld [vmem:[%s1197_s1 + $0x28] sm:$0xff] (!%p138_p2)   ;;  %v1025_v28 = vld [vmem:[%s1197_s1 + $0x30] sm:$0xff] (!%p138_p2)   ;;  %vm683_vm3 = vcmask (!%p138_p2), 506880   ;;  %v1027_v37 = vld [vmem:[%s1197_s1 + $0x38] sm:$0xff] (!%p138_p2)  }
   0x9   : > { %s1046_s24 = smov (!%p138_p2), 62   ;;  %s1047_s25 = smov (!%p138_p2), 96   ;;  %v1026_v32 = vld [vmem:[%s1197_s1 + $0x10] sm:$0xff] (!%p138_p2)   ;;  %v1028_v40 = vld [vmem:[%s1197_s1 + $0x18] sm:$0xff] (!%p138_p2)   ;;  %v1029_v42 = vld [vmem:[%s1197_s1 + $0x40] sm:$0xff] (!%p138_p2)   ;;  %vm768_vm4 = vcmask (!%p138_p2), 519168  }
   0xd   : > { %s1201_s13 = smov (!%p161_p3, %s826_s13), 1 }
   0xe   : > { %s861_s14 = sshll.u32 %s1201_s13, 5  ;;  %s862_s27 = sshll.u32 %s1201_s13, 3 }
   0xf   : > { %s165_s17 = scalar_lea.vmem %s1196_s0, %s861_s14  ;;  %s170_s30 = scalar_lea.vmem %s1199_s3, %s862_s27 }
  0x10   : > { %v1089_v1 = vld [vmem:[%s165_s17] ss:$8 sps:$4 sm:$0xff]   ;;  %v1093_v2 = vld [vmem:[%s165_s17 + $0x10] ss:$8 sps:$4 sm:$0xff]   ;;  %v1019_v3 = vld [vmem:[%s165_s17 + $0x4] ss:$8 sps:$4 sm:$0xff]  }
  0x11   : > { %434 = vrot.lane.b32.xlu0 %v1089_v1, %s1040_s18  ;;  %213 = vrot.lane.b32.xlu1 %v1089_v1, %s1041_s19  ;;  %v1020_v4 = vld [vmem:[%s165_s17 + $0x14] ss:$8 sps:$4 sm:$0xff]  }
  0x15   : > { %436 = vrot.lane.b32.xlu0 %v1093_v2, %s1040_s18  ;;  %491 = vrot.lane.b32.xlu1 %v1089_v1, %s1042_s20 }
  0x19   : > { %215 = vrot.lane.b32.xlu0 %v1093_v2, %s1041_s19  ;;  %493 = vrot.lane.b32.xlu1 %v1093_v2, %s1042_s20 }
  0x1d   : > { %550 = vrot.lane.b32.xlu1 %v1093_v2, %s1043_s21  ;;  %548 = vrot.lane.b32.xlu0 %v1089_v1, %s1043_s21 }
  0x21   : > { %613 = vrot.lane.b32.xlu1 %v1019_v3, %s1044_s22  ;;  %611 = vrot.lane.b32.xlu0 %v1089_v1, %s1044_s22 }
  0x25   : > { %615 = vrot.lane.b32.xlu1 %v1093_v2, %s1044_s22  ;;  %320 = vrot.lane.b32.xlu0 %v1089_v1, %s1045_s23 }
  0x29   : > { %322 = vrot.lane.b32.xlu1 %v1093_v2, %s1045_s23  ;;  %617 = vrot.lane.b32.xlu0 %v1020_v4, %s1044_s22 }
  0x2d   : > { %677 = vrot.lane.b32.xlu1 %v1019_v3, %s1046_s24  ;;  %675 = vrot.lane.b32.xlu0 %v1089_v1, %s1046_s24 }
  0x31   : > { %679 = vrot.lane.b32.xlu1 %v1093_v2, %s1046_s24  ;;  %377 = vrot.lane.b32.xlu0 %v1089_v1, %s1047_s25 }
  0x35   : > { %379 = vrot.lane.b32.xlu1 %v1093_v2, %s1047_s25  ;;  %681 = vrot.lane.b32.xlu0 %v1020_v4, %s1046_s24 }
  0x39   : > { %741 = vperm.xlu1 %1014, %v195_v5   ;;  %736 = vperm.xlu0 %1013, %v194_v6  }
  0x3d   : > { %748 = vperm.xlu1 %1014, %v196_v8   ;;  %753 = vperm.xlu0 %1013, %v197_v9  }
  0x83   : > { %v435_v10 = vpop.permute.xlu0 %434  ;;  %v214_v11 = vpop.permute.xlu1 %213 }
  0x84   : > { %925 = vmatpush3.bf16.msra.mxu0 %v435_v10  ;;  %893 = vmatpush3.bf16.msra.mxu1 %v214_v11 }
  0x85   : > { %926 = vmatprep.subr.bf16.mxu0 %v1038_v0  ;;  %894 = vmatprep.subr.bf16.mxu1 %v1038_v0 }
  0x87   : > { %v437_v12 = vpop.permute.xlu0 %436  ;;  %v492_v13 = vpop.permute.xlu1 %491 }
  0x88   : > { %927 = vmatpush3.bf16.msra.mxu0 %v437_v12 }
  0x89   : > { %932 = vmatprep.subr.bf16.mxu0 %v1038_v0 }
  0x8b   : > { %929 = vmatmul.mubr.msk.bf16.vlgmr.msra.gmra.mrb[0].mxu0 %vm219_vm1, %v1021_v14  ;;  %v216_v15 = vpop.permute.xlu0 %215  ;;  %v494_v17 = vpop.permute.xlu1 %493 }
  0x8c   : > { %895 = vmatpush3.bf16.msra.mxu1 %v216_v15  ;;  %933 = vmatpush3.bf16.msra.mxu0 %v492_v13 }
  0x8d   : > { %934 = vmatprep.subr.bf16.mxu0 %v1038_v0  ;;  %900 = vmatprep.subr.bf16.mxu1 %v1038_v0 }
  0x8e   : > { %936 = vmatprep.mubr.msk.bf16.mxu0 %vm1039_vm0, %v1038_v0 }
  0x8f   : > { %897 = vmatmul.mubr.msk.bf16.vlgmr.msra.gmra.mrb[0].mxu1 %vm219_vm1, %v1022_v16  ;;  %v551_v18 = vpop.permute.xlu1 %550  ;;  %v549_v19 = vpop.permute.xlu0 %548 }
  0x90   : > { %935 = vmatpush3.bf16.msra.mxu0 %v494_v17  ;;  %901 = vmatpush3.bf16.msra.mxu1 %v1089_v1 }
  0x91   : > { %902 = vmatprep.subr.bf16.mxu1 %v1038_v0  ;;  %940 = vmatprep.subr.bf16.mxu0 %v1038_v0 }
  0x92   : > { %904 = vmatprep.mubr.msk.bf16.mxu1 %vm1039_vm0, %v1038_v0 }
  0x93   : > { %v614_v21 = vpop.permute.xlu1 %613  ;;  %v612_v22 = vpop.permute.xlu0 %611 }
  0x94   : > { %903 = vmatpush3.bf16.msra.mxu1 %v1093_v2  ;;  %v620_v31 = vsel %vm619_vm2, %v612_v22, %v614_v21 }
  0x95   : > { %908 = vmatprep.subr.bf16.mxu1 %v1038_v0 }
  0x97   : > { %937 = vmatmul.mubr.msk.bf16.vlgmr.msra.gmra.mrb[0].mxu0 %vm219_vm1, %v1023_v20  ;;  %v616_v24 = vpop.permute.xlu1 %615  ;;  %v321_v25 = vpop.permute.xlu0 %320 }
  0x98   : > { %941 = vmatpush3.bf16.msra.mxu0 %v549_v19  ;;  %944 = vmatprep.mubr.msk.bf16.mxu0 %vm1039_vm0, %v1038_v0 }
  0x99   : > { %942 = vmatprep.subr.bf16.mxu0 %v1038_v0 }
  0x9b   : > { %905 = vmatmul.mubr.msk.bf16.vlgmr.msra.gmra.mrb[0].mxu1 %vm219_vm1, %v1024_v23  ;;  %v323_v26 = vpop.permute.xlu1 %322  ;;  %v618_v27 = vpop.permute.xlu0 %617 }
  0x9c   : > { %943 = vmatpush3.bf16.msra.mxu0 %v551_v18  ;;  %909 = vmatpush3.bf16.msra.mxu1 %v321_v25  ;;  %v621_v34 = vsel %vm619_vm2, %v616_v24, %v618_v27 }
  0x9d   : > { %948 = vmatprep.subr.bf16.mxu0 %v1038_v0  ;;  %910 = vmatprep.subr.bf16.mxu1 %v1038_v0 }
  0x9e   : > { %912 = vmatprep.mubr.msk.bf16.mxu1 %vm1039_vm0, %v1038_v0 }
  0x9f   : > { %v678_v29 = vpop.permute.xlu1 %677  ;;  %v676_v30 = vpop.permute.xlu0 %675 }
  0xa0   : > { %911 = vmatpush3.bf16.msra.mxu1 %v323_v26  ;;  %v684_v38 = vsel %vm683_vm3, %v676_v30, %v678_v29 }
  0xa1   : > { %916 = vmatprep.subr.bf16.mxu1 %v1038_v0 }
  0xa3   : > { %945 = vmatmul.mubr.msk.bf16.vlgmr.msra.gmra.mrb[0].mxu0 %vm219_vm1, %v1025_v28  ;;  %v680_v33 = vpop.permute.xlu1 %679  ;;  %v378_v35 = vpop.permute.xlu0 %377 }
  0xa4   : > { %949 = vmatpush3.bf16.msra.mxu0 %v620_v31  ;;  %952 = vmatprep.mubr.msk.bf16.mxu0 %vm1039_vm0, %v1038_v0 }
  0xa5   : > { %950 = vmatprep.subr.bf16.mxu0 %v1038_v0 }
  0xa7   : > { %913 = vmatmul.mubr.msk.bf16.vlgmr.msra.gmra.mrb[0].mxu1 %vm219_vm1, %v1026_v32  ;;  %v380_v36 = vpop.permute.xlu1 %379  ;;  %v682_v39 = vpop.permute.xlu0 %681 }
  0xa8   : > { %951 = vmatpush3.bf16.msra.mxu0 %v621_v34  ;;  %917 = vmatpush3.bf16.msra.mxu1 %v378_v35  ;;  %v685_v41 = vsel %vm683_vm3, %v680_v33, %v682_v39 }
  0xa9   : > { %956 = vmatprep.subr.bf16.mxu0 %v1038_v0  ;;  %918 = vmatprep.subr.bf16.mxu1 %v1038_v0 }
  0xaa   : > { %920 = vmatprep.mubr.msk.bf16.mxu1 %vm1039_vm0, %v1038_v0 }
  0xac   : > { %919 = vmatpush3.bf16.msra.mxu1 %v380_v36 }
  0xaf   : > { %953 = vmatmul.mubr.msk.bf16.vlgmr.msra.gmra.mrb[0].mxu0 %vm219_vm1, %v1027_v37 }
  0xb0   : > { %957 = vmatpush3.bf16.msra.mxu0 %v684_v38  ;;  %960 = vmatprep.mubr.msk.bf16.mxu0 %vm1039_vm0, %v1038_v0 }
  0xb1   : > { %958 = vmatprep.subr.bf16.mxu0 %v1038_v0 }
  0xb3   : > { %921 = vmatmul.mubr.msk.bf16.vlgmr.msra.gmra.mrb[0].mxu1 %vm219_vm1, %v1028_v40 }
  0xb4   : > { %959 = vmatpush3.bf16.msra.mxu0 %v685_v41 }
  0xb8   : > { %v742_v47 = vpop.permute.xlu1 %741  ;;  %v737_v48 = vpop.permute.xlu0 %736 }
  0xbb   : > { %961 = vmatmul.mubr.msk.bf16.vlgmr.msra.gmra.mrb[0].mxu0 %vm219_vm1, %v1029_v42 }
  0xbc   : > { %v749_v56 = vpop.permute.xlu1 %748  ;;  %v754_v59 = vpop.permute.xlu0 %753 }
 0x186   : > { %v420_v43 = vpop.f32.mrb[0].mxu1 }
 0x187   : > { %v922_v44 = vpop.f32.mrb[1].mxu1 }
 0x188   : > { %v423_v45 = vpop.f32.mrb[2].mxu1 }
 0x189   : > { %v923_v46 = vpop.f32.mrb[3].mxu1 }
 0x18e   : > { %v725_v49 = vpop.f32.mrb[0].mxu0 }
 0x18f   : > { %v964_v50 = vadd.f32 %v725_v49, %v420_v43  ;;  %v962_v51 = vpop.f32.mrb[1].mxu0 }
 0x190   : > { %v728_v52 = vpop.f32.mrb[2].mxu0 }
 0x191   : > { %v965_v53 = vadd.f32 %v728_v52, %v423_v45  ;;  %v744_v54 = vmul.f32 %v964_v50, %v737_v48  ;;  %v963_v55 = vpop.f32.mrb[3].mxu0 }
 0x193   : > { %v756_v57 = vadd.f32 %v749_v56, %v744_v54  ;;  %v745_v58 = vmul.f32 %v965_v53, %v742_v47 }
 0x195   : > { %v758_v60 = vmax.f32 %v756_v57, 0.0  ;;  %v757_v61 = vadd.f32 %v754_v59, %v745_v58 }
 0x197   : > { %v863_v62 = vpack.c.bf16 %v758_v60, %v758_v60  ;;  %v759_v63 = vmax.f32 %v757_v61, 0.0 }
 0x199   : > { %769 = vst.msk [vmem:[%s170_s30] sm:$0xf] %vm768_vm4, %v863_v62  ;;  %v864_v0 = vpack.c.bf16 %v759_v63, %v759_v63 }
 0x19b   : > { %770 = vst.msk [vmem:[%s170_s30 + $0x4] sm:$0xf] %vm768_vm4, %v864_v0 }
 0x19c PF: > { %s13_s12 = sadd.s32 1, %s1036_s12  }
 0x19d   : > { %p10_p4 = scmp.ge.s32.totalorder %s13_s12, 4  }
 0x19f   :  { %12 = sbr.rel (!%p10_p4) target bundleno = 1 (0x1), region = 62 }

// kernel: forward.12
= control target key start
LH: loop header
LB: loop body
LE: loop exit
PB: predicated region body
PF: predicated region fallthrough
CT: control target
= control target key end

     0   :  { %s878_s12 = smov 0   ;;  %s968_s0 = inlined_call_operand.vmem [shape: bf16[2,16,146], index: 0, kind: input, shape index: {}]   ;;  %s969_s1 = inlined_call_operand.vmem [shape: bf16[9,4,16], index: 1, kind: input, shape index: {}]   ;;  %s970_s2 = inlined_call_operand.vmem [shape: f32[2,4,1], index: 2, kind: input, shape index: {}]   ;;  %s971_s3 = inlined_call_operand.vmem [shape: bf16[2,4,48], index: 3, kind: output, shape index: {}]  }
   0x1 LB: > { %s692_s13 = sadd.s32 4294967295, %s845_s12   ;;  %p696_p0 = scmp.ge.s32.totalorder %s845_s12, 1  ;;  %s845_s12 = sphi %s878_s12, %s13_s12  }
   0x2   : > { %p137_p1 = scmp.lt.s32.totalorder %s845_s12, 3 }
   0x4   : > { %p138_p2 = pnand %p696_p0, %p137_p1 }
   0x5   : > { %p160_p3 = scmp.lt.s32.totalorder (!%p138_p2), %s692_s13, 1  ;;  %v847_v0 = vmov (!%p138_p2), 0.0   ;;  %vm848_vm0 = vmmov (!%p138_p2), 0   ;;  %s849_s18 = smov (!%p138_p2), 79   ;;  %v181_v3 = vld [vmem:[%s970_s2] sm:$0xf] (!%p138_p2) }
   0x6   : > { %141 = sbr.rel (%p138_p2) target bundleno = 406 (0x196), region = 32  ;;  %756 = vmatprep.subr.bf16.mxu0 (!%p138_p2), %v847_v0  ;;  %758 = vmatprep.mubr.msk.bf16.mxu0 (!%p138_p2), %vm848_vm0, %v847_v0  ;;  %s850_s19 = smov (!%p138_p2), 78   ;;  %v182_v4 = vld [vmem:[%s970_s2 + $0x4] sm:$0xf] (!%p138_p2)  ;;  %v857_v5 = vmov (!%p138_p2), 0   ;;  %vm191_vm1 = vcmask (!%p138_p2), 130048  }
   0x7   : > { %732 = vmatprep.subr.bf16.mxu1 (!%p138_p2), %v847_v0  ;;  %734 = vmatprep.mubr.msk.bf16.mxu1 (!%p138_p2), %vm848_vm0, %v847_v0  ;;  %s851_s20 = smov (!%p138_p2), 127   ;;  %s852_s21 = smov (!%p138_p2), 32   ;;  %v176_v7 = vld [vmem:[%s969_s1 + $0x8] sm:$0x3] (!%p138_p2)  ;;  %v173_v10 = vld [vmem:[%s969_s1 + $0x2] sm:$0x3] (!%p138_p2) }
   0x8   : > { %s853_s22 = smov (!%p138_p2), 31   ;;  %s854_s23 = smov (!%p138_p2), 126   ;;  %834 = vset.pattern.permute.xlu1 (!%p138_p2), %v857_v5  ;;  %835 = vset.pattern.permute.xlu0 (!%p138_p2), %v857_v5  ;;  %vm474_vm2 = vcmask (!%p138_p2), 261120   ;;  %v177_v14 = vld [vmem:[%s969_s1 + $0xa] sm:$0x3] (!%p138_p2)  ;;  %vm525_vm3 = vcmask (!%p138_p2), 252928  }
   0x9   : > { %s855_s24 = smov (!%p138_p2), 30   ;;  %s856_s25 = smov (!%p138_p2), 80   ;;  %v172_v16 = vld [vmem:[%s969_s1] sm:$0x3] (!%p138_p2)  ;;  %v178_v20 = vld [vmem:[%s969_s1 + $0xc] sm:$0x3] (!%p138_p2) }
   0xa   : > { %v174_v22 = vld [vmem:[%s969_s1 + $0x4] sm:$0x3] (!%p138_p2)  ;;  %vm576_vm4 = vcmask (!%p138_p2), 244736   ;;  %v179_v25 = vld [vmem:[%s969_s1 + $0xe] sm:$0x3] (!%p138_p2)  ;;  %vm637_vm5 = vcmask (!%p138_p2), 386048  }
   0xb   : > { %v175_v27 = vld [vmem:[%s969_s1 + $0x6] sm:$0x3] (!%p138_p2)  ;;  %v180_v28 = vld [vmem:[%s969_s1 + $0x10] sm:$0x3] (!%p138_p2) }
   0xd   : > { %s973_s13 = smov (!%p160_p3, %s692_s13), 1 }
   0xe   : > { %s713_s14 = sshll.u32 %s973_s13, 4 }
   0xf   : > { %s164_s17 = scalar_lea.vmem %s968_s0, %s713_s14 }
  0x10   : > { %v836_v1 = vld [vmem:[%s164_s17] ss:$8 sps:$4 sm:$0xff]   ;;  %v838_v2 = vld [vmem:[%s164_s17 + $0x4] ss:$8 sps:$4 sm:$0xff]  }
  0x11   : > { %373 = vrot.lane.b32.xlu0 %v836_v1, %s849_s18  ;;  %420 = vrot.lane.b32.xlu1 %v836_v1, %s850_s19 }
  0x15   : > { %188 = vrot.lane.b32.xlu0 %v836_v1, %s851_s20  ;;  %470 = vrot.lane.b32.xlu1 %v836_v1, %s852_s21 }
  0x19   : > { %472 = vrot.lane.b32.xlu0 %v838_v2, %s852_s21  ;;  %521 = vrot.lane.b32.xlu1 %v836_v1, %s853_s22 }
  0x1d   : > { %523 = vrot.lane.b32.xlu0 %v838_v2, %s853_s22  ;;  %279 = vrot.lane.b32.xlu1 %v836_v1, %s854_s23  ;;  %s699_s23 = sshll.u32 %s973_s13, 1 }
  0x1e   : > { %s168_s26 = scalar_lea.vmem %s971_s3, %s699_s23 }
  0x21   : > { %574 = vrot.lane.b32.xlu1 %v838_v2, %s855_s24  ;;  %572 = vrot.lane.b32.xlu0 %v836_v1, %s855_s24 }
  0x25   : > { %326 = vrot.lane.b32.xlu0 %v836_v1, %s856_s25  ;;  %625 = vperm.xlu1 %834, %v181_v3  }
  0x29   : > { %631 = vperm.xlu0 %835, %v182_v4  }
  0x83   : > { %v374_v6 = vpop.permute.xlu0 %373  ;;  %v421_v8 = vpop.permute.xlu1 %420 }
  0x84   : > { %757 = vmatpush3.bf16.msra.mxu0 %v374_v6 }
  0x85   : > { %762 = vmatprep.subr.bf16.mxu0 %v847_v0 }
  0x87   : > { %759 = vmatmul.mubr.msk.bf16.vlgmr.msra.gmra.mrb[0].mxu0 %vm191_vm1, %v176_v7  ;;  %v189_v9 = vpop.permute.xlu0 %188  ;;  %v471_v11 = vpop.permute.xlu1 %470 }
  0x88   : > { %733 = vmatpush3.bf16.msra.mxu1 %v189_v9  ;;  %763 = vmatpush3.bf16.msra.mxu0 %v421_v8 }
  0x89   : > { %764 = vmatprep.mubr.msk.bf16.mxu0 %vm848_vm0, %v847_v0  ;;  %738 = vmatprep.subr.bf16.mxu1 %v847_v0 }
  0x8a   : > { %768 = vmatprep.subr.bf16.mxu0 %v847_v0 }
  0x8b   : > { %735 = vmatmul.mubr.msk.bf16.vlgmr.msra.gmra.mrb[0].mxu1 %vm191_vm1, %v173_v10  ;;  %v473_v12 = vpop.permute.xlu0 %472  ;;  %v522_v13 = vpop.permute.xlu1 %521 }
  0x8c   : > { %739 = vmatpush3.bf16.msra.mxu1 %v836_v1  ;;  %740 = vmatprep.mubr.msk.bf16.mxu1 %vm848_vm0, %v847_v0  ;;  %v475_v15 = vsel %vm474_vm2, %v471_v11, %v473_v12 }
  0x8d   : > { %744 = vmatprep.subr.bf16.mxu1 %v847_v0 }
  0x8f   : > { %v524_v17 = vpop.permute.xlu0 %523  ;;  %v280_v18 = vpop.permute.xlu1 %279 }
  0x90   : > { %v526_v21 = vsel %vm525_vm3, %v522_v13, %v524_v17 }
  0x93   : > { %765 = vmatmul.mubr.msk.bf16.vlgmr.msra.gmra.mrb[0].mxu0 %vm191_vm1, %v177_v14  ;;  %v573_v19 = vpop.permute.xlu0 %572  ;;  %v575_v24 = vpop.permute.xlu1 %574 }
  0x94   : > { %769 = vmatpush3.bf16.msra.mxu0 %v475_v15  ;;  %770 = vmatprep.mubr.msk.bf16.mxu0 %vm848_vm0, %v847_v0  ;;  %v577_v26 = vsel %vm576_vm4, %v573_v19, %v575_v24 }
  0x95   : > { %774 = vmatprep.subr.bf16.mxu0 %v847_v0 }
  0x97   : > { %741 = vmatmul.mubr.msk.bf16.vlgmr.msra.gmra.mrb[0].mxu1 %vm191_vm1, %v172_v16  ;;  %v327_v23 = vpop.permute.xlu0 %326 }
  0x98   : > { %745 = vmatpush3.bf16.msra.mxu1 %v280_v18  ;;  %746 = vmatprep.mubr.msk.bf16.mxu1 %vm848_vm0, %v847_v0 }
  0x99   : > { %750 = vmatprep.subr.bf16.mxu1 %v847_v0 }
  0x9f   : > { %771 = vmatmul.mubr.msk.bf16.vlgmr.msra.gmra.mrb[0].mxu0 %vm191_vm1, %v178_v20 }
  0xa0   : > { %775 = vmatpush3.bf16.msra.mxu0 %v526_v21  ;;  %776 = vmatprep.mubr.msk.bf16.mxu0 %vm848_vm0, %v847_v0 }
  0xa1   : > { %780 = vmatprep.subr.bf16.mxu0 %v847_v0 }
  0xa3   : > { %747 = vmatmul.mubr.msk.bf16.vlgmr.msra.gmra.mrb[0].mxu1 %vm191_vm1, %v174_v22 }
  0xa4   : > { %751 = vmatpush3.bf16.msra.mxu1 %v327_v23  ;;  %752 = vmatprep.mubr.msk.bf16.mxu1 %vm848_vm0, %v847_v0  ;;  %v626_v34 = vpop.permute.xlu1 %625 }
  0xa8   : > { %v632_v38 = vpop.permute.xlu0 %631 }
  0xab   : > { %777 = vmatmul.mubr.msk.bf16.vlgmr.msra.gmra.mrb[0].mxu0 %vm191_vm1, %v179_v25 }
  0xac   : > { %781 = vmatpush3.bf16.msra.mxu0 %v577_v26  ;;  %782 = vmatprep.mubr.msk.bf16.mxu0 %vm848_vm0, %v847_v0 }
  0xaf   : > { %753 = vmatmul.mubr.msk.bf16.vlgmr.msra.gmra.mrb[0].mxu1 %vm191_vm1, %v175_v27 }
  0xb7   : > { %783 = vmatmul.mubr.msk.bf16.vlgmr.msra.gmra.mrb[0].mxu0 %vm191_vm1, %v180_v28 }
 0x182   : > { %v366_v29 = vpop.f32.mrb[0].mxu1 }
 0x183   : > { %v754_v30 = vpop.f32.mrb[1].mxu1 }
 0x184   : > { %v369_v31 = vpop.f32.mrb[2].mxu1 }
 0x185   : > { %v755_v32 = vpop.f32.mrb[3].mxu1 }
 0x18a   : > { %v616_v33 = vpop.f32.mrb[0].mxu0 }
 0x18b   : > { %v786_v35 = vadd.f32 %v616_v33, %v366_v29  ;;  %v784_v36 = vpop.f32.mrb[1].mxu0 }
 0x18c   : > { %v619_v37 = vpop.f32.mrb[2].mxu0 }
 0x18d   : > { %v628_v39 = vmul.f32 %v786_v35, %v626_v34  ;;  %v785_v40 = vpop.f32.mrb[3].mxu0 }
 0x18f   : > { %v634_v41 = vadd.f32 %v632_v38, %v628_v39 }
 0x191   : > { %v635_v42 = vmax.f32 %v634_v41, 0.0 }
 0x193   : > { %v636_v43 = vpack.c.bf16 %v635_v42, %v635_v42 }
 0x195   : > { %638 = vst.msk [vmem:[%s168_s26] sm:$0x3] %vm637_vm5, %v636_v43 }
 0x196 PF: > { %s13_s12 = sadd.s32 1, %s845_s12  }
 0x197   : > { %p10_p4 = scmp.ge.s32.totalorder %s13_s12, 4  }
 0x199   :  { %12 = sbr.rel (!%p10_p4) target bundleno = 1 (0x1), region = 62 }

// kernel: forward.13
= control target key start
LH: loop header
LB: loop body
LE: loop exit
PB: predicated region body
PF: predicated region fallthrough
CT: control target
= control target key end

     0   :  { %v352_v1 = vmov 0.0   ;;  %vm353_vm0 = vmmov 0   ;;  %s451_s0 = inlined_call_operand.vmem [shape: bf16[2,128], index: 0, kind: input, shape index: {}]   ;;  %s452_s1 = inlined_call_operand.vmem [shape: bf16[128,20], index: 1, kind: input, shape index: {}]   ;;  %s453_s2 = inlined_call_operand.vmem [shape: f32[1,20], index: 2, kind: input, shape index: {}]   ;;  %s454_s3 = inlined_call_operand.vmem [shape: f32[2,10], index: 3, kind: input, shape index: {}]   ;;  %s455_s4 = inlined_call_operand.vmem [shape: bf16[10,128], index: 4, kind: input, shape index: {}]   ;;  %s456_s5 = inlined_call_operand.vmem [shape: f32[1,128], index: 5, kind: input, shape index: {}]   ;;  %s457_s6 = inlined_call_operand.vmem [shape: bf16[2,128], index: 6, kind: output, shape index: {0}]   ;;  %s458_s7 = inlined_call_operand.hbm [shape: f32[1,1], index: 7, kind: output, shape index: {1}]  }
   0x1   :  { %v315_v0 = vld [vmem:[%s452_s1] sm:$0xff]   ;;  %284 = vmatprep.subr.bf16.mxu0 %v352_v1  ;;  %304 = vmatprep.subr.bf16.mxu1 %v352_v1  ;;  %v316_v2 = vld [vmem:[%s452_s1 + $0x8] sm:$0xff]   ;;  %v317_v3 = vld [vmem:[%s452_s1 + $0x10] sm:$0xff]  }
   0x2   :  { %285 = vmatpush3.bf16.msra.mxu0 %v315_v0  ;;  %300 = vmatprep.mubr.msk.bf16.mxu0 %vm353_vm0, %v352_v1 }
   0x3   :  { %286 = vmatprep.subr.bf16.mxu0 %v352_v1  ;;  %306 = vmatprep.mubr.msk.bf16.mxu1 %vm353_vm0, %v352_v1 }
   0x6   :  { %287 = vmatpush3.bf16.msra.mxu0 %v316_v2 }
   0x7   :  { %288 = vmatprep.subr.bf16.mxu0 %v352_v1 }
   0x8   :  { %13 = vsyncpa [#allocation3], 0  ;;  %v318_v4 = vld [vmem:[%s452_s1 + $0x18] sm:$0xff]   ;;  %v319_v5 = vld [vmem:[%s452_s1 + $0x20] sm:$0xff]   ;;  %vm197_vm1 = vcmask 1044480   ;;  %vm193_vm2 = vcmask 80896  }
   0x9   :  { %v320_v6 = vld [vmem:[%s452_s1 + $0x28] sm:$0xff]   ;;  %v321_v7 = vld [vmem:[%s452_s1 + $0x30] sm:$0xff]   ;;  %v322_v8 = vld [vmem:[%s452_s1 + $0x38] sm:$0xff]   ;;  %vm163_vm3 = vcmask 74752   ;;  %vm167_vm4 = vcmask 1041408   ;;  %s356_s26 = smov [#allocation2]  }
   0xa   :  { %289 = vmatpush3.bf16.msra.mxu0 %v317_v3  ;;  %v27_v9 = vld [vmem:[%s451_s0] sm:$0x1]  ;;  %s354_s0 = smov 118   ;;  %vm176_vm5 = vcmask 0  }
   0xb   :  { %290 = vmatprep.subr.bf16.mxu0 %v352_v1  ;;  %v261_v10 = vld [vmem:[%s453_s2] ss:$0 sm:$0xff]  ;;  %s355_s2 = smov 10  }
   0xc   :  { %v323_v18 = vld [vmem:[%s455_s4] sm:$0x1f]  }
   0xd   :  { %v199_v19 = vsel %vm197_vm1, %v323_v18, 0  ;;  %v139_v23 = vld [vmem:[%s454_s3] sm:$0x3] }
   0xe   :  { %291 = vmatpush3.bf16.msra.mxu0 %v318_v4  ;;  %305 = vmatpush3.bf16.msra.mxu1 %v199_v19  ;;  %v270_v35 = vld [vmem:[%s456_s5] ss:$0 sm:$0xff]  ;;  %s251_s5 = sshll.u32 %s356_s26, 4  ;;  %s252_s5 = int_to_ptr.vmem [resolvable:$true] %s251_s5 }
   0xf   :  { %292 = vmatprep.subr.bf16.mxu0 %v352_v1  ;;  %s328_s27 = scalar_lea.vmem %s252_s5, 16  ;;  %s332_s28 = scalar_lea.vmem %s252_s5, 32 }
  0x10   :  { %p329_p0 = scmp.ne.s32.totalorder %s252_s5, %s328_s27  ;;  %p333_p1 = scmp.lt.s32.totalorder %s252_s5, %s252_s5 }
  0x11   :  { %p334_p2 = scmp.lt.s32.totalorder %s332_s28, %s328_s27 }
  0x12   :  { %293 = vmatpush3.bf16.msra.mxu0 %v319_v5 }
  0x13   :  { %294 = vmatprep.subr.bf16.mxu0 %v352_v1  ;;  %p335_p3 = por %p334_p2, %p333_p1 }
  0x15   :  { %p336_p4 = pnand %p335_p3, %p329_p0 }
  0x16   :  { %295 = vmatpush3.bf16.msra.mxu0 %v320_v6 }
  0x17   :  { %296 = vmatprep.subr.bf16.mxu0 %v352_v1 }
  0x1a   :  { %297 = vmatpush3.bf16.msra.mxu0 %v321_v7 }
  0x1b   :  { %298 = vmatprep.subr.bf16.mxu0 %v352_v1 }
  0x1e   :  { %299 = vmatpush3.bf16.msra.mxu0 %v322_v8 }
  0x21   :  { %301 = vmatmul.mubr.bf16.vlgmr.msra.gmra.mrb[0].mxu0 %v27_v9 }
  0xf4   :  { %v133_v11 = vpop.f32.mrb[0].mxu0 }
  0xf5   :  { %v134_v12 = vadd.f32 %v261_v10, %v133_v11  ;;  %v302_v13 = vpop.f32.mrb[1].mxu0 }
  0xf6   :  { %v136_v14 = vpop.f32.mrb[2].mxu0 }
  0xf7   :  { %v303_v15 = vpop.f32.mrb[3].mxu0  ;;  %v140_v16 = vmul.f32 0.5, %v134_v12  ;;  %v150_v21 = vmul.f32 %v134_v12, %v134_v12  ;;  %v156_v22 = vmul.f32 1.442695, %v134_v12  ;;  %v149_v27 = vadd.f32 1.0, %v134_v12 }
  0xf9   :  { %v141_v17 = vmul.f32 1.442695, %v140_v16 }
  0xfb   :  { %324 = vpow2.f32 %v141_v17 }
  0xfc   :  { %326 = vpow2.f32 %v156_v22 }
 0x105   :  { %v325_v20 = vpop.eup %324 }
 0x106   :  { %144 = vrot.lane.b32.xlu0 %v325_v20, %s354_s0  ;;  %v327_v31 = vpop.eup %326 }
 0x10a   :  { %152 = vrot.lane.b32.xlu0 %v150_v21, %s355_s2 }
 0x178   :  { %v145_v24 = vpop.permute.xlu0 %144 }
 0x179   :  { %v147_v25 = vmul.f32 %v145_v24, %v139_v23 }
 0x17b   :  { %v148_v26 = vadd.f32 %v147_v25, %v134_v12 }
 0x17c   :  { %v153_v28 = vpop.permute.xlu0 %152 }
 0x17d   :  { %v178_v29 = vpack.c.bf16 %v148_v26, %v148_v26  ;;  %v155_v30 = vsub.f32 %v149_v27, %v153_v28 }
 0x17f   :  { %307 = vmatmul.mubr.msk.bf16.vlgmr.msra.gmra.mrb[0].mxu1 %vm193_vm2, %v178_v29  ;;  %v158_v32 = vsub.f32 %v155_v30, %v327_v31 }
 0x181   :  { %160 = vrot.lane.b32.xlu1 %v158_v32, %s354_s0 }
 0x1f3   :  { %v161_v33 = vpop.permute.xlu1 %160 }
 0x1f4   :  { %v164_v34 = vsel %vm163_vm3, %v161_v33, 0.0 }
 0x1f5   :  { %165 = vadd.xlane.f32.xlu1 %v164_v34 }
 0x252   :  { %v235_v36 = vpop.f32.mrb[0].mxu1 }
 0x253   :  { %v236_v37 = vadd.f32 %v270_v35, %v235_v36  ;;  %v308_v38 = vpop.f32.mrb[1].mxu1 }
 0x254   :  { %v238_v39 = vpop.f32.mrb[2].mxu1 }
 0x255   :  { %v241_v40 = vpack.c.bf16 %v236_v37, %v236_v37  ;;  %v309_v41 = vpop.f32.mrb[3].mxu1 }
 0x257   :  { %242 = vst [vmem:[%s457_s6] sm:$0x1] %v241_v40 }
 0x282   :  { %v166_v42 = vpop.xlane.xlu1 %165 }
 0x283   :  { %v168_v43 = vsel %vm167_vm4, %v166_v42, 0.0 }
 0x284   :  { %v169_v44 = vrot.slane %v168_v43, 4 }
 0x286   :  { %v170_v45 = vadd.f32 %v169_v44, %v168_v43 }
 0x288   :  { %v171_v46 = vrot.slane %v170_v45, 2 }
 0x28a   :  { %v172_v47 = vadd.f32 %v171_v46, %v170_v45 }
 0x28c   :  { %v173_v48 = vrot.slane %v172_v47, 1 }
 0x28e   :  { %v174_v49 = vadd.f32 %v173_v48, %v172_v47 }
 0x290   :  { %v175_v50 = vmul.f32 -0.5, %v174_v49 }
 0x292   :  { %177 = vst.msk [vmem:[#allocation2] sm:$0x1] %vm176_vm5, %v175_v50 }
 0x293   :  { %339 = shalt.err (!%p336_p4)
}
 0x294   :  { %s340_s30 = scalar_lea.hbm %s458_s7, 16 }
 0x295   :  { %p341_p5 = scmp.ne.s32.totalorder %s458_s7, %s340_s30  ;;  %p344_p6 = scmp.lt.u32.totalorder %s340_s30, %s458_s7 }
 0x297   :  { %p346_p7 = pnand %p344_p6, %p341_p5 }
 0x299   :  { %349 = shalt.err (!%p346_p7)
}
 0x29a   :  { %254 = dma.vmem_to_hbm [thread:$0]  %s252_s5, 16, %s458_s7, [#allocation3]  }
 0x29b   :  { %350 = dma.done.wait [#allocation3], 16  }
 0x29c   :  { %351 = vsyncadd [#allocation3], 4294967280 }
 0x29d   :  { %260 = vsyncpa [#allocation3], 1 }

// kernel: forward.14
= control target key start
LH: loop header
LB: loop body
LE: loop exit
PB: predicated region body
PF: predicated region fallthrough
CT: control target
= control target key end

     0   :  { %s998_s12 = smov 0   ;;  %s1103_s0 = inlined_call_operand.vmem [shape: bf16[2,4,82], index: 0, kind: input, shape index: {}]   ;;  %s1104_s1 = inlined_call_operand.vmem [shape: bf16[9,16,4], index: 1, kind: input, shape index: {}]   ;;  %s1105_s2 = inlined_call_operand.vmem [shape: f32[2,16,1], index: 2, kind: input, shape index: {}]   ;;  %s1106_s3 = inlined_call_operand.vmem [shape: bf16[2,16,64], index: 3, kind: output, shape index: {}]  }
   0x1 LB: > { %s792_s13 = sadd.s32 4294967295, %s964_s12   ;;  %p796_p0 = scmp.ge.s32.totalorder %s964_s12, 1  ;;  %s964_s12 = sphi %s998_s12, %s13_s12  }
   0x2   : > { %p136_p1 = scmp.lt.s32.totalorder %s964_s12, 3 }
   0x4   : > { %p137_p2 = pnand %p796_p0, %p136_p1 }
   0x5   : > { %p159_p3 = scmp.lt.s32.totalorder (!%p137_p2), %s792_s13, 1  ;;  %v201_v0 = vlaneseq (!%p137_p2)  ;;  %v966_v1 = vmov (!%p137_p2), 1983009808   ;;  %v967_v3 = vmov (!%p137_p2), 0.0   ;;  %vm968_vm0 = vmmov (!%p137_p2), 0   ;;  %s969_s18 = smov (!%p137_p2), 119  }
   0x6   : > { %140 = sbr.rel (%p137_p2) target bundleno = 411 (0x19b), region = 32  ;;  %v199_v2 = vunpack.c.l.s4 (!%p137_p2), %v966_v1  ;;  %867 = vmatprep.subr.bf16.mxu0 (!%p137_p2), %v967_v3  ;;  %843 = vmatprep.subr.bf16.mxu1 (!%p137_p2), %v967_v3  ;;  %s970_s19 = smov (!%p137_p2), 118   ;;  %v189_v9 = vld [vmem:[%s1105_s2 + $0x8] sm:$0xff] (!%p137_p2)  ;;  %v188_v10 = vld [vmem:[%s1105_s2] sm:$0xff] (!%p137_p2)  ;;  %v977_v11 = vmov (!%p137_p2), 0   ;;  %v190_v12 = vld [vmem:[%s1105_s2 + $0x10] sm:$0xff] (!%p137_p2) }
   0x7   : > { %v202_v4 = vshrl.u32 (!%p137_p2), %v201_v0, 7  ;;  %869 = vmatprep.mubr.msk.bf16.mxu0 (!%p137_p2), %vm968_vm0, %v967_v3  ;;  %845 = vmatprep.mubr.msk.bf16.mxu1 (!%p137_p2), %vm968_vm0, %v967_v3  ;;  %s971_s20 = smov (!%p137_p2), 127   ;;  %s972_s21 = smov (!%p137_p2), 112   ;;  %v191_v13 = vld [vmem:[%s1105_s2 + $0x18] sm:$0xff] (!%p137_p2)  ;;  %vm211_vm1 = vcmask (!%p137_p2), 1041408   ;;  %v949_v17 = vld [vmem:[%s1104_s1 + $0x20] sm:$0xff] (!%p137_p2)  }
   0x8   : > { %v200_v5 = vunpack.c.0.s8 (!%p137_p2), %v199_v2  ;;  %s973_s22 = smov (!%p137_p2), 111   ;;  %s974_s23 = smov (!%p137_p2), 126   ;;  %948 = vset.pattern.permute.xlu1 (!%p137_p2), %v977_v11  ;;  %947 = vset.pattern.permute.xlu0 (!%p137_p2), %v977_v11  ;;  %vm207_vm2 = vcmask (!%p137_p2), 31744   ;;  %v950_v21 = vld [vmem:[%s1104_s1 + $0x8] sm:$0xff] (!%p137_p2)   ;;  %v952_v27 = vld [vmem:[%s1104_s1] sm:$0xff] (!%p137_p2)   ;;  %v953_v30 = vld [vmem:[%s1104_s1 + $0x30] sm:$0xff] (!%p137_p2)  }
   0x9   : > { %s975_s24 = smov (!%p137_p2), 110   ;;  %s976_s25 = smov (!%p137_p2), 120   ;;  %v951_v24 = vld [vmem:[%s1104_s1 + $0x28] sm:$0xff] (!%p137_p2)   ;;  %v954_v33 = vld [vmem:[%s1104_s1 + $0x10] sm:$0xff] (!%p137_p2)   ;;  %v955_v36 = vld [vmem:[%s1104_s1 + $0x38] sm:$0xff] (!%p137_p2)   ;;  %vm734_vm3 = vcmask (!%p137_p2), 519168  }
   0xa   : > { %v203_v6 = vsub.s32 (!%p137_p2), %v200_v5, %v202_v4  ;;  %v956_v38 = vld [vmem:[%s1104_s1 + $0x18] sm:$0xff] (!%p137_p2)   ;;  %v957_v39 = vld [vmem:[%s1104_s1 + $0x40] sm:$0xff] (!%p137_p2)  }
   0xd   : > { %s1108_s13 = smov (!%p159_p3, %s792_s13), 1 }
   0xe   : > { %s797_s14 = sshll.u32 %s1108_s13, 1  ;;  %s822_s27 = sshll.u32 %s1108_s13, 3 }
   0xf   : > { %s162_s17 = scalar_lea.vmem %s1103_s0, %s797_s14  ;;  %s167_s30 = scalar_lea.vmem %s1106_s3, %s822_s27 }
  0x10   : > { %v169_v7 = vld [vmem:[%s162_s17] sm:$0x3] }
  0x11   : > { %v204_v8 = vrot.slane %v169_v7, %v203_v6  ;;  %v265_v22 = vsel %vm211_vm1, %v169_v7, 0 }
  0x13   : > { %425 = vrot.lane.b32.xlu0 %v204_v8, %s969_s18  ;;  %481 = vrot.lane.b32.xlu1 %v204_v8, %s970_s19 }
  0x17   : > { %205 = vrot.lane.b32.xlu0 %v204_v8, %s971_s20  ;;  %537 = vrot.lane.b32.xlu1 %v204_v8, %s972_s21 }
  0x1b   : > { %593 = vrot.lane.b32.xlu1 %v204_v8, %s973_s22  ;;  %313 = vrot.lane.b32.xlu0 %v204_v8, %s974_s23 }
  0x1f   : > { %649 = vrot.lane.b32.xlu1 %v204_v8, %s975_s24  ;;  %369 = vrot.lane.b32.xlu0 %v204_v8, %s976_s25 }
  0x23   : > { %707 = vperm.xlu1 %948, %v189_v9   ;;  %702 = vperm.xlu0 %947, %v188_v10  }
  0x27   : > { %714 = vperm.xlu1 %948, %v190_v12   ;;  %719 = vperm.xlu0 %947, %v191_v13  }
  0x85   : > { %v426_v14 = vpop.permute.xlu0 %425  ;;  %v482_v15 = vpop.permute.xlu1 %481 }
  0x86   : > { %v431_v16 = vsel %vm211_vm1, %v426_v14, 0  ;;  %v487_v18 = vsel %vm211_vm1, %v482_v15, 0 }
  0x87   : > { %868 = vmatpush3.bf16.msra.mxu0 %v431_v16 }
  0x88   : > { %873 = vmatprep.subr.bf16.mxu0 %v967_v3 }
  0x89   : > { %v206_v19 = vpop.permute.xlu0 %205  ;;  %v538_v23 = vpop.permute.xlu1 %537 }
  0x8a   : > { %870 = vmatmul.mubr.msk.bf16.vlgmr.msra.gmra.mrb[0].mxu0 %vm207_vm2, %v949_v17  ;;  %v213_v20 = vsel %vm211_vm1, %v206_v19, 0  ;;  %v543_v25 = vsel %vm211_vm1, %v538_v23, 0 }
  0x8b   : > { %844 = vmatpush3.bf16.msra.mxu1 %v213_v20  ;;  %874 = vmatpush3.bf16.msra.mxu0 %v487_v18 }
  0x8c   : > { %875 = vmatprep.mubr.msk.bf16.mxu0 %vm968_vm0, %v967_v3  ;;  %849 = vmatprep.subr.bf16.mxu1 %v967_v3 }
  0x8d   : > { %879 = vmatprep.subr.bf16.mxu0 %v967_v3  ;;  %v314_v26 = vpop.permute.xlu0 %313  ;;  %v594_v29 = vpop.permute.xlu1 %593 }
  0x8e   : > { %846 = vmatmul.mubr.msk.bf16.vlgmr.msra.gmra.mrb[0].mxu1 %vm207_vm2, %v950_v21  ;;  %v319_v28 = vsel %vm211_vm1, %v314_v26, 0  ;;  %v599_v31 = vsel %vm211_vm1, %v594_v29, 0 }
  0x8f   : > { %850 = vmatpush3.bf16.msra.mxu1 %v265_v22  ;;  %851 = vmatprep.mubr.msk.bf16.mxu1 %vm968_vm0, %v967_v3 }
  0x90   : > { %855 = vmatprep.subr.bf16.mxu1 %v967_v3 }
  0x91   : > { %v370_v32 = vpop.permute.xlu0 %369  ;;  %v650_v35 = vpop.permute.xlu1 %649 }
  0x92   : > { %v375_v34 = vsel %vm211_vm1, %v370_v32, 0  ;;  %v655_v37 = vsel %vm211_vm1, %v650_v35, 0 }
  0x96   : > { %876 = vmatmul.mubr.msk.bf16.vlgmr.msra.gmra.mrb[0].mxu0 %vm207_vm2, %v951_v24 }
  0x97   : > { %880 = vmatpush3.bf16.msra.mxu0 %v543_v25  ;;  %881 = vmatprep.mubr.msk.bf16.mxu0 %vm968_vm0, %v967_v3 }
  0x98   : > { %885 = vmatprep.subr.bf16.mxu0 %v967_v3 }
  0x9a   : > { %852 = vmatmul.mubr.msk.bf16.vlgmr.msra.gmra.mrb[0].mxu1 %vm207_vm2, %v952_v27 }
  0x9b   : > { %856 = vmatpush3.bf16.msra.mxu1 %v319_v28  ;;  %857 = vmatprep.mubr.msk.bf16.mxu1 %vm968_vm0, %v967_v3 }
  0x9c   : > { %861 = vmatprep.subr.bf16.mxu1 %v967_v3 }
  0xa2   : > { %882 = vmatmul.mubr.msk.bf16.vlgmr.msra.gmra.mrb[0].mxu0 %vm207_vm2, %v953_v30  ;;  %v708_v44 = vpop.permute.xlu1 %707  ;;  %v703_v45 = vpop.permute.xlu0 %702 }
  0xa3   : > { %886 = vmatpush3.bf16.msra.mxu0 %v599_v31  ;;  %887 = vmatprep.mubr.msk.bf16.mxu0 %vm968_vm0, %v967_v3 }
  0xa4   : > { %891 = vmatprep.subr.bf16.mxu0 %v967_v3 }
  0xa6   : > { %858 = vmatmul.mubr.msk.bf16.vlgmr.msra.gmra.mrb[0].mxu1 %vm207_vm2, %v954_v33  ;;  %v715_v53 = vpop.permute.xlu1 %714  ;;  %v720_v56 = vpop.permute.xlu0 %719 }
  0xa7   : > { %862 = vmatpush3.bf16.msra.mxu1 %v375_v34  ;;  %863 = vmatprep.mubr.msk.bf16.mxu1 %vm968_vm0, %v967_v3 }
  0xae   : > { %888 = vmatmul.mubr.msk.bf16.vlgmr.msra.gmra.mrb[0].mxu0 %vm207_vm2, %v955_v36 }
  0xaf   : > { %892 = vmatpush3.bf16.msra.mxu0 %v655_v37  ;;  %893 = vmatprep.mubr.msk.bf16.mxu0 %vm968_vm0, %v967_v3 }
  0xb2   : > { %864 = vmatmul.mubr.msk.bf16.vlgmr.msra.gmra.mrb[0].mxu1 %vm207_vm2, %v956_v38 }
  0xba   : > { %894 = vmatmul.mubr.msk.bf16.vlgmr.msra.gmra.mrb[0].mxu0 %vm207_vm2, %v957_v39 }
 0x185   : > { %v411_v40 = vpop.f32.mrb[0].mxu1 }
 0x186   : > { %v865_v41 = vpop.f32.mrb[1].mxu1 }
 0x187   : > { %v414_v42 = vpop.f32.mrb[2].mxu1 }
 0x188   : > { %v866_v43 = vpop.f32.mrb[3].mxu1 }
 0x18d   : > { %v691_v46 = vpop.f32.mrb[0].mxu0 }
 0x18e   : > { %v897_v47 = vadd.f32 %v691_v46, %v411_v40  ;;  %v895_v48 = vpop.f32.mrb[1].mxu0 }
 0x18f   : > { %v694_v49 = vpop.f32.mrb[2].mxu0 }
 0x190   : > { %v898_v50 = vadd.f32 %v694_v49, %v414_v42  ;;  %v710_v51 = vmul.f32 %v897_v47, %v703_v45  ;;  %v896_v52 = vpop.f32.mrb[3].mxu0 }
 0x192   : > { %v722_v54 = vadd.f32 %v715_v53, %v710_v51  ;;  %v711_v55 = vmul.f32 %v898_v50, %v708_v44 }
 0x194   : > { %v724_v57 = vmax.f32 %v722_v54, 0.0  ;;  %v723_v58 = vadd.f32 %v720_v56, %v711_v55 }
 0x196   : > { %v823_v59 = vpack.c.bf16 %v724_v57, %v724_v57  ;;  %v725_v60 = vmax.f32 %v723_v58, 0.0 }
 0x198   : > { %735 = vst.msk [vmem:[%s167_s30] sm:$0xf] %vm734_vm3, %v823_v59  ;;  %v824_v61 = vpack.c.bf16 %v725_v60, %v725_v60 }
 0x19a   : > { %736 = vst.msk [vmem:[%s167_s30 + $0x4] sm:$0xf] %vm734_vm3, %v824_v61 }
 0x19b PF: > { %s13_s12 = sadd.s32 1, %s964_s12  }
 0x19c   : > { %p10_p4 = scmp.ge.s32.totalorder %s13_s12, 4  }
 0x19e   :  { %12 = sbr.rel (!%p10_p4) target bundleno = 1 (0x1), region = 62 }

// kernel: forward.15
= control target key start
LH: loop header
LB: loop body
LE: loop exit
PB: predicated region body
PF: predicated region fallthrough
CT: control target
= control target key end

     0   :  { %s1236_s12 = smov 0   ;;  %s1353_s0 = inlined_call_operand.vmem [shape: bf16[2,16,122], index: 0, kind: input, shape index: {}]   ;;  %s1354_s1 = inlined_call_operand.vmem [shape: bf16[9,32,16], index: 1, kind: input, shape index: {}]   ;;  %s1355_s2 = inlined_call_operand.vmem [shape: f32[2,32,1], index: 2, kind: input, shape index: {}]   ;;  %s1356_s3 = inlined_call_operand.vmem [shape: bf16[2,32,80], index: 3, kind: output, shape index: {}]  }
   0x1 LB: > { %s990_s13 = sadd.s32 4294967295, %s1205_s12   ;;  %p994_p0 = scmp.ge.s32.totalorder %s1205_s12, 1  ;;  %s1205_s12 = sphi %s1236_s12, %s13_s12  }
   0x2   : > { %p137_p1 = scmp.lt.s32.totalorder %s1205_s12, 3 }
   0x4   : > { %p138_p2 = pnand %p994_p0, %p137_p1 }
   0x5   : > { %p161_p3 = scmp.lt.s32.totalorder (!%p138_p2), %s990_s13, 1  ;;  %vm236_vm0 = vcmask (!%p138_p2), 130048   ;;  %v1181_v0 = vld [vmem:[%s1354_s1 + $0x40] sm:$0xff] (!%p138_p2)   ;;  %v1183_v1 = vld [vmem:[%s1354_s1 + $0x10] sm:$0xff] (!%p138_p2)   ;;  %s1207_s22 = smov (!%p138_p2), 107   ;;  %v211_v3 = vld [vmem:[%s1355_s2 + $0x8] sm:$0xff] (!%p138_p2) }
   0x6   : > { %141 = sbr.rel (%p138_p2) target bundleno = 410 (0x19a), region = 32  ;;  %1101 = vmatprep.mubr.msk.bf16.mxu0 (!%p138_p2), %vm236_vm0, %v1181_v0  ;;  %1077 = vmatprep.mubr.msk.bf16.mxu1 (!%p138_p2), %vm236_vm0, %v1183_v1  ;;  %s1208_s23 = smov (!%p138_p2), 106   ;;  %v210_v4 = vld [vmem:[%s1355_s2] sm:$0xff] (!%p138_p2)  ;;  %v1215_v5 = vmov (!%p138_p2), 0   ;;  %v212_v6 = vld [vmem:[%s1355_s2 + $0x10] sm:$0xff] (!%p138_p2)  ;;  %v213_v7 = vld [vmem:[%s1355_s2 + $0x18] sm:$0xff] (!%p138_p2) }
   0x7   : > { %s1209_s24 = smov (!%p138_p2), 127   ;;  %s1210_s25 = smov (!%p138_p2), 88   ;;  %1179 = vset.pattern.permute.xlu1 (!%p138_p2), %v1215_v5  ;;  %1178 = vset.pattern.permute.xlu0 (!%p138_p2), %v1215_v5  ;;  %v214_v8 = vld [vmem:[%s1355_s2 + $0x20] sm:$0xff] (!%p138_p2)  ;;  %v215_v9 = vld [vmem:[%s1355_s2 + $0x28] sm:$0xff] (!%p138_p2)  ;;  %v216_v10 = vld [vmem:[%s1355_s2 + $0x30] sm:$0xff] (!%p138_p2)  ;;  %vm930_vm1 = vcmask (!%p138_p2), 650240  }
   0x8   : > { %s1211_s26 = smov (!%p138_p2), 87   ;;  %s1212_s27 = smov (!%p138_p2), 126   ;;  %v217_v11 = vld [vmem:[%s1355_s2 + $0x38] sm:$0xff] (!%p138_p2)  ;;  %v1182_v14 = vld [vmem:[%s1354_s1 + $0x48] sm:$0xff] (!%p138_p2)   ;;  %v1185_v15 = vld [vmem:[%s1354_s1 + $0x50] sm:$0xff] (!%p138_p2)  }
   0x9   : > { %s1213_s28 = smov (!%p138_p2), 86   ;;  %s1214_s29 = smov (!%p138_p2), 108   ;;  %v1184_v18 = vld [vmem:[%s1354_s1 + $0x18] sm:$0xff] (!%p138_p2)   ;;  %v1187_v19 = vld [vmem:[%s1354_s1] sm:$0xff] (!%p138_p2)   ;;  %v1188_v24 = vld [vmem:[%s1354_s1 + $0x8] sm:$0xff] (!%p138_p2)  }
   0xa   : > { %v1186_v21 = vld [vmem:[%s1354_s1 + $0x58] sm:$0xff] (!%p138_p2)   ;;  %v1189_v22 = vld [vmem:[%s1354_s1 + $0x60] sm:$0xff] (!%p138_p2)   ;;  %v1190_v27 = vld [vmem:[%s1354_s1 + $0x68] sm:$0xff] (!%p138_p2)  }
   0xb   : > { %v1191_v25 = vld [vmem:[%s1354_s1 + $0x20] sm:$0xff] (!%p138_p2)   ;;  %v1193_v28 = vld [vmem:[%s1354_s1 + $0x70] sm:$0xff] (!%p138_p2)   ;;  %v1192_v30 = vld [vmem:[%s1354_s1 + $0x28] sm:$0xff] (!%p138_p2)  }
   0xc   : > { %v1195_v31 = vld [vmem:[%s1354_s1 + $0x30] sm:$0xff] (!%p138_p2)   ;;  %v1194_v32 = vld [vmem:[%s1354_s1 + $0x78] sm:$0xff] (!%p138_p2)   ;;  %v1197_v33 = vld [vmem:[%s1354_s1 + $0x80] sm:$0xff] (!%p138_p2)  }
   0xd   : > { %s1358_s13 = smov (!%p161_p3, %s990_s13), 1  ;;  %v1196_v34 = vld [vmem:[%s1354_s1 + $0x38] sm:$0xff]   ;;  %v1198_v35 = vld [vmem:[%s1354_s1 + $0x88] sm:$0xff]  }
   0xe   : > { %s1042_s18 = sshll.u32 %s1358_s13, 3 }
   0xf   : > { %s165_s21 = scalar_lea.vmem %s1353_s0, %s1042_s18 }
  0x10   : > { %v1180_v2 = vld [vmem:[%s165_s21] sm:$0xff]  }
  0x11   : > { %512 = vrot.lane.b32.xlu0 %v1180_v2, %s1207_s22  ;;  %584 = vrot.lane.b32.xlu1 %v1180_v2, %s1208_s23 }
  0x15   : > { %233 = vrot.lane.b32.xlu0 %v1180_v2, %s1209_s24  ;;  %656 = vrot.lane.b32.xlu1 %v1180_v2, %s1210_s25 }
  0x19   : > { %728 = vrot.lane.b32.xlu1 %v1180_v2, %s1211_s26  ;;  %368 = vrot.lane.b32.xlu0 %v1180_v2, %s1212_s27 }
  0x1d   : > { %800 = vrot.lane.b32.xlu1 %v1180_v2, %s1213_s28  ;;  %440 = vrot.lane.b32.xlu0 %v1180_v2, %s1214_s29  ;;  %s1043_s28 = sshll.u32 %s1358_s13, 4 }
  0x1e   : > { %s170_s4 = scalar_lea.vmem %s1356_s3, %s1043_s28 }
  0x21   : > { %869 = vperm.xlu1 %1179, %v211_v3   ;;  %864 = vperm.xlu0 %1178, %v210_v4  }
  0x25   : > { %874 = vperm.xlu1 %1179, %v212_v6   ;;  %879 = vperm.xlu0 %1178, %v213_v7  }
  0x29   : > { %888 = vperm.xlu1 %1179, %v214_v8   ;;  %893 = vperm.xlu0 %1178, %v215_v9  }
  0x2d   : > { %898 = vperm.xlu1 %1179, %v216_v10   ;;  %903 = vperm.xlu0 %1178, %v217_v11  }
  0x83   : > { %v513_v12 = vpop.permute.xlu0 %512  ;;  %v585_v13 = vpop.permute.xlu1 %584 }
  0x84   : > { %1099 = vmatprep.subr.bf16.mxu0 %v513_v12 }
  0x85   : > { %1100 = vmatpush3.bf16.msra.mxu0 %v513_v12 }
  0x86   : > { %1105 = vmatprep.subr.bf16.mxu0 %v585_v13 }
  0x87   : > { %v234_v16 = vpop.permute.xlu0 %233  ;;  %v657_v17 = vpop.permute.xlu1 %656 }
  0x88   : > { %1075 = vmatprep.subr.bf16.mxu1 %v234_v16  ;;  %1102 = vmatmul.mubr.msk.bf16.vlgmr.msra.gmra.mrb[0].mxu0 %vm236_vm0, %v1182_v14 }
  0x89   : > { %1076 = vmatpush3.bf16.msra.mxu1 %v234_v16  ;;  %1106 = vmatpush3.bf16.msra.mxu0 %v585_v13 }
  0x8a   : > { %1107 = vmatprep.mubr.msk.bf16.mxu0 %vm236_vm0, %v1185_v15  ;;  %1111 = vmatprep.subr.bf16.mxu0 %v657_v17 }
  0x8b   : > { %1081 = vmatprep.subr.bf16.mxu1 %v1180_v2  ;;  %v369_v20 = vpop.permute.xlu0 %368  ;;  %v729_v23 = vpop.permute.xlu1 %728 }
  0x8c   : > { %1078 = vmatmul.mubr.msk.bf16.vlgmr.msra.gmra.mrb[0].mxu1 %vm236_vm0, %v1184_v18 }
  0x8d   : > { %1082 = vmatpush3.bf16.msra.mxu1 %v1180_v2  ;;  %1083 = vmatprep.mubr.msk.bf16.mxu1 %vm236_vm0, %v1187_v19 }
  0x8e   : > { %1087 = vmatprep.subr.bf16.mxu1 %v369_v20 }
  0x8f   : > { %v441_v26 = vpop.permute.xlu0 %440  ;;  %v801_v29 = vpop.permute.xlu1 %800 }
  0x94   : > { %1108 = vmatmul.mubr.msk.bf16.vlgmr.msra.gmra.mrb[0].mxu0 %vm236_vm0, %v1186_v21 }
  0x95   : > { %1112 = vmatpush3.bf16.msra.mxu0 %v657_v17  ;;  %1113 = vmatprep.mubr.msk.bf16.mxu0 %vm236_vm0, %v1189_v22 }
  0x96   : > { %1117 = vmatprep.subr.bf16.mxu0 %v729_v23 }
  0x98   : > { %1084 = vmatmul.mubr.msk.bf16.vlgmr.msra.gmra.mrb[0].mxu1 %vm236_vm0, %v1188_v24 }
  0x99   : > { %1088 = vmatpush3.bf16.msra.mxu1 %v369_v20  ;;  %1089 = vmatprep.mubr.msk.bf16.mxu1 %vm236_vm0, %v1191_v25 }
  0x9a   : > { %1093 = vmatprep.subr.bf16.mxu1 %v441_v26 }
  0xa0   : > { %1114 = vmatmul.mubr.msk.bf16.vlgmr.msra.gmra.mrb[0].mxu0 %vm236_vm0, %v1190_v27  ;;  %v870_v36 = vpop.permute.xlu1 %869  ;;  %v865_v37 = vpop.permute.xlu0 %864 }
  0xa1   : > { %1118 = vmatpush3.bf16.msra.mxu0 %v729_v23  ;;  %1119 = vmatprep.mubr.msk.bf16.mxu0 %vm236_vm0, %v1193_v28 }
  0xa2   : > { %1123 = vmatprep.subr.bf16.mxu0 %v801_v29 }
  0xa4   : > { %1090 = vmatmul.mubr.msk.bf16.vlgmr.msra.gmra.mrb[0].mxu1 %vm236_vm0, %v1192_v30  ;;  %v875_v38 = vpop.permute.xlu1 %874  ;;  %v880_v41 = vpop.permute.xlu0 %879 }
  0xa5   : > { %1094 = vmatpush3.bf16.msra.mxu1 %v441_v26  ;;  %1095 = vmatprep.mubr.msk.bf16.mxu1 %vm236_vm0, %v1195_v31 }
  0xa8   : > { %v889_v44 = vpop.permute.xlu1 %888  ;;  %v894_v45 = vpop.permute.xlu0 %893 }
  0xac   : > { %1120 = vmatmul.mubr.msk.bf16.vlgmr.msra.gmra.mrb[0].mxu0 %vm236_vm0, %v1194_v32  ;;  %v899_v54 = vpop.permute.xlu1 %898  ;;  %v904_v59 = vpop.permute.xlu0 %903 }
  0xad   : > { %1124 = vmatpush3.bf16.msra.mxu0 %v801_v29  ;;  %1125 = vmatprep.mubr.msk.bf16.mxu0 %vm236_vm0, %v1197_v33 }
  0xb0   : > { %1096 = vmatmul.mubr.msk.bf16.vlgmr.msra.gmra.mrb[0].mxu1 %vm236_vm0, %v1196_v34 }
  0xb8   : > { %1126 = vmatmul.mubr.msk.bf16.vlgmr.msra.gmra.mrb[0].mxu0 %vm236_vm0, %v1198_v35 }
 0x183   : > { %v1097_v39 = vpop.f32.mrb[0].mxu1 }
 0x184   : > { %v483_v40 = vpop.f32.mrb[1].mxu1 }
 0x185   : > { %v1098_v42 = vpop.f32.mrb[2].mxu1 }
 0x186   : > { %v486_v43 = vpop.f32.mrb[3].mxu1 }
 0x18b   : > { %v1127_v46 = vpop.f32.mrb[0].mxu0 }
 0x18c   : > { %v1129_v47 = vadd.f32 %v1127_v46, %v1097_v39  ;;  %v843_v48 = vpop.f32.mrb[1].mxu0 }
 0x18d   : > { %v1130_v49 = vadd.f32 %v843_v48, %v483_v40  ;;  %v1128_v50 = vpop.f32.mrb[2].mxu0 }
 0x18e   : > { %v884_v51 = vmul.f32 %v1129_v47, %v875_v38  ;;  %v1131_v52 = vadd.f32 %v1128_v50, %v1098_v42  ;;  %v846_v53 = vpop.f32.mrb[3].mxu0 }
 0x18f   : > { %v882_v55 = vmul.f32 %v1130_v49, %v865_v37  ;;  %v1132_v56 = vadd.f32 %v846_v53, %v486_v43 }
 0x190   : > { %v908_v57 = vadd.f32 %v899_v54, %v884_v51  ;;  %v885_v58 = vmul.f32 %v1131_v52, %v880_v41 }
 0x191   : > { %v906_v60 = vadd.f32 %v889_v44, %v882_v55  ;;  %v883_v61 = vmul.f32 %v1132_v56, %v870_v36 }
 0x192   : > { %v912_v62 = vmax.f32 %v908_v57, 0.0  ;;  %v909_v63 = vadd.f32 %v904_v59, %v885_v58 }
 0x193   : > { %v910_v0 = vmax.f32 %v906_v60, 0.0  ;;  %v907_v1 = vadd.f32 %v894_v45, %v883_v61 }
 0x194   : > { %v1046_v2 = vpack.c.bf16 %v912_v62, %v912_v62  ;;  %v913_v3 = vmax.f32 %v909_v63, 0.0 }
 0x195   : > { %v1044_v4 = vpack.c.bf16 %v910_v0, %v910_v0  ;;  %v911_v5 = vmax.f32 %v907_v1, 0.0 }
 0x196   : > { %933 = vst.msk [vmem:[%s170_s4 + $0x8] sm:$0xf] %vm930_vm1, %v1046_v2  ;;  %v1047_v6 = vpack.c.bf16 %v913_v3, %v913_v3 }
 0x197   : > { %931 = vst.msk [vmem:[%s170_s4] sm:$0xf] %vm930_vm1, %v1044_v4  ;;  %v1045_v7 = vpack.c.bf16 %v911_v5, %v911_v5 }
 0x198   : > { %934 = vst.msk [vmem:[%s170_s4 + $0xc] sm:$0xf] %vm930_vm1, %v1047_v6 }
 0x199   : > { %932 = vst.msk [vmem:[%s170_s4 + $0x4] sm:$0xf] %vm930_vm1, %v1045_v7 }
 0x19a PF: > { %s13_s12 = sadd.s32 1, %s1205_s12  }
 0x19b   : > { %p10_p4 = scmp.ge.s32.totalorder %s13_s12, 4  }
 0x19d   :  { %12 = sbr.rel (!%p10_p4) target bundleno = 1 (0x1), region = 62 }

// kernel: forward.16
= control target key start
LH: loop header
LB: loop body
LE: loop exit
PB: predicated region body
PF: predicated region fallthrough
CT: control target
= control target key end

     0   :  { %s1693_s12 = smov 0   ;;  %s1966_s0 = inlined_call_operand.vmem [shape: bf16[2,32,482], index: 0, kind: input, shape index: {}]   ;;  %s1967_s1 = inlined_call_operand.vmem [shape: bf16[9,8,32], index: 1, kind: input, shape index: {}]   ;;  %s1968_s2 = inlined_call_operand.vmem [shape: f32[2,8,1], index: 2, kind: input, shape index: {}]   ;;  %s1969_s3 = inlined_call_operand.vmem [shape: bf16[2,8,320], index: 3, kind: output, shape index: {}]  }
   0x1 LB: > { %s1402_s13 = sadd.s32 4294967295, %s1660_s12   ;;  %p1406_p0 = scmp.ge.s32.totalorder %s1660_s12, 1  ;;  %s1660_s12 = sphi %s1693_s12, %s13_s12  }
   0x2   : > { %p137_p1 = scmp.lt.s32.totalorder %s1660_s12, 3 }
   0x4   : > { %p138_p2 = pnand %p1406_p0, %p137_p1 }
   0x5   : > { %p161_p3 = scmp.lt.s32.totalorder (!%p138_p2), %s1402_s13, 1  ;;  %v1662_v0 = vmov (!%p138_p2), 0.0   ;;  %vm1663_vm0 = vmmov (!%p138_p2), 0   ;;  %v1664_v9 = vmov (!%p138_p2), 0   ;;  %s1665_s18 = smov (!%p138_p2), 127   ;;  %vm229_vm1 = vcmask (!%p138_p2), 1039360  }
   0x6   : > { %141 = sbr.rel (%p138_p2) target bundleno = 482 (0x1e2), region = 32  ;;  %1488 = vmatprep.subr.bf16.mxu1 (!%p138_p2), %v1662_v0  ;;  %1492 = vmatprep.mubr.msk.bf16.mxu1 (!%p138_p2), %vm1663_vm0, %v1662_v0  ;;  %s1666_s19 = smov (!%p138_p2), 126   ;;  %v189_v22 = vld [vmem:[%s1968_s2] sm:$0xff] (!%p138_p2)  ;;  %v190_v24 = vld [vmem:[%s1968_s2 + $0x8] sm:$0xff] (!%p138_p2)  ;;  %vm240_vm2 = vcmask (!%p138_p2), 261120   ;;  %vm427_vm3 = vcmask (!%p138_p2), 1031168  }
   0x7   : > { %276 = vmatprep.mubr.bf16.mxu0 (!%p138_p2), %v1664_v9  ;;  %1644 = vset.pattern.permute.xlu0 (!%p138_p2), %v1664_v9  ;;  %s1667_s20 = smov (!%p138_p2), 48   ;;  %s1668_s21 = smov (!%p138_p2), 47   ;;  %v181_v30 = vld [vmem:[%s1967_s1 + $0x4] sm:$0xf] (!%p138_p2)  ;;  %v180_v38 = vld [vmem:[%s1967_s1] sm:$0xf] (!%p138_p2) }
   0x8   : > { %1645 = vset.pattern.permute.xlu1 (!%p138_p2), %v1664_v9  ;;  %s1669_s22 = smov (!%p138_p2), 46   ;;  %s1670_s23 = smov (!%p138_p2), 96   ;;  %vm547_vm4 = vcmask (!%p138_p2), 392192   ;;  %v182_v49 = vld [vmem:[%s1967_s1 + $0x8] sm:$0xf] (!%p138_p2)  ;;  %vm663_vm5 = vcmask (!%p138_p2), 384000  }
   0x9   : > { %s1671_s24 = smov (!%p138_p2), 95   ;;  %s1672_s25 = smov (!%p138_p2), 94   ;;  %v183_v62 = vld [vmem:[%s1967_s1 + $0xc] sm:$0xf] (!%p138_p2)  ;;  %vm779_vm6 = vcmask (!%p138_p2), 375808   ;;  %vm903_vm7 = vcmask (!%p138_p2), 1043456  }
   0xa   : > { %vm905_vm8 = vcmask (!%p138_p2), 785408   ;;  %vm1049_vm9 = vcmask (!%p138_p2), 777216   ;;  %vm1193_vm10 = vcmask (!%p138_p2), 769024   ;;  %vm1345_vm11 = vcmask (!%p138_p2), 519168  }
   0xd   : > { %s1971_s13 = smov (!%p161_p3, %s1402_s13), 1 }
   0xe   : > { %s1458_s14 = sshll.u32 %s1971_s13, 6 }
   0xf   : > { %s165_s17 = scalar_lea.vmem %s1966_s0, %s1458_s14 }
  0x10   : > { %v1708_v1 = vld [vmem:[%s165_s17] sm:$0xff]  ;;  %v1710_v2 = vld [vmem:[%s165_s17 + $0x10] sm:$0xff]  ;;  %v1712_v3 = vld [vmem:[%s165_s17 + $0x8] sm:$0xff] }
  0x11   : > { %v1718_v4 = vcombine.high %v1708_v1, %v1710_v2  ;;  %v1722_v5 = vcombine.low %v1708_v1, %v1710_v2  ;;  %v1724_v6 = vld [vmem:[%s165_s17 + $0x18] sm:$0xff]  ;;  %v1726_v7 = vld [vmem:[%s165_s17 + $0x20] sm:$0xff]  ;;  %v1728_v8 = vld [vmem:[%s165_s17 + $0x30] sm:$0xff] }
  0x12   : > { %v1735_v10 = vcombine.low %v1712_v3, %v1724_v6  ;;  %v1739_v11 = vcombine.high %v1726_v7, %v1728_v8  ;;  %v1741_v12 = vld [vmem:[%s165_s17 + $0x28] sm:$0xff]  ;;  %v1743_v13 = vld [vmem:[%s165_s17 + $0x38] sm:$0xff]  ;;  %v1755_v15 = vcombine.low %v1726_v7, %v1728_v8  ;;  %v1422_v16 = vcombine.high %v1712_v3, %v1724_v6 }
  0x13   : > { %219 = vrot.lane.b32.xlu0 %v1718_v4, %s1665_s18  ;;  %217 = vrot.lane.b32.xlu1 %v1722_v5, %s1665_s18  ;;  %v1751_v14 = vcombine.low %v1741_v12, %v1743_v13  ;;  %v1423_v17 = vcombine.high %v1741_v12, %v1743_v13 }
  0x17   : > { %221 = vrot.lane.b32.xlu0 %v1735_v10, %s1665_s18  ;;  %225 = vrot.lane.b32.xlu1 %v1739_v11, %s1665_s18 }
  0x1b   : > { %227 = vrot.lane.b32.xlu0 %v1751_v14, %s1665_s18  ;;  %223 = vrot.lane.b32.xlu1 %v1755_v15, %s1665_s18 }
  0x1f   : > { %417 = vrot.lane.b32.xlu0 %v1718_v4, %s1666_s19  ;;  %419 = vrot.lane.b32.xlu1 %v1735_v10, %s1666_s19 }
  0x23   : > { %415 = vrot.lane.b32.xlu0 %v1722_v5, %s1666_s19  ;;  %423 = vrot.lane.b32.xlu1 %v1739_v11, %s1666_s19 }
  0x27   : > { %425 = vrot.lane.b32.xlu0 %v1751_v14, %s1666_s19  ;;  %421 = vrot.lane.b32.xlu1 %v1755_v15, %s1666_s19 }
  0x2b   : > { %533 = vrot.lane.b32.xlu0 %v1718_v4, %s1667_s20  ;;  %535 = vrot.lane.b32.xlu1 %v1735_v10, %s1667_s20 }
  0x2f   : > { %531 = vrot.lane.b32.xlu0 %v1722_v5, %s1667_s20  ;;  %537 = vrot.lane.b32.xlu1 %v1422_v16, %s1667_s20 }
  0x33   : > { %541 = vrot.lane.b32.xlu0 %v1739_v11, %s1667_s20  ;;  %543 = vrot.lane.b32.xlu1 %v1751_v14, %s1667_s20 }
  0x37   : > { %539 = vrot.lane.b32.xlu0 %v1755_v15, %s1667_s20  ;;  %545 = vrot.lane.b32.xlu1 %v1423_v17, %s1667_s20 }
  0x3b   : > { %649 = vrot.lane.b32.xlu0 %v1718_v4, %s1668_s21  ;;  %651 = vrot.lane.b32.xlu1 %v1735_v10, %s1668_s21 }
  0x3f   : > { %647 = vrot.lane.b32.xlu0 %v1722_v5, %s1668_s21  ;;  %653 = vrot.lane.b32.xlu1 %v1422_v16, %s1668_s21 }
  0x43   : > { %657 = vrot.lane.b32.xlu0 %v1739_v11, %s1668_s21  ;;  %659 = vrot.lane.b32.xlu1 %v1751_v14, %s1668_s21 }
  0x47   : > { %655 = vrot.lane.b32.xlu0 %v1755_v15, %s1668_s21  ;;  %661 = vrot.lane.b32.xlu1 %v1423_v17, %s1668_s21 }
  0x4b   : > { %765 = vrot.lane.b32.xlu0 %v1718_v4, %s1669_s22  ;;  %767 = vrot.lane.b32.xlu1 %v1735_v10, %s1669_s22 }
  0x4f   : > { %763 = vrot.lane.b32.xlu0 %v1722_v5, %s1669_s22  ;;  %769 = vrot.lane.b32.xlu1 %v1422_v16, %s1669_s22 }
  0x53   : > { %773 = vrot.lane.b32.xlu0 %v1739_v11, %s1669_s22  ;;  %775 = vrot.lane.b32.xlu1 %v1751_v14, %s1669_s22 }
  0x57   : > { %771 = vrot.lane.b32.xlu0 %v1755_v15, %s1669_s22  ;;  %777 = vrot.lane.b32.xlu1 %v1423_v17, %s1669_s22 }
  0x5b   : > { %879 = vrot.lane.b32.xlu0 %v1708_v1, %s1670_s23  ;;  %881 = vrot.lane.b32.xlu1 %v1712_v3, %s1670_s23 }
  0x5f   : > { %883 = vrot.lane.b32.xlu0 %v1710_v2, %s1670_s23  ;;  %885 = vrot.lane.b32.xlu1 %v1724_v6, %s1670_s23 }
  0x63   : > { %887 = vrot.lane.b32.xlu0 %v1726_v7, %s1670_s23  ;;  %889 = vrot.lane.b32.xlu1 %v1741_v12, %s1670_s23 }
  0x67   : > { %891 = vrot.lane.b32.xlu0 %v1728_v8, %s1670_s23  ;;  %893 = vrot.lane.b32.xlu1 %v1743_v13, %s1670_s23  ;;  %s1624_s23 = smul.u32 12, %s1971_s13 }
  0x69   : > { %s170_s26 = scalar_lea.vmem %s1969_s3, %s1624_s23 }
  0x6b   : > { %1024 = vrot.lane.b32.xlu0 %v1708_v1, %s1671_s24  ;;  %1026 = vrot.lane.b32.xlu1 %v1712_v3, %s1671_s24 }
  0x6f   : > { %1028 = vrot.lane.b32.xlu0 %v1710_v2, %s1671_s24  ;;  %1030 = vrot.lane.b32.xlu1 %v1724_v6, %s1671_s24 }
  0x73   : > { %1032 = vrot.lane.b32.xlu0 %v1726_v7, %s1671_s24  ;;  %1034 = vrot.lane.b32.xlu1 %v1741_v12, %s1671_s24 }
  0x77   : > { %1036 = vrot.lane.b32.xlu0 %v1728_v8, %s1671_s24  ;;  %1038 = vrot.lane.b32.xlu1 %v1743_v13, %s1671_s24 }
  0x7b   : > { %1168 = vrot.lane.b32.xlu0 %v1708_v1, %s1672_s25  ;;  %1170 = vrot.lane.b32.xlu1 %v1712_v3, %s1672_s25 }
  0x7f   : > { %1172 = vrot.lane.b32.xlu0 %v1710_v2, %s1672_s25  ;;  %1174 = vrot.lane.b32.xlu1 %v1724_v6, %s1672_s25 }
  0x83   : > { %1176 = vrot.lane.b32.xlu0 %v1726_v7, %s1672_s25  ;;  %1178 = vrot.lane.b32.xlu1 %v1741_v12, %s1672_s25 }
  0x85   : > { %v220_v18 = vpop.permute.xlu0 %219  ;;  %v218_v19 = vpop.permute.xlu1 %217 }
  0x86   : > { %v230_v25 = vsel %vm229_vm1, %v218_v19, %v220_v18 }
  0x87   : > { %1180 = vrot.lane.b32.xlu0 %v1728_v8, %s1672_s25  ;;  %1182 = vrot.lane.b32.xlu1 %v1743_v13, %s1672_s25  ;;  %v184_v13 = vld [vmem:[%s1967_s1 + $0x10] sm:$0xf] }
  0x89   : > { %v222_v20 = vpop.permute.xlu0 %221  ;;  %v226_v21 = vpop.permute.xlu1 %225 }
  0x8a   : > { %1489 = vmatpush3.bf16.msra.mxu1 %v222_v20  ;;  %v231_v23 = vsel %vm229_vm1, %v220_v18, %v222_v20 }
  0x8b   : > { %244 = vmatprep.subr.bf16.mxu0 %v231_v23  ;;  %1490 = vmatprep.subr.bf16.mxu1 %v1662_v0 }
  0x8c   : > { %245 = vmatpush1.bf16.msra.mxu0 %v230_v25  ;;  %1314 = vperm.xlu0 %1644, %v189_v22   ;;  %v185_v25 = vld [vmem:[%s1967_s1 + $0x14] sm:$0xf] }
  0x8d   : > { %v228_v26 = vpop.permute.xlu0 %227  ;;  %v224_v27 = vpop.permute.xlu1 %223  ;;  %1322 = vperm.xlu1 %1645, %v190_v24  }
  0x8e   : > { %1491 = vmatpush3.bf16.msra.mxu1 %v228_v26  ;;  %v233_v28 = vsel %vm229_vm1, %v226_v21, %v228_v26  ;;  %v232_v29 = vsel %vm229_vm1, %v224_v27, %v226_v21 }
  0x8f   : > { %246 = vmatprep.subr.bf16.mxu0 %v233_v28  ;;  %1496 = vmatprep.subr.bf16.mxu1 %v1662_v0 }
  0x90   : > { %247 = vmatpush1.bf16.msra.mxu0 %v232_v29 }
  0x91   : > { %1493 = vmatmul.mubr.msk.bf16.vlgmr.msra.gmra.mrb[0].mxu1 %vm240_vm2, %v181_v30  ;;  %v418_v31 = vpop.permute.xlu0 %417  ;;  %v420_v32 = vpop.permute.xlu1 %419  ;;  %334 = vmatprep.subr.bf16.mxu0 %v1718_v4 }
  0x92   : > { %1497 = vmatpush3.bf16.msra.mxu1 %v1735_v10  ;;  %1500 = vmatprep.mubr.msk.bf16.mxu1 %vm1663_vm0, %v1662_v0  ;;  %v429_v35 = vsel %vm427_vm3, %v418_v31, %v420_v32 }
  0x93   : > { %1416 = vmatmul.mubr.msk.bf16.vlgmr.msra.gmra.mrb[0].mxu0 %vm240_vm2, %v181_v30  ;;  %1498 = vmatprep.subr.bf16.mxu1 %v1662_v0 }
  0x94   : > { %335 = vmatpush1.bf16.msra.mxu0 %v1722_v5  ;;  %366 = vmatprep.mubr.bf16.mxu0 %v1664_v9 }
  0x95   : > { %v416_v33 = vpop.permute.xlu0 %415  ;;  %v424_v34 = vpop.permute.xlu1 %423  ;;  %336 = vmatprep.subr.bf16.mxu0 %v1739_v11 }
  0x96   : > { %1499 = vmatpush3.bf16.msra.mxu1 %v1751_v14  ;;  %v428_v41 = vsel %vm427_vm3, %v416_v33, %v418_v31 }
  0x97   : > { %1504 = vmatprep.subr.bf16.mxu1 %v1662_v0 }
  0x98   : > { %337 = vmatpush1.bf16.msra.mxu0 %v1755_v15 }
  0x99   : > { %v426_v36 = vpop.permute.xlu0 %425  ;;  %441 = vmatprep.subr.bf16.mxu0 %v429_v35  ;;  %v422_v37 = vpop.permute.xlu1 %421 }
  0x9a   : > { %v431_v42 = vsel %vm427_vm3, %v424_v34, %v426_v36  ;;  %v430_v45 = vsel %vm427_vm3, %v422_v37, %v424_v34 }
  0x9d   : > { %1501 = vmatmul.mubr.msk.bf16.vlgmr.msra.gmra.mrb[0].mxu1 %vm240_vm2, %v180_v38  ;;  %v534_v39 = vpop.permute.xlu0 %533  ;;  %v536_v40 = vpop.permute.xlu1 %535 }
  0x9e   : > { %1505 = vmatpush3.bf16.msra.mxu1 %v420_v32  ;;  %1508 = vmatprep.mubr.msk.bf16.mxu1 %vm1663_vm0, %v1662_v0  ;;  %v549_v46 = vsel %vm547_vm4, %v534_v39, %v536_v40 }
  0x9f   : > { %1418 = vmatmul.mubr.msk.bf16.vlgmr.msra.gmra.mrb[0].mxu0 %vm240_vm2, %v180_v38  ;;  %1506 = vmatprep.subr.bf16.mxu1 %v1662_v0 }
  0xa0   : > { %442 = vmatpush1.bf16.msra.mxu0 %v428_v41  ;;  %473 = vmatprep.mubr.bf16.mxu0 %v1664_v9 }
  0xa1   : > { %443 = vmatprep.subr.bf16.mxu0 %v431_v42  ;;  %v532_v43 = vpop.permute.xlu0 %531  ;;  %v538_v44 = vpop.permute.xlu1 %537 }
  0xa2   : > { %1507 = vmatpush3.bf16.msra.mxu1 %v426_v36  ;;  %v550_v50 = vsel %vm547_vm4, %v536_v40, %v538_v44  ;;  %v548_v53 = vsel %vm547_vm4, %v532_v43, %v534_v39 }
  0xa3   : > { %1512 = vmatprep.subr.bf16.mxu1 %v1662_v0 }
  0xa4   : > { %444 = vmatpush1.bf16.msra.mxu0 %v430_v45 }
  0xa5   : > { %563 = vmatprep.subr.bf16.mxu0 %v549_v46  ;;  %v542_v47 = vpop.permute.xlu0 %541  ;;  %v544_v48 = vpop.permute.xlu1 %543 }
  0xa6   : > { %v552_v54 = vsel %vm547_vm4, %v542_v47, %v544_v48 }
  0xa9   : > { %v540_v51 = vpop.permute.xlu0 %539  ;;  %1509 = vmatmul.mubr.msk.bf16.vlgmr.msra.gmra.mrb[0].mxu1 %vm240_vm2, %v182_v49  ;;  %v546_v52 = vpop.permute.xlu1 %545 }
  0xaa   : > { %1513 = vmatpush3.bf16.msra.mxu1 %v550_v50  ;;  %1516 = vmatprep.mubr.msk.bf16.mxu1 %vm1663_vm0, %v1662_v0  ;;  %v553_v55 = vsel %vm547_vm4, %v544_v48, %v546_v52  ;;  %v551_v59 = vsel %vm547_vm4, %v540_v51, %v542_v47 }
  0xab   : > { %1420 = vmatmul.mubr.msk.bf16.vlgmr.msra.gmra.mrb[0].mxu0 %vm240_vm2, %v182_v49  ;;  %1514 = vmatprep.subr.bf16.mxu1 %v1662_v0 }
  0xac   : > { %564 = vmatpush1.bf16.msra.mxu0 %v548_v53  ;;  %595 = vmatprep.mubr.bf16.mxu0 %v1664_v9 }
  0xad   : > { %565 = vmatprep.subr.bf16.mxu0 %v552_v54  ;;  %v650_v56 = vpop.permute.xlu0 %649  ;;  %v652_v57 = vpop.permute.xlu1 %651 }
  0xae   : > { %1515 = vmatpush3.bf16.msra.mxu1 %v553_v55  ;;  %v665_v58 = vsel %vm663_vm5, %v650_v56, %v652_v57 }
  0xaf   : > { %1520 = vmatprep.subr.bf16.mxu1 %v1662_v0 }
  0xb0   : > { %566 = vmatpush1.bf16.msra.mxu0 %v551_v59 }
  0xb1   : > { %679 = vmatprep.subr.bf16.mxu0 %v665_v58  ;;  %v648_v60 = vpop.permute.xlu0 %647  ;;  %v654_v61 = vpop.permute.xlu1 %653 }
  0xb2   : > { %v666_v63 = vsel %vm663_vm5, %v652_v57, %v654_v61  ;;  %v664_v4 = vsel %vm663_vm5, %v648_v60, %v650_v56  ;;  %v186_v60 = vld [vmem:[%s1967_s1 + $0x18] sm:$0xf] }
  0xb5   : > { %v658_v1 = vpop.permute.xlu0 %657  ;;  %1517 = vmatmul.mubr.msk.bf16.vlgmr.msra.gmra.mrb[0].mxu1 %vm240_vm2, %v183_v62  ;;  %v660_v2 = vpop.permute.xlu1 %659 }
  0xb6   : > { %1521 = vmatpush3.bf16.msra.mxu1 %v666_v63  ;;  %v668_v3 = vsel %vm663_vm5, %v658_v1, %v660_v2  ;;  %1524 = vmatprep.mubr.msk.bf16.mxu1 %vm1663_vm0, %v1662_v0 }
  0xb7   : > { %1424 = vmatmul.mubr.msk.bf16.vlgmr.msra.gmra.mrb[0].mxu0 %vm240_vm2, %v183_v62  ;;  %1522 = vmatprep.subr.bf16.mxu1 %v1662_v0 }
  0xb8   : > { %680 = vmatpush1.bf16.msra.mxu0 %v664_v4  ;;  %711 = vmatprep.mubr.bf16.mxu0 %v1664_v9 }
  0xb9   : > { %681 = vmatprep.subr.bf16.mxu0 %v668_v3  ;;  %v656_v5 = vpop.permute.xlu0 %655  ;;  %v662_v6 = vpop.permute.xlu1 %661 }
  0xba   : > { %v667_v7 = vsel %vm663_vm5, %v656_v5, %v658_v1  ;;  %v669_v8 = vsel %vm663_vm5, %v660_v2, %v662_v6 }
  0xbb   : > { %1523 = vmatpush3.bf16.msra.mxu1 %v669_v8 }
  0xbc   : > { %682 = vmatpush1.bf16.msra.mxu0 %v667_v7  ;;  %1528 = vmatprep.subr.bf16.mxu1 %v1662_v0 }
  0xbd   : > { %v766_v10 = vpop.permute.xlu0 %765  ;;  %v768_v11 = vpop.permute.xlu1 %767 }
  0xbe   : > { %v781_v12 = vsel %vm779_vm6, %v766_v10, %v768_v11 }
  0xbf   : > { %795 = vmatprep.subr.bf16.mxu0 %v781_v12 }
  0xc1   : > { %v764_v14 = vpop.permute.xlu0 %763  ;;  %v770_v15 = vpop.permute.xlu1 %769  ;;  %1525 = vmatmul.mubr.msk.bf16.vlgmr.msra.gmra.mrb[0].mxu1 %vm240_vm2, %v184_v13 }
  0xc2   : > { %v780_v16 = vsel %vm779_vm6, %v764_v14, %v766_v10  ;;  %v782_v17 = vsel %vm779_vm6, %v768_v11, %v770_v15  ;;  %1532 = vmatprep.mubr.msk.bf16.mxu1 %vm1663_vm0, %v1662_v0 }
  0xc3   : > { %1426 = vmatmul.mubr.msk.bf16.vlgmr.msra.gmra.mrb[0].mxu0 %vm240_vm2, %v184_v13  ;;  %1529 = vmatpush3.bf16.msra.mxu1 %v782_v17 }
  0xc4   : > { %796 = vmatpush1.bf16.msra.mxu0 %v780_v16  ;;  %1530 = vmatprep.subr.bf16.mxu1 %v1662_v0 }
  0xc5   : > { %v774_v18 = vpop.permute.xlu0 %773  ;;  %v776_v19 = vpop.permute.xlu1 %775  ;;  %827 = vmatprep.mubr.bf16.mxu0 %v1664_v9 }
  0xc6   : > { %v784_v20 = vsel %vm779_vm6, %v774_v18, %v776_v19 }
  0xc7   : > { %797 = vmatprep.subr.bf16.mxu0 %v784_v20 }
  0xc9   : > { %v772_v21 = vpop.permute.xlu0 %771  ;;  %v778_v22 = vpop.permute.xlu1 %777 }
  0xca   : > { %v783_v23 = vsel %vm779_vm6, %v772_v21, %v774_v18  ;;  %v785_v24 = vsel %vm779_vm6, %v776_v19, %v778_v22 }
  0xcb   : > { %798 = vmatpush1.bf16.msra.mxu0 %v783_v23  ;;  %1531 = vmatpush3.bf16.msra.mxu1 %v785_v24 }
  0xcc   : > { %1536 = vmatprep.subr.bf16.mxu1 %v1662_v0 }
  0xcd   : > { %v880_v26 = vpop.permute.xlu0 %879  ;;  %v882_v27 = vpop.permute.xlu1 %881 }
  0xce   : > { %v895_v28 = vrot.slane %v880_v26, 4  ;;  %v896_v29 = vrot.slane %v882_v27, 4  ;;  %1533 = vmatmul.mubr.msk.bf16.vlgmr.msra.gmra.mrb[0].mxu1 %vm240_vm2, %v185_v25 }
  0xcf   : > { %1428 = vmatmul.mubr.msk.bf16.vlgmr.msra.gmra.mrb[0].mxu0 %vm240_vm2, %v185_v25  ;;  %1540 = vmatprep.mubr.msk.bf16.mxu1 %vm1663_vm0, %v1662_v0 }
  0xd0   : > { %972 = vmatprep.mubr.bf16.mxu0 %v1664_v9  ;;  %v904_v32 = vsel %vm903_vm7, %v895_v28, %v896_v29 }
  0xd1   : > { %v884_v30 = vpop.permute.xlu0 %883  ;;  %v886_v31 = vpop.permute.xlu1 %885  ;;  %v906_v37 = vsel %vm905_vm8, %v904_v32, %v882_v27 }
  0xd2   : > { %v897_v33 = vrot.slane %v884_v30, 4  ;;  %v898_v34 = vrot.slane %v886_v31, 4 }
  0xd4   : > { %v907_v35 = vsel %vm903_vm7, %v897_v33, %v898_v34  ;;  %v1432_v36 = vcombine.low %v896_v29, %v898_v34  ;;  %v187_v29 = vld [vmem:[%s1967_s1 + $0x1c] sm:$0xf] }
  0xd5   : > { %v908_v38 = vsel %vm905_vm8, %v907_v35, %v886_v31  ;;  %v888_v39 = vpop.permute.xlu0 %887  ;;  %v890_v40 = vpop.permute.xlu1 %889 }
  0xd6   : > { %v1430_v41 = vcombine.low %v906_v37, %v908_v38  ;;  %v1431_v42 = vcombine.high %v906_v37, %v908_v38  ;;  %v899_v43 = vrot.slane %v888_v39, 4  ;;  %v900_v44 = vrot.slane %v890_v40, 4  ;;  %1537 = vmatpush3.bf16.msra.mxu1 %v1432_v36 }
  0xd7   : > { %1538 = vmatprep.subr.bf16.mxu1 %v1662_v0 }
  0xd8   : > { %940 = vmatprep.subr.bf16.mxu0 %v1431_v42  ;;  %v909_v47 = vsel %vm903_vm7, %v899_v43, %v900_v44 }
  0xd9   : > { %v892_v45 = vpop.permute.xlu0 %891  ;;  %941 = vmatpush1.bf16.msra.mxu0 %v1430_v41  ;;  %v894_v46 = vpop.permute.xlu1 %893  ;;  %v910_v52 = vsel %vm905_vm8, %v909_v47, %v890_v40 }
  0xda   : > { %v901_v48 = vrot.slane %v892_v45, 4  ;;  %v902_v49 = vrot.slane %v894_v46, 4 }
  0xdc   : > { %v911_v50 = vsel %vm903_vm7, %v901_v48, %v902_v49  ;;  %v1435_v51 = vcombine.low %v900_v44, %v902_v49 }
  0xdd   : > { %v912_v53 = vsel %vm905_vm8, %v911_v50, %v894_v46  ;;  %v1025_v54 = vpop.permute.xlu0 %1024  ;;  %v1027_v55 = vpop.permute.xlu1 %1026 }
  0xde   : > { %v1433_v56 = vcombine.low %v910_v52, %v912_v53  ;;  %v1434_v57 = vcombine.high %v910_v52, %v912_v53  ;;  %v1040_v58 = vrot.slane %v1025_v54, 4  ;;  %v1041_v59 = vrot.slane %v1027_v55, 4  ;;  %1539 = vmatpush3.bf16.msra.mxu1 %v1435_v51 }
  0xdf   : > { %1544 = vmatprep.subr.bf16.mxu1 %v1662_v0 }
  0xe0   : > { %942 = vmatprep.subr.bf16.mxu0 %v1434_v57  ;;  %v1048_v63 = vsel %vm903_vm7, %v1040_v58, %v1041_v59 }
  0xe1   : > { %v1029_v61 = vpop.permute.xlu0 %1028  ;;  %943 = vmatpush1.bf16.msra.mxu0 %v1433_v56  ;;  %v1031_v62 = vpop.permute.xlu1 %1030  ;;  %1541 = vmatmul.mubr.msk.bf16.vlgmr.msra.gmra.mrb[0].mxu1 %vm240_vm2, %v186_v60  ;;  %v1050_v5 = vsel %vm1049_vm9, %v1048_v63, %v1027_v55 }
  0xe2   : > { %v1042_v1 = vrot.slane %v1029_v61, 4  ;;  %v1043_v2 = vrot.slane %v1031_v62, 4  ;;  %1548 = vmatprep.mubr.msk.bf16.mxu1 %vm1663_vm0, %v1662_v0 }
  0xe4   : > { %v1051_v3 = vsel %vm903_vm7, %v1042_v1, %v1043_v2  ;;  %v1440_v4 = vcombine.low %v1041_v59, %v1043_v2  ;;  %1436 = vmatmul.mubr.msk.bf16.vlgmr.msra.gmra.mrb[0].mxu0 %vm240_vm2, %v186_v60 }
  0xe5   : > { %v1052_v6 = vsel %vm1049_vm9, %v1051_v3, %v1031_v62  ;;  %v1033_v7 = vpop.permute.xlu0 %1032  ;;  %v1035_v8 = vpop.permute.xlu1 %1034  ;;  %1116 = vmatprep.mubr.bf16.mxu0 %v1664_v9 }
  0xe6   : > { %v1438_v10 = vcombine.low %v1050_v5, %v1052_v6  ;;  %v1439_v11 = vcombine.high %v1050_v5, %v1052_v6  ;;  %v1044_v12 = vrot.slane %v1033_v7, 4  ;;  %v1045_v13 = vrot.slane %v1035_v8, 4  ;;  %1545 = vmatpush3.bf16.msra.mxu1 %v1440_v4 }
  0xe7   : > { %1546 = vmatprep.subr.bf16.mxu1 %v1662_v0 }
  0xe8   : > { %1084 = vmatprep.subr.bf16.mxu0 %v1439_v11  ;;  %v1053_v16 = vsel %vm903_vm7, %v1044_v12, %v1045_v13 }
  0xe9   : > { %v1037_v14 = vpop.permute.xlu0 %1036  ;;  %1085 = vmatpush1.bf16.msra.mxu0 %v1438_v10  ;;  %v1039_v15 = vpop.permute.xlu1 %1038  ;;  %v1054_v21 = vsel %vm1049_vm9, %v1053_v16, %v1035_v8 }
  0xea   : > { %v1046_v17 = vrot.slane %v1037_v14, 4  ;;  %v1047_v18 = vrot.slane %v1039_v15, 4 }
  0xec   : > { %v1055_v19 = vsel %vm903_vm7, %v1046_v17, %v1047_v18  ;;  %v1443_v20 = vcombine.low %v1045_v13, %v1047_v18 }
  0xed   : > { %v1056_v22 = vsel %vm1049_vm9, %v1055_v19, %v1039_v15  ;;  %v1169_v23 = vpop.permute.xlu0 %1168  ;;  %v1171_v24 = vpop.permute.xlu1 %1170 }
  0xee   : > { %v1441_v25 = vcombine.low %v1054_v21, %v1056_v22  ;;  %v1442_v26 = vcombine.high %v1054_v21, %v1056_v22  ;;  %v1184_v27 = vrot.slane %v1169_v23, 4  ;;  %v1185_v28 = vrot.slane %v1171_v24, 4  ;;  %1547 = vmatpush3.bf16.msra.mxu1 %v1443_v20 }
  0xef   : > { %1552 = vmatprep.subr.bf16.mxu1 %v1662_v0 }
  0xf0   : > { %1086 = vmatprep.subr.bf16.mxu0 %v1442_v26  ;;  %v1192_v32 = vsel %vm903_vm7, %v1184_v27, %v1185_v28 }
  0xf1   : > { %v1173_v30 = vpop.permute.xlu0 %1172  ;;  %1087 = vmatpush1.bf16.msra.mxu0 %v1441_v25  ;;  %v1175_v31 = vpop.permute.xlu1 %1174  ;;  %1549 = vmatmul.mubr.msk.bf16.vlgmr.msra.gmra.mrb[0].mxu1 %vm240_vm2, %v187_v29  ;;  %v1194_v37 = vsel %vm1193_vm10, %v1192_v32, %v1171_v24 }
  0xf2   : > { %v1186_v33 = vrot.slane %v1173_v30, 4  ;;  %v1187_v34 = vrot.slane %v1175_v31, 4  ;;  %1556 = vmatprep.mubr.msk.bf16.mxu1 %vm1663_vm0, %v1662_v0 }
  0xf4   : > { %v1195_v35 = vsel %vm903_vm7, %v1186_v33, %v1187_v34  ;;  %v1448_v36 = vcombine.low %v1185_v28, %v1187_v34  ;;  %1444 = vmatmul.mubr.msk.bf16.vlgmr.msra.gmra.mrb[0].mxu0 %vm240_vm2, %v187_v29 }
  0xf5   : > { %v1196_v38 = vsel %vm1193_vm10, %v1195_v35, %v1175_v31  ;;  %v1177_v39 = vpop.permute.xlu0 %1176  ;;  %v1179_v40 = vpop.permute.xlu1 %1178  ;;  %1260 = vmatprep.mubr.bf16.mxu0 %v1664_v9 }
  0xf6   : > { %v1446_v41 = vcombine.low %v1194_v37, %v1196_v38  ;;  %v1447_v42 = vcombine.high %v1194_v37, %v1196_v38  ;;  %v1188_v43 = vrot.slane %v1177_v39, 4  ;;  %v1189_v44 = vrot.slane %v1179_v40, 4  ;;  %1553 = vmatpush3.bf16.msra.mxu1 %v1448_v36 }
  0xf7   : > { %1554 = vmatprep.subr.bf16.mxu1 %v1662_v0  ;;  %v188_v0 = vld [vmem:[%s1967_s1 + $0x20] sm:$0xf] }
  0xf8   : > { %1228 = vmatprep.subr.bf16.mxu0 %v1447_v42  ;;  %v1197_v47 = vsel %vm903_vm7, %v1188_v43, %v1189_v44 }
  0xf9   : > { %v1181_v45 = vpop.permute.xlu0 %1180  ;;  %1229 = vmatpush1.bf16.msra.mxu0 %v1446_v41  ;;  %v1183_v46 = vpop.permute.xlu1 %1182  ;;  %v1198_v9 = vsel %vm1193_vm10, %v1197_v47, %v1179_v40 }
  0xfa   : > { %v1190_v48 = vrot.slane %v1181_v45, 4  ;;  %v1191_v49 = vrot.slane %v1183_v46, 4 }
  0xfc   : > { %v1199_v50 = vsel %vm903_vm7, %v1190_v48, %v1191_v49  ;;  %v1451_v51 = vcombine.low %v1189_v44, %v1191_v49 }
  0xfd   : > { %v1200_v52 = vsel %vm1193_vm10, %v1199_v50, %v1183_v46 }
  0xfe   : > { %v1449_v53 = vcombine.low %v1198_v9, %v1200_v52  ;;  %v1450_v54 = vcombine.high %v1198_v9, %v1200_v52  ;;  %1555 = vmatpush3.bf16.msra.mxu1 %v1451_v51 }
 0x100   : > { %1230 = vmatprep.subr.bf16.mxu0 %v1450_v54 }
 0x101   : > { %1231 = vmatpush1.bf16.msra.mxu0 %v1449_v53  ;;  %1557 = vmatmul.mubr.msk.bf16.vlgmr.msra.gmra.mrb[0].mxu1 %vm240_vm2, %v188_v0 }
 0x104   : > { %1452 = vmatmul.mubr.msk.bf16.vlgmr.msra.gmra.mrb[0].mxu0 %vm240_vm2, %v188_v0 }
 0x10b   : > { %v1315_v55 = vpop.permute.xlu0 %1314 }
 0x10c   : > { %v1323_v57 = vpop.permute.xlu1 %1322 }
 0x1d4   : > { %v1303_v56 = vpop.f32.mrb[0].mxu1 }
 0x1d5   : > { %v1319_v58 = vmul.f32 %v1315_v55, %v1303_v56  ;;  %v1558_v59 = vpop.f32.mrb[1].mxu1 }
 0x1d6   : > { %v1306_v60 = vpop.f32.mrb[2].mxu1 }
 0x1d7   : > { %v1327_v61 = vadd.f32 %v1323_v57, %v1319_v58  ;;  %v1262_v62 = vpop.f32.mrb[0].mxu0  ;;  %v1559_v63 = vpop.f32.mrb[3].mxu1 }
 0x1d8   : > { %v1317_v1 = vmul.f32 %v1315_v55, %v1262_v62  ;;  %v1264_v2 = vpop.f32.mrb[1].mxu0 }
 0x1d9   : > { %v1330_v3 = vmax.f32 %v1327_v61, 0.0  ;;  %v1318_v4 = vmul.f32 %v1315_v55, %v1264_v2  ;;  %v1266_v5 = vpop.f32.mrb[2].mxu0 }
 0x1da   : > { %v1325_v6 = vadd.f32 %v1323_v57, %v1317_v1  ;;  %v1267_v7 = vpop.f32.mrb[3].mxu0 }
 0x1db   : > { %v1460_v8 = vpack.c.bf16 %v1330_v3, %v1330_v3  ;;  %v1326_v10 = vadd.f32 %v1323_v57, %v1318_v4 }
 0x1dc   : > { %v1328_v11 = vmax.f32 %v1325_v6, 0.0 }
 0x1dd   : > { %1346 = vst.msk [vmem:[%s170_s26 + $0x8] sm:$0xf] %vm1345_vm11, %v1460_v8  ;;  %v1329_v12 = vmax.f32 %v1326_v10, 0.0 }
 0x1df   : > { %v1459_v13 = vpack.c.bf16 %v1329_v12, %v1328_v11 }
 0x1e1   : > { %1344 = vst [vmem:[%s170_s26] sm:$0xff] %v1459_v13 }
 0x1e2 PF: > { %s13_s12 = sadd.s32 1, %s1660_s12  }
 0x1e3   : > { %p10_p4 = scmp.ge.s32.totalorder %s13_s12, 4  }
 0x1e5   :  { %12 = sbr.rel (!%p10_p4) target bundleno = 1 (0x1), region = 62 }

// kernel: forward.17
= control target key start
LH: loop header
LB: loop body
LE: loop exit
PB: predicated region body
PF: predicated region fallthrough
CT: control target
= control target key end

     0   :  { %s3356_s12 = smov 0   ;;  %s3985_s0 = inlined_call_operand.vmem [shape: bf16[2,8,1922], index: 0, kind: input, shape index: {}]   ;;  %s3986_s1 = inlined_call_operand.vmem [shape: bf16[9,1,8], index: 1, kind: input, shape index: {}]   ;;  %s3987_s2 = inlined_call_operand.vmem [shape: f32[2,1,1], index: 2, kind: input, shape index: {}]   ;;  %s3988_s3 = inlined_call_operand.vmem [shape: f32[2,1,1280], index: 3, kind: output, shape index: {}]  }
   0x1 LB: > { %s2953_s13 = sadd.s32 4294967295, %s3327_s12   ;;  %p2957_p0 = scmp.ge.s32.totalorder %s3327_s12, 1  ;;  %s3327_s12 = sphi %s3356_s12, %s13_s12  }
   0x2   : > { %p137_p1 = scmp.lt.s32.totalorder %s3327_s12, 3 }
   0x4   : > { %p138_p2 = pnand %p2957_p0, %p137_p1 }
   0x5   : > { %p160_p3 = scmp.lt.s32.totalorder (!%p138_p2), %s2953_s13, 1  ;;  %v3329_v0 = vmov (!%p138_p2), 0   ;;  %vm254_vm0 = vcmask (!%p138_p2), 1043456   ;;  %s3330_s18 = smov (!%p138_p2), 127   ;;  %v3419_v14 = vld [vmem:[%s3986_s1] sm:$0x1] (!%p138_p2) }
   0x6   : > { %141 = sbr.rel (%p138_p2) target bundleno = 574 (0x23e), region = 32  ;;  %637 = vmatprep.mubr.bf16.mxu0 (!%p138_p2), %v3329_v0  ;;  %317 = vmatprep.mubr.bf16.mxu1 (!%p138_p2), %v3329_v0  ;;  %vm250_vm1 = vcmask (!%p138_p2), 64512   ;;  %s3331_s21 = smov (!%p138_p2), 126   ;;  %vm239_vm2 = vcmask (!%p138_p2), 1039360   ;;  %v3550_v33 = vld [vmem:[%s3986_s1 + $0x1] sm:$0x1] (!%p138_p2) }
   0x7   : > { %3266 = vset.pattern.permute.xlu1 (!%p138_p2), %v3329_v0  ;;  %3267 = vset.pattern.permute.xlu0 (!%p138_p2), %v3329_v0  ;;  %s3332_s22 = smov (!%p138_p2), 64   ;;  %s3333_s23 = smov (!%p138_p2), 63   ;;  %vm750_vm3 = vcmask (!%p138_p2), 1031168   ;;  %v3580_v47 = vld [vmem:[%s3986_s1 + $0x2] sm:$0x1] (!%p138_p2)  ;;  %vm1036_vm4 = vcmask (!%p138_p2), 523264  }
   0x8   : > { %s3334_s24 = smov (!%p138_p2), 62   ;;  %vm1317_vm5 = vcmask (!%p138_p2), 515072   ;;  %vm1598_vm6 = vcmask (!%p138_p2), 506880  }
   0xd   : > { %s3990_s13 = smov (!%p160_p3, %s2953_s13), 1 }
   0xe   : > { %s3095_s14 = sshll.u32 %s3990_s13, 6  ;;  %s3250_s20 = smul.u32 10, %s3990_s13 }
   0xf   : > { %s3374_s17 = scalar_lea.vmem %s3985_s0, %s3095_s14 }
  0x10   : > { %v171_v1 = vld [vmem:[%s3374_s17 + $0x8] sm:$0xff]  ;;  %v170_v2 = vld [vmem:[%s3374_s17] sm:$0xff]  ;;  %v3379_v3 = vld [vmem:[%s3374_s17 + $0x10] sm:$0xff] }
  0x11   : > { %v3381_v4 = vcombine.low %v171_v1, %v171_v1  ;;  %v3383_v5 = vcombine.low %v170_v2, %v170_v2  ;;  %v3386_v6 = vld [vmem:[%s3374_s17 + $0x20] sm:$0xff]  ;;  %v3390_v7 = vcombine.low %v3379_v3, %v3379_v3  ;;  %v3394_v8 = vcombine.high %v3379_v3, %v3379_v3  ;;  %v3437_v16 = vld [vmem:[%s3374_s17 + $0x18] sm:$0xff]  ;;  %v3467_v19 = vld [vmem:[%s3374_s17 + $0x28] sm:$0xff] }
  0x12   : > { %v3400_v9 = vcombine.high %v171_v1, %v171_v1  ;;  %v3402_v10 = vcombine.high %v170_v2, %v170_v2  ;;  %v3406_v11 = vcombine.low %v3386_v6, %v3386_v6  ;;  %v3410_v12 = vcombine.high %v3386_v6, %v3386_v6  ;;  %v3496_v22 = vld [vmem:[%s3374_s17 + $0x30] sm:$0xff]  ;;  %v3538_v26 = vld [vmem:[%s3374_s17 + $0x38] sm:$0xff] }
  0x13   : > { %221 = vrot.lane.b32.xlu1 %v3381_v4, %s3330_s18  ;;  %217 = vrot.lane.b32.xlu0 %v3383_v5, %s3330_s18  ;;  %v506_v13 = vsel %vm254_vm0, %v3390_v7, 0  ;;  %v3445_v17 = vcombine.low %v3437_v16, %v3437_v16  ;;  %v3460_v18 = vcombine.high %v3437_v16, %v3437_v16  ;;  %v2970_v20 = vcombine.low %v3467_v19, %v3467_v19 }
  0x14   : > { %2985 = vmatprep.subr.msk.bf16.mxu0 %vm254_vm0, %v3394_v8  ;;  %v518_v15 = vsel %vm254_vm0, %v3406_v11, 0  ;;  %v3001_v21 = vcombine.high %v3467_v19, %v3467_v19  ;;  %v3002_v23 = vcombine.low %v3496_v22, %v3496_v22 }
  0x15   : > { %606 = vmatpush1.bf16.msra.mxu0 %v506_v13 }
  0x16   : > { %2989 = vmatprep.subr.msk.bf16.mxu0 %vm254_vm0, %v3410_v12 }
  0x17   : > { %223 = vrot.lane.b32.xlu1 %v3400_v9, %s3330_s18  ;;  %219 = vrot.lane.b32.xlu0 %v3402_v10, %s3330_s18 }
  0x18   : > { %2986 = vmatmul.mubr.msk.bf16.vlgmr.msra.gmra.mrb[0].mxu0 %vm250_vm1, %v3419_v14 }
  0x19   : > { %688 = vmatpush1.bf16.msra.mxu0 %v518_v15  ;;  %719 = vmatprep.mubr.bf16.mxu0 %v3329_v0 }
  0x1b   : > { %728 = vrot.lane.b32.xlu1 %v3383_v5, %s3331_s21  ;;  %225 = vrot.lane.b32.xlu0 %v3390_v7, %s3330_s18 }
  0x1f   : > { %732 = vrot.lane.b32.xlu1 %v3381_v4, %s3331_s21  ;;  %730 = vrot.lane.b32.xlu0 %v3402_v10, %s3331_s21 }
  0x20   : > { %2990 = vmatmul.mubr.msk.bf16.vlgmr.msra.gmra.mrb[4].mxu0 %vm250_vm1, %v3419_v14 }
  0x21   : > { %826 = vmatprep.mubr.bf16.mxu0 %v3329_v0 }
  0x23   : > { %229 = vrot.lane.b32.xlu1 %v3445_v17, %s3330_s18  ;;  %227 = vrot.lane.b32.xlu0 %v3394_v8, %s3330_s18 }
  0x27   : > { %738 = vrot.lane.b32.xlu1 %v3394_v8, %s3331_s21  ;;  %736 = vrot.lane.b32.xlu0 %v3390_v7, %s3331_s21 }
  0x2b   : > { %231 = vrot.lane.b32.xlu1 %v3460_v18, %s3330_s18  ;;  %740 = vrot.lane.b32.xlu0 %v3445_v17, %s3331_s21 }
  0x2f   : > { %744 = vrot.lane.b32.xlu1 %v3406_v11, %s3331_s21  ;;  %233 = vrot.lane.b32.xlu0 %v3406_v11, %s3330_s18 }
  0x33   : > { %748 = vrot.lane.b32.xlu1 %v2970_v20, %s3331_s21  ;;  %746 = vrot.lane.b32.xlu0 %v3410_v12, %s3331_s21 }
  0x37   : > { %237 = vrot.lane.b32.xlu1 %v2970_v20, %s3330_s18  ;;  %235 = vrot.lane.b32.xlu0 %v3410_v12, %s3330_s18 }
  0x3b   : > { %1016 = vrot.lane.b32.xlu1 %v3400_v9, %s3332_s22  ;;  %1014 = vrot.lane.b32.xlu0 %v3381_v4, %s3332_s22 }
  0x3f   : > { %1022 = vrot.lane.b32.xlu1 %v3445_v17, %s3332_s22  ;;  %1018 = vrot.lane.b32.xlu0 %v3390_v7, %s3332_s22 }
  0x43   : > { %1026 = vrot.lane.b32.xlu1 %v3406_v11, %s3332_s22  ;;  %1024 = vrot.lane.b32.xlu0 %v3460_v18, %s3332_s22 }
  0x47   : > { %1032 = vrot.lane.b32.xlu1 %v3001_v21, %s3332_s22  ;;  %1030 = vrot.lane.b32.xlu0 %v2970_v20, %s3332_s22 }
  0x4b   : > { %1295 = vrot.lane.b32.xlu1 %v3381_v4, %s3333_s23  ;;  %1034 = vrot.lane.b32.xlu0 %v3002_v23, %s3332_s22 }
  0x4f   : > { %1299 = vrot.lane.b32.xlu1 %v3390_v7, %s3333_s23  ;;  %1297 = vrot.lane.b32.xlu0 %v3400_v9, %s3333_s23 }
  0x53   : > { %1303 = vrot.lane.b32.xlu1 %v3445_v17, %s3333_s23  ;;  %734 = vrot.lane.b32.xlu0 %v3400_v9, %s3331_s21 }
  0x57   : > { %1307 = vrot.lane.b32.xlu1 %v3406_v11, %s3333_s23  ;;  %1305 = vrot.lane.b32.xlu0 %v3460_v18, %s3333_s23 }
  0x5b   : > { %1311 = vrot.lane.b32.xlu1 %v2970_v20, %s3333_s23  ;;  %742 = vrot.lane.b32.xlu0 %v3460_v18, %s3331_s21 }
  0x5f   : > { %1315 = vrot.lane.b32.xlu1 %v3002_v23, %s3333_s23  ;;  %1313 = vrot.lane.b32.xlu0 %v3001_v21, %s3333_s23 }
  0x63   : > { %1576 = vrot.lane.b32.xlu1 %v3381_v4, %s3334_s24  ;;  %1020 = vrot.lane.b32.xlu0 %v3394_v8, %s3332_s22 }
  0x67   : > { %1580 = vrot.lane.b32.xlu1 %v3390_v7, %s3334_s24  ;;  %1578 = vrot.lane.b32.xlu0 %v3400_v9, %s3334_s24 }
  0x6b   : > { %1584 = vrot.lane.b32.xlu1 %v3445_v17, %s3334_s24  ;;  %1028 = vrot.lane.b32.xlu0 %v3410_v12, %s3332_s22 }
  0x6f   : > { %1588 = vrot.lane.b32.xlu1 %v3406_v11, %s3334_s24  ;;  %1586 = vrot.lane.b32.xlu0 %v3460_v18, %s3334_s24 }
  0x73   : > { %1592 = vrot.lane.b32.xlu1 %v2970_v20, %s3334_s24  ;;  %1301 = vrot.lane.b32.xlu0 %v3394_v8, %s3333_s23 }
  0x77   : > { %1596 = vrot.lane.b32.xlu1 %v3002_v23, %s3334_s24  ;;  %1594 = vrot.lane.b32.xlu0 %v3001_v21, %s3334_s24  ;;  %v494_v21 = vsel %vm254_vm0, %v3383_v5, 0 }
  0x7b   : > { %1582 = vrot.lane.b32.xlu1 %v3394_v8, %s3334_s24  ;;  %1309 = vrot.lane.b32.xlu0 %v3410_v12, %s3333_s23  ;;  %s168_s23 = scalar_lea.vmem %s3988_s3, %s3250_s20 }
  0x7f   : > { %1590 = vrot.lane.b32.xlu0 %v3410_v12, %s3334_s24  ;;  %2138 = vrot.lane.b32.xlu1 %v3379_v3, %s3330_s18 }
  0x83   : > { %2140 = vrot.lane.b32.xlu0 %v3437_v16, %s3330_s18  ;;  %2142 = vrot.lane.b32.xlu1 %v3386_v6, %s3330_s18 }
  0x85   : > { %v222_v24 = vpop.permute.xlu1 %221  ;;  %v218_v25 = vpop.permute.xlu0 %217 }
  0x87   : > { %2144 = vrot.lane.b32.xlu0 %v3467_v19, %s3330_s18  ;;  %2146 = vrot.lane.b32.xlu1 %v3496_v22, %s3330_s18 }
  0x89   : > { %v224_v27 = vpop.permute.xlu1 %223  ;;  %v220_v28 = vpop.permute.xlu0 %219 }
  0x8a   : > { %v241_v29 = vsel %vm239_vm2, %v220_v28, %v222_v24  ;;  %v240_v30 = vsel %vm239_vm2, %v218_v25, %v220_v28  ;;  %v242_v32 = vsel %vm239_vm2, %v222_v24, %v224_v27 }
  0x8b   : > { %2971 = vmatprep.subr.msk.bf16.mxu1 %vm254_vm0, %v241_v29  ;;  %v256_v31 = vsel %vm254_vm0, %v240_v30, 0  ;;  %2148 = vrot.lane.b32.xlu0 %v3538_v26, %s3330_s18  ;;  %v262_v37 = vsel %vm254_vm0, %v242_v32, 0  ;;  %v500_v30 = vsel %vm254_vm0, %v3381_v4, 0 }
  0x8c   : > { %286 = vmatpush1.bf16.msra.mxu1 %v256_v31  ;;  %2434 = vrot.lane.b32.xlu1 %v3379_v3, %s3331_s21 }
  0x8d   : > { %v729_v34 = vpop.permute.xlu1 %728  ;;  %v226_v35 = vpop.permute.xlu0 %225 }
  0x8e   : > { %v243_v36 = vsel %vm239_vm2, %v224_v27, %v226_v35  ;;  %v3650_v27 = vld [vmem:[%s3986_s1 + $0x3] sm:$0x1] }
  0x8f   : > { %2972 = vmatmul.mubr.msk.bf16.vlgmr.msra.gmra.mrb[0].mxu1 %vm250_vm1, %v3550_v33  ;;  %2973 = vmatprep.subr.msk.bf16.mxu1 %vm254_vm0, %v243_v36 }
  0x90   : > { %327 = vmatpush1.bf16.msra.mxu1 %v262_v37  ;;  %358 = vmatprep.mubr.bf16.mxu1 %v3329_v0  ;;  %v512_v37 = vsel %vm254_vm0, %v3445_v17, 0 }
  0x91   : > { %v3560_v38 = vpop.permute.xlu1 %732  ;;  %v731_v39 = vpop.permute.xlu0 %730  ;;  %2436 = vrot.lane.b32.xlu0 %v3437_v16, %s3331_s21  ;;  %2438 = vrot.lane.b32.xlu1 %v3386_v6, %s3331_s21 }
  0x92   : > { %v751_v40 = vsel %vm750_vm3, %v729_v34, %v731_v39  ;;  %v752_v41 = vsel %vm750_vm3, %v731_v39, %v3560_v38 }
  0x93   : > { %v765_v42 = vsel %vm254_vm0, %v751_v40, 0  ;;  %2991 = vmatprep.subr.msk.bf16.mxu0 %vm254_vm0, %v752_v41 }
  0x94   : > { %795 = vmatpush1.bf16.msra.mxu0 %v765_v42 }
  0x95   : > { %v230_v43 = vpop.permute.xlu1 %229  ;;  %v228_v44 = vpop.permute.xlu0 %227  ;;  %2440 = vrot.lane.b32.xlu0 %v3467_v19, %s3331_s21  ;;  %2442 = vrot.lane.b32.xlu1 %v3496_v22, %s3331_s21 }
  0x96   : > { %v244_v45 = vsel %vm239_vm2, %v226_v35, %v228_v44  ;;  %v245_v46 = vsel %vm239_vm2, %v228_v44, %v230_v43 }
  0x97   : > { %v268_v48 = vsel %vm254_vm0, %v244_v45, 0  ;;  %2974 = vmatmul.mubr.msk.bf16.vlgmr.msra.gmra.mrb[4].mxu1 %vm250_vm1, %v3550_v33  ;;  %2975 = vmatprep.subr.msk.bf16.mxu1 %vm254_vm0, %v245_v46 }
  0x98   : > { %368 = vmatpush1.bf16.msra.mxu1 %v268_v48  ;;  %399 = vmatprep.mubr.bf16.mxu1 %v3329_v0 }
  0x99   : > { %v739_v49 = vpop.permute.xlu1 %738  ;;  %v3587_v50 = vpop.permute.xlu0 %736  ;;  %2992 = vmatmul.mubr.msk.bf16.vlgmr.msra.gmra.mrb[8].mxu0 %vm250_vm1, %v3580_v47  ;;  %2444 = vrot.lane.b32.xlu0 %v3538_v26, %s3331_s21 }
  0x9a   : > { %908 = vmatprep.mubr.bf16.mxu0 %v3329_v0  ;;  %v755_v51 = vsel %vm750_vm3, %v3587_v50, %v739_v49 }
  0x9b   : > { %v777_v55 = vsel %vm254_vm0, %v755_v51, 0 }
  0x9d   : > { %v232_v52 = vpop.permute.xlu1 %231  ;;  %v3596_v53 = vpop.permute.xlu0 %740 }
  0x9e   : > { %v756_v54 = vsel %vm750_vm3, %v739_v49, %v3596_v53  ;;  %v246_v56 = vsel %vm239_vm2, %v230_v43, %v232_v52 }
  0x9f   : > { %2976 = vmatmul.mubr.msk.bf16.vlgmr.msra.gmra.mrb[8].mxu1 %vm250_vm1, %v3550_v33  ;;  %2995 = vmatprep.subr.msk.bf16.mxu0 %vm254_vm0, %v756_v54  ;;  %v274_v60 = vsel %vm254_vm0, %v246_v56, 0 }
  0xa0   : > { %877 = vmatpush1.bf16.msra.mxu0 %v777_v55  ;;  %440 = vmatprep.mubr.bf16.mxu1 %v3329_v0  ;;  %v3718_v55 = vld [vmem:[%s3986_s1 + $0x4] sm:$0x1] }
  0xa1   : > { %v3606_v57 = vpop.permute.xlu1 %744  ;;  %v234_v58 = vpop.permute.xlu0 %233 }
  0xa2   : > { %v247_v59 = vsel %vm239_vm2, %v232_v52, %v234_v58 }
  0xa3   : > { %2977 = vmatprep.subr.msk.bf16.mxu1 %vm254_vm0, %v247_v59  ;;  %2996 = vmatmul.mubr.msk.bf16.vlgmr.msra.gmra.mrb[0].mxu0 %vm250_vm1, %v3580_v47 }
  0xa4   : > { %409 = vmatpush1.bf16.msra.mxu1 %v274_v60  ;;  %990 = vmatprep.mubr.bf16.mxu0 %v3329_v0 }
  0xa5   : > { %v749_v61 = vpop.permute.xlu1 %748  ;;  %v747_v62 = vpop.permute.xlu0 %746 }
  0xa6   : > { %v759_v63 = vsel %vm750_vm3, %v3606_v57, %v747_v62  ;;  %v760_v1 = vsel %vm750_vm3, %v747_v62, %v749_v61 }
  0xa7   : > { %v789_v2 = vsel %vm254_vm0, %v759_v63, 0  ;;  %2978 = vmatmul.mubr.msk.bf16.vlgmr.msra.gmra.mrb[12].mxu1 %vm250_vm1, %v3550_v33  ;;  %2999 = vmatprep.subr.msk.bf16.mxu0 %vm254_vm0, %v760_v1 }
  0xa8   : > { %959 = vmatpush1.bf16.msra.mxu0 %v789_v2  ;;  %481 = vmatprep.mubr.bf16.mxu1 %v3329_v0 }
  0xa9   : > { %v238_v7 = vpop.permute.xlu1 %237  ;;  %v236_v8 = vpop.permute.xlu0 %235 }
  0xaa   : > { %v248_v11 = vsel %vm239_vm2, %v234_v58, %v236_v8  ;;  %v249_v12 = vsel %vm239_vm2, %v236_v8, %v238_v7 }
  0xab   : > { %v280_v13 = vsel %vm254_vm0, %v248_v11, 0  ;;  %2979 = vmatprep.subr.msk.bf16.mxu1 %vm254_vm0, %v249_v12  ;;  %3000 = vmatmul.mubr.msk.bf16.vlgmr.msra.gmra.mrb[4].mxu0 %vm250_vm1, %v3580_v47 }
  0xac   : > { %450 = vmatpush1.bf16.msra.mxu1 %v280_v13  ;;  %1112 = vmatprep.mubr.bf16.mxu0 %v3329_v0 }
  0xad   : > { %v1017_v15 = vpop.permute.xlu1 %1016  ;;  %v1015_v20 = vpop.permute.xlu0 %1014  ;;  %2981 = vmatprep.subr.msk.bf16.mxu1 %vm254_vm0, %v3402_v10 }
  0xae   : > { %v1037_v23 = vsel %vm1036_vm4, %v1015_v20, %v1017_v15 }
  0xaf   : > { %2980 = vmatmul.mubr.msk.bf16.vlgmr.msra.gmra.mrb[16].mxu1 %vm250_vm1, %v3550_v33  ;;  %v1051_v5 = vsel %vm254_vm0, %v1037_v23, 0 }
  0xb0   : > { %524 = vmatpush1.bf16.msra.mxu1 %v494_v21  ;;  %555 = vmatprep.mubr.bf16.mxu1 %v3329_v0 }
  0xb1   : > { %v3637_v24 = vpop.permute.xlu1 %1022  ;;  %v3639_v25 = vpop.permute.xlu0 %1018  ;;  %2983 = vmatprep.subr.msk.bf16.mxu1 %vm254_vm0, %v3400_v9 }
  0xb2   : > { %v1038_v10 = vsel %vm1036_vm4, %v1017_v15, %v3639_v25 }
  0xb3   : > { %3003 = vmatprep.subr.msk.bf16.mxu0 %vm254_vm0, %v1038_v10 }
  0xb4   : > { %1081 = vmatpush1.bf16.msra.mxu0 %v1051_v5 }
  0xb5   : > { %v3652_v28 = vpop.permute.xlu1 %1026  ;;  %v1025_v29 = vpop.permute.xlu0 %1024 }
  0xb6   : > { %v1041_v9 = vsel %vm1036_vm4, %v3637_v24, %v1025_v29  ;;  %v1042_v31 = vsel %vm1036_vm4, %v1025_v29, %v3652_v28 }
  0xb7   : > { %v1063_v32 = vsel %vm254_vm0, %v1041_v9, 0  ;;  %2982 = vmatmul.mubr.msk.bf16.vlgmr.msra.gmra.mrb[0].mxu1 %vm250_vm1, %v3419_v14  ;;  %3004 = vmatmul.mubr.msk.bf16.vlgmr.msra.gmra.mrb[8].mxu0 %vm250_vm1, %v3650_v27 }
  0xb8   : > { %3007 = vmatprep.subr.msk.bf16.mxu0 %vm254_vm0, %v1042_v31  ;;  %565 = vmatpush1.bf16.msra.mxu1 %v500_v30 }
  0xb9   : > { %1163 = vmatpush1.bf16.msra.mxu0 %v1063_v32  ;;  %v1033_v33 = vpop.permute.xlu1 %1032  ;;  %v3666_v4 = vpop.permute.xlu0 %1030  ;;  %596 = vmatprep.mubr.bf16.mxu1 %v3329_v0  ;;  %v3778_v32 = vld [vmem:[%s3986_s1 + $0x5] sm:$0x1] }
  0xba   : > { %1194 = vmatprep.mubr.bf16.mxu0 %v3329_v0  ;;  %2987 = vmatprep.subr.msk.bf16.mxu1 %vm254_vm0, %v3460_v18  ;;  %v1045_v34 = vsel %vm1036_vm4, %v3666_v4, %v1033_v33 }
  0xbb   : > { %v1075_v39 = vsel %vm254_vm0, %v1045_v34, 0 }
  0xbd   : > { %v1296_v35 = vpop.permute.xlu1 %1295  ;;  %v1035_v36 = vpop.permute.xlu0 %1034 }
  0xbe   : > { %v1046_v40 = vsel %vm1036_vm4, %v1033_v33, %v1035_v36  ;;  %v1858_v36 = vrot.slane %v3379_v3, 4 }
  0xbf   : > { %2984 = vmatmul.mubr.msk.bf16.vlgmr.msra.gmra.mrb[4].mxu1 %vm250_vm1, %v3419_v14  ;;  %3008 = vmatmul.mubr.msk.bf16.vlgmr.msra.gmra.mrb[0].mxu0 %vm250_vm1, %v3650_v27 }
  0xc0   : > { %3011 = vmatprep.subr.msk.bf16.mxu0 %vm254_vm0, %v1046_v40  ;;  %647 = vmatpush1.bf16.msra.mxu1 %v512_v37  ;;  %v1859_v37 = vrot.slane %v3437_v16, 4 }
  0xc1   : > { %1245 = vmatpush1.bf16.msra.mxu0 %v1075_v39  ;;  %v3683_v18 = vpop.permute.xlu1 %1299  ;;  %v1298_v41 = vpop.permute.xlu0 %1297  ;;  %678 = vmatprep.mubr.bf16.mxu1 %v3329_v0 }
  0xc2   : > { %v1319_v17 = vsel %vm1317_vm5, %v1298_v41, %v3683_v18  ;;  %1276 = vmatprep.mubr.bf16.mxu0 %v3329_v0  ;;  %v1318_v42 = vsel %vm1317_vm5, %v1296_v35, %v1298_v41  ;;  %v1865_v41 = vsel %vm254_vm0, %v1858_v36, %v1859_v37 }
  0xc3   : > { %3013 = vmatprep.subr.msk.bf16.mxu0 %vm254_vm0, %v1319_v17  ;;  %v1332_v45 = vsel %vm254_vm0, %v1318_v42, 0 }
  0xc5   : > { %v3691_v43 = vpop.permute.xlu1 %1303  ;;  %v735_v44 = vpop.permute.xlu0 %734 }
  0xc6   : > { %v753_v46 = vsel %vm750_vm3, %v3560_v38, %v735_v44  ;;  %v754_v48 = vsel %vm750_vm3, %v735_v44, %v3587_v50 }
  0xc7   : > { %v771_v49 = vsel %vm254_vm0, %v753_v46, 0  ;;  %2988 = vmatmul.mubr.msk.bf16.vlgmr.msra.gmra.mrb[12].mxu1 %vm250_vm1, %v3419_v14  ;;  %2993 = vmatprep.subr.msk.bf16.mxu1 %vm254_vm0, %v754_v48  ;;  %v1860_v48 = vrot.slane %v3386_v6, 4  ;;  %v187_v6 = vld [vmem:[%s3987_s2] sm:$0x1] }
  0xc8   : > { %3012 = vmatmul.mubr.msk.bf16.vlgmr.msra.gmra.mrb[4].mxu0 %vm250_vm1, %v3650_v27  ;;  %836 = vmatpush1.bf16.msra.mxu1 %v771_v49  ;;  %v1861_v49 = vrot.slane %v3467_v19, 4  ;;  %v188_v19 = vld [vmem:[%s3987_s2 + $0x1] sm:$0x1] }
  0xc9   : > { %1362 = vmatpush1.bf16.msra.mxu0 %v1332_v45  ;;  %v3704_v51 = vpop.permute.xlu1 %1307  ;;  %v1306_v52 = vpop.permute.xlu0 %1305  ;;  %867 = vmatprep.mubr.bf16.mxu1 %v3329_v0  ;;  %v3034_v45 = vcombine.high %v1865_v41, %v1865_v41 }
  0xca   : > { %v1323_v38 = vsel %vm1317_vm5, %v1306_v52, %v3704_v51  ;;  %1393 = vmatprep.mubr.bf16.mxu0 %v3329_v0  ;;  %v1322_v14 = vsel %vm1317_vm5, %v3691_v43, %v1306_v52  ;;  %2732 = vperm.xlu1 %3266, %v187_v6  }
  0xcb   : > { %3017 = vmatprep.subr.msk.bf16.mxu0 %vm254_vm0, %v1323_v38  ;;  %v1344_v56 = vsel %vm254_vm0, %v1322_v14, 0  ;;  %v1867_v38 = vsel %vm254_vm0, %v1860_v48, %v1861_v49  ;;  %2751 = vperm.xlu0 %3267, %v188_v19  }
  0xcd   : > { %v3713_v50 = vpop.permute.xlu1 %1311  ;;  %v743_v54 = vpop.permute.xlu0 %742 }
  0xce   : > { %v757_v58 = vsel %vm750_vm3, %v3596_v53, %v743_v54  ;;  %v758_v59 = vsel %vm750_vm3, %v743_v54, %v3606_v57 }
  0xcf   : > { %v783_v60 = vsel %vm254_vm0, %v757_v58, 0  ;;  %2994 = vmatmul.mubr.msk.bf16.vlgmr.msra.gmra.mrb[4].mxu1 %vm250_vm1, %v3580_v47  ;;  %2997 = vmatprep.subr.msk.bf16.mxu1 %vm254_vm0, %v758_v59  ;;  %v1862_v58 = vrot.slane %v3496_v22, 4  ;;  %v1863_v59 = vrot.slane %v3538_v26, 4  ;;  %v1866_v22 = vsel %vm254_vm0, %v1859_v37, %v1860_v48 }
  0xd0   : > { %3014 = vmatmul.mubr.msk.bf16.vlgmr.msra.gmra.mrb[8].mxu0 %vm250_vm1, %v3718_v55  ;;  %918 = vmatpush1.bf16.msra.mxu1 %v783_v60 }
  0xd1   : > { %1444 = vmatpush1.bf16.msra.mxu0 %v1344_v56  ;;  %v1316_v61 = vpop.permute.xlu1 %1315  ;;  %v1314_v62 = vpop.permute.xlu0 %1313  ;;  %949 = vmatprep.mubr.bf16.mxu1 %v3329_v0  ;;  %v3038_v56 = vcombine.high %v1867_v38, %v1867_v38 }
  0xd2   : > { %v1327_v53 = vsel %vm1317_vm5, %v1314_v62, %v1316_v61  ;;  %1475 = vmatprep.mubr.bf16.mxu0 %v3329_v0  ;;  %v1326_v57 = vsel %vm1317_vm5, %v3713_v50, %v1314_v62 }
  0xd3   : > { %3021 = vmatprep.subr.msk.bf16.mxu0 %vm254_vm0, %v1327_v53  ;;  %v1356_v2 = vsel %vm254_vm0, %v1326_v57, 0 }
  0xd5   : > { %v1577_v63 = vpop.permute.xlu1 %1576  ;;  %v1021_v1 = vpop.permute.xlu0 %1020 }
  0xd6   : > { %v1039_v7 = vsel %vm1036_vm4, %v3639_v25, %v1021_v1  ;;  %v1040_v8 = vsel %vm1036_vm4, %v1021_v1, %v3637_v24  ;;  %v3846_v1 = vld [vmem:[%s3986_s1 + $0x6] sm:$0x1] }
  0xd7   : > { %v1057_v11 = vsel %vm254_vm0, %v1039_v7, 0  ;;  %2998 = vmatmul.mubr.msk.bf16.vlgmr.msra.gmra.mrb[12].mxu1 %vm250_vm1, %v3580_v47  ;;  %3005 = vmatprep.subr.msk.bf16.mxu1 %vm254_vm0, %v1040_v8  ;;  %v3036_v7 = vcombine.high %v1866_v22, %v1866_v22 }
  0xd8   : > { %3018 = vmatmul.mubr.msk.bf16.vlgmr.msra.gmra.mrb[0].mxu0 %vm250_vm1, %v3718_v55  ;;  %1122 = vmatpush1.bf16.msra.mxu1 %v1057_v11 }
  0xd9   : > { %1526 = vmatpush1.bf16.msra.mxu0 %v1356_v2  ;;  %v3748_v12 = vpop.permute.xlu1 %1580  ;;  %v1579_v13 = vpop.permute.xlu0 %1578  ;;  %1153 = vmatprep.mubr.bf16.mxu1 %v3329_v0 }
  0xda   : > { %v1600_v15 = vsel %vm1598_vm6, %v1579_v13, %v3748_v12  ;;  %1557 = vmatprep.mubr.bf16.mxu0 %v3329_v0  ;;  %v1599_v47 = vsel %vm1598_vm6, %v1577_v63, %v1579_v13  ;;  %v1869_v63 = vsel %vm254_vm0, %v1862_v58, %v1863_v59 }
  0xdb   : > { %3023 = vmatprep.subr.msk.bf16.mxu0 %vm254_vm0, %v1600_v15  ;;  %v1613_v23 = vsel %vm254_vm0, %v1599_v47, 0  ;;  %v3042_v11 = vcombine.high %v1869_v63, %v1869_v63  ;;  %v3035_v15 = vcombine.low %v1866_v22, %v1866_v22  ;;  %v3041_v47 = vcombine.low %v1869_v63, %v1869_v63 }
  0xdd   : > { %v1585_v20 = vpop.permute.xlu1 %1584  ;;  %v1029_v21 = vpop.permute.xlu0 %1028 }
  0xde   : > { %v1043_v24 = vsel %vm1036_vm4, %v3652_v28, %v1029_v21  ;;  %v1044_v25 = vsel %vm1036_vm4, %v1029_v21, %v3666_v4 }
  0xdf   : > { %v1069_v10 = vsel %vm254_vm0, %v1043_v24, 0  ;;  %3006 = vmatmul.mubr.msk.bf16.vlgmr.msra.gmra.mrb[4].mxu1 %vm250_vm1, %v3650_v27  ;;  %3009 = vmatprep.subr.msk.bf16.mxu1 %vm254_vm0, %v1044_v25  ;;  %v1868_v24 = vsel %vm254_vm0, %v1861_v49, %v1862_v58  ;;  %v1900_v25 = vsel %vm254_vm0, %v3035_v15, 0 }
  0xe0   : > { %3022 = vmatmul.mubr.msk.bf16.vlgmr.msra.gmra.mrb[4].mxu0 %vm250_vm1, %v3718_v55  ;;  %1204 = vmatpush1.bf16.msra.mxu1 %v1069_v10 }
  0xe1   : > { %1643 = vmatpush1.bf16.msra.mxu0 %v1613_v23  ;;  %v3767_v5 = vpop.permute.xlu1 %1588  ;;  %v1587_v29 = vpop.permute.xlu0 %1586  ;;  %1235 = vmatprep.mubr.bf16.mxu1 %v3329_v0 }
  0xe2   : > { %v1604_v28 = vsel %vm1598_vm6, %v1587_v29, %v3767_v5  ;;  %1674 = vmatprep.mubr.bf16.mxu0 %v3329_v0  ;;  %v1603_v30 = vsel %vm1598_vm6, %v1585_v20, %v1587_v29  ;;  %v1918_v29 = vsel %vm254_vm0, %v3041_v47, 0 }
  0xe3   : > { %3027 = vmatprep.subr.msk.bf16.mxu0 %vm254_vm0, %v1604_v28  ;;  %v1625_v33 = vsel %vm254_vm0, %v1603_v30, 0  ;;  %v3040_v30 = vcombine.high %v1868_v24, %v1868_v24 }
  0xe5   : > { %v1593_v9 = vpop.permute.xlu1 %1592  ;;  %v1302_v31 = vpop.permute.xlu0 %1301 }
  0xe6   : > { %v1320_v4 = vsel %vm1317_vm5, %v3683_v18, %v1302_v31  ;;  %v1321_v34 = vsel %vm1317_vm5, %v1302_v31, %v3691_v43 }
  0xe7   : > { %v1338_v35 = vsel %vm254_vm0, %v1320_v4, 0  ;;  %3010 = vmatmul.mubr.msk.bf16.vlgmr.msra.gmra.mrb[12].mxu1 %vm250_vm1, %v3650_v27  ;;  %3015 = vmatprep.subr.msk.bf16.mxu1 %vm254_vm0, %v1321_v34 }
  0xe8   : > { %3024 = vmatmul.mubr.msk.bf16.vlgmr.msra.gmra.mrb[8].mxu0 %vm250_vm1, %v3778_v32  ;;  %1403 = vmatpush1.bf16.msra.mxu1 %v1338_v35 }
  0xe9   : > { %1725 = vmatpush1.bf16.msra.mxu0 %v1625_v33  ;;  %v1597_v39 = vpop.permute.xlu1 %1596  ;;  %v1595_v40 = vpop.permute.xlu0 %1594  ;;  %1434 = vmatprep.mubr.bf16.mxu1 %v3329_v0  ;;  %v3039_v33 = vcombine.low %v1868_v24, %v1868_v24 }
  0xea   : > { %v1608_v18 = vsel %vm1598_vm6, %v1595_v40, %v1597_v39  ;;  %1756 = vmatprep.mubr.bf16.mxu0 %v3329_v0  ;;  %v1607_v27 = vsel %vm1598_vm6, %v1593_v9, %v1595_v40 }
  0xeb   : > { %3031 = vmatprep.subr.msk.bf16.mxu0 %vm254_vm0, %v1608_v18  ;;  %v1637_v3 = vsel %vm254_vm0, %v1607_v27, 0  ;;  %v1912_v40 = vsel %vm254_vm0, %v3039_v33, 0 }
  0xed   : > { %v1583_v17 = vpop.permute.xlu1 %1582  ;;  %v1310_v42 = vpop.permute.xlu0 %1309 }
  0xee   : > { %v1324_v16 = vsel %vm1317_vm5, %v3704_v51, %v1310_v42  ;;  %v1325_v43 = vsel %vm1317_vm5, %v1310_v42, %v3713_v50  ;;  %v1602_v46 = vsel %vm1598_vm6, %v1583_v17, %v1585_v20  ;;  %v3033_v51 = vcombine.low %v1865_v41, %v1865_v41 }
  0xef   : > { %v1350_v44 = vsel %vm254_vm0, %v1324_v16, 0  ;;  %3016 = vmatmul.mubr.msk.bf16.vlgmr.msra.gmra.mrb[4].mxu1 %vm250_vm1, %v3718_v55  ;;  %3019 = vmatprep.subr.msk.bf16.mxu1 %vm254_vm0, %v1325_v43  ;;  %v1601_v52 = vsel %vm1598_vm6, %v3748_v12, %v1583_v17 }
  0xf0   : > { %3028 = vmatmul.mubr.msk.bf16.vlgmr.msra.gmra.mrb[0].mxu0 %vm250_vm1, %v3778_v32  ;;  %1485 = vmatpush1.bf16.msra.mxu1 %v1350_v44  ;;  %v1894_v50 = vsel %vm254_vm0, %v3033_v51, 0  ;;  %v1619_v54 = vsel %vm254_vm0, %v1601_v52, 0  ;;  %v185_v52 = vld [vmem:[%s3986_s1 + $0x7] sm:$0x1] }
  0xf1   : > { %1807 = vmatpush1.bf16.msra.mxu0 %v1637_v3  ;;  %3025 = vmatprep.subr.msk.bf16.mxu1 %vm254_vm0, %v1602_v46  ;;  %v1591_v14 = vpop.permute.xlu0 %1590  ;;  %v2139_v61 = vpop.permute.xlu1 %2138 }
  0xf2   : > { %1516 = vmatprep.mubr.bf16.mxu1 %v3329_v0  ;;  %1838 = vmatprep.mubr.bf16.mxu0 %v3329_v0  ;;  %v1606_v60 = vsel %vm1598_vm6, %v1591_v14, %v1593_v9  ;;  %v1605_v26 = vsel %vm1598_vm6, %v3767_v5, %v1591_v14  ;;  %v2150_v53 = vrot.slane %v2139_v61, 4 }
  0xf3   : > { %3043 = vmatprep.subr.msk.bf16.mxu0 %vm254_vm0, %v3034_v45  ;;  %v1631_v8 = vsel %vm254_vm0, %v1605_v26, 0 }
  0xf5   : > { %v2141_v62 = vpop.permute.xlu0 %2140  ;;  %v2143_v13 = vpop.permute.xlu1 %2142 }
  0xf6   : > { %v2151_v57 = vrot.slane %v2141_v62, 4  ;;  %v2152_v23 = vrot.slane %v2143_v13, 4 }
  0xf7   : > { %3020 = vmatmul.mubr.msk.bf16.vlgmr.msra.gmra.mrb[12].mxu1 %vm250_vm1, %v3718_v55  ;;  %v3037_v55 = vcombine.low %v1867_v38, %v1867_v38 }
  0xf8   : > { %1684 = vmatpush1.bf16.msra.mxu1 %v1619_v54  ;;  %3032 = vmatmul.mubr.msk.bf16.vlgmr.msra.gmra.mrb[4].mxu0 %vm250_vm1, %v3778_v32  ;;  %v2156_v12 = vsel %vm254_vm0, %v2150_v53, %v2151_v57  ;;  %v2158_v28 = vsel %vm254_vm0, %v2151_v57, %v2152_v23 }
  0xf9   : > { %3029 = vmatprep.subr.msk.bf16.mxu1 %vm254_vm0, %v1606_v60  ;;  %1924 = vmatpush1.bf16.msra.mxu0 %v1894_v50  ;;  %v1906_v2 = vsel %vm254_vm0, %v3037_v55, 0  ;;  %v2145_v20 = vpop.permute.xlu0 %2144  ;;  %v2157_v21 = vsel %vm239_vm2, %v2156_v12, %v2141_v62  ;;  %v2147_v9 = vpop.permute.xlu1 %2146  ;;  %v2159_v34 = vsel %vm239_vm2, %v2158_v28, %v2143_v13 }
  0xfa   : > { %1715 = vmatprep.mubr.bf16.mxu1 %v3329_v0  ;;  %1955 = vmatprep.mubr.bf16.mxu0 %v3329_v0  ;;  %v2153_v10 = vrot.slane %v2145_v20, 4  ;;  %v3054_v5 = vcombine.high %v2157_v21, %v2157_v21  ;;  %v3053_v4 = vcombine.low %v2157_v21, %v2157_v21  ;;  %v2154_v35 = vrot.slane %v2147_v9, 4 }
  0xfb   : > { %3047 = vmatprep.subr.msk.bf16.mxu0 %vm254_vm0, %v3038_v56  ;;  %v3056_v39 = vcombine.high %v2159_v34, %v2159_v34  ;;  %v3055_v45 = vcombine.low %v2159_v34, %v2159_v34 }
  0xfc   : > { %v2160_v31 = vsel %vm254_vm0, %v2152_v23, %v2153_v10  ;;  %v2190_v27 = vsel %vm254_vm0, %v3053_v4, 0  ;;  %v2162_v17 = vsel %vm254_vm0, %v2153_v10, %v2154_v35 }
  0xfd   : > { %v2161_v36 = vsel %vm239_vm2, %v2160_v31, %v2145_v20  ;;  %v2163_v43 = vsel %vm239_vm2, %v2162_v17, %v2147_v9  ;;  %v2196_v6 = vsel %vm254_vm0, %v3055_v45, 0 }
  0xfe   : > { %v2435_v37 = vpop.permute.xlu1 %2434  ;;  %v3058_v41 = vcombine.high %v2161_v36, %v2161_v36  ;;  %v3057_v16 = vcombine.low %v2161_v36, %v2161_v36  ;;  %v3060_v51 = vcombine.high %v2163_v43, %v2163_v43  ;;  %v3059_v60 = vcombine.low %v2163_v43, %v2163_v43 }
  0xff   : > { %3026 = vmatmul.mubr.msk.bf16.vlgmr.msra.gmra.mrb[4].mxu1 %vm250_vm1, %v3778_v32  ;;  %v2446_v48 = vrot.slane %v2435_v37, 4 }
 0x100   : > { %1766 = vmatpush1.bf16.msra.mxu1 %v1631_v8  ;;  %3044 = vmatmul.mubr.msk.bf16.vlgmr.msra.gmra.mrb[8].mxu0 %vm250_vm1, %v3846_v1  ;;  %v2202_v14 = vsel %vm254_vm0, %v3057_v16, 0  ;;  %v2208_v57 = vsel %vm254_vm0, %v3059_v60, 0 }
 0x101   : > { %2006 = vmatpush1.bf16.msra.mxu0 %v1906_v2  ;;  %1797 = vmatprep.mubr.bf16.mxu1 %v3329_v0 }
 0x102   : > { %2037 = vmatprep.mubr.bf16.mxu0 %v3329_v0  ;;  %3045 = vmatprep.subr.msk.bf16.mxu1 %vm254_vm0, %v3036_v7 }
 0x103   : > { %3051 = vmatprep.subr.msk.bf16.mxu0 %vm254_vm0, %v3042_v11  ;;  %v2439_v44 = vpop.permute.xlu1 %2438 }
 0x104   : > { %v2448_v38 = vrot.slane %v2439_v44, 4 }
 0x107   : > { %3030 = vmatmul.mubr.msk.bf16.vlgmr.msra.gmra.mrb[12].mxu1 %vm250_vm1, %v3778_v32  ;;  %v2149_v32 = vpop.permute.xlu0 %2148  ;;  %v2443_v59 = vpop.permute.xlu1 %2442 }
 0x108   : > { %3048 = vmatmul.mubr.msk.bf16.vlgmr.msra.gmra.mrb[0].mxu0 %vm250_vm1, %v3846_v1  ;;  %1965 = vmatpush1.bf16.msra.mxu1 %v1900_v25  ;;  %v2155_v18 = vrot.slane %v2149_v32, 4  ;;  %v2450_v22 = vrot.slane %v2443_v59, 4 }
 0x109   : > { %2088 = vmatpush1.bf16.msra.mxu0 %v1918_v29  ;;  %1996 = vmatprep.mubr.bf16.mxu1 %v3329_v0  ;;  %v186_v29 = vld [vmem:[%s3986_s1 + $0x8] sm:$0x1] }
 0x10a   : > { %2119 = vmatprep.mubr.bf16.mxu0 %v3329_v0  ;;  %3063 = vmatprep.subr.msk.bf16.mxu0 %vm254_vm0, %v3054_v5  ;;  %v2164_v42 = vsel %vm254_vm0, %v2154_v35, %v2155_v18 }
 0x10b   : > { %3049 = vmatprep.subr.msk.bf16.mxu1 %vm254_vm0, %v3040_v30  ;;  %v2437_v3 = vpop.permute.xlu0 %2436  ;;  %v2165_v46 = vsel %vm239_vm2, %v2164_v42, %v2149_v32  ;;  %v2735_v42 = vlaneseq }
 0x10c   : > { %v2447_v49 = vrot.slane %v2437_v3, 4  ;;  %v3062_v19 = vcombine.high %v2165_v46, %v2165_v46  ;;  %v3061_v58 = vcombine.low %v2165_v46, %v2165_v46 }
 0x10d   : > { %vm2897_vm7 = vcmp.lt.s32.totalorder %v2735_v42, 256 }
 0x10e   : > { %v2452_v50 = vsel %vm254_vm0, %v2446_v48, %v2447_v49  ;;  %v2454_v54 = vsel %vm254_vm0, %v2447_v49, %v2448_v38  ;;  %v2214_v26 = vsel %vm254_vm0, %v3061_v58, 0 }
 0x10f   : > { %3046 = vmatmul.mubr.msk.bf16.vlgmr.msra.gmra.mrb[4].mxu1 %vm250_vm1, %v3846_v1  ;;  %v2441_v56 = vpop.permute.xlu0 %2440  ;;  %v2453_v61 = vsel %vm750_vm3, %v2452_v50, %v2437_v3  ;;  %v2455_v62 = vsel %vm750_vm3, %v2454_v54, %v2439_v44  ;;  %v3947_v3 = vshrl.u32 %v2735_v42, 7 }
 0x110   : > { %3052 = vmatmul.mubr.msk.bf16.vlgmr.msra.gmra.mrb[4].mxu0 %vm250_vm1, %v3846_v1  ;;  %2047 = vmatpush1.bf16.msra.mxu1 %v1912_v40  ;;  %v2449_v55 = vrot.slane %v2441_v56, 4  ;;  %v3074_v53 = vcombine.high %v2453_v61, %v2453_v61  ;;  %v3076_v63 = vcombine.high %v2455_v62, %v2455_v62  ;;  %v3075_v2 = vcombine.low %v2455_v62, %v2455_v62 }
 0x111   : > { %2220 = vmatpush1.bf16.msra.mxu0 %v2190_v27  ;;  %3065 = vmatprep.subr.msk.bf16.mxu1 %vm254_vm0, %v3056_v39  ;;  %v3073_v11 = vcombine.low %v2453_v61, %v2453_v61 }
 0x112   : > { %2078 = vmatprep.mubr.bf16.mxu1 %v3329_v0  ;;  %2251 = vmatprep.mubr.bf16.mxu0 %v3329_v0  ;;  %v2458_v7 = vsel %vm254_vm0, %v2449_v55, %v2450_v22  ;;  %v2492_v47 = vsel %vm254_vm0, %v3075_v2, 0 }
 0x113   : > { %3067 = vmatprep.subr.msk.bf16.mxu0 %vm254_vm0, %v3058_v41  ;;  %v2445_v8 = vpop.permute.xlu0 %2444  ;;  %v2459_v13 = vsel %vm750_vm3, %v2458_v7, %v2443_v59  ;;  %v2486_v20 = vsel %vm254_vm0, %v3073_v11, 0 }
 0x114   : > { %v2451_v15 = vrot.slane %v2445_v8, 4  ;;  %v3080_v23 = vcombine.high %v2459_v13, %v2459_v13  ;;  %v3079_v25 = vcombine.low %v2459_v13, %v2459_v13 }
 0x116   : > { %v2460_v24 = vsel %vm254_vm0, %v2450_v22, %v2451_v15  ;;  %v2504_v28 = vsel %vm254_vm0, %v3079_v25, 0 }
 0x117   : > { %3050 = vmatmul.mubr.msk.bf16.vlgmr.msra.gmra.mrb[12].mxu1 %vm250_vm1, %v3846_v1  ;;  %v2456_v1 = vsel %vm254_vm0, %v2448_v38, %v2449_v55  ;;  %v2461_v5 = vsel %vm750_vm3, %v2460_v24, %v2445_v8 }
 0x118   : > { %3064 = vmatmul.mubr.msk.bf16.vlgmr.msra.gmra.mrb[8].mxu0 %vm250_vm1, %v185_v52  ;;  %2261 = vmatpush1.bf16.msra.mxu1 %v2196_v6  ;;  %v2457_v12 = vsel %vm750_vm3, %v2456_v1, %v2441_v56  ;;  %v3082_v9 = vcombine.high %v2461_v5, %v2461_v5  ;;  %v3081_v31 = vcombine.low %v2461_v5, %v2461_v5 }
 0x119   : > { %2302 = vmatpush1.bf16.msra.mxu0 %v2202_v14  ;;  %3069 = vmatprep.subr.msk.bf16.mxu1 %vm254_vm0, %v3060_v51  ;;  %v3078_v21 = vcombine.high %v2457_v12, %v2457_v12  ;;  %v3077_v10 = vcombine.low %v2457_v12, %v2457_v12 }
 0x11a   : > { %2292 = vmatprep.mubr.bf16.mxu1 %v3329_v0  ;;  %2333 = vmatprep.mubr.bf16.mxu0 %v3329_v0  ;;  %v2510_v33 = vsel %vm254_vm0, %v3081_v31, 0 }
 0x11b   : > { %3071 = vmatprep.subr.msk.bf16.mxu0 %vm254_vm0, %v3062_v19  ;;  %v2498_v30 = vsel %vm254_vm0, %v3077_v10, 0 }
 0x11f   : > { %3066 = vmatmul.mubr.msk.bf16.vlgmr.msra.gmra.mrb[4].mxu1 %vm250_vm1, %v185_v52 }
 0x120   : > { %3068 = vmatmul.mubr.msk.bf16.vlgmr.msra.gmra.mrb[0].mxu0 %vm250_vm1, %v185_v52  ;;  %2343 = vmatpush1.bf16.msra.mxu1 %v2208_v57 }
 0x121   : > { %2384 = vmatpush1.bf16.msra.mxu0 %v2214_v26  ;;  %2374 = vmatprep.mubr.bf16.mxu1 %v3329_v0 }
 0x122   : > { %2415 = vmatprep.mubr.bf16.mxu0 %v3329_v0  ;;  %3083 = vmatprep.subr.msk.bf16.mxu0 %vm254_vm0, %v3074_v53 }
 0x123   : > { %3085 = vmatprep.subr.msk.bf16.mxu1 %vm254_vm0, %v3076_v63 }
 0x127   : > { %3070 = vmatmul.mubr.msk.bf16.vlgmr.msra.gmra.mrb[12].mxu1 %vm250_vm1, %v185_v52 }
 0x128   : > { %3072 = vmatmul.mubr.msk.bf16.vlgmr.msra.gmra.mrb[4].mxu0 %vm250_vm1, %v185_v52  ;;  %2557 = vmatpush1.bf16.msra.mxu1 %v2492_v47 }
 0x129   : > { %2516 = vmatpush1.bf16.msra.mxu0 %v2486_v20  ;;  %2547 = vmatprep.mubr.bf16.mxu0 %v3329_v0 }
 0x12a   : > { %2588 = vmatprep.mubr.bf16.mxu1 %v3329_v0  ;;  %3087 = vmatprep.subr.msk.bf16.mxu0 %vm254_vm0, %v3078_v21 }
 0x12b   : > { %3089 = vmatprep.subr.msk.bf16.mxu1 %vm254_vm0, %v3080_v23 }
 0x12f   : > { %3086 = vmatmul.mubr.msk.bf16.vlgmr.msra.gmra.mrb[4].mxu1 %vm250_vm1, %v186_v29 }
 0x130   : > { %3084 = vmatmul.mubr.msk.bf16.vlgmr.msra.gmra.mrb[8].mxu0 %vm250_vm1, %v186_v29  ;;  %2639 = vmatpush1.bf16.msra.mxu1 %v2504_v28 }
 0x131   : > { %2598 = vmatpush1.bf16.msra.mxu0 %v2498_v30  ;;  %2629 = vmatprep.mubr.bf16.mxu0 %v3329_v0 }
 0x132   : > { %2670 = vmatprep.mubr.bf16.mxu1 %v3329_v0  ;;  %3091 = vmatprep.subr.msk.bf16.mxu0 %vm254_vm0, %v3082_v9 }
 0x137   : > { %3090 = vmatmul.mubr.msk.bf16.vlgmr.msra.gmra.mrb[12].mxu1 %vm250_vm1, %v186_v29 }
 0x138   : > { %3088 = vmatmul.mubr.msk.bf16.vlgmr.msra.gmra.mrb[0].mxu0 %vm250_vm1, %v186_v29 }
 0x139   : > { %2680 = vmatpush1.bf16.msra.mxu0 %v2510_v33  ;;  %2711 = vmatprep.mubr.bf16.mxu0 %v3329_v0  ;;  %v2737_v0 = vsub.s32 0, %v3947_v3 }
 0x140   : > { %3092 = vmatmul.mubr.msk.bf16.vlgmr.msra.gmra.mrb[4].mxu0 %vm250_vm1, %v186_v29 }
 0x149   : > { %v2733_v16 = vpop.permute.xlu1 %2732 }
 0x14a   : > { %v2752_v43 = vpop.permute.xlu0 %2751  ;;  %v3950_v44 = vrot.slane %v2733_v16, %v2737_v0 }
 0x14b   : > { %v3952_v45 = vrot.slane %v2752_v43, %v2737_v0 }
 0x172   : > { %v401_v4 = vpop.f32.mrb[8].mxu1 }
 0x173   : > { %v403_v34 = vpop.f32.mrb[9].mxu1 }
 0x174   : > { %v405_v32 = vpop.f32.mrb[10].mxu1 }
 0x175   : > { %v406_v35 = vpop.f32.mrb[11].mxu1 }
 0x182   : > { %v3942_v36 = vpop.f32.mrb[16].mxu1 }
 0x183   : > { %v3944_v37 = vpop.f32.mrb[17].mxu1 }
 0x184   : > { %v487_v39 = vpop.f32.mrb[18].mxu1 }
 0x185   : > { %v488_v40 = vpop.f32.mrb[19].mxu1 }
 0x18a   : > { %v557_v18 = vpop.f32.mrb[0].mxu1 }
 0x18b   : > { %v559_v27 = vpop.f32.mrb[1].mxu1 }
 0x18c   : > { %v561_v41 = vpop.f32.mrb[2].mxu1 }
 0x18d   : > { %v562_v17 = vpop.f32.mrb[3].mxu1 }
 0x202   : > { %v2590_v46 = vpop.f32.mrb[4].mxu1 }
 0x203   : > { %v2549_v48 = vpop.f32.mrb[8].mxu0  ;;  %v2741_v49 = vmul.f32 %v3950_v44, %v2590_v46  ;;  %v2592_v51 = vpop.f32.mrb[5].mxu1 }
 0x204   : > { %v3096_v52 = vadd.f32 %v2549_v48, %v557_v18  ;;  %v2551_v38 = vpop.f32.mrb[9].mxu0  ;;  %v2742_v14 = vmul.f32 %v3950_v44, %v2592_v51  ;;  %v2594_v6 = vpop.f32.mrb[6].mxu1 }
 0x205   : > { %v2760_v19 = vadd.f32 %v3952_v45, %v2741_v49  ;;  %v3097_v50 = vadd.f32 %v2551_v38, %v559_v27  ;;  %v2553_v54 = vpop.f32.mrb[10].mxu0  ;;  %v2595_v56 = vpop.f32.mrb[7].mxu1 }
 0x206   : > { %v2739_v58 = vmul.f32 %v3096_v52, %v3950_v44  ;;  %v2761_v59 = vadd.f32 %v3952_v45, %v2742_v14  ;;  %v2554_v60 = vpop.f32.mrb[11].mxu0 }
 0x207   : > { %v2770_v61 = vsub.f32 0.0, %v2760_v19  ;;  %v2740_v62 = vmul.f32 %v3097_v50, %v3950_v44  ;;  %v3335_v60 = vmov 1966171168  }
 0x208   : > { %v2758_v55 = vadd.f32 %v3952_v45, %v2739_v58  ;;  %v2771_v22 = vsub.f32 0.0, %v2761_v59 }
 0x209   : > { %v2782_v26 = vmul.f32 1.442695, %v2770_v61  ;;  %v2759_v53 = vadd.f32 %v3952_v45, %v2740_v62  ;;  %v2833_v61 = vunpack.c.l.s4 %v3335_v60 }
 0x20a   : > { %v2768_v57 = vsub.f32 0.0, %v2758_v55  ;;  %v2784_v63 = vmul.f32 1.442695, %v2771_v22  ;;  %v2672_v1 = vpop.f32.mrb[12].mxu1 }
 0x20b   : > { %3281 = vpow2.f32 %v2782_v26  ;;  %v2769_v2 = vsub.f32 0.0, %v2759_v53  ;;  %v2631_v7 = vpop.f32.mrb[0].mxu0  ;;  %v2745_v8 = vmul.f32 %v3950_v44, %v2672_v1  ;;  %v2674_v11 = vpop.f32.mrb[13].mxu1 }
 0x20c   : > { %v2778_v12 = vmul.f32 1.442695, %v2768_v57  ;;  %3283 = vpow2.f32 %v2784_v63  ;;  %v3098_v13 = vadd.f32 %v2631_v7, %v401_v4  ;;  %v2633_v15 = vpop.f32.mrb[1].mxu0  ;;  %v2746_v47 = vmul.f32 %v3950_v44, %v2674_v11  ;;  %v2676_v20 = vpop.f32.mrb[14].mxu1 }
 0x20d   : > { %v2780_v21 = vmul.f32 1.442695, %v2769_v2  ;;  %v2764_v23 = vadd.f32 %v3952_v45, %v2745_v8  ;;  %v3099_v24 = vadd.f32 %v2633_v15, %v403_v34  ;;  %v2635_v25 = vpop.f32.mrb[2].mxu0  ;;  %v2677_v10 = vpop.f32.mrb[15].mxu1  ;;  %v2834_v57 = vunpack.c.0.s8 %v2833_v61 }
 0x20e   : > { %3285 = vpow2.f32 %v2778_v12  ;;  %v2743_v5 = vmul.f32 %v3098_v13, %v3950_v44  ;;  %v2765_v29 = vadd.f32 %v3952_v45, %v2746_v47  ;;  %v2636_v28 = vpop.f32.mrb[3].mxu0 }
 0x20f   : > { %3287 = vpow2.f32 %v2780_v21  ;;  %v2774_v30 = vsub.f32 0.0, %v2764_v23  ;;  %v2744_v9 = vmul.f32 %v3099_v24, %v3950_v44  ;;  %v2837_v11 = vsub.s32 %v2834_v57, %v3947_v3 }
 0x210   : > { %v2762_v31 = vadd.f32 %v3952_v45, %v2743_v5  ;;  %v2775_v33 = vsub.f32 0.0, %v2765_v29 }
 0x211   : > { %v2790_v4 = vmul.f32 1.442695, %v2774_v30  ;;  %v2763_v32 = vadd.f32 %v3952_v45, %v2744_v9 }
 0x212   : > { %v2772_v35 = vsub.f32 0.0, %v2762_v31  ;;  %v2792_v34 = vmul.f32 1.442695, %v2775_v33 }
 0x213   : > { %3289 = vpow2.f32 %v2790_v4  ;;  %v2773_v39 = vsub.f32 0.0, %v2763_v32  ;;  %v2713_v40 = vpop.f32.mrb[4].mxu0 }
 0x214   : > { %v2786_v18 = vmul.f32 1.442695, %v2772_v35  ;;  %3291 = vpow2.f32 %v2792_v34  ;;  %v3100_v27 = vadd.f32 %v2713_v40, %v3942_v36  ;;  %v2715_v41 = vpop.f32.mrb[5].mxu0 }
 0x215   : > { %v3282_v17 = vpop.eup %3281  ;;  %v2788_v0 = vmul.f32 1.442695, %v2773_v39  ;;  %v3101_v16 = vadd.f32 %v2715_v41, %v3944_v37  ;;  %v2717_v43 = vpop.f32.mrb[6].mxu0 }
 0x216   : > { %v3284_v46 = vpop.eup %3283  ;;  %v2800_v48 = vadd.f32 1.0, %v3282_v17  ;;  %3293 = vpow2.f32 %v2786_v18  ;;  %v2747_v49 = vmul.f32 %v3100_v27, %v3950_v44  ;;  %v2718_v51 = vpop.f32.mrb[7].mxu0 }
 0x217   : > { %v2801_v52 = vadd.f32 1.0, %v3284_v46  ;;  %3295 = vpow2.f32 %v2788_v0  ;;  %v2748_v38 = vmul.f32 %v3101_v16, %v3950_v44 }
 0x218   : > { %v3286_v14 = vpop.eup %3285  ;;  %3297 = vrcp.f32 %v2800_v48  ;;  %v2766_v36 = vadd.f32 %v3952_v45, %v2747_v49 }
 0x219   : > { %v3288_v6 = vpop.eup %3287  ;;  %v2798_v19 = vadd.f32 1.0, %v3286_v14  ;;  %3299 = vrcp.f32 %v2801_v52  ;;  %v2767_v37 = vadd.f32 %v3952_v45, %v2748_v38 }
 0x21a   : > { %v2799_v50 = vadd.f32 1.0, %v3288_v6  ;;  %v2776_v54 = vsub.f32 0.0, %v2766_v36 }
 0x21b   : > { %3301 = vrcp.f32 %v2798_v19  ;;  %v2777_v56 = vsub.f32 0.0, %v2767_v37 }
 0x21c   : > { %3303 = vrcp.f32 %v2799_v50  ;;  %v2794_v58 = vmul.f32 1.442695, %v2776_v54 }
 0x21d   : > { %v3290_v59 = vpop.eup %3289  ;;  %v2796_v62 = vmul.f32 1.442695, %v2777_v56 }
 0x21e   : > { %v3292_v44 = vpop.eup %3291  ;;  %v2804_v55 = vadd.f32 1.0, %v3290_v59  ;;  %3305 = vpow2.f32 %v2794_v58 }
 0x21f   : > { %v2805_v22 = vadd.f32 1.0, %v3292_v44  ;;  %3307 = vpow2.f32 %v2796_v62 }
 0x220   : > { %v3294_v26 = vpop.eup %3293  ;;  %3309 = vrcp.f32 %v2804_v55 }
 0x221   : > { %v3296_v53 = vpop.eup %3295  ;;  %v2802_v45 = vadd.f32 1.0, %v3294_v26  ;;  %3311 = vrcp.f32 %v2805_v22 }
 0x222   : > { %v3298_v63 = vpop.eup %3297  ;;  %v2803_v1 = vadd.f32 1.0, %v3296_v53 }
 0x223   : > { %v3300_v2 = vpop.eup %3299  ;;  %3313 = vrcp.f32 %v2802_v45 }
 0x224   : > { %v2829_v7 = vcombine.low %v3298_v63, %v3300_v2  ;;  %3315 = vrcp.f32 %v2803_v1 }
 0x225   : > { %v3302_v8 = vpop.eup %3301 }
 0x226   : > { %v3304_v12 = vpop.eup %3303  ;;  %v2845_v21 = vrot.slane %v2829_v7, %v2837_v11 }
 0x227   : > { %v2828_v13 = vcombine.low %v3302_v8, %v3304_v12 }
 0x228   : > { %v3306_v15 = vpop.eup %3305 }
 0x229   : > { %v3308_v47 = vpop.eup %3307  ;;  %v2838_v20 = vrot.slane %v2828_v13, %v2837_v11  ;;  %v2806_v23 = vadd.f32 1.0, %v3306_v15 }
 0x22a   : > { %v3310_v24 = vpop.eup %3309  ;;  %v2807_v25 = vadd.f32 1.0, %v3308_v47 }
 0x22b   : > { %v3312_v10 = vpop.eup %3311  ;;  %v2860_v5 = vcombine.low %v2838_v20, %v2845_v21  ;;  %3317 = vrcp.f32 %v2806_v23 }
 0x22c   : > { %v2831_v29 = vcombine.low %v3310_v24, %v3312_v10  ;;  %3319 = vrcp.f32 %v2807_v25 }
 0x22d   : > { %v3314_v28 = vpop.eup %3313  ;;  %v2868_v32 = vrot.slane %v2860_v5, %v2837_v11 }
 0x22e   : > { %v3316_v30 = vpop.eup %3315  ;;  %v2859_v3 = vrot.slane %v2831_v29, %v2837_v11 }
 0x22f   : > { %v2830_v9 = vcombine.low %v3314_v28, %v3316_v30 }
 0x231   : > { %v2852_v31 = vrot.slane %v2830_v9, %v2837_v11 }
 0x233   : > { %v2861_v33 = vcombine.low %v2852_v31, %v2859_v3 }
 0x235   : > { %v3318_v4 = vpop.eup %3317  ;;  %v2875_v35 = vrot.slane %v2861_v33, %v2837_v11 }
 0x236   : > { %v3320_v34 = vpop.eup %3319 }
 0x237   : > { %v2876_v39 = vcombine.low %v2868_v32, %v2875_v35  ;;  %v2877_v40 = vcombine.low %v3318_v4, %v3320_v34 }
 0x239   : > { %2894 = vst [vmem:[%s168_s23] sm:$0xff] %v2876_v39  ;;  %v2884_v18 = vrot.slane %v2877_v40, %v2837_v11 }
 0x23b   : > { %v2891_v27 = vrot.slane %v2884_v18, %v2837_v11 }
 0x23d   : > { %2899 = vst.msk [vmem:[%s168_s23 + $0x8] sm:$0x3] %vm2897_vm7, %v2891_v27 }
 0x23e PF: > { %s13_s12 = sadd.s32 1, %s3327_s12  }
 0x23f   : > { %p10_p4 = scmp.ge.s32.totalorder %s13_s12, 4  }
 0x241   :  { %12 = sbr.rel (!%p10_p4) target bundleno = 1 (0x1), region = 62 }

</bundles_post_ra>
